<compile_context>
chip_gen: v6e
topology: v6e:2x2x1
jax: 0.10.0
libtpu: 0.0.40
codegen_flags: <defaults>
</compile_context>

<pallas_src>
import functools

import jax
import jax.numpy as jnp
from jax.experimental import pallas as pl
from jax.experimental.pallas import tpu as pltpu


# ------------------------------------------------------------------ Pallas ---
def _matmul_bias_kernel(a_ref, b_ref, bias_ref, o_ref, *, apply_relu):
    # a: (tm, K) bf16   b: (K, Cout) bf16   bias: (1, Cout) f32 -> o: (tm, Cout)
    acc = jnp.dot(a_ref[...], b_ref[...], preferred_element_type=jnp.float32)
    acc = acc + bias_ref[...]
    if apply_relu:
        acc = jnp.maximum(acc, 0.0)
    o_ref[...] = acc.astype(o_ref.dtype)


def matmul_bias(a, b, bias, *, apply_relu, out_dtype=jnp.float32, tm=256):
    """out = relu?(a @ b + bias); matmul/bias/relu run inside a Pallas kernel.

    Operands are fed to the MXU as bf16, accumulation is f32.
    """
    M, K = a.shape
    K2, N = b.shape
    assert K == K2

    # Keep the grid length >= 2 so v7x's two TensorCores both get work.
    if M <= tm:
        tm = max(8, ((M + 1) // 2 + 7) // 8 * 8)
    grid_m = pl.cdiv(M, tm)   # ragged trailing block handled by Pallas (masked)

    a = a.astype(jnp.bfloat16)
    b = b.astype(jnp.bfloat16)
    bias = bias.reshape(1, N).astype(jnp.float32)

    cost = pl.CostEstimate(
        flops=2 * M * K * N,
        transcendentals=0,
        bytes_accessed=(a.size * 2 + b.size * 2 + 4 * N
                        + M * N * jnp.dtype(out_dtype).itemsize),
    )

    return pl.pallas_call(
        functools.partial(_matmul_bias_kernel, apply_relu=apply_relu),
        out_shape=jax.ShapeDtypeStruct((M, N), out_dtype),
        grid_spec=pltpu.PrefetchScalarGridSpec(
            num_scalar_prefetch=0,
            grid=(grid_m,),
            in_specs=[
                pl.BlockSpec((tm, K), lambda i: (i, 0)),   # A row tile
                pl.BlockSpec((K, N), lambda i: (0, 0)),    # full weight (resident)
                pl.BlockSpec((1, N), lambda i: (0, 0)),    # bias row
            ],
            out_specs=pl.BlockSpec((tm, N), lambda i: (i, 0)),
        ),
        compiler_params=pltpu.CompilerParams(
            dimension_semantics=("parallel",),
            vmem_limit_bytes=32 * 1024 * 1024,
        ),
        cost_estimate=cost,
    )(a, b, bias)


# ------------------------------------------------------------------ glue -----
def im2col(x_nhwc, kh, kw, pad):
    """(N,H,W,C) -> (N*H*W, kh*kw*C), columns ordered (kh, kw, c)."""
    N, H, W, C = x_nhwc.shape
    xp = jnp.pad(x_nhwc, ((0, 0), (pad, pad), (pad, pad), (0, 0))) if pad else x_nhwc
    cols = [xp[:, i:i + H, j:j + W, :] for i in range(kh) for j in range(kw)]
    patches = cols[0] if len(cols) == 1 else jnp.concatenate(cols, axis=-1)
    return patches.reshape(N * H * W, kh * kw * C)


def conv2d(x_nhwc, w_hwio, bias, *, pad, apply_relu, out_dtype=jnp.float32):
    """Conv2d(stride=1) + optional ReLU; hot path runs in the Pallas kernel."""
    N, H, W, Cin = x_nhwc.shape
    KH, KW, Cin2, Cout = w_hwio.shape
    assert Cin == Cin2
    a = im2col(x_nhwc.astype(jnp.bfloat16), KH, KW, pad)
    b = w_hwio.reshape(KH * KW * Cin, Cout)
    y = matmul_bias(a, b, bias, apply_relu=apply_relu, out_dtype=out_dtype)
    return y.reshape(N, H, W, Cout)


# ------------------------------------------------------------------ model ----
def init_params(key, mixtures=1):
    c_corr = 4 * mixtures + 6
    c_cov = 2 * mixtures
    defs = {
        "convc1": (1, 1, c_corr, 256),
        "convc2": (3, 3, 256, 192),
        "convf1": (7, 7, c_cov, 128),
        "convf2": (3, 3, 128, 64),
        "conv":   (3, 3, 64 + 192, 128 - 2),
    }
    params = {}
    for name, (kh, kw, cin, cout) in defs.items():
        key, k_w, k_b = jax.random.split(key, 3)
        fan_in = kh * kw * cin
        w = jax.random.normal(k_w, (kh, kw, cin, cout), jnp.float32) * jnp.sqrt(2.0 / fan_in)
        b = jax.random.normal(k_b, (cout,), jnp.float32) * 0.01
        params[name] = (w, b)
    return params


def gaussian_encoder_forward(params, cov_nchw, corr_nchw):
    """Semantics of GaussianEncoder.forward; inputs/outputs NCHW like PyTorch."""
    cov = jnp.transpose(cov_nchw, (0, 2, 3, 1))    # NCHW -> NHWC (kept f32)
    corr = jnp.transpose(corr_nchw, (0, 2, 3, 1))

    bf16 = jnp.bfloat16
    w, b = params["convc1"]
    cor = conv2d(corr, w, b, pad=0, apply_relu=True, out_dtype=bf16)
    w, b = params["convc2"]
    cor = conv2d(cor, w, b, pad=1, apply_relu=True, out_dtype=bf16)

    w, b = params["convf1"]
    flo = conv2d(cov, w, b, pad=3, apply_relu=True, out_dtype=bf16)
    w, b = params["convf2"]
    flo = conv2d(flo, w, b, pad=1, apply_relu=True, out_dtype=bf16)

    cor_flo = jnp.concatenate([cor, flo], axis=-1)   # channel concat (dim=1 in NCHW)

    # Final conv: pad Cout 126 -> 128 so the out_spec is lane-dense (unmasked vst);
    # the padded channels (zero weights + zero bias -> zeros) are then overwritten
    # with cov, which fuses torch.cat([out, cov], dim=1) for free.
    w, b = params["conv"]
    Cout = w.shape[-1]                        # 126
    Ccov = cov.shape[-1]                      # 2 * mixtures
    Cout_pad = ((Cout + 127) // 128) * 128    # 128
    w_p = jnp.pad(w, ((0, 0), (0, 0), (0, 0), (0, Cout_pad - Cout)))
    b_p = jnp.pad(b, (0, Cout_pad - Cout))
    out = conv2d(cor_flo, w_p, b_p, pad=1, apply_relu=False, out_dtype=jnp.float32)

    if Cout + Ccov == Cout_pad:
        out = jax.lax.dynamic_update_slice(out, cov.astype(out.dtype), (0, 0, 0, Cout))
    else:
        out = jnp.concatenate([out[..., :Cout], cov.astype(out.dtype)], axis=-1)

    return jnp.transpose(out, (0, 3, 1, 2))          # NHWC -> NCHW


# ------------------------------------------------------------------ ref ------
def ref_forward(params, cov_nchw, corr_nchw, *, bf16_ops):
    """XLA reference. bf16_ops=True mirrors the kernel's bf16-operand / f32-accum
    numerics; bf16_ops=False is the original full-f32 HIGHEST-precision reference."""
    cdt = jnp.bfloat16 if bf16_ops else jnp.float32
    prec = None if bf16_ops else jax.lax.Precision.HIGHEST

    def conv(x, w, b, pad, relu):
        y = jax.lax.conv_general_dilated(
            x.astype(cdt), w.astype(cdt), (1, 1), [(pad, pad), (pad, pad)],
            dimension_numbers=("NCHW", "HWIO", "NCHW"),
            preferred_element_type=jnp.float32, precision=prec)
        y = y + b[None, :, None, None]
        if relu:
            y = jnp.maximum(y, 0.0).astype(cdt)   # intermediates stored in bf16
        return y

    w, b = params["convc1"]; cor = conv(corr_nchw, w, b, 0, True)
    w, b = params["convc2"]; cor = conv(cor, w, b, 1, True)
    w, b = params["convf1"]; flo = conv(cov_nchw, w, b, 3, True)
    w, b = params["convf2"]; flo = conv(flo, w, b, 1, True)
    cor_flo = jnp.concatenate([cor, flo], axis=1)
    w, b = params["conv"]; out = conv(cor_flo, w, b, 1, False)
    return jnp.concatenate([out, cov_nchw], axis=1)


# ------------------------------------------------------------------ main -----
if __name__ == "__main__":
    mixtures = 1                       # cfg.mixtures
    N, H, W = 2, 16, 16

    key = jax.random.PRNGKey(0)
    k_p, k_cov, k_corr = jax.random.split(key, 3)
    params = init_params(k_p, mixtures)

    cov = jax.random.normal(k_cov, (N, 2 * mixtures, H, W), jnp.float32)
    corr = jax.random.normal(k_corr, (N, 4 * mixtures + 6, H, W), jnp.float32)

    fwd = jax.jit(lambda c, r: gaussian_encoder_forward(params, c, r))
    out = jax.block_until_ready(fwd(cov, corr))
    assert out.shape == (N, (128 - 2) + 2 * mixtures, H, W), out.shape

    # (1) tight check against a reference with matching bf16-operand numerics.
    ref_bf = jax.block_until_ready(ref_forward(params, cov, corr, bf16_ops=True))
    max_err = float(jnp.max(jnp.abs(out - ref_bf)))
    assert jnp.allclose(out, ref_bf, atol=1e-2, rtol=1e-2), max_err

    # (2) end-to-end sanity against the full-f32 HIGHEST-precision reference.
    ref_f32 = jax.block_until_ready(ref_forward(params, cov, corr, bf16_ops=False))
    rel = float(jnp.linalg.norm(out - ref_f32) / jnp.linalg.norm(ref_f32))
    assert rel < 2e-2, rel

    print("KERNEL_OK")
</pallas_src>

<mosaic_0001>
module attributes {stable_mosaic.version = 11 : i64} {
  func.func @_matmul_bias_kernel(%arg0: i32, %arg1: memref<256x98xbf16, #tpu.memory_space<vmem>>, %arg2: memref<98x128xbf16, #tpu.memory_space<vmem>>, %arg3: memref<1x128xf32, #tpu.memory_space<vmem>>, %arg4: memref<256x128xbf16, #tpu.memory_space<vmem>>) attributes {dimension_semantics = [#tpu.dimension_semantics<parallel>], iteration_bounds = array<i64: 2>, scalar_prefetch = 0 : i64, scratch_operands = 0 : i64, tpu.core_type = #tpu.core_type<tc>, window_params = [{transform_indices = @transform_0, window_bounds = array<i64: 256, 98>}, {pipeline_mode = #tpu.pipeline_mode<synchronous>, transform_indices = @transform_1, window_bounds = array<i64: 98, 128>}, {pipeline_mode = #tpu.pipeline_mode<synchronous>, transform_indices = @transform_2, window_bounds = array<i64: 1, 128>}, {transform_indices = @transform_3, window_bounds = array<i64: 256, 128>}]} {
    %c0 = arith.constant 0 : index
    %c0_0 = arith.constant 0 : index
    %0 = vector.load %arg1[%c0, %c0_0] : memref<256x98xbf16, #tpu.memory_space<vmem>>, vector<256x98xbf16>
    %c0_1 = arith.constant 0 : index
    %c0_2 = arith.constant 0 : index
    %1 = vector.load %arg2[%c0_1, %c0_2] : memref<98x128xbf16, #tpu.memory_space<vmem>>, vector<98x128xbf16>
    %cst = arith.constant dense<0.000000e+00> : vector<256x128xf32>
    %2 = tpu.matmul %0, %1, %cst {dimension_numbers = #tpu.dot_dimension_numbers<[1], [0], [0], [1], [0, 0, 1, 1], [], []>} : vector<256x98xbf16>, vector<98x128xbf16>, vector<256x128xf32> -> vector<256x128xf32>
    %c0_3 = arith.constant 0 : index
    %c0_4 = arith.constant 0 : index
    %3 = vector.load %arg3[%c0_3, %c0_4] : memref<1x128xf32, #tpu.memory_space<vmem>>, vector<1x128xf32>
    %4 = vector.broadcast %3 : vector<1x128xf32> to vector<256x128xf32>
    %5 = arith.addf %2, %4 : vector<256x128xf32>
    %cst_5 = arith.constant 0.000000e+00 : f32
    %6 = vector.broadcast %cst_5 : f32 to vector<256x128xf32>
    %7 = arith.maximumf %5, %6 : vector<256x128xf32>
    %8 = arith.truncf %7 : vector<256x128xf32> to vector<256x128xbf16>
    %c0_6 = arith.constant 0 : index
    %c0_7 = arith.constant 0 : index
    %9 = vector.load %arg4[%c0_6, %c0_7] : memref<256x128xbf16, #tpu.memory_space<vmem>>, vector<256x128xbf16>
    tpu.vector_store %arg4[%c0_6, %c0_7], %8 {strides = array<i32>} : memref<256x128xbf16, #tpu.memory_space<vmem>>, vector<256x128xbf16>,
    return
  }
  func.func @transform_0(%arg0: i32) -> (i32, i32) {
    %c0_i32 = arith.constant 0 : i32
    %c0_i32_0 = arith.constant 0 : i32
    return %arg0, %c0_i32 : i32, i32
  }
  func.func @transform_1(%arg0: i32) -> (i32, i32) {
    %c0_i32 = arith.constant 0 : i32
    %c0_i32_0 = arith.constant 0 : i32
    %c0_i32_1 = arith.constant 0 : i32
    return %c0_i32, %c0_i32_0 : i32, i32
  }
  func.func @transform_2(%arg0: i32) -> (i32, i32) {
    %c0_i32 = arith.constant 0 : i32
    %c0_i32_0 = arith.constant 0 : i32
    %c0_i32_1 = arith.constant 0 : i32
    return %c0_i32, %c0_i32_0 : i32, i32
  }
  func.func @transform_3(%arg0: i32) -> (i32, i32) {
    %c0_i32 = arith.constant 0 : i32
    %c0_i32_0 = arith.constant 0 : i32
    return %arg0, %c0_i32 : i32, i32
  }
}

module attributes {stable_mosaic.version = 11 : i64} {
  func.func @_matmul_bias_kernel(%arg0: i32, %arg1: memref<256x1152xbf16, #tpu.memory_space<vmem>>, %arg2: memref<1152x64xbf16, #tpu.memory_space<vmem>>, %arg3: memref<1x64xf32, #tpu.memory_space<vmem>>, %arg4: memref<256x64xbf16, #tpu.memory_space<vmem>>) attributes {dimension_semantics = [#tpu.dimension_semantics<parallel>], iteration_bounds = array<i64: 2>, scalar_prefetch = 0 : i64, scratch_operands = 0 : i64, tpu.core_type = #tpu.core_type<tc>, window_params = [{transform_indices = @transform_0, window_bounds = array<i64: 256, 1152>}, {pipeline_mode = #tpu.pipeline_mode<synchronous>, transform_indices = @transform_1, window_bounds = array<i64: 1152, 64>}, {pipeline_mode = #tpu.pipeline_mode<synchronous>, transform_indices = @transform_2, window_bounds = array<i64: 1, 64>}, {transform_indices = @transform_3, window_bounds = array<i64: 256, 64>}]} {
    %c0 = arith.constant 0 : index
    %c0_0 = arith.constant 0 : index
    %0 = vector.load %arg1[%c0, %c0_0] : memref<256x1152xbf16, #tpu.memory_space<vmem>>, vector<256x1152xbf16>
    %c0_1 = arith.constant 0 : index
    %c0_2 = arith.constant 0 : index
    %1 = vector.load %arg2[%c0_1, %c0_2] : memref<1152x64xbf16, #tpu.memory_space<vmem>>, vector<1152x64xbf16>
    %cst = arith.constant dense<0.000000e+00> : vector<256x64xf32>
    %2 = tpu.matmul %0, %1, %cst {dimension_numbers = #tpu.dot_dimension_numbers<[1], [0], [0], [1], [0, 0, 1, 1], [], []>} : vector<256x1152xbf16>, vector<1152x64xbf16>, vector<256x64xf32> -> vector<256x64xf32>
    %c0_3 = arith.constant 0 : index
    %c0_4 = arith.constant 0 : index
    %3 = vector.load %arg3[%c0_3, %c0_4] : memref<1x64xf32, #tpu.memory_space<vmem>>, vector<1x64xf32>
    %4 = vector.broadcast %3 : vector<1x64xf32> to vector<256x64xf32>
    %5 = arith.addf %2, %4 : vector<256x64xf32>
    %cst_5 = arith.constant 0.000000e+00 : f32
    %6 = vector.broadcast %cst_5 : f32 to vector<256x64xf32>
    %7 = arith.maximumf %5, %6 : vector<256x64xf32>
    %8 = arith.truncf %7 : vector<256x64xf32> to vector<256x64xbf16>
    %c0_6 = arith.constant 0 : index
    %c0_7 = arith.constant 0 : index
    %9 = vector.load %arg4[%c0_6, %c0_7] : memref<256x64xbf16, #tpu.memory_space<vmem>>, vector<256x64xbf16>
    tpu.vector_store %arg4[%c0_6, %c0_7], %8 {strides = array<i32>} : memref<256x64xbf16, #tpu.memory_space<vmem>>, vector<256x64xbf16>,
    return
  }
  func.func @transform_0(%arg0: i32) -> (i32, i32) {
    %c0_i32 = arith.constant 0 : i32
    %c0_i32_0 = arith.constant 0 : i32
    return %arg0, %c0_i32 : i32, i32
  }
  func.func @transform_1(%arg0: i32) -> (i32, i32) {
    %c0_i32 = arith.constant 0 : i32
    %c0_i32_0 = arith.constant 0 : i32
    %c0_i32_1 = arith.constant 0 : i32
    return %c0_i32, %c0_i32_0 : i32, i32
  }
  func.func @transform_2(%arg0: i32) -> (i32, i32) {
    %c0_i32 = arith.constant 0 : i32
    %c0_i32_0 = arith.constant 0 : i32
    %c0_i32_1 = arith.constant 0 : i32
    return %c0_i32, %c0_i32_0 : i32, i32
  }
  func.func @transform_3(%arg0: i32) -> (i32, i32) {
    %c0_i32 = arith.constant 0 : i32
    %c0_i32_0 = arith.constant 0 : i32
    return %arg0, %c0_i32 : i32, i32
  }
}

module attributes {stable_mosaic.version = 11 : i64} {
  func.func @_matmul_bias_kernel(%arg0: i32, %arg1: memref<256x10xbf16, #tpu.memory_space<vmem>>, %arg2: memref<10x256xbf16, #tpu.memory_space<vmem>>, %arg3: memref<1x256xf32, #tpu.memory_space<vmem>>, %arg4: memref<256x256xbf16, #tpu.memory_space<vmem>>) attributes {dimension_semantics = [#tpu.dimension_semantics<parallel>], iteration_bounds = array<i64: 2>, scalar_prefetch = 0 : i64, scratch_operands = 0 : i64, tpu.core_type = #tpu.core_type<tc>, window_params = [{transform_indices = @transform_0, window_bounds = array<i64: 256, 10>}, {pipeline_mode = #tpu.pipeline_mode<synchronous>, transform_indices = @transform_1, window_bounds = array<i64: 10, 256>}, {pipeline_mode = #tpu.pipeline_mode<synchronous>, transform_indices = @transform_2, window_bounds = array<i64: 1, 256>}, {transform_indices = @transform_3, window_bounds = array<i64: 256, 256>}]} {
    %c0 = arith.constant 0 : index
    %c0_0 = arith.constant 0 : index
    %0 = vector.load %arg1[%c0, %c0_0] : memref<256x10xbf16, #tpu.memory_space<vmem>>, vector<256x10xbf16>
    %c0_1 = arith.constant 0 : index
    %c0_2 = arith.constant 0 : index
    %1 = vector.load %arg2[%c0_1, %c0_2] : memref<10x256xbf16, #tpu.memory_space<vmem>>, vector<10x256xbf16>
    %cst = arith.constant dense<0.000000e+00> : vector<256x256xf32>
    %2 = tpu.matmul %0, %1, %cst {dimension_numbers = #tpu.dot_dimension_numbers<[1], [0], [0], [1], [0, 0, 1, 1], [], []>} : vector<256x10xbf16>, vector<10x256xbf16>, vector<256x256xf32> -> vector<256x256xf32>
    %c0_3 = arith.constant 0 : index
    %c0_4 = arith.constant 0 : index
    %3 = vector.load %arg3[%c0_3, %c0_4] : memref<1x256xf32, #tpu.memory_space<vmem>>, vector<1x256xf32>
    %4 = vector.broadcast %3 : vector<1x256xf32> to vector<256x256xf32>
    %5 = arith.addf %2, %4 : vector<256x256xf32>
    %cst_5 = arith.constant 0.000000e+00 : f32
    %6 = vector.broadcast %cst_5 : f32 to vector<256x256xf32>
    %7 = arith.maximumf %5, %6 : vector<256x256xf32>
    %8 = arith.truncf %7 : vector<256x256xf32> to vector<256x256xbf16>
    %c0_6 = arith.constant 0 : index
    %c0_7 = arith.constant 0 : index
    %9 = vector.load %arg4[%c0_6, %c0_7] : memref<256x256xbf16, #tpu.memory_space<vmem>>, vector<256x256xbf16>
    tpu.vector_store %arg4[%c0_6, %c0_7], %8 {strides = array<i32>} : memref<256x256xbf16, #tpu.memory_space<vmem>>, vector<256x256xbf16>,
    return
  }
  func.func @transform_0(%arg0: i32) -> (i32, i32) {
    %c0_i32 = arith.constant 0 : i32
    %c0_i32_0 = arith.constant 0 : i32
    return %arg0, %c0_i32 : i32, i32
  }
  func.func @transform_1(%arg0: i32) -> (i32, i32) {
    %c0_i32 = arith.constant 0 : i32
    %c0_i32_0 = arith.constant 0 : i32
    %c0_i32_1 = arith.constant 0 : i32
    return %c0_i32, %c0_i32_0 : i32, i32
  }
  func.func @transform_2(%arg0: i32) -> (i32, i32) {
    %c0_i32 = arith.constant 0 : i32
    %c0_i32_0 = arith.constant 0 : i32
    %c0_i32_1 = arith.constant 0 : i32
    return %c0_i32, %c0_i32_0 : i32, i32
  }
  func.func @transform_3(%arg0: i32) -> (i32, i32) {
    %c0_i32 = arith.constant 0 : i32
    %c0_i32_0 = arith.constant 0 : i32
    return %arg0, %c0_i32 : i32, i32
  }
}

module attributes {stable_mosaic.version = 11 : i64} {
  func.func @_matmul_bias_kernel(%arg0: i32, %arg1: memref<256x2304xbf16, #tpu.memory_space<vmem>>, %arg2: memref<2304x192xbf16, #tpu.memory_space<vmem>>, %arg3: memref<1x192xf32, #tpu.memory_space<vmem>>, %arg4: memref<256x192xbf16, #tpu.memory_space<vmem>>) attributes {dimension_semantics = [#tpu.dimension_semantics<parallel>], iteration_bounds = array<i64: 2>, scalar_prefetch = 0 : i64, scratch_operands = 0 : i64, tpu.core_type = #tpu.core_type<tc>, window_params = [{transform_indices = @transform_0, window_bounds = array<i64: 256, 2304>}, {pipeline_mode = #tpu.pipeline_mode<synchronous>, transform_indices = @transform_1, window_bounds = array<i64: 2304, 192>}, {pipeline_mode = #tpu.pipeline_mode<synchronous>, transform_indices = @transform_2, window_bounds = array<i64: 1, 192>}, {transform_indices = @transform_3, window_bounds = array<i64: 256, 192>}]} {
    %c0 = arith.constant 0 : index
    %c0_0 = arith.constant 0 : index
    %0 = vector.load %arg1[%c0, %c0_0] : memref<256x2304xbf16, #tpu.memory_space<vmem>>, vector<256x2304xbf16>
    %c0_1 = arith.constant 0 : index
    %c0_2 = arith.constant 0 : index
    %1 = vector.load %arg2[%c0_1, %c0_2] : memref<2304x192xbf16, #tpu.memory_space<vmem>>, vector<2304x192xbf16>
    %cst = arith.constant dense<0.000000e+00> : vector<256x192xf32>
    %2 = tpu.matmul %0, %1, %cst {dimension_numbers = #tpu.dot_dimension_numbers<[1], [0], [0], [1], [0, 0, 1, 1], [], []>} : vector<256x2304xbf16>, vector<2304x192xbf16>, vector<256x192xf32> -> vector<256x192xf32>
    %c0_3 = arith.constant 0 : index
    %c0_4 = arith.constant 0 : index
    %3 = vector.load %arg3[%c0_3, %c0_4] : memref<1x192xf32, #tpu.memory_space<vmem>>, vector<1x192xf32>
    %4 = vector.broadcast %3 : vector<1x192xf32> to vector<256x192xf32>
    %5 = arith.addf %2, %4 : vector<256x192xf32>
    %cst_5 = arith.constant 0.000000e+00 : f32
    %6 = vector.broadcast %cst_5 : f32 to vector<256x192xf32>
    %7 = arith.maximumf %5, %6 : vector<256x192xf32>
    %8 = arith.truncf %7 : vector<256x192xf32> to vector<256x192xbf16>
    %c0_6 = arith.constant 0 : index
    %c0_7 = arith.constant 0 : index
    %9 = vector.load %arg4[%c0_6, %c0_7] : memref<256x192xbf16, #tpu.memory_space<vmem>>, vector<256x192xbf16>
    tpu.vector_store %arg4[%c0_6, %c0_7], %8 {strides = array<i32>} : memref<256x192xbf16, #tpu.memory_space<vmem>>, vector<256x192xbf16>,
    return
  }
  func.func @transform_0(%arg0: i32) -> (i32, i32) {
    %c0_i32 = arith.constant 0 : i32
    %c0_i32_0 = arith.constant 0 : i32
    return %arg0, %c0_i32 : i32, i32
  }
  func.func @transform_1(%arg0: i32) -> (i32, i32) {
    %c0_i32 = arith.constant 0 : i32
    %c0_i32_0 = arith.constant 0 : i32
    %c0_i32_1 = arith.constant 0 : i32
    return %c0_i32, %c0_i32_0 : i32, i32
  }
  func.func @transform_2(%arg0: i32) -> (i32, i32) {
    %c0_i32 = arith.constant 0 : i32
    %c0_i32_0 = arith.constant 0 : i32
    %c0_i32_1 = arith.constant 0 : i32
    return %c0_i32, %c0_i32_0 : i32, i32
  }
  func.func @transform_3(%arg0: i32) -> (i32, i32) {
    %c0_i32 = arith.constant 0 : i32
    %c0_i32_0 = arith.constant 0 : i32
    return %arg0, %c0_i32 : i32, i32
  }
}

module attributes {stable_mosaic.version = 11 : i64} {
  func.func @_matmul_bias_kernel(%arg0: i32, %arg1: memref<256x2304xbf16, #tpu.memory_space<vmem>>, %arg2: memref<2304x128xbf16, #tpu.memory_space<vmem>>, %arg3: memref<1x128xf32, #tpu.memory_space<vmem>>, %arg4: memref<256x128xf32, #tpu.memory_space<vmem>>) attributes {dimension_semantics = [#tpu.dimension_semantics<parallel>], iteration_bounds = array<i64: 2>, scalar_prefetch = 0 : i64, scratch_operands = 0 : i64, tpu.core_type = #tpu.core_type<tc>, window_params = [{transform_indices = @transform_0, window_bounds = array<i64: 256, 2304>}, {pipeline_mode = #tpu.pipeline_mode<synchronous>, transform_indices = @transform_1, window_bounds = array<i64: 2304, 128>}, {pipeline_mode = #tpu.pipeline_mode<synchronous>, transform_indices = @transform_2, window_bounds = array<i64: 1, 128>}, {transform_indices = @transform_3, window_bounds = array<i64: 256, 128>}]} {
    %c0 = arith.constant 0 : index
    %c0_0 = arith.constant 0 : index
    %0 = vector.load %arg1[%c0, %c0_0] : memref<256x2304xbf16, #tpu.memory_space<vmem>>, vector<256x2304xbf16>
    %c0_1 = arith.constant 0 : index
    %c0_2 = arith.constant 0 : index
    %1 = vector.load %arg2[%c0_1, %c0_2] : memref<2304x128xbf16, #tpu.memory_space<vmem>>, vector<2304x128xbf16>
    %cst = arith.constant dense<0.000000e+00> : vector<256x128xf32>
    %2 = tpu.matmul %0, %1, %cst {dimension_numbers = #tpu.dot_dimension_numbers<[1], [0], [0], [1], [0, 0, 1, 1], [], []>} : vector<256x2304xbf16>, vector<2304x128xbf16>, vector<256x128xf32> -> vector<256x128xf32>
    %c0_3 = arith.constant 0 : index
    %c0_4 = arith.constant 0 : index
    %3 = vector.load %arg3[%c0_3, %c0_4] : memref<1x128xf32, #tpu.memory_space<vmem>>, vector<1x128xf32>
    %4 = vector.broadcast %3 : vector<1x128xf32> to vector<256x128xf32>
    %5 = arith.addf %2, %4 : vector<256x128xf32>
    %c0_5 = arith.constant 0 : index
    %c0_6 = arith.constant 0 : index
    %6 = vector.load %arg4[%c0_5, %c0_6] : memref<256x128xf32, #tpu.memory_space<vmem>>, vector<256x128xf32>
    tpu.vector_store %arg4[%c0_5, %c0_6], %5 {strides = array<i32>} : memref<256x128xf32, #tpu.memory_space<vmem>>, vector<256x128xf32>,
    return
  }
  func.func @transform_0(%arg0: i32) -> (i32, i32) {
    %c0_i32 = arith.constant 0 : i32
    %c0_i32_0 = arith.constant 0 : i32
    return %arg0, %c0_i32 : i32, i32
  }
  func.func @transform_1(%arg0: i32) -> (i32, i32) {
    %c0_i32 = arith.constant 0 : i32
    %c0_i32_0 = arith.constant 0 : i32
    %c0_i32_1 = arith.constant 0 : i32
    return %c0_i32, %c0_i32_0 : i32, i32
  }
  func.func @transform_2(%arg0: i32) -> (i32, i32) {
    %c0_i32 = arith.constant 0 : i32
    %c0_i32_0 = arith.constant 0 : i32
    %c0_i32_1 = arith.constant 0 : i32
    return %c0_i32, %c0_i32_0 : i32, i32
  }
  func.func @transform_3(%arg0: i32) -> (i32, i32) {
    %c0_i32 = arith.constant 0 : i32
    %c0_i32_0 = arith.constant 0 : i32
    return %arg0, %c0_i32 : i32, i32
  }
}

</mosaic_0001>

<bundles_post_ra>
// kernel: _lambda_.7
= control target key start
LH: loop header
LB: loop body
LE: loop exit
PB: predicated region body
PF: predicated region fallthrough
CT: control target
= control target key end

     0   :  { %s1162_s12 = smov 0   ;;  %s1296_s0 = inlined_call_operand.vmem [shape: bf16[512,98], index: 0, kind: input, shape index: {}]   ;;  %s1297_s1 = inlined_call_operand.vmem [shape: bf16[98,128], index: 1, kind: input, shape index: {}]   ;;  %s1298_s2 = inlined_call_operand.vmem [shape: f32[1,128], index: 2, kind: input, shape index: {}]   ;;  %s1299_s3 = inlined_call_operand.vmem [shape: bf16[512,128], index: 3, kind: output, shape index: {}]  }
   0x1 LB: > { %s808_s13 = sadd.s32 4294967295, %s1140_s12   ;;  %p812_p0 = scmp.ge.s32.totalorder %s1140_s12, 1  ;;  %s1140_s12 = sphi %s1162_s12, %s13_s12  }
   0x2   : > { %p138_p1 = scmp.lt.s32.totalorder %s1140_s12, 3 }
   0x4   : > { %p139_p2 = pnand %p812_p0, %p138_p1 }
   0x5   : > { %s813_s18 = sshll.u32 (!%p139_p2), %s808_s13, 5 }
   0x6   : > { %142 = sbr.rel (%p139_p2) target bundleno = 270 (0x10e), region = 32  ;;  %p163_p3 = scmp.lt.s32.totalorder (!%p139_p2), %s813_s18, 63 }
   0xb   : > { %v1111_v0 = vld [vmem:[%s1297_s1 + $0x30] ss:$0 sps:$4 sm:$0x11]   ;;  %vm395_vm0 = vcmask 1040384   ;;  %v1112_v1 = vld [vmem:[%s1297_s1 + $0x28] sm:$0xff]   ;;  %v1113_v3 = vld [vmem:[%s1297_s1 + $0x20] sm:$0xff]  }
   0xc   : > { %1101 = vmatprep.subr.msk.bf16.mxu0 %vm395_vm0, %v1111_v0  ;;  %1102 = vmatprep.subr.msk.bf16.mxu1 %vm395_vm0, %v1111_v0  ;;  %v397_v2 = vsel %vm395_vm0, %v1111_v0, 0  ;;  %s1301_s18 = smov (!%p163_p3, %s813_s18), 63  ;;  %v1114_v4 = vld [vmem:[%s1297_s1 + $0x18] sm:$0xff]   ;;  %vm346_vm1 = vcmask 801792   ;;  %v1115_v7 = vld [vmem:[%s1297_s1 + $0x10] sm:$0xff]   ;;  %v1116_v8 = vld [vmem:[%s1297_s1 + $0x8] sm:$0xff]  }
   0xd   : > { %1042 = vmatpush3.bf16.msra.mxu0 %v397_v2  ;;  %1094 = vmatpush3.bf16.msra.mxu1 %v397_v2  ;;  %s814_s21 = sshll.u32 %s1301_s18, 2  ;;  %v1117_v9 = vld [vmem:[%s1297_s1] sm:$0xff]  }
   0xe   : > { %1043 = vmatprep.subr.bf16.mxu0 %v1112_v1  ;;  %1088 = vmatprep.subr.bf16.mxu1 %v1112_v1  ;;  %s1190_s26 = scalar_lea.vmem %s1296_s0, %s814_s21  ;;  %v1236_v24 = vld [vmem:[%s1298_s2] ss:$0 sm:$0xff]  ;;  %s1251_s10 = scalar_lea.vmem %s1299_s3, %s814_s21 }
   0xf   : > { %v1118_v5 = vld [vmem:[%s1190_s26] sm:$0xff]   ;;  %v1120_v10 = vld [vmem:[%s1190_s26 + $0x8] sm:$0xff]   ;;  %v1122_v12 = vld [vmem:[%s1190_s26 + $0x10] sm:$0xff]  }
  0x10   : > { %v1119_v6 = vld [vmem:[%s1190_s26 + $0x40] sm:$0xff]   ;;  %1055 = vmatprep.mubr.msk.bf16.mxu0 %vm346_vm1, %v1118_v5  ;;  %v1121_v11 = vld [vmem:[%s1190_s26 + $0x48] sm:$0xff]   ;;  %v1123_v13 = vld [vmem:[%s1190_s26 + $0x50] sm:$0xff]  }
  0x11   : > { %1044 = vmatpush3.bf16.msra.mxu0 %v1112_v1  ;;  %1095 = vmatpush3.bf16.msra.mxu1 %v1112_v1  ;;  %v1124_v14 = vld [vmem:[%s1190_s26 + $0x18] sm:$0xff]   ;;  %v1126_v16 = vld [vmem:[%s1190_s26 + $0x20] sm:$0xff]   ;;  %v1128_v18 = vld [vmem:[%s1190_s26 + $0x28] sm:$0xff]  }
  0x12   : > { %1045 = vmatprep.subr.bf16.mxu0 %v1113_v3  ;;  %1089 = vmatprep.subr.bf16.mxu1 %v1113_v3  ;;  %v1125_v15 = vld [vmem:[%s1190_s26 + $0x58] sm:$0xff]   ;;  %v1127_v17 = vld [vmem:[%s1190_s26 + $0x60] sm:$0xff]   ;;  %v1129_v19 = vld [vmem:[%s1190_s26 + $0x68] sm:$0xff]  }
  0x13   : > { %1071 = vmatprep.mubr.msk.bf16.mxu1 %vm346_vm1, %v1119_v6  ;;  %v1130_v20 = vld [vmem:[%s1190_s26 + $0x30] sm:$0xff]   ;;  %v1132_v22 = vld [vmem:[%s1190_s26 + $0x38] sm:$0xff]  }
  0x14   : > { %v1131_v21 = vld [vmem:[%s1190_s26 + $0x70] sm:$0xff]   ;;  %v1133_v23 = vld [vmem:[%s1190_s26 + $0x78] sm:$0xff]  }
  0x15   : > { %1046 = vmatpush3.bf16.msra.mxu0 %v1113_v3  ;;  %1096 = vmatpush3.bf16.msra.mxu1 %v1113_v3 }
  0x16   : > { %1047 = vmatprep.subr.bf16.mxu0 %v1114_v4  ;;  %1090 = vmatprep.subr.bf16.mxu1 %v1114_v4 }
  0x19   : > { %1048 = vmatpush3.bf16.msra.mxu0 %v1114_v4  ;;  %1097 = vmatpush3.bf16.msra.mxu1 %v1114_v4 }
  0x1a   : > { %1049 = vmatprep.subr.bf16.mxu0 %v1115_v7  ;;  %1091 = vmatprep.subr.bf16.mxu1 %v1115_v7 }
  0x1d   : > { %1050 = vmatpush3.bf16.msra.mxu0 %v1115_v7  ;;  %1098 = vmatpush3.bf16.msra.mxu1 %v1115_v7 }
  0x1e   : > { %1051 = vmatprep.subr.bf16.mxu0 %v1116_v8  ;;  %1092 = vmatprep.subr.bf16.mxu1 %v1116_v8 }
  0x21   : > { %1052 = vmatpush3.bf16.msra.mxu0 %v1116_v8  ;;  %1099 = vmatpush3.bf16.msra.mxu1 %v1116_v8 }
  0x22   : > { %1053 = vmatprep.subr.bf16.mxu0 %v1117_v9  ;;  %1093 = vmatprep.subr.bf16.mxu1 %v1117_v9 }
  0x25   : > { %1054 = vmatpush3.bf16.msra.mxu0 %v1117_v9  ;;  %1100 = vmatpush3.bf16.msra.mxu1 %v1117_v9 }
  0x28   : > { %1056 = vmatmul.mubr.msk.bf16.vlgmr.msra.gmra.mxu0 %vm346_vm1, %v1120_v10  ;;  %1072 = vmatmul.mubr.msk.bf16.vlgmr.msra.gmra.mxu1 %vm346_vm1, %v1121_v11 }
  0x29   : > { %1059 = vmatprep.mubr.msk.bf16.mxu0 %vm346_vm1, %v1122_v12  ;;  %1075 = vmatprep.mubr.msk.bf16.mxu1 %vm346_vm1, %v1123_v13 }
  0x30   : > { %1060 = vmatmul.mubr.msk.bf16.gmra.mxu0 %vm346_vm1, %v1124_v14  ;;  %1076 = vmatmul.mubr.msk.bf16.gmra.mxu1 %vm346_vm1, %v1125_v15 }
  0x31   : > { %1063 = vmatprep.mubr.msk.bf16.mxu0 %vm346_vm1, %v1126_v16  ;;  %1079 = vmatprep.mubr.msk.bf16.mxu1 %vm346_vm1, %v1127_v17 }
  0x38   : > { %1064 = vmatmul.mubr.msk.bf16.gmra.mxu0 %vm346_vm1, %v1128_v18  ;;  %1080 = vmatmul.mubr.msk.bf16.gmra.mxu1 %vm346_vm1, %v1129_v19 }
  0x39   : > { %1067 = vmatprep.mubr.msk.bf16.mxu0 %vm346_vm1, %v1130_v20  ;;  %1083 = vmatprep.mubr.msk.bf16.mxu1 %vm346_vm1, %v1131_v21 }
  0x40   : > { %1068 = vmatmul.mubr.msk.bf16.gmra.mxu0 %vm346_vm1, %v1132_v22  ;;  %1084 = vmatmul.mubr.msk.bf16.gmra.mxu1 %vm346_vm1, %v1133_v23 }
  0xe8   : > { %v1057_v25 = vpop.f32.mrf.mxu0  ;;  %v1073_v26 = vpop.f32.mrf.mxu1 }
  0xe9   : > { %v442_v27 = vadd.f32 %v1057_v25, %v1236_v24  ;;  %v506_v28 = vadd.f32 %v1073_v26, %v1236_v24 }
  0xea   : > { %v433_v29 = vpop.f32.mrf.mxu0  ;;  %v497_v30 = vpop.f32.mrf.mxu1 }
  0xeb   : > { %v434_v31 = vadd.f32 %v1236_v24, %v433_v29  ;;  %v498_v32 = vadd.f32 %v1236_v24, %v497_v30  ;;  %v562_v37 = vmax.f32 %v442_v27, 0.0  ;;  %v578_v38 = vmax.f32 %v506_v28, 0.0 }
  0xec   : > { %v1058_v33 = vpop.f32.mrf.mxu0  ;;  %v1074_v34 = vpop.f32.mrf.mxu1 }
  0xed   : > { %v445_v35 = vadd.f32 %v1058_v33, %v1236_v24  ;;  %v509_v36 = vadd.f32 %v1074_v34, %v1236_v24  ;;  %v560_v45 = vmax.f32 %v434_v31, 0.0  ;;  %v576_v46 = vmax.f32 %v498_v32, 0.0 }
  0xee   : > { %v436_v39 = vpop.f32.mrf.mxu0  ;;  %v500_v40 = vpop.f32.mrf.mxu1 }
  0xef   : > { %v563_v41 = vmax.f32 %v445_v35, 0.0  ;;  %v579_v42 = vmax.f32 %v509_v36, 0.0  ;;  %v437_v43 = vadd.f32 %v1236_v24, %v436_v39  ;;  %v501_v44 = vadd.f32 %v1236_v24, %v500_v40 }
  0xf0   : > { %v1061_v47 = vpop.f32.mrf.mxu0  ;;  %v1077_v48 = vpop.f32.mrf.mxu1 }
  0xf1   : > { %v931_v49 = vpack.c.bf16 %v563_v41, %v562_v37  ;;  %v971_v50 = vpack.c.bf16 %v579_v42, %v578_v38  ;;  %v561_v51 = vmax.f32 %v437_v43, 0.0  ;;  %v577_v52 = vmax.f32 %v501_v44, 0.0 }
  0xf2   : > { %v458_v53 = vadd.f32 %v1061_v47, %v1236_v24  ;;  %v522_v54 = vadd.f32 %v1077_v48, %v1236_v24  ;;  %v449_v55 = vpop.f32.mrf.mxu0  ;;  %v513_v56 = vpop.f32.mrf.mxu1 }
  0xf3   : > { %1003 = vst [vmem:[%s1251_s10 + $0x8] sm:$0xff] %v931_v49   ;;  %1011 = vst [vmem:[%s1251_s10 + $0x48] sm:$0xff] %v971_v50   ;;  %v926_v57 = vpack.c.bf16 %v561_v51, %v560_v45  ;;  %v966_v58 = vpack.c.bf16 %v577_v52, %v576_v46  ;;  %v450_v59 = vadd.f32 %v1236_v24, %v449_v55 }
  0xf4   : > { %v514_v60 = vadd.f32 %v1236_v24, %v513_v56  ;;  %v1062_v61 = vpop.f32.mrf.mxu0  ;;  %v1078_v62 = vpop.f32.mrf.mxu1  ;;  %v566_v1 = vmax.f32 %v458_v53, 0.0  ;;  %v582_v2 = vmax.f32 %v522_v54, 0.0 }
  0xf5   : > { %927 = vst [vmem:[%s1251_s10] sm:$0xff] %v926_v57   ;;  %1010 = vst [vmem:[%s1251_s10 + $0x40] sm:$0xff] %v966_v58   ;;  %v461_v63 = vadd.f32 %v1062_v61, %v1236_v24  ;;  %v525_v0 = vadd.f32 %v1078_v62, %v1236_v24  ;;  %v564_v9 = vmax.f32 %v450_v59, 0.0 }
  0xf6   : > { %v452_v3 = vpop.f32.mrf.mxu0  ;;  %v516_v4 = vpop.f32.mrf.mxu1  ;;  %v580_v10 = vmax.f32 %v514_v60, 0.0 }
  0xf7   : > { %v567_v5 = vmax.f32 %v461_v63, 0.0  ;;  %v583_v6 = vmax.f32 %v525_v0, 0.0  ;;  %v453_v7 = vadd.f32 %v1236_v24, %v452_v3  ;;  %v517_v8 = vadd.f32 %v1236_v24, %v516_v4 }
  0xf8   : > { %v1065_v11 = vpop.f32.mrf.mxu0  ;;  %v1081_v12 = vpop.f32.mrf.mxu1 }
  0xf9   : > { %v941_v13 = vpack.c.bf16 %v567_v5, %v566_v1  ;;  %v981_v14 = vpack.c.bf16 %v583_v6, %v582_v2  ;;  %v565_v15 = vmax.f32 %v453_v7, 0.0  ;;  %v581_v16 = vmax.f32 %v517_v8, 0.0 }
  0xfa   : > { %v474_v17 = vadd.f32 %v1065_v11, %v1236_v24  ;;  %v538_v18 = vadd.f32 %v1081_v12, %v1236_v24  ;;  %v465_v19 = vpop.f32.mrf.mxu0  ;;  %v529_v20 = vpop.f32.mrf.mxu1 }
  0xfb   : > { %1005 = vst [vmem:[%s1251_s10 + $0x18] sm:$0xff] %v941_v13   ;;  %1013 = vst [vmem:[%s1251_s10 + $0x58] sm:$0xff] %v981_v14   ;;  %v936_v21 = vpack.c.bf16 %v565_v15, %v564_v9  ;;  %v976_v22 = vpack.c.bf16 %v581_v16, %v580_v10  ;;  %v466_v23 = vadd.f32 %v1236_v24, %v465_v19 }
  0xfc   : > { %v530_v25 = vadd.f32 %v1236_v24, %v529_v20  ;;  %v1066_v26 = vpop.f32.mrf.mxu0  ;;  %v1082_v27 = vpop.f32.mrf.mxu1  ;;  %v570_v30 = vmax.f32 %v474_v17, 0.0  ;;  %v586_v31 = vmax.f32 %v538_v18, 0.0 }
  0xfd   : > { %1004 = vst [vmem:[%s1251_s10 + $0x10] sm:$0xff] %v936_v21   ;;  %1012 = vst [vmem:[%s1251_s10 + $0x50] sm:$0xff] %v976_v22   ;;  %v477_v28 = vadd.f32 %v1066_v26, %v1236_v24  ;;  %v541_v29 = vadd.f32 %v1082_v27, %v1236_v24  ;;  %v568_v38 = vmax.f32 %v466_v23, 0.0 }
  0xfe   : > { %v468_v32 = vpop.f32.mrf.mxu0  ;;  %v532_v33 = vpop.f32.mrf.mxu1  ;;  %v584_v39 = vmax.f32 %v530_v25, 0.0 }
  0xff   : > { %v571_v34 = vmax.f32 %v477_v28, 0.0  ;;  %v587_v35 = vmax.f32 %v541_v29, 0.0  ;;  %v469_v36 = vadd.f32 %v1236_v24, %v468_v32  ;;  %v533_v37 = vadd.f32 %v1236_v24, %v532_v33 }
 0x100   : > { %v1069_v40 = vpop.f32.mrf.mxu0  ;;  %v1085_v41 = vpop.f32.mrf.mxu1 }
 0x101   : > { %v951_v42 = vpack.c.bf16 %v571_v34, %v570_v30  ;;  %v991_v43 = vpack.c.bf16 %v587_v35, %v586_v31  ;;  %v569_v44 = vmax.f32 %v469_v36, 0.0  ;;  %v585_v45 = vmax.f32 %v533_v37, 0.0 }
 0x102   : > { %v490_v46 = vadd.f32 %v1069_v40, %v1236_v24  ;;  %v554_v47 = vadd.f32 %v1085_v41, %v1236_v24  ;;  %v481_v48 = vpop.f32.mrf.mxu0  ;;  %v545_v49 = vpop.f32.mrf.mxu1 }
 0x103   : > { %1007 = vst [vmem:[%s1251_s10 + $0x28] sm:$0xff] %v951_v42   ;;  %1015 = vst [vmem:[%s1251_s10 + $0x68] sm:$0xff] %v991_v43   ;;  %v946_v50 = vpack.c.bf16 %v569_v44, %v568_v38  ;;  %v986_v51 = vpack.c.bf16 %v585_v45, %v584_v39  ;;  %v482_v52 = vadd.f32 %v1236_v24, %v481_v48 }
 0x104   : > { %v546_v53 = vadd.f32 %v1236_v24, %v545_v49  ;;  %v1070_v54 = vpop.f32.mrf.mxu0  ;;  %v1086_v55 = vpop.f32.mrf.mxu1  ;;  %v574_v58 = vmax.f32 %v490_v46, 0.0  ;;  %v590_v59 = vmax.f32 %v554_v47, 0.0 }
 0x105   : > { %1006 = vst [vmem:[%s1251_s10 + $0x20] sm:$0xff] %v946_v50   ;;  %1014 = vst [vmem:[%s1251_s10 + $0x60] sm:$0xff] %v986_v51   ;;  %v493_v56 = vadd.f32 %v1070_v54, %v1236_v24  ;;  %v557_v57 = vadd.f32 %v1086_v55, %v1236_v24  ;;  %v572_v2 = vmax.f32 %v482_v52, 0.0 }
 0x106   : > { %v484_v60 = vpop.f32.mrf.mxu0  ;;  %v548_v61 = vpop.f32.mrf.mxu1  ;;  %v588_v3 = vmax.f32 %v546_v53, 0.0 }
 0x107   : > { %v575_v62 = vmax.f32 %v493_v56, 0.0  ;;  %v591_v63 = vmax.f32 %v557_v57, 0.0  ;;  %v485_v0 = vadd.f32 %v1236_v24, %v484_v60  ;;  %v549_v1 = vadd.f32 %v1236_v24, %v548_v61 }
 0x109   : > { %v961_v4 = vpack.c.bf16 %v575_v62, %v574_v58  ;;  %v1001_v5 = vpack.c.bf16 %v591_v63, %v590_v59  ;;  %v573_v6 = vmax.f32 %v485_v0, 0.0  ;;  %v589_v7 = vmax.f32 %v549_v1, 0.0 }
 0x10b   : > { %1009 = vst [vmem:[%s1251_s10 + $0x38] sm:$0xff] %v961_v4   ;;  %1017 = vst [vmem:[%s1251_s10 + $0x78] sm:$0xff] %v1001_v5   ;;  %v956_v8 = vpack.c.bf16 %v573_v6, %v572_v2  ;;  %v996_v9 = vpack.c.bf16 %v589_v7, %v588_v3 }
 0x10d   : > { %1008 = vst [vmem:[%s1251_s10 + $0x30] sm:$0xff] %v956_v8   ;;  %1016 = vst [vmem:[%s1251_s10 + $0x70] sm:$0xff] %v996_v9  }
 0x10e PF: > { %s13_s12 = sadd.s32 1, %s1140_s12  }
 0x10f   : > { %p10_p4 = scmp.ge.s32.totalorder %s13_s12, 4  }
 0x111   :  { %12 = sbr.rel (!%p10_p4) target bundleno = 1 (0x1), region = 62 }

// kernel: _lambda_.8
= control target key start
LH: loop header
LB: loop body
LE: loop exit
PB: predicated region body
PF: predicated region fallthrough
CT: control target
= control target key end

     0   :  { %s3856_s12 = smov 0   ;;  %s4762_s0 = inlined_call_operand.vmem [shape: bf16[512,1152], index: 0, kind: input, shape index: {}]   ;;  %s4763_s1 = inlined_call_operand.vmem [shape: bf16[1152,64], index: 1, kind: input, shape index: {}]   ;;  %s4764_s2 = inlined_call_operand.vmem [shape: f32[1,64], index: 2, kind: input, shape index: {}]   ;;  %s4765_s3 = inlined_call_operand.vmem [shape: bf16[512,64], index: 3, kind: output, shape index: {}]  }
   0x1 LB: > { %s2711_s13 = sadd.s32 4294967295, %s3834_s12   ;;  %p2715_p0 = scmp.ge.s32.totalorder %s3834_s12, 1  ;;  %s3834_s12 = sphi %s3856_s12, %s13_s12  }
   0x2   : > { %p139_p1 = scmp.lt.s32.totalorder %s3834_s12, 3 }
   0x4   : > { %p140_p2 = pnand %p2715_p0, %p139_p1 }
   0x6   : > { %143 = sbr.rel (%p140_p2) target bundleno = 534 (0x216), region = 32 }
   0xb   : > { %v3548_v0 = vld [vmem:[%s4763_s1 + $0x78] sm:$0xff]   ;;  %s2716_s16 = sshll.u32 %s2711_s13, 5  ;;  %v3550_v2 = vld [vmem:[%s4763_s1 + $0x70] sm:$0xff]   ;;  %v3552_v4 = vld [vmem:[%s4763_s1 + $0x68] sm:$0xff]   ;;  %vm2622_vm0 = vcmask 519168  }
   0xc   : > { %v3549_v1 = vld [vmem:[%s4763_s1 + $0x38] sm:$0xff]   ;;  %3003 = vmatprep.subr.bf16.mxu0 %v3548_v0  ;;  %3523 = vmatprep.subr.bf16.mxu1 %v3548_v0  ;;  %p165_p3 = scmp.lt.s32.totalorder %s2716_s16, 63  ;;  %v3551_v3 = vld [vmem:[%s4763_s1 + $0x30] sm:$0xff]   ;;  %v3553_v5 = vld [vmem:[%s4763_s1 + $0x28] sm:$0xff]  }
   0xd   : > { %3004 = vmatpush3.bf16.msra.mxu0 %v3549_v1  ;;  %3531 = vmatpush3.bf16.msra.mxu1 %v3549_v1  ;;  %v3554_v6 = vld [vmem:[%s4763_s1 + $0x60] sm:$0xff]   ;;  %v3556_v8 = vld [vmem:[%s4763_s1 + $0x58] sm:$0xff]   ;;  %v3558_v10 = vld [vmem:[%s4763_s1 + $0x50] sm:$0xff]  }
   0xe   : > { %3005 = vmatprep.subr.bf16.mxu0 %v3550_v2  ;;  %3524 = vmatprep.subr.bf16.mxu1 %v3550_v2  ;;  %s4789_s16 = smov (!%p165_p3, %s2716_s16), 63  ;;  %v3555_v7 = vld [vmem:[%s4763_s1 + $0x20] sm:$0xff]   ;;  %v3557_v9 = vld [vmem:[%s4763_s1 + $0x18] sm:$0xff]   ;;  %v3559_v13 = vld [vmem:[%s4763_s1 + $0x10] sm:$0xff]  }
   0xf   : > { %s3539_s29 = smul.u32 36, %s4789_s16  ;;  %v3560_v14 = vld [vmem:[%s4763_s1 + $0x48] sm:$0xff]   ;;  %v3562_v16 = vld [vmem:[%s4763_s1 + $0x40] sm:$0xff]   ;;  %v3570_v18 = vld [vmem:[%s4763_s1 + $0xf8] sm:$0xff]  }
  0x10   : > { %v3561_v15 = vld [vmem:[%s4763_s1 + $0x8] sm:$0xff]   ;;  %v3563_v17 = vld [vmem:[%s4763_s1] sm:$0xff]   ;;  %v3573_v21 = vld [vmem:[%s4763_s1 + $0x178] sm:$0xff]  }
  0x11   : > { %3006 = vmatpush3.bf16.msra.mxu0 %v3551_v3  ;;  %3532 = vmatpush3.bf16.msra.mxu1 %v3551_v3  ;;  %s3897_s9 = scalar_lea.vmem %s4762_s0, %s3539_s29  ;;  %v3571_v22 = vld [vmem:[%s4763_s1 + $0xb8] sm:$0xff]   ;;  %v3572_v23 = vld [vmem:[%s4763_s1 + $0xf0] sm:$0xff]   ;;  %v3582_v31 = vld [vmem:[%s4763_s1 + $0xe8] sm:$0xff]  }
  0x12   : > { %3007 = vmatprep.subr.bf16.mxu0 %v3552_v4  ;;  %3525 = vmatprep.subr.bf16.mxu1 %v3552_v4  ;;  %v3566_v11 = vld [vmem:[%s3897_s9 + $0x4] ss:$36 sps:$4 sm:$0xff]   ;;  %v3575_v24 = vld [vmem:[%s4763_s1 + $0x138] sm:$0xff]   ;;  %v3576_v25 = vld [vmem:[%s3897_s9 + $0x4c] ss:$36 sps:$4 sm:$0xff]  }
  0x13   : > { %v3569_v12 = vld [vmem:[%s3897_s9 + $0x364] ss:$36 sps:$4 sm:$0xff]   ;;  %1689 = vmatprep.mubr.bf16.mxu0 %v3566_v11  ;;  %v3578_v26 = vld [vmem:[%s3897_s9 + $0x3ac] ss:$36 sps:$4 sm:$0xff]   ;;  %v3586_v35 = vld [vmem:[%s3897_s9 + $0x94] ss:$36 sps:$4 sm:$0xff]  }
  0x14   : > { %1785 = vmatprep.mubr.bf16.mxu1 %v3569_v12  ;;  %v3564_v19 = vld [vmem:[%s3897_s9] ss:$36 sps:$4 sm:$0xff]   ;;  %v3574_v27 = vld [vmem:[%s4763_s1 + $0xb0] sm:$0xff]   ;;  %v3580_v29 = vld [vmem:[%s3897_s9 + $0x48] ss:$36 sps:$4 sm:$0xff]  }
  0x15   : > { %3008 = vmatpush3.bf16.msra.mxu0 %v3553_v5  ;;  %3533 = vmatpush3.bf16.msra.mxu1 %v3553_v5  ;;  %v3567_v20 = vld [vmem:[%s3897_s9 + $0x360] ss:$36 sps:$4 sm:$0xff]   ;;  %v3593_v28 = vld [vmem:[%s4763_s1 + $0x170] sm:$0xff]   ;;  %v3581_v30 = vld [vmem:[%s3897_s9 + $0x3a8] ss:$36 sps:$4 sm:$0xff]  }
  0x16   : > { %3009 = vmatprep.subr.bf16.mxu0 %v3554_v6  ;;  %3526 = vmatprep.subr.bf16.mxu1 %v3554_v6  ;;  %v3583_v32 = vld [vmem:[%s4763_s1 + $0xa8] sm:$0xff]   ;;  %v3595_v33 = vld [vmem:[%s4763_s1 + $0x130] sm:$0xff]   ;;  %v3584_v34 = vld [vmem:[%s4763_s1 + $0xe0] sm:$0xff]  }
  0x17   : > { %v3588_v36 = vld [vmem:[%s3897_s9 + $0x3f4] ss:$36 sps:$4 sm:$0xff]   ;;  %v3585_v37 = vld [vmem:[%s4763_s1 + $0xa0] sm:$0xff]   ;;  %v3607_v43 = vld [vmem:[%s4763_s1 + $0x168] sm:$0xff]  }
  0x18   : > { %v3590_v38 = vld [vmem:[%s3897_s9 + $0x90] ss:$36 sps:$4 sm:$0xff]   ;;  %v3592_v40 = vld [vmem:[%s4763_s1 + $0xd8] sm:$0xff]   ;;  %v3609_v46 = vld [vmem:[%s4763_s1 + $0x128] sm:$0xff]  }
  0x19   : > { %3010 = vmatpush3.bf16.msra.mxu0 %v3555_v7  ;;  %3534 = vmatpush3.bf16.msra.mxu1 %v3555_v7  ;;  %v3591_v39 = vld [vmem:[%s3897_s9 + $0x3f0] ss:$36 sps:$4 sm:$0xff]   ;;  %v3594_v41 = vld [vmem:[%s4763_s1 + $0x98] sm:$0xff]   ;;  %v3604_v48 = vld [vmem:[%s4763_s1 + $0xc8] sm:$0xff]  }
  0x1a   : > { %3011 = vmatprep.subr.bf16.mxu0 %v3556_v8  ;;  %3527 = vmatprep.subr.bf16.mxu1 %v3556_v8  ;;  %v3596_v42 = vld [vmem:[%s4763_s1 + $0xd0] sm:$0xff]   ;;  %v3598_v44 = vld [vmem:[%s3897_s9 + $0xdc] ss:$36 sps:$4 sm:$0xff]   ;;  %v3605_v51 = vld [vmem:[%s4763_s1 + $0x88] sm:$0xff]  }
  0x1b   : > { %v3600_v45 = vld [vmem:[%s3897_s9 + $0x43c] ss:$36 sps:$4 sm:$0xff]   ;;  %v3597_v47 = vld [vmem:[%s4763_s1 + $0x90] sm:$0xff]   ;;  %v3610_v53 = vld [vmem:[%s3897_s9 + $0x124] ss:$36 sps:$4 sm:$0xff]  }
  0x1c   : > { %v3602_v49 = vld [vmem:[%s3897_s9 + $0xd8] ss:$36 sps:$4 sm:$0xff]   ;;  %v3606_v52 = vld [vmem:[%s4763_s1 + $0xc0] sm:$0xff]   ;;  %v3614_v54 = vld [vmem:[%s3897_s9 + $0xc] ss:$36 sps:$4 sm:$0xff]  }
  0x1d   : > { %3012 = vmatpush3.bf16.msra.mxu0 %v3557_v9  ;;  %3535 = vmatpush3.bf16.msra.mxu1 %v3557_v9  ;;  %v3603_v50 = vld [vmem:[%s3897_s9 + $0x438] ss:$36 sps:$4 sm:$0xff]   ;;  %v3624_v55 = vld [vmem:[%s4763_s1 + $0x160] sm:$0xff]   ;;  %v3612_v58 = vld [vmem:[%s3897_s9 + $0x8] ss:$36 sps:$4 sm:$0xff]  }
  0x1e   : > { %3013 = vmatprep.subr.bf16.mxu0 %v3558_v10  ;;  %3528 = vmatprep.subr.bf16.mxu1 %v3558_v10  ;;  %v3625_v56 = vld [vmem:[%s4763_s1 + $0x120] sm:$0xff]   ;;  %v3616_v60 = vld [vmem:[%s4763_s1 + $0x1f8] sm:$0xff]   ;;  %v3618_v62 = vld [vmem:[%s3897_s9 + $0x16c] ss:$36 sps:$4 sm:$0xff]  }
  0x1f   : > { %v3608_v57 = vld [vmem:[%s4763_s1 + $0x80] sm:$0xff]   ;;  %v3617_v61 = vld [vmem:[%s4763_s1 + $0x1b8] sm:$0xff]   ;;  %v3632_v1 = vld [vmem:[%s4763_s1 + $0x1f0] sm:$0xff]  }
  0x20   : > { %v3615_v59 = vld [vmem:[%s3897_s9 + $0x120] ss:$36 sps:$4 sm:$0xff]   ;;  %v3620_v63 = vld [vmem:[%s3897_s9 + $0x54] ss:$36 sps:$4 sm:$0xff]   ;;  %v3622_v4 = vld [vmem:[%s3897_s9 + $0x168] ss:$36 sps:$4 sm:$0xff]  }
  0x21   : > { %3014 = vmatpush3.bf16.msra.mxu0 %v3559_v13  ;;  %3536 = vmatpush3.bf16.msra.mxu1 %v3559_v13  ;;  %v3634_v0 = vld [vmem:[%s4763_s1 + $0x158] sm:$0xff]   ;;  %v3633_v3 = vld [vmem:[%s4763_s1 + $0x1b0] sm:$0xff]   ;;  %v3649_v9 = vld [vmem:[%s4763_s1 + $0x1e8] sm:$0xff]  }
  0x22   : > { %3015 = vmatprep.subr.bf16.mxu0 %v3560_v14  ;;  %3529 = vmatprep.subr.bf16.mxu1 %v3560_v14  ;;  %v3635_v2 = vld [vmem:[%s4763_s1 + $0x118] sm:$0xff]   ;;  %v3623_v5 = vld [vmem:[%s3897_s9 + $0x50] ss:$36 sps:$4 sm:$0xff]   ;;  %v3651_v11 = vld [vmem:[%s4763_s1 + $0x1a8] sm:$0xff]  }
  0x23   : > { %v3626_v6 = vld [vmem:[%s3897_s9 + $0x1b4] ss:$36 sps:$4 sm:$0xff]   ;;  %v3628_v7 = vld [vmem:[%s3897_s9 + $0x9c] ss:$36 sps:$4 sm:$0xff]  }
  0x24   : > { %v3648_v8 = vld [vmem:[%s4763_s1 + $0x150] sm:$0xff]   ;;  %v3631_v13 = vld [vmem:[%s3897_s9 + $0x98] ss:$36 sps:$4 sm:$0xff]  }
  0x25   : > { %3016 = vmatpush3.bf16.msra.mxu0 %v3561_v15  ;;  %3537 = vmatpush3.bf16.msra.mxu1 %v3561_v15  ;;  %v3650_v10 = vld [vmem:[%s4763_s1 + $0x110] sm:$0xff]   ;;  %v3636_v14 = vld [vmem:[%s3897_s9 + $0x1fc] ss:$36 sps:$4 sm:$0xff]   ;;  %v3658_v15 = vld [vmem:[%s4763_s1 + $0x148] sm:$0xff]  }
  0x26   : > { %3017 = vmatprep.subr.bf16.mxu0 %v3562_v16  ;;  %3530 = vmatprep.subr.bf16.mxu1 %v3562_v16  ;;  %v3630_v12 = vld [vmem:[%s3897_s9 + $0x1b0] ss:$36 sps:$4 sm:$0xff]   ;;  %v3659_v16 = vld [vmem:[%s4763_s1 + $0x108] sm:$0xff]  }
  0x29   : > { %3018 = vmatpush3.bf16.msra.mxu0 %v3563_v17  ;;  %3538 = vmatpush3.bf16.msra.mxu1 %v3563_v17  ;;  %v3638_v17 = vld [vmem:[%s3897_s9 + $0xe4] ss:$36 sps:$4 sm:$0xff]  }
  0x2a   : > { %3115 = vmatprep.subr.bf16.mxu1 %v3570_v18  ;;  %3227 = vmatprep.subr.bf16.mxu0 %v3573_v21  ;;  %v3666_v18 = vld [vmem:[%s4763_s1 + $0x1e0] sm:$0xff]  }
  0x2b   : > { %v3641_v21 = vld [vmem:[%s3897_s9 + $0xe0] ss:$36 sps:$4 sm:$0xff]  }
  0x2c   : > { %1690 = vmatmul.mubr.bf16.vlgmr.msra.gmra.mxu0 %v3564_v19  ;;  %1786 = vmatmul.mubr.bf16.vlgmr.msra.gmra.mxu1 %v3567_v20  ;;  %v3667_v19 = vld [vmem:[%s4763_s1 + $0x1a0] sm:$0xff]   ;;  %v3640_v20 = vld [vmem:[%s3897_s9 + $0x1f8] ss:$36 sps:$4 sm:$0xff]  }
  0x2d   : > { %3116 = vmatpush3.bf16.msra.mxu1 %v3571_v22  ;;  %3228 = vmatpush3.bf16.msra.mxu0 %v3575_v24  ;;  %v3642_v22 = vld [vmem:[%s3897_s9 + $0x244] ss:$36 sps:$4 sm:$0xff]  }
  0x2e   : > { %3117 = vmatprep.subr.bf16.mxu1 %v3572_v23  ;;  %1697 = vmatprep.mubr.bf16.mxu0 %v3576_v25  ;;  %v3644_v23 = vld [vmem:[%s3897_s9 + $0x12c] ss:$36 sps:$4 sm:$0xff]   ;;  %v3674_v24 = vld [vmem:[%s4763_s1 + $0x140] sm:$0xff]  }
  0x2f   : > { %1793 = vmatprep.mubr.bf16.mxu1 %v3578_v26  ;;  %3229 = vmatprep.subr.bf16.mxu0 %v3593_v28  ;;  %v3675_v25 = vld [vmem:[%s4763_s1 + $0x100] sm:$0xff]   ;;  %v3682_v26 = vld [vmem:[%s4763_s1 + $0x1d8] sm:$0xff]  }
  0x30   : > { %v3683_v28 = vld [vmem:[%s4763_s1 + $0x198] sm:$0xff]  }
  0x31   : > { %3118 = vmatpush3.bf16.msra.mxu1 %v3574_v27  ;;  %3230 = vmatpush3.bf16.msra.mxu0 %v3595_v33  ;;  %v3646_v27 = vld [vmem:[%s3897_s9 + $0x240] ss:$36 sps:$4 sm:$0xff]   ;;  %v3697_v33 = vld [vmem:[%s4763_s1 + $0x1d0] sm:$0xff]  }
  0x32   : > { %3119 = vmatprep.subr.bf16.mxu1 %v3582_v31  ;;  %3231 = vmatprep.subr.bf16.mxu0 %v3607_v43  ;;  %v3652_v31 = vld [vmem:[%s3897_s9 + $0x28c] ss:$36 sps:$4 sm:$0xff]   ;;  %v3668_v43 = vld [vmem:[%s3897_s9 + $0x31c] ss:$36 sps:$4 sm:$0xff]  }
  0x34   : > { %1698 = vmatmul.mubr.bf16.gmra.mxu0 %v3580_v29  ;;  %1794 = vmatmul.mubr.bf16.gmra.mxu1 %v3581_v30  ;;  %v3684_v29 = vld [vmem:[%s4763_s1 + $0x238] sm:$0xff]   ;;  %v3647_v30 = vld [vmem:[%s3897_s9 + $0x128] ss:$36 sps:$4 sm:$0xff]  }
  0x35   : > { %3120 = vmatpush3.bf16.msra.mxu1 %v3583_v32  ;;  %1705 = vmatprep.mubr.bf16.mxu0 %v3586_v35  ;;  %v3654_v32 = vld [vmem:[%s3897_s9 + $0x174] ss:$36 sps:$4 sm:$0xff]  }
  0x36   : > { %3121 = vmatprep.subr.bf16.mxu1 %v3584_v34  ;;  %1801 = vmatprep.mubr.bf16.mxu1 %v3588_v36  ;;  %v3656_v34 = vld [vmem:[%s3897_s9 + $0x288] ss:$36 sps:$4 sm:$0xff]   ;;  %v3698_v35 = vld [vmem:[%s4763_s1 + $0x190] sm:$0xff]  }
  0x37   : > { %3232 = vmatpush3.bf16.msra.mxu0 %v3609_v46  ;;  %v3657_v36 = vld [vmem:[%s3897_s9 + $0x170] ss:$36 sps:$4 sm:$0xff]   ;;  %v3673_v46 = vld [vmem:[%s3897_s9 + $0x200] ss:$36 sps:$4 sm:$0xff]  }
  0x38   : > { %3233 = vmatprep.subr.bf16.mxu0 %v3624_v55  ;;  %v3699_v55 = vld [vmem:[%s4763_s1 + $0x230] sm:$0xff]  }
  0x39   : > { %3122 = vmatpush3.bf16.msra.mxu1 %v3585_v37  ;;  %v3660_v37 = vld [vmem:[%s3897_s9 + $0x2d4] ss:$36 sps:$4 sm:$0xff]  }
  0x3a   : > { %3123 = vmatprep.subr.bf16.mxu1 %v3592_v40  ;;  %v3665_v40 = vld [vmem:[%s3897_s9 + $0x1b8] ss:$36 sps:$4 sm:$0xff]  }
  0x3b   : > { %3234 = vmatpush3.bf16.msra.mxu0 %v3625_v56  ;;  %v3714_v56 = vld [vmem:[%s4763_s1 + $0x228] sm:$0xff]  }
  0x3c   : > { %1706 = vmatmul.mubr.bf16.gmra.mxu0 %v3590_v38  ;;  %1802 = vmatmul.mubr.bf16.gmra.mxu1 %v3591_v39  ;;  %v3662_v38 = vld [vmem:[%s3897_s9 + $0x1bc] ss:$36 sps:$4 sm:$0xff]   ;;  %v3664_v39 = vld [vmem:[%s3897_s9 + $0x2d0] ss:$36 sps:$4 sm:$0xff]  }
  0x3d   : > { %3124 = vmatpush3.bf16.msra.mxu1 %v3594_v41  ;;  %1713 = vmatprep.mubr.bf16.mxu0 %v3598_v44  ;;  %v3712_v41 = vld [vmem:[%s4763_s1 + $0x1c8] sm:$0xff]  }
  0x3e   : > { %3125 = vmatprep.subr.bf16.mxu1 %v3596_v42  ;;  %1809 = vmatprep.mubr.bf16.mxu1 %v3600_v45  ;;  %v3713_v42 = vld [vmem:[%s4763_s1 + $0x188] sm:$0xff]   ;;  %v3672_v45 = vld [vmem:[%s3897_s9 + $0x318] ss:$36 sps:$4 sm:$0xff]  }
  0x3f   : > { %3235 = vmatprep.subr.bf16.mxu0 %v3634_v0  ;;  %v3670_v44 = vld [vmem:[%s3897_s9 + $0x204] ss:$36 sps:$4 sm:$0xff]  }
  0x40   : > { %3236 = vmatpush3.bf16.msra.mxu0 %v3635_v2  ;;  %v3696_v0 = vld [vmem:[%s3897_s9 + $0xa0] ss:$36 sps:$4 sm:$0xff]   ;;  %v3702_v2 = vld [vmem:[%s3897_s9 + $0xec] ss:$36 sps:$4 sm:$0xff]  }
  0x41   : > { %3126 = vmatpush3.bf16.msra.mxu1 %v3597_v47  ;;  %3237 = vmatprep.subr.bf16.mxu0 %v3648_v8  ;;  %v3727_v47 = vld [vmem:[%s4763_s1 + $0x1c0] sm:$0xff]   ;;  %v3708_v8 = vld [vmem:[%s3897_s9 + $0x134] ss:$36 sps:$4 sm:$0xff]  }
  0x42   : > { %3127 = vmatprep.subr.bf16.mxu1 %v3604_v48  ;;  %v3728_v48 = vld [vmem:[%s4763_s1 + $0x180] sm:$0xff]  }
  0x44   : > { %1714 = vmatmul.mubr.bf16.gmra.mxu0 %v3602_v49  ;;  %1810 = vmatmul.mubr.bf16.gmra.mxu1 %v3603_v50  ;;  %v3676_v49 = vld [vmem:[%s3897_s9 + $0x24c] ss:$36 sps:$4 sm:$0xff]   ;;  %v3680_v50 = vld [vmem:[%s3897_s9 + $0x14] ss:$36 sps:$4 sm:$0xff]  }
  0x45   : > { %3128 = vmatpush3.bf16.msra.mxu1 %v3605_v51  ;;  %1721 = vmatprep.mubr.bf16.mxu0 %v3610_v53  ;;  %v3678_v51 = vld [vmem:[%s3897_s9 + $0x10] ss:$36 sps:$4 sm:$0xff]  }
  0x46   : > { %3129 = vmatprep.subr.bf16.mxu1 %v3606_v52  ;;  %1850 = vmatprep.mubr.bf16.mxu1 %v3614_v54  ;;  %v3681_v52 = vld [vmem:[%s3897_s9 + $0x248] ss:$36 sps:$4 sm:$0xff]   ;;  %v3685_v53 = vld [vmem:[%s3897_s9 + $0x294] ss:$36 sps:$4 sm:$0xff]   ;;  %v3687_v54 = vld [vmem:[%s3897_s9 + $0x5c] ss:$36 sps:$4 sm:$0xff]  }
  0x47   : > { %3238 = vmatpush3.bf16.msra.mxu0 %v3650_v10  ;;  %v3710_v10 = vld [vmem:[%s3897_s9 + $0x368] ss:$36 sps:$4 sm:$0xff]  }
  0x48   : > { %3239 = vmatprep.subr.bf16.mxu0 %v3658_v15  ;;  %v3720_v15 = vld [vmem:[%s3897_s9 + $0x178] ss:$36 sps:$4 sm:$0xff]  }
  0x49   : > { %3130 = vmatpush3.bf16.msra.mxu1 %v3608_v57  ;;  %v3689_v57 = vld [vmem:[%s3897_s9 + $0x290] ss:$36 sps:$4 sm:$0xff]  }
  0x4a   : > { %3339 = vmatprep.subr.bf16.mxu1 %v3616_v60  ;;  %v3693_v60 = vld [vmem:[%s3897_s9 + $0xa4] ss:$36 sps:$4 sm:$0xff]  }
  0x4b   : > { %3240 = vmatpush3.bf16.msra.mxu0 %v3659_v16  ;;  %v3721_v16 = vld [vmem:[%s3897_s9 + $0x3fc] ss:$36 sps:$4 sm:$0xff]  }
  0x4c   : > { %1722 = vmatmul.mubr.bf16.gmra.mxu0 %v3615_v59  ;;  %1851 = vmatmul.mubr.bf16.vlgmr.msra.gmra.mxu1 %v3612_v58  ;;  %v3690_v58 = vld [vmem:[%s3897_s9 + $0x58] ss:$36 sps:$4 sm:$0xff]  }
  0x4d   : > { %3340 = vmatpush3.bf16.msra.mxu1 %v3617_v61  ;;  %1729 = vmatprep.mubr.bf16.mxu0 %v3618_v62  ;;  %v3691_v59 = vld [vmem:[%s3897_s9 + $0x2dc] ss:$36 sps:$4 sm:$0xff]  }
  0x4e   : > { %1858 = vmatprep.mubr.bf16.mxu1 %v3620_v63  ;;  %3341 = vmatprep.subr.bf16.mxu1 %v3632_v1  ;;  %v3729_v61 = vld [vmem:[%s4763_s1 + $0x220] sm:$0xff]   ;;  %v3695_v62 = vld [vmem:[%s3897_s9 + $0x2d8] ss:$36 sps:$4 sm:$0xff]  }
  0x4f   : > { %3241 = vmatprep.subr.bf16.mxu0 %v3674_v24  ;;  %v3742_v63 = vld [vmem:[%s4763_s1 + $0x218] sm:$0xff]   ;;  %v3700_v1 = vld [vmem:[%s3897_s9 + $0x324] ss:$36 sps:$4 sm:$0xff]  }
  0x50   : > { %3242 = vmatpush3.bf16.msra.mxu0 %v3675_v25  ;;  %v3736_v24 = vld [vmem:[%s3897_s9 + $0x254] ss:$36 sps:$4 sm:$0xff]   ;;  %v3740_v25 = vld [vmem:[%s3897_s9 + $0x1c] ss:$36 sps:$4 sm:$0xff]  }
  0x51   : > { %3342 = vmatpush3.bf16.msra.mxu1 %v3633_v3  ;;  %3475 = vmatprep.subr.bf16.mxu0 %v3684_v29  ;;  %v3755_v3 = vld [vmem:[%s4763_s1 + $0x210] sm:$0xff]  }
  0x52   : > { %3343 = vmatprep.subr.bf16.mxu1 %v3649_v9  ;;  %v3781_v9 = vld [vmem:[%s4763_s1 + $0x200] sm:$0xff]  }
  0x54   : > { %1730 = vmatmul.mubr.bf16.gmra.mxu0 %v3622_v4  ;;  %1859 = vmatmul.mubr.bf16.gmra.mxu1 %v3623_v5  ;;  %v3704_v4 = vld [vmem:[%s3897_s9 + $0x320] ss:$36 sps:$4 sm:$0xff]   ;;  %v3768_v5 = vld [vmem:[%s4763_s1 + $0x208] sm:$0xff]  }
  0x55   : > { %1737 = vmatprep.mubr.bf16.mxu0 %v3626_v6  ;;  %1866 = vmatprep.mubr.bf16.mxu1 %v3628_v7  ;;  %v3705_v6 = vld [vmem:[%s3897_s9 + $0xe8] ss:$36 sps:$4 sm:$0xff]  }
  0x56   : > { %3344 = vmatpush3.bf16.msra.mxu1 %v3651_v11  ;;  %v3706_v7 = vld [vmem:[%s3897_s9 + $0x36c] ss:$36 sps:$4 sm:$0xff]  }
  0x57   : > { %3345 = vmatprep.subr.bf16.mxu1 %v3666_v18  ;;  %v3711_v11 = vld [vmem:[%s3897_s9 + $0x130] ss:$36 sps:$4 sm:$0xff]   ;;  %v3725_v18 = vld [vmem:[%s3897_s9 + $0x3f8] ss:$36 sps:$4 sm:$0xff]  }
  0x5a   : > { %3346 = vmatpush3.bf16.msra.mxu1 %v3667_v19  ;;  %v3726_v19 = vld [vmem:[%s3897_s9 + $0x1c0] ss:$36 sps:$4 sm:$0xff]  }
  0x5b   : > { %3347 = vmatprep.subr.bf16.mxu1 %v3682_v26  ;;  %v3738_v26 = vld [vmem:[%s3897_s9 + $0x18] ss:$36 sps:$4 sm:$0xff]  }
  0x5c   : > { %1738 = vmatmul.mubr.bf16.gmra.mxu0 %v3630_v12  ;;  %1867 = vmatmul.mubr.bf16.gmra.mxu1 %v3631_v13  ;;  %v3715_v12 = vld [vmem:[%s3897_s9 + $0x3b4] ss:$36 sps:$4 sm:$0xff]   ;;  %v3717_v13 = vld [vmem:[%s3897_s9 + $0x17c] ss:$36 sps:$4 sm:$0xff]  }
  0x5d   : > { %1745 = vmatprep.mubr.bf16.mxu0 %v3636_v14  ;;  %1874 = vmatprep.mubr.bf16.mxu1 %v3638_v17  ;;  %v3719_v14 = vld [vmem:[%s3897_s9 + $0x3b0] ss:$36 sps:$4 sm:$0xff]   ;;  %v3723_v17 = vld [vmem:[%s3897_s9 + $0x1c4] ss:$36 sps:$4 sm:$0xff]  }
  0x5e   : > { %3348 = vmatpush3.bf16.msra.mxu1 %v3683_v28  ;;  %v3743_v28 = vld [vmem:[%s3897_s9 + $0x29c] ss:$36 sps:$4 sm:$0xff]  }
  0x5f   : > { %3349 = vmatprep.subr.bf16.mxu1 %v3697_v33  ;;  %v3751_v33 = vld [vmem:[%s3897_s9 + $0xac] ss:$36 sps:$4 sm:$0xff]  }
  0x62   : > { %3350 = vmatpush3.bf16.msra.mxu1 %v3698_v35  ;;  %v3754_v35 = vld [vmem:[%s3897_s9 + $0xa8] ss:$36 sps:$4 sm:$0xff]  }
  0x63   : > { %3351 = vmatprep.subr.bf16.mxu1 %v3712_v41  ;;  %v3764_v41 = vld [vmem:[%s3897_s9 + $0x13c] ss:$36 sps:$4 sm:$0xff]  }
  0x64   : > { %1746 = vmatmul.mubr.bf16.gmra.mxu0 %v3640_v20  ;;  %1875 = vmatmul.mubr.bf16.gmra.mxu1 %v3641_v21  ;;  %v3730_v20 = vld [vmem:[%s3897_s9 + $0x444] ss:$36 sps:$4 sm:$0xff]   ;;  %v3732_v21 = vld [vmem:[%s3897_s9 + $0x20c] ss:$36 sps:$4 sm:$0xff]  }
  0x65   : > { %1753 = vmatprep.mubr.bf16.mxu0 %v3642_v22  ;;  %1882 = vmatprep.mubr.bf16.mxu1 %v3644_v23  ;;  %v3734_v22 = vld [vmem:[%s3897_s9 + $0x440] ss:$36 sps:$4 sm:$0xff]   ;;  %v3735_v23 = vld [vmem:[%s3897_s9 + $0x208] ss:$36 sps:$4 sm:$0xff]  }
  0x66   : > { %3352 = vmatpush3.bf16.msra.mxu1 %v3713_v42  ;;  %v3766_v42 = vld [vmem:[%s3897_s9 + $0x370] ss:$36 sps:$4 sm:$0xff]  }
  0x67   : > { %3353 = vmatprep.subr.bf16.mxu1 %v3727_v47 }
  0x6a   : > { %3354 = vmatpush3.bf16.msra.mxu1 %v3728_v48 }
  0x6c   : > { %1754 = vmatmul.mubr.bf16.gmra.mxu0 %v3646_v27  ;;  %1883 = vmatmul.mubr.bf16.gmra.mxu1 %v3647_v30  ;;  %v3741_v27 = vld [vmem:[%s3897_s9 + $0x250] ss:$36 sps:$4 sm:$0xff]   ;;  %v3747_v30 = vld [vmem:[%s3897_s9 + $0x298] ss:$36 sps:$4 sm:$0xff]  }
  0x6d   : > { %1761 = vmatprep.mubr.bf16.mxu0 %v3652_v31  ;;  %1890 = vmatprep.mubr.bf16.mxu1 %v3654_v32  ;;  %v3748_v31 = vld [vmem:[%s3897_s9 + $0x60] ss:$36 sps:$4 sm:$0xff]  }
  0x6e   : > { %v3749_v32 = vld [vmem:[%s3897_s9 + $0x2e4] ss:$36 sps:$4 sm:$0xff]  }
  0x74   : > { %1762 = vmatmul.mubr.bf16.gmra.mxu0 %v3656_v34  ;;  %1891 = vmatmul.mubr.bf16.gmra.mxu1 %v3657_v36  ;;  %v3753_v34 = vld [vmem:[%s3897_s9 + $0x2e0] ss:$36 sps:$4 sm:$0xff]   ;;  %v3756_v36 = vld [vmem:[%s3897_s9 + $0x32c] ss:$36 sps:$4 sm:$0xff]  }
  0x75   : > { %1769 = vmatprep.mubr.bf16.mxu0 %v3660_v37  ;;  %1898 = vmatprep.mubr.bf16.mxu1 %v3662_v38  ;;  %v3758_v37 = vld [vmem:[%s3897_s9 + $0xf4] ss:$36 sps:$4 sm:$0xff]   ;;  %v3760_v38 = vld [vmem:[%s3897_s9 + $0x328] ss:$36 sps:$4 sm:$0xff]  }
  0x7c   : > { %1770 = vmatmul.mubr.bf16.gmra.mxu0 %v3664_v39  ;;  %1899 = vmatmul.mubr.bf16.gmra.mxu1 %v3665_v40  ;;  %v3761_v39 = vld [vmem:[%s3897_s9 + $0xf0] ss:$36 sps:$4 sm:$0xff]  }
  0x7d   : > { %1777 = vmatprep.mubr.bf16.mxu0 %v3668_v43  ;;  %1906 = vmatprep.mubr.bf16.mxu1 %v3670_v44  ;;  %v3762_v40 = vld [vmem:[%s3897_s9 + $0x374] ss:$36 sps:$4 sm:$0xff]   ;;  %v3769_v44 = vld [vmem:[%s3897_s9 + $0x3bc] ss:$36 sps:$4 sm:$0xff]  }
  0x7e   : > { %v3767_v43 = vld [vmem:[%s3897_s9 + $0x138] ss:$36 sps:$4 sm:$0xff]  }
  0x84   : > { %1778 = vmatmul.mubr.bf16.gmra.mxu0 %v3672_v45  ;;  %1907 = vmatmul.mubr.bf16.gmra.mxu1 %v3673_v46  ;;  %v3771_v45 = vld [vmem:[%s3897_s9 + $0x184] ss:$36 sps:$4 sm:$0xff]  }
  0x85   : > { %1914 = vmatprep.mubr.bf16.mxu1 %v3676_v49  ;;  %2011 = vmatprep.mubr.bf16.mxu0 %v3680_v50 }
  0x8c   : > { %1915 = vmatmul.mubr.bf16.gmra.mxu1 %v3681_v52  ;;  %2012 = vmatmul.mubr.bf16.vlgmr.msra.gmra.mxu0 %v3678_v51 }
  0x8d   : > { %3476 = vmatpush3.bf16.msra.mxu0 %v3684_v29  ;;  %1922 = vmatprep.mubr.bf16.mxu1 %v3685_v53  ;;  %v3745_v29 = vld [vmem:[%s3897_s9 + $0x64] ss:$36 sps:$4 sm:$0xff]  }
  0x8e   : > { %2019 = vmatprep.mubr.bf16.mxu0 %v3687_v54  ;;  %3477 = vmatprep.subr.bf16.mxu0 %v3699_v55  ;;  %v3773_v54 = vld [vmem:[%s3897_s9 + $0x3b8] ss:$36 sps:$4 sm:$0xff]  }
  0x91   : > { %3478 = vmatpush3.bf16.msra.mxu0 %v3699_v55  ;;  %v3774_v55 = vld [vmem:[%s3897_s9 + $0x180] ss:$36 sps:$4 sm:$0xff]  }
  0x92   : > { %3479 = vmatprep.subr.bf16.mxu0 %v3714_v56 }
  0x94   : > { %1923 = vmatmul.mubr.bf16.gmra.mxu1 %v3689_v57  ;;  %2020 = vmatmul.mubr.bf16.gmra.mxu0 %v3690_v58  ;;  %v3777_v57 = vld [vmem:[%s3897_s9 + $0x1cc] ss:$36 sps:$4 sm:$0xff]  }
  0x95   : > { %1930 = vmatprep.mubr.bf16.mxu1 %v3691_v59  ;;  %2027 = vmatprep.mubr.bf16.mxu0 %v3693_v60 }
  0x96   : > { %3480 = vmatpush3.bf16.msra.mxu0 %v3714_v56  ;;  %v3775_v56 = vld [vmem:[%s3897_s9 + $0x404] ss:$36 sps:$4 sm:$0xff]  }
  0x97   : > { %3481 = vmatprep.subr.bf16.mxu0 %v3729_v61 }
  0x9a   : > { %3482 = vmatpush3.bf16.msra.mxu0 %v3729_v61 }
  0x9b   : > { %3483 = vmatprep.subr.bf16.mxu0 %v3742_v63 }
  0x9c   : > { %1931 = vmatmul.mubr.bf16.gmra.mxu1 %v3695_v62  ;;  %2028 = vmatmul.mubr.bf16.gmra.mxu0 %v3696_v0 }
  0x9d   : > { %1938 = vmatprep.mubr.bf16.mxu1 %v3700_v1  ;;  %2035 = vmatprep.mubr.bf16.mxu0 %v3702_v2 }
  0x9e   : > { %3484 = vmatpush3.bf16.msra.mxu0 %v3742_v63 }
  0x9f   : > { %3485 = vmatprep.subr.bf16.mxu0 %v3755_v3 }
  0xa2   : > { %3486 = vmatpush3.bf16.msra.mxu0 %v3755_v3 }
  0xa3   : > { %3487 = vmatprep.subr.bf16.mxu0 %v3768_v5 }
  0xa4   : > { %1939 = vmatmul.mubr.bf16.gmra.mxu1 %v3704_v4  ;;  %2036 = vmatmul.mubr.bf16.gmra.mxu0 %v3705_v6  ;;  %v3779_v6 = vld [vmem:[%s3897_s9 + $0x400] ss:$36 sps:$4 sm:$0xff]  }
  0xa5   : > { %1946 = vmatprep.mubr.bf16.mxu1 %v3706_v7  ;;  %2043 = vmatprep.mubr.bf16.mxu0 %v3708_v8  ;;  %v3780_v7 = vld [vmem:[%s3897_s9 + $0x1c8] ss:$36 sps:$4 sm:$0xff]  }
  0xa6   : > { %3488 = vmatpush3.bf16.msra.mxu0 %v3768_v5  ;;  %v3782_v8 = vld [vmem:[%s3897_s9 + $0x44c] ss:$36 sps:$4 sm:$0xff]  }
  0xa7   : > { %3489 = vmatprep.subr.bf16.mxu0 %v3781_v9 }
  0xaa   : > { %3490 = vmatpush3.bf16.msra.mxu0 %v3781_v9  ;;  %v3784_v9 = vld [vmem:[%s3897_s9 + $0x214] ss:$36 sps:$4 sm:$0xff]  }
  0xac   : > { %1947 = vmatmul.mubr.bf16.gmra.mxu1 %v3710_v10  ;;  %2044 = vmatmul.mubr.bf16.gmra.mxu0 %v3711_v11 }
  0xad   : > { %1954 = vmatprep.mubr.bf16.mxu1 %v3715_v12  ;;  %2051 = vmatprep.mubr.bf16.mxu0 %v3717_v13 }
  0xb4   : > { %1955 = vmatmul.mubr.bf16.gmra.mxu1 %v3719_v14  ;;  %2052 = vmatmul.mubr.bf16.gmra.mxu0 %v3720_v15 }
  0xb5   : > { %1962 = vmatprep.mubr.bf16.mxu1 %v3721_v16  ;;  %2059 = vmatprep.mubr.bf16.mxu0 %v3723_v17 }
  0xbc   : > { %1963 = vmatmul.mubr.bf16.gmra.mxu1 %v3725_v18  ;;  %2060 = vmatmul.mubr.bf16.gmra.mxu0 %v3726_v19 }
  0xbd   : > { %1970 = vmatprep.mubr.bf16.mxu1 %v3730_v20  ;;  %2067 = vmatprep.mubr.bf16.mxu0 %v3732_v21 }
  0xc4   : > { %1971 = vmatmul.mubr.bf16.gmra.mxu1 %v3734_v22  ;;  %2068 = vmatmul.mubr.bf16.gmra.mxu0 %v3735_v23  ;;  %v3786_v22 = vld [vmem:[%s3897_s9 + $0x448] ss:$36 sps:$4 sm:$0xff]   ;;  %v3787_v23 = vld [vmem:[%s3897_s9 + $0x210] ss:$36 sps:$4 sm:$0xff]  }
  0xc5   : > { %2075 = vmatprep.mubr.bf16.mxu0 %v3736_v24  ;;  %2172 = vmatprep.mubr.bf16.mxu1 %v3740_v25  ;;  %v3790_v24 = vld [vmem:[%s3897_s9 + $0x25c] ss:$36 sps:$4 sm:$0xff]  }
  0xc6   : > { %v3791_v25 = vld [vmem:[%s3897_s9 + $0x20] ss:$36 sps:$4 sm:$0xff]  }
  0xcc   : > { %2076 = vmatmul.mubr.bf16.gmra.mxu0 %v3741_v27  ;;  %2173 = vmatmul.mubr.bf16.vlgmr.msra.gmra.mxu1 %v3738_v26 }
  0xcd   : > { %2083 = vmatprep.mubr.bf16.mxu0 %v3743_v28  ;;  %2180 = vmatprep.mubr.bf16.mxu1 %v3745_v29 }
  0xd4   : > { %2084 = vmatmul.mubr.bf16.gmra.mxu0 %v3747_v30  ;;  %2181 = vmatmul.mubr.bf16.gmra.mxu1 %v3748_v31 }
  0xd5   : > { %2091 = vmatprep.mubr.bf16.mxu0 %v3749_v32  ;;  %2188 = vmatprep.mubr.bf16.mxu1 %v3751_v33 }
  0xdc   : > { %2092 = vmatmul.mubr.bf16.gmra.mxu0 %v3753_v34  ;;  %2189 = vmatmul.mubr.bf16.gmra.mxu1 %v3754_v35 }
  0xdd   : > { %2099 = vmatprep.mubr.bf16.mxu0 %v3756_v36  ;;  %2196 = vmatprep.mubr.bf16.mxu1 %v3758_v37 }
  0xe4   : > { %2100 = vmatmul.mubr.bf16.gmra.mxu0 %v3760_v38  ;;  %2197 = vmatmul.mubr.bf16.gmra.mxu1 %v3761_v39  ;;  %v3788_v38 = vld [vmem:[%s3897_s9 + $0x258] ss:$36 sps:$4 sm:$0xff]   ;;  %v3792_v39 = vld [vmem:[%s3897_s9 + $0x68] ss:$36 sps:$4 sm:$0xff]  }
  0xe5   : > { %2107 = vmatprep.mubr.bf16.mxu0 %v3762_v40  ;;  %2204 = vmatprep.mubr.bf16.mxu1 %v3764_v41  ;;  %v3795_v40 = vld [vmem:[%s3897_s9 + $0x2a4] ss:$36 sps:$4 sm:$0xff]   ;;  %v3796_v41 = vld [vmem:[%s3897_s9 + $0xb0] ss:$36 sps:$4 sm:$0xff]  }
  0xec   : > { %v3019_v46 = vpop.f32.mrf.mxu0  ;;  %v3091_v47 = vpop.f32.mrf.mxu1  ;;  %2108 = vmatmul.mubr.bf16.gmra.mxu0 %v3766_v42  ;;  %2205 = vmatmul.mubr.bf16.gmra.mxu1 %v3767_v43 }
  0xed   : > { %2115 = vmatprep.mubr.bf16.mxu0 %v3769_v44  ;;  %2212 = vmatprep.mubr.bf16.mxu1 %v3771_v45 }
  0xee   : > { %v3020_v48 = vpop.f32.mrf.mxu0  ;;  %v3092_v49 = vpop.f32.mrf.mxu1 }
  0xef   : > { %v4190_v50 = vadd.f32 %v3020_v48, %v3019_v46  ;;  %v4192_v51 = vadd.f32 %v3092_v49, %v3091_v47  ;;  %v4241_v48 = vld [vmem:[%s4764_s2] ss:$0 sm:$0xff] }
  0xf0   : > { %v3022_v52 = vpop.f32.mrf.mxu0  ;;  %v3094_v53 = vpop.f32.mrf.mxu1 }
  0xf2   : > { %v3023_v58 = vpop.f32.mrf.mxu0  ;;  %v3095_v59 = vpop.f32.mrf.mxu1 }
  0xf3   : > { %v4198_v60 = vadd.f32 %v3023_v58, %v3022_v52  ;;  %v4200_v61 = vadd.f32 %v3095_v59, %v3094_v53  ;;  %v1692_v53 = vadd.f32 %v4190_v50, %v4241_v48  ;;  %v3793_v58 = vld [vmem:[%s3897_s9 + $0x2a0] ss:$36 sps:$4 sm:$0xff]   ;;  %v3797_v59 = vld [vmem:[%s3897_s9 + $0xf8] ss:$36 sps:$4 sm:$0xff]  }
  0xf4   : > { %v3025_v62 = vpop.f32.mrf.mxu0  ;;  %v3097_v63 = vpop.f32.mrf.mxu1  ;;  %2116 = vmatmul.mubr.bf16.gmra.mxu0 %v3773_v54  ;;  %2213 = vmatmul.mubr.bf16.gmra.mxu1 %v3774_v55 }
  0xf5   : > { %2123 = vmatprep.mubr.bf16.mxu0 %v3775_v56  ;;  %2220 = vmatprep.mubr.bf16.mxu1 %v3777_v57 }
  0xf6   : > { %v3026_v0 = vpop.f32.mrf.mxu0  ;;  %v3098_v1 = vpop.f32.mrf.mxu1 }
  0xf7   : > { %v4202_v2 = vadd.f32 %v3026_v0, %v3025_v62  ;;  %v4204_v3 = vadd.f32 %v3098_v1, %v3097_v63  ;;  %v3800_v63 = vld [vmem:[%s3897_s9 + $0x2ec] ss:$36 sps:$4 sm:$0xff]   ;;  %v3801_v0 = vld [vmem:[%s3897_s9 + $0x140] ss:$36 sps:$4 sm:$0xff]  }
  0xf8   : > { %v3028_v4 = vpop.f32.mrf.mxu0  ;;  %v3100_v5 = vpop.f32.mrf.mxu1 }
  0xfa   : > { %v3029_v10 = vpop.f32.mrf.mxu0  ;;  %v3101_v11 = vpop.f32.mrf.mxu1 }
  0xfb   : > { %v4210_v12 = vadd.f32 %v3029_v10, %v3028_v4  ;;  %v4212_v13 = vadd.f32 %v3101_v11, %v3100_v5  ;;  %v1695_v5 = vadd.f32 %v4198_v60, %v4241_v48  ;;  %v1700_v60 = vadd.f32 %v4202_v2, %v4241_v48 }
  0xfc   : > { %v3031_v14 = vpop.f32.mrf.mxu0  ;;  %v3103_v15 = vpop.f32.mrf.mxu1  ;;  %2124 = vmatmul.mubr.bf16.gmra.mxu0 %v3779_v6  ;;  %2221 = vmatmul.mubr.bf16.gmra.mxu1 %v3780_v7 }
  0xfd   : > { %2131 = vmatprep.mubr.bf16.mxu0 %v3782_v8  ;;  %2228 = vmatprep.mubr.bf16.mxu1 %v3784_v9 }
  0xfe   : > { %v3032_v16 = vpop.f32.mrf.mxu0  ;;  %v3104_v17 = vpop.f32.mrf.mxu1 }
  0xff   : > { %v4214_v18 = vadd.f32 %v3032_v16, %v3031_v14  ;;  %v4216_v19 = vadd.f32 %v3104_v17, %v3103_v15 }
 0x100   : > { %v3034_v20 = vpop.f32.mrf.mxu0  ;;  %v3106_v21 = vpop.f32.mrf.mxu1 }
 0x102   : > { %v3035_v26 = vpop.f32.mrf.mxu0  ;;  %v3107_v27 = vpop.f32.mrf.mxu1 }
 0x103   : > { %v4222_v28 = vadd.f32 %v3035_v26, %v3034_v20  ;;  %v4224_v29 = vadd.f32 %v3107_v27, %v3106_v21  ;;  %v3798_v20 = vld [vmem:[%s3897_s9 + $0x2e8] ss:$36 sps:$4 sm:$0xff]   ;;  %v1703_v27 = vadd.f32 %v4210_v12, %v4241_v48  ;;  %v1708_v12 = vadd.f32 %v4214_v18, %v4241_v48 }
 0x104   : > { %v3037_v30 = vpop.f32.mrf.mxu0  ;;  %v3109_v31 = vpop.f32.mrf.mxu1  ;;  %2132 = vmatmul.mubr.bf16.gmra.mxu0 %v3786_v22  ;;  %2229 = vmatmul.mubr.bf16.gmra.mxu1 %v3787_v23  ;;  %v3802_v21 = vld [vmem:[%s3897_s9 + $0x188] ss:$36 sps:$4 sm:$0xff]   ;;  %v3805_v23 = vld [vmem:[%s3897_s9 + $0x334] ss:$36 sps:$4 sm:$0xff]  }
 0x105   : > { %2236 = vmatprep.mubr.bf16.mxu1 %v3790_v24  ;;  %3491 = vmatprep.mubr.bf16.mxu0 %v3791_v25  ;;  %v3806_v24 = vld [vmem:[%s3897_s9 + $0x1d0] ss:$36 sps:$4 sm:$0xff]  }
 0x106   : > { %v3038_v32 = vpop.f32.mrf.mxu0  ;;  %v3110_v33 = vpop.f32.mrf.mxu1 }
 0x107   : > { %v4226_v34 = vadd.f32 %v3038_v32, %v3037_v30  ;;  %v4228_v35 = vadd.f32 %v3110_v33, %v3109_v31 }
 0x108   : > { %v3040_v36 = vpop.f32.mrf.mxu0  ;;  %v3112_v37 = vpop.f32.mrf.mxu1 }
 0x10a   : > { %v3041_v42 = vpop.f32.mrf.mxu0  ;;  %v3113_v43 = vpop.f32.mrf.mxu1 }
 0x10b   : > { %v4234_v44 = vadd.f32 %v3041_v42, %v3040_v36  ;;  %v4236_v45 = vadd.f32 %v3113_v43, %v3112_v37  ;;  %v3803_v42 = vld [vmem:[%s3897_s9 + $0x330] ss:$36 sps:$4 sm:$0xff]   ;;  %v3807_v43 = vld [vmem:[%s3897_s9 + $0x218] ss:$36 sps:$4 sm:$0xff]  }
 0x10c   : > { %v3043_v46 = vpop.f32.mrf.mxu0  ;;  %v3131_v47 = vpop.f32.mrf.mxu1  ;;  %2237 = vmatmul.mubr.bf16.gmra.mxu1 %v3788_v38  ;;  %3492 = vmatmul.mubr.bf16.vlgmr.msra.gmra.mxu0 %v3792_v39 }
 0x10d   : > { %2244 = vmatprep.mubr.bf16.mxu1 %v3795_v40  ;;  %3495 = vmatprep.mubr.bf16.mxu0 %v3796_v41 }
 0x10e   : > { %v3044_v49 = vpop.f32.mrf.mxu0  ;;  %v3132_v52 = vpop.f32.mrf.mxu1 }
 0x10f   : > { %v4245_v54 = vadd.f32 %v3044_v49, %v3043_v46  ;;  %v3133_v55 = vadd.f32 %v3132_v52, %v3131_v47  ;;  %v3810_v47 = vld [vmem:[%s3897_s9 + $0x37c] ss:$36 sps:$4 sm:$0xff]  }
 0x110   : > { %v3046_v56 = vpop.f32.mrf.mxu0  ;;  %v3134_v57 = vpop.f32.mrf.mxu1  ;;  %v3811_v49 = vld [vmem:[%s3897_s9 + $0x260] ss:$36 sps:$4 sm:$0xff]  }
 0x111   : > { %v4249_v62 = vadd.f32 %v3133_v55, %v1692_v53  ;;  %v1711_v55 = vadd.f32 %v4222_v28, %v4241_v48  ;;  %v1716_v28 = vadd.f32 %v4226_v34, %v4241_v48 }
 0x112   : > { %v3047_v1 = vpop.f32.mrf.mxu0  ;;  %v3135_v4 = vpop.f32.mrf.mxu1 }
 0x113   : > { %v4255_v6 = vadd.f32 %v3047_v1, %v3046_v56  ;;  %v3136_v50 = vadd.f32 %v3135_v4, %v3134_v57 }
 0x114   : > { %v3049_v7 = vpop.f32.mrf.mxu0  ;;  %v3137_v8 = vpop.f32.mrf.mxu1  ;;  %2245 = vmatmul.mubr.bf16.gmra.mxu1 %v3793_v58  ;;  %3496 = vmatmul.mubr.bf16.gmra.mxu0 %v3797_v59 }
 0x115   : > { %v4257_v9 = vadd.f32 %v3136_v50, %v1695_v5  ;;  %2252 = vmatprep.mubr.bf16.mxu1 %v3800_v63  ;;  %3499 = vmatprep.mubr.bf16.mxu0 %v3801_v0 }
 0x116   : > { %v3050_v10 = vpop.f32.mrf.mxu0  ;;  %v3138_v11 = vpop.f32.mrf.mxu1 }
 0x117   : > { %v4261_v14 = vadd.f32 %v3050_v10, %v3049_v7  ;;  %v3139_v15 = vadd.f32 %v3138_v11, %v3137_v8  ;;  %v3808_v7 = vld [vmem:[%s3897_s9 + $0x378] ss:$36 sps:$4 sm:$0xff]   ;;  %v3812_v8 = vld [vmem:[%s3897_s9 + $0x2a8] ss:$36 sps:$4 sm:$0xff]  }
 0x118   : > { %v3052_v16 = vpop.f32.mrf.mxu0  ;;  %v3140_v17 = vpop.f32.mrf.mxu1  ;;  %v3815_v11 = vld [vmem:[%s3897_s9 + $0x3c4] ss:$36 sps:$4 sm:$0xff]  }
 0x119   : > { %v4265_v22 = vadd.f32 %v3139_v15, %v1700_v60  ;;  %v3816_v60 = vld [vmem:[%s3897_s9 + $0x2f0] ss:$36 sps:$4 sm:$0xff]  }
 0x11a   : > { %v3053_v25 = vpop.f32.mrf.mxu0  ;;  %v3141_v26 = vpop.f32.mrf.mxu1 }
 0x11b   : > { %v4271_v30 = vadd.f32 %v3053_v25, %v3052_v16  ;;  %v3142_v2 = vadd.f32 %v3141_v26, %v3140_v17  ;;  %v1719_v17 = vadd.f32 %v4234_v44, %v4241_v48  ;;  %v1724_v44 = vadd.f32 %v4245_v54, %v4241_v48 }
 0x11c   : > { %v3055_v31 = vpop.f32.mrf.mxu0  ;;  %v3143_v32 = vpop.f32.mrf.mxu1  ;;  %2253 = vmatmul.mubr.bf16.gmra.mxu1 %v3798_v20  ;;  %3500 = vmatmul.mubr.bf16.gmra.mxu0 %v3802_v21 }
 0x11d   : > { %v4273_v33 = vadd.f32 %v3142_v2, %v1703_v27  ;;  %2260 = vmatprep.mubr.bf16.mxu1 %v3805_v23  ;;  %3503 = vmatprep.mubr.bf16.mxu0 %v3806_v24 }
 0x11e   : > { %v3056_v36 = vpop.f32.mrf.mxu0  ;;  %v3144_v37 = vpop.f32.mrf.mxu1 }
 0x11f   : > { %v4277_v38 = vadd.f32 %v3056_v36, %v3055_v31  ;;  %v3145_v39 = vadd.f32 %v3144_v37, %v3143_v32  ;;  %v3813_v36 = vld [vmem:[%s3897_s9 + $0x3c0] ss:$36 sps:$4 sm:$0xff]   ;;  %v3817_v37 = vld [vmem:[%s3897_s9 + $0x338] ss:$36 sps:$4 sm:$0xff]  }
 0x120   : > { %v3058_v40 = vpop.f32.mrf.mxu0  ;;  %v3146_v41 = vpop.f32.mrf.mxu1 }
 0x121   : > { %v4281_v46 = vadd.f32 %v3145_v39, %v1708_v12  ;;  %v3820_v39 = vld [vmem:[%s3897_s9 + $0x40c] ss:$36 sps:$4 sm:$0xff]  }
 0x122   : > { %v3059_v52 = vpop.f32.mrf.mxu0  ;;  %v3147_v53 = vpop.f32.mrf.mxu1 }
 0x123   : > { %v4287_v56 = vadd.f32 %v3059_v52, %v3058_v40  ;;  %v3148_v18 = vadd.f32 %v3147_v53, %v3146_v41  ;;  %v3821_v40 = vld [vmem:[%s3897_s9 + $0x380] ss:$36 sps:$4 sm:$0xff]  }
 0x124   : > { %v3061_v57 = vpop.f32.mrf.mxu0  ;;  %v3149_v58 = vpop.f32.mrf.mxu1  ;;  %2261 = vmatmul.mubr.bf16.gmra.mxu1 %v3803_v42  ;;  %3504 = vmatmul.mubr.bf16.gmra.mxu0 %v3807_v43  ;;  %v1727_v43 = vadd.f32 %v4255_v6, %v4241_v48  ;;  %v1732_v6 = vadd.f32 %v4261_v14, %v4241_v48 }
 0x125   : > { %v4289_v59 = vadd.f32 %v3148_v18, %v1711_v55  ;;  %2268 = vmatprep.mubr.bf16.mxu1 %v3810_v47  ;;  %3507 = vmatprep.mubr.bf16.mxu0 %v3811_v49 }
 0x126   : > { %v3062_v63 = vpop.f32.mrf.mxu0  ;;  %v3150_v0 = vpop.f32.mrf.mxu1 }
 0x127   : > { %v4293_v1 = vadd.f32 %v3062_v63, %v3061_v57  ;;  %v3151_v4 = vadd.f32 %v3150_v0, %v3149_v58 }
 0x128   : > { %v3064_v5 = vpop.f32.mrf.mxu0  ;;  %v3152_v50 = vpop.f32.mrf.mxu1 }
 0x129   : > { %v4297_v10 = vadd.f32 %v3151_v4, %v1716_v28  ;;  %v3818_v28 = vld [vmem:[%s3897_s9 + $0x408] ss:$36 sps:$4 sm:$0xff]  }
 0x12a   : > { %v3065_v15 = vpop.f32.mrf.mxu0  ;;  %v3153_v16 = vpop.f32.mrf.mxu1  ;;  %v3822_v4 = vld [vmem:[%s3897_s9 + $0x3c8] ss:$36 sps:$4 sm:$0xff]  }
 0x12b   : > { %v4303_v20 = vadd.f32 %v3065_v15, %v3064_v5  ;;  %v3154_v34 = vadd.f32 %v3153_v16, %v3152_v50  ;;  %v3825_v50 = vld [vmem:[%s3897_s9 + $0x454] ss:$36 sps:$4 sm:$0xff]  }
 0x12c   : > { %v3067_v21 = vpop.f32.mrf.mxu0  ;;  %v3155_v23 = vpop.f32.mrf.mxu1  ;;  %2269 = vmatmul.mubr.bf16.gmra.mxu1 %v3808_v7  ;;  %3508 = vmatmul.mubr.bf16.gmra.mxu0 %v3812_v8  ;;  %v3826_v7 = vld [vmem:[%s3897_s9 + $0x410] ss:$36 sps:$4 sm:$0xff]  }
 0x12d   : > { %v4305_v24 = vadd.f32 %v3154_v34, %v1719_v17  ;;  %2276 = vmatprep.mubr.bf16.mxu1 %v3815_v11  ;;  %3511 = vmatprep.mubr.bf16.mxu0 %v3816_v60  ;;  %v1735_v60 = vadd.f32 %v4271_v30, %v4241_v48 }
 0x12e   : > { %v3068_v25 = vpop.f32.mrf.mxu0  ;;  %v3156_v26 = vpop.f32.mrf.mxu1 }
 0x12f   : > { %v4309_v27 = vadd.f32 %v3068_v25, %v3067_v21  ;;  %v3157_v2 = vadd.f32 %v3156_v26, %v3155_v23  ;;  %v1740_v25 = vadd.f32 %v4277_v38, %v4241_v48 }
 0x130   : > { %v3070_v31 = vpop.f32.mrf.mxu0  ;;  %v3158_v32 = vpop.f32.mrf.mxu1 }
 0x131   : > { %v4313_v12 = vadd.f32 %v3157_v2, %v1724_v44 }
 0x132   : > { %v3071_v41 = vpop.f32.mrf.mxu0  ;;  %v3159_v42 = vpop.f32.mrf.mxu1 }
 0x133   : > { %v4319_v47 = vadd.f32 %v3071_v41, %v3070_v31  ;;  %v3160_v54 = vadd.f32 %v3159_v42, %v3158_v32  ;;  %v3823_v31 = vld [vmem:[%s3897_s9 + $0x450] ss:$36 sps:$4 sm:$0xff]   ;;  %v3827_v32 = vld [vmem:[%s3897_s9 + $0x458] ss:$36 sps:$4 sm:$0xff]   ;;  %s2719_s9 = sshll.u32 %s4789_s16, 2 }
 0x134   : > { %v3073_v49 = vpop.f32.mrf.mxu0  ;;  %v3161_v52 = vpop.f32.mrf.mxu1  ;;  %2277 = vmatmul.mubr.bf16.gmra.mxu1 %v3813_v36  ;;  %3512 = vmatmul.mubr.bf16.gmra.mxu0 %v3817_v37  ;;  %s4610_s22 = scalar_lea.vmem %s4765_s3, %s2719_s9 }
 0x135   : > { %v4321_v53 = vadd.f32 %v3160_v54, %v1727_v43  ;;  %2284 = vmatprep.mubr.bf16.mxu1 %v3820_v39  ;;  %3515 = vmatprep.mubr.bf16.mxu0 %v3821_v40  ;;  %v1743_v40 = vadd.f32 %v4287_v56, %v4241_v48 }
 0x136   : > { %v3074_v55 = vpop.f32.mrf.mxu0  ;;  %v3162_v18 = vpop.f32.mrf.mxu1 }
 0x137   : > { %v4325_v57 = vadd.f32 %v3074_v55, %v3073_v49  ;;  %v3163_v58 = vadd.f32 %v3162_v18, %v3161_v52  ;;  %v1748_v55 = vadd.f32 %v4293_v1, %v4241_v48 }
 0x138   : > { %v3076_v63 = vpop.f32.mrf.mxu0  ;;  %v3164_v0 = vpop.f32.mrf.mxu1 }
 0x139   : > { %v4329_v5 = vadd.f32 %v3163_v58, %v1732_v6 }
 0x13a   : > { %v3077_v8 = vpop.f32.mrf.mxu0  ;;  %v3165_v11 = vpop.f32.mrf.mxu1 }
 0x13b   : > { %v4335_v15 = vadd.f32 %v3077_v8, %v3076_v63  ;;  %v3166_v14 = vadd.f32 %v3165_v11, %v3164_v0 }
 0x13c   : > { %v3079_v16 = vpop.f32.mrf.mxu0  ;;  %v3167_v17 = vpop.f32.mrf.mxu1  ;;  %2285 = vmatmul.mubr.bf16.gmra.mxu1 %v3818_v28  ;;  %3516 = vmatmul.mubr.bf16.gmra.mxu0 %v3822_v4  ;;  %v1751_v4 = vadd.f32 %v4303_v20, %v4241_v48 }
 0x13d   : > { %v4337_v34 = vadd.f32 %v3166_v14, %v1735_v60  ;;  %2292 = vmatprep.mubr.bf16.mxu1 %v3825_v50  ;;  %3519 = vmatprep.mubr.bf16.mxu0 %v3826_v7 }
 0x13e   : > { %v3080_v21 = vpop.f32.mrf.mxu0  ;;  %v3168_v23 = vpop.f32.mrf.mxu1 }
 0x13f   : > { %v4341_v26 = vadd.f32 %v3080_v21, %v3079_v16  ;;  %v3169_v30 = vadd.f32 %v3168_v23, %v3167_v17  ;;  %v1756_v16 = vadd.f32 %v4309_v27, %v4241_v48 }
 0x140   : > { %v3082_v44 = vpop.f32.mrf.mxu0  ;;  %v3170_v2 = vpop.f32.mrf.mxu1 }
 0x141   : > { %v4345_v36 = vadd.f32 %v3169_v30, %v1740_v25 }
 0x142   : > { %v3083_v37 = vpop.f32.mrf.mxu0  ;;  %v3171_v39 = vpop.f32.mrf.mxu1 }
 0x143   : > { %v4349_v41 = vadd.f32 %v3083_v37, %v3082_v44  ;;  %v3172_v42 = vadd.f32 %v3171_v39, %v3170_v2 }
 0x144   : > { %v3085_v43 = vpop.f32.mrf.mxu0  ;;  %v3173_v54 = vpop.f32.mrf.mxu1  ;;  %2293 = vmatmul.mubr.bf16.gmra.mxu1 %v3823_v31  ;;  %3520 = vmatmul.mubr.bf16.gmra.mxu0 %v3827_v32  ;;  %v1759_v31 = vadd.f32 %v4319_v47, %v4241_v48 }
 0x145   : > { %v4351_v38 = vadd.f32 %v3172_v42, %v1743_v40 }
 0x146   : > { %v3086_v49 = vpop.f32.mrf.mxu0  ;;  %v3174_v52 = vpop.f32.mrf.mxu1 }
 0x147   : > { %v4355_v18 = vadd.f32 %v3086_v49, %v3085_v43  ;;  %v3175_v6 = vadd.f32 %v3174_v52, %v3173_v54 }
 0x148   : > { %v3088_v58 = vpop.f32.mrf.mxu0  ;;  %v3176_v63 = vpop.f32.mrf.mxu1 }
 0x149   : > { %v4357_v56 = vadd.f32 %v3175_v6, %v1748_v55 }
 0x14a   : > { %v3089_v0 = vpop.f32.mrf.mxu0  ;;  %v3177_v28 = vpop.f32.mrf.mxu1 }
 0x14b   : > { %v4361_v50 = vadd.f32 %v3089_v0, %v3088_v58  ;;  %v3178_v7 = vadd.f32 %v3177_v28, %v3176_v63 }
 0x14c   : > { %v3179_v8 = vpop.f32.mrf.mxu1  ;;  %v3243_v11 = vpop.f32.mrf.mxu0 }
 0x14d   : > { %v4363_v60 = vadd.f32 %v3178_v7, %v1751_v4 }
 0x14e   : > { %v3180_v1 = vpop.f32.mrf.mxu1  ;;  %v3244_v14 = vpop.f32.mrf.mxu0 }
 0x14f   : > { %v3181_v17 = vadd.f32 %v3180_v1, %v3179_v8  ;;  %v3245_v21 = vadd.f32 %v3244_v14, %v3243_v11 }
 0x150   : > { %v3182_v23 = vpop.f32.mrf.mxu1  ;;  %v3246_v25 = vpop.f32.mrf.mxu0 }
 0x151   : > { %v4367_v30 = vadd.f32 %v3181_v17, %v1756_v16  ;;  %v4370_v20 = vadd.f32 %v3245_v21, %v4249_v62  ;;  %v1764_v62 = vadd.f32 %v4325_v57, %v4241_v48 }
 0x152   : > { %v3183_v44 = vpop.f32.mrf.mxu1  ;;  %v3247_v2 = vpop.f32.mrf.mxu0 }
 0x153   : > { %v3184_v32 = vadd.f32 %v3183_v44, %v3182_v23  ;;  %v3248_v37 = vadd.f32 %v3247_v2, %v3246_v25 }
 0x154   : > { %v3185_v39 = vpop.f32.mrf.mxu1  ;;  %v3249_v40 = vpop.f32.mrf.mxu0 }
 0x155   : > { %v4374_v42 = vadd.f32 %v3184_v32, %v1759_v31  ;;  %v4377_v27 = vadd.f32 %v3248_v37, %v4257_v9  ;;  %v1767_v9 = vadd.f32 %v4335_v15, %v4241_v48 }
 0x156   : > { %v3186_v43 = vpop.f32.mrf.mxu1  ;;  %v3250_v54 = vpop.f32.mrf.mxu0 }
 0x157   : > { %v3187_v49 = vadd.f32 %v3186_v43, %v3185_v39  ;;  %v3251_v52 = vadd.f32 %v3250_v54, %v3249_v40 }
 0x158   : > { %v3188_v55 = vpop.f32.mrf.mxu1  ;;  %v3252_v6 = vpop.f32.mrf.mxu0 }
 0x159   : > { %v4381_v58 = vadd.f32 %v3187_v49, %v1764_v62  ;;  %v4384_v47 = vadd.f32 %v3251_v52, %v4265_v22  ;;  %v1772_v22 = vadd.f32 %v4341_v26, %v4241_v48 }
 0x15a   : > { %v3189_v63 = vpop.f32.mrf.mxu1  ;;  %v3253_v0 = vpop.f32.mrf.mxu0 }
 0x15b   : > { %v3190_v28 = vadd.f32 %v3189_v63, %v3188_v55  ;;  %v3254_v4 = vadd.f32 %v3253_v0, %v3252_v6 }
 0x15c   : > { %v3191_v7 = vpop.f32.mrf.mxu1  ;;  %v3255_v8 = vpop.f32.mrf.mxu0 }
 0x15d   : > { %v4388_v11 = vadd.f32 %v3190_v28, %v1767_v9  ;;  %v4391_v57 = vadd.f32 %v3254_v4, %v4273_v33  ;;  %v1775_v33 = vadd.f32 %v4349_v41, %v4241_v48 }
 0x15e   : > { %v3192_v1 = vpop.f32.mrf.mxu1  ;;  %v3256_v14 = vpop.f32.mrf.mxu0 }
 0x15f   : > { %v3193_v16 = vadd.f32 %v3192_v1, %v3191_v7  ;;  %v3257_v17 = vadd.f32 %v3256_v14, %v3255_v8 }
 0x160   : > { %v3194_v21 = vpop.f32.mrf.mxu1  ;;  %v3258_v23 = vpop.f32.mrf.mxu0 }
 0x161   : > { %v4395_v25 = vadd.f32 %v3193_v16, %v1772_v22  ;;  %v4398_v15 = vadd.f32 %v3257_v17, %v4281_v46  ;;  %v1780_v46 = vadd.f32 %v4355_v18, %v4241_v48 }
 0x162   : > { %v3195_v44 = vpop.f32.mrf.mxu1  ;;  %v3259_v2 = vpop.f32.mrf.mxu0 }
 0x163   : > { %v3196_v31 = vadd.f32 %v3195_v44, %v3194_v21  ;;  %v3260_v32 = vadd.f32 %v3259_v2, %v3258_v23 }
 0x164   : > { %v3197_v37 = vpop.f32.mrf.mxu1  ;;  %v3261_v39 = vpop.f32.mrf.mxu0 }
 0x165   : > { %v4402_v40 = vadd.f32 %v3196_v31, %v1775_v33  ;;  %v4405_v26 = vadd.f32 %v3260_v32, %v4289_v59  ;;  %v1783_v59 = vadd.f32 %v4361_v50, %v4241_v48 }
 0x166   : > { %v3198_v43 = vpop.f32.mrf.mxu1  ;;  %v3262_v54 = vpop.f32.mrf.mxu0 }
 0x167   : > { %v3199_v62 = vadd.f32 %v3198_v43, %v3197_v37  ;;  %v3263_v49 = vadd.f32 %v3262_v54, %v3261_v39 }
 0x168   : > { %v3200_v52 = vpop.f32.mrf.mxu1  ;;  %v3264_v55 = vpop.f32.mrf.mxu0 }
 0x169   : > { %v4409_v6 = vadd.f32 %v3199_v62, %v1780_v46  ;;  %v4412_v41 = vadd.f32 %v3263_v49, %v4297_v10  ;;  %v1788_v10 = vadd.f32 %v4192_v51, %v4241_v48 }
 0x16a   : > { %v3201_v63 = vpop.f32.mrf.mxu1  ;;  %v3265_v0 = vpop.f32.mrf.mxu0 }
 0x16b   : > { %v3202_v9 = vadd.f32 %v3201_v63, %v3200_v52  ;;  %v3266_v28 = vadd.f32 %v3265_v0, %v3264_v55 }
 0x16c   : > { %v3203_v4 = vpop.f32.mrf.mxu1  ;;  %v3267_v7 = vpop.f32.mrf.mxu0 }
 0x16d   : > { %v4416_v8 = vadd.f32 %v3202_v9, %v1783_v59  ;;  %v4419_v18 = vadd.f32 %v3266_v28, %v4305_v24  ;;  %v1791_v24 = vadd.f32 %v4200_v61, %v4241_v48 }
 0x16e   : > { %v3204_v1 = vpop.f32.mrf.mxu1  ;;  %v3268_v14 = vpop.f32.mrf.mxu0 }
 0x16f   : > { %v3205_v22 = vadd.f32 %v3204_v1, %v3203_v4  ;;  %v3269_v16 = vadd.f32 %v3268_v14, %v3267_v7 }
 0x170   : > { %v3206_v17 = vpop.f32.mrf.mxu1  ;;  %v3270_v21 = vpop.f32.mrf.mxu0 }
 0x171   : > { %v4423_v23 = vadd.f32 %v3205_v22, %v1788_v10  ;;  %v4426_v50 = vadd.f32 %v3269_v16, %v4313_v12  ;;  %v1796_v12 = vadd.f32 %v4204_v3, %v4241_v48 }
 0x172   : > { %v3207_v44 = vpop.f32.mrf.mxu1  ;;  %v3271_v2 = vpop.f32.mrf.mxu0 }
 0x173   : > { %v3208_v33 = vadd.f32 %v3207_v44, %v3206_v17  ;;  %v3272_v31 = vadd.f32 %v3271_v2, %v3270_v21 }
 0x174   : > { %v3209_v32 = vpop.f32.mrf.mxu1  ;;  %v3273_v37 = vpop.f32.mrf.mxu0 }
 0x175   : > { %v4430_v39 = vadd.f32 %v3208_v33, %v1791_v24  ;;  %v4433_v51 = vadd.f32 %v3272_v31, %v4321_v53  ;;  %v1799_v53 = vadd.f32 %v4212_v13, %v4241_v48 }
 0x176   : > { %v3210_v43 = vpop.f32.mrf.mxu1  ;;  %v3274_v54 = vpop.f32.mrf.mxu0 }
 0x177   : > { %v3211_v46 = vadd.f32 %v3210_v43, %v3209_v32  ;;  %v3275_v62 = vadd.f32 %v3274_v54, %v3273_v37 }
 0x178   : > { %v3212_v49 = vpop.f32.mrf.mxu1  ;;  %v3276_v52 = vpop.f32.mrf.mxu0 }
 0x179   : > { %v4437_v55 = vadd.f32 %v3211_v46, %v1796_v12  ;;  %v4440_v61 = vadd.f32 %v3275_v62, %v4329_v5  ;;  %v1804_v5 = vadd.f32 %v4216_v19, %v4241_v48 }
 0x17a   : > { %v3213_v63 = vpop.f32.mrf.mxu1  ;;  %v3277_v0 = vpop.f32.mrf.mxu0 }
 0x17b   : > { %v3214_v59 = vadd.f32 %v3213_v63, %v3212_v49  ;;  %v3278_v9 = vadd.f32 %v3277_v0, %v3276_v52 }
 0x17c   : > { %v3215_v28 = vpop.f32.mrf.mxu1  ;;  %v3279_v4 = vpop.f32.mrf.mxu0 }
 0x17d   : > { %v4444_v7 = vadd.f32 %v3214_v59, %v1799_v53  ;;  %v4447_v3 = vadd.f32 %v3278_v9, %v4337_v34  ;;  %v1807_v34 = vadd.f32 %v4224_v29, %v4241_v48 }
 0x17e   : > { %v3216_v1 = vpop.f32.mrf.mxu1  ;;  %v3280_v14 = vpop.f32.mrf.mxu0 }
 0x17f   : > { %v3217_v10 = vadd.f32 %v3216_v1, %v3215_v28  ;;  %v3281_v22 = vadd.f32 %v3280_v14, %v3279_v4 }
 0x180   : > { %v3218_v16 = vpop.f32.mrf.mxu1  ;;  %v3282_v17 = vpop.f32.mrf.mxu0 }
 0x181   : > { %v4451_v21 = vadd.f32 %v3217_v10, %v1804_v5  ;;  %v4454_v13 = vadd.f32 %v3281_v22, %v4345_v36  ;;  %v1812_v36 = vadd.f32 %v4228_v35, %v4241_v48 }
 0x182   : > { %v3219_v44 = vpop.f32.mrf.mxu1  ;;  %v3283_v2 = vpop.f32.mrf.mxu0 }
 0x183   : > { %v3220_v24 = vadd.f32 %v3219_v44, %v3218_v16  ;;  %v3284_v33 = vadd.f32 %v3283_v2, %v3282_v17 }
 0x184   : > { %v3221_v31 = vpop.f32.mrf.mxu1  ;;  %v3285_v32 = vpop.f32.mrf.mxu0 }
 0x185   : > { %v4458_v37 = vadd.f32 %v3220_v24, %v1807_v34  ;;  %v4461_v19 = vadd.f32 %v3284_v33, %v4351_v38  ;;  %v1815_v38 = vadd.f32 %v4236_v45, %v4241_v48 }
 0x186   : > { %v3222_v43 = vpop.f32.mrf.mxu1  ;;  %v3286_v54 = vpop.f32.mrf.mxu0 }
 0x187   : > { %v3223_v12 = vadd.f32 %v3222_v43, %v3221_v31  ;;  %v3287_v46 = vadd.f32 %v3286_v54, %v3285_v32 }
 0x188   : > { %v3224_v62 = vpop.f32.mrf.mxu1  ;;  %v3288_v49 = vpop.f32.mrf.mxu0 }
 0x189   : > { %v4465_v52 = vadd.f32 %v3223_v12, %v1812_v36  ;;  %v4468_v29 = vadd.f32 %v3287_v46, %v4357_v56 }
 0x18a   : > { %v3225_v63 = vpop.f32.mrf.mxu1  ;;  %v3289_v0 = vpop.f32.mrf.mxu0 }
 0x18b   : > { %v3226_v53 = vadd.f32 %v3225_v63, %v3224_v62  ;;  %v3290_v59 = vadd.f32 %v3289_v0, %v3288_v49 }
 0x18c   : > { %v3291_v9 = vpop.f32.mrf.mxu0  ;;  %v4472_v28 = vpop.f32.mrf.mxu1 }
 0x18d   : > { %v4474_v35 = vadd.f32 %v3226_v53, %v1815_v38  ;;  %v4477_v4 = vadd.f32 %v3290_v59, %v4363_v60 }
 0x18e   : > { %v3292_v1 = vpop.f32.mrf.mxu0  ;;  %v4479_v14 = vpop.f32.mrf.mxu1 }
 0x18f   : > { %v3293_v56 = vadd.f32 %v3292_v1, %v3291_v9 }
 0x190   : > { %v3294_v5 = vpop.f32.mrf.mxu0  ;;  %v4481_v10 = vpop.f32.mrf.mxu1 }
 0x191   : > { %v4484_v22 = vadd.f32 %v3293_v56, %v4367_v30 }
 0x192   : > { %v3295_v45 = vpop.f32.mrf.mxu0  ;;  %v4486_v48 = vpop.f32.mrf.mxu1 }
 0x193   : > { %v3296_v16 = vadd.f32 %v3295_v45, %v3294_v5 }
 0x194   : > { %v3297_v17 = vpop.f32.mrf.mxu0  ;;  %v4488_v44 = vpop.f32.mrf.mxu1 }
 0x195   : > { %v4491_v60 = vadd.f32 %v3296_v16, %v4374_v42 }
 0x196   : > { %v3298_v2 = vpop.f32.mrf.mxu0  ;;  %v4493_v34 = vpop.f32.mrf.mxu1 }
 0x197   : > { %4766 = vst [vmem:[#allocation2_spill] sm:$0xff] %v4491_v60  ;;  %v3299_v24 = vadd.f32 %v3298_v2, %v3297_v17 }
 0x198   : > { %v3300_v33 = vpop.f32.mrf.mxu0  ;;  %v4495_v31 = vpop.f32.mrf.mxu1 }
 0x199   : > { %v4498_v30 = vadd.f32 %v3299_v24, %v4381_v58 }
 0x19a   : > { %v3301_v32 = vpop.f32.mrf.mxu0  ;;  %v4500_v43 = vpop.f32.mrf.mxu1 }
 0x19b   : > { %v3302_v54 = vadd.f32 %v3301_v32, %v3300_v33 }
 0x19c   : > { %v3303_v36 = vpop.f32.mrf.mxu0  ;;  %v4502_v12 = vpop.f32.mrf.mxu1 }
 0x19d   : > { %v4505_v42 = vadd.f32 %v3302_v54, %v4388_v11 }
 0x19e   : > { %v3304_v46 = vpop.f32.mrf.mxu0  ;;  %v4507_v62 = vpop.f32.mrf.mxu1 }
 0x19f   : > { %v3305_v49 = vadd.f32 %v3304_v46, %v3303_v36 }
 0x1a0   : > { %v3306_v63 = vpop.f32.mrf.mxu0  ;;  %v4509_v0 = vpop.f32.mrf.mxu1 }
 0x1a1   : > { %v4512_v58 = vadd.f32 %v3305_v49, %v4395_v25 }
 0x1a2   : > { %v3307_v38 = vpop.f32.mrf.mxu0  ;;  %v4514_v53 = vpop.f32.mrf.mxu1 }
 0x1a3   : > { %4767 = vst [vmem:[#allocation3_spill] sm:$0xff] %v4512_v58  ;;  %v3308_v59 = vadd.f32 %v3307_v38, %v3306_v63 }
 0x1a4   : > { %v3309_v9 = vpop.f32.mrf.mxu0  ;;  %v4516_v1 = vpop.f32.mrf.mxu1 }
 0x1a5   : > { %v4519_v11 = vadd.f32 %v3308_v59, %v4402_v40 }
 0x1a6   : > { %v3310_v56 = vpop.f32.mrf.mxu0  ;;  %v4521_v5 = vpop.f32.mrf.mxu1 }
 0x1a7   : > { %4768 = vst [vmem:[#allocation4_spill] sm:$0xff] %v4519_v11  ;;  %v3311_v45 = vadd.f32 %v3310_v56, %v3309_v9 }
 0x1a8   : > { %v3312_v16 = vpop.f32.mrf.mxu0  ;;  %v4523_v17 = vpop.f32.mrf.mxu1 }
 0x1a9   : > { %v4526_v25 = vadd.f32 %v3311_v45, %v4409_v6 }
 0x1aa   : > { %v3313_v2 = vpop.f32.mrf.mxu0  ;;  %v4528_v24 = vpop.f32.mrf.mxu1 }
 0x1ab   : > { %4769 = vst [vmem:[#allocation5_spill] sm:$0xff] %v4526_v25  ;;  %v3314_v33 = vadd.f32 %v3313_v2, %v3312_v16 }
 0x1ac   : > { %v3315_v32 = vpop.f32.mrf.mxu0  ;;  %v4530_v54 = vpop.f32.mrf.mxu1 }
 0x1ad   : > { %v4533_v40 = vadd.f32 %v3314_v33, %v4416_v8 }
 0x1ae   : > { %v3316_v36 = vpop.f32.mrf.mxu0  ;;  %v4535_v46 = vpop.f32.mrf.mxu1 }
 0x1af   : > { %4770 = vst [vmem:[#allocation6_spill] sm:$0xff] %v4533_v40  ;;  %v3317_v49 = vadd.f32 %v3316_v36, %v3315_v32 }
 0x1b0   : > { %v3318_v63 = vpop.f32.mrf.mxu0  ;;  %v4537_v38 = vpop.f32.mrf.mxu1 }
 0x1b1   : > { %v4540_v6 = vadd.f32 %v3317_v49, %v4423_v23 }
 0x1b2   : > { %v3319_v59 = vpop.f32.mrf.mxu0  ;;  %v4542_v9 = vpop.f32.mrf.mxu1 }
 0x1b3   : > { %4771 = vst [vmem:[#allocation7_spill] sm:$0xff] %v4540_v6  ;;  %v3320_v56 = vadd.f32 %v3319_v59, %v3318_v63 }
 0x1b4   : > { %v3321_v45 = vpop.f32.mrf.mxu0  ;;  %v4544_v16 = vpop.f32.mrf.mxu1 }
 0x1b5   : > { %v4547_v8 = vadd.f32 %v3320_v56, %v4430_v39 }
 0x1b6   : > { %v3322_v2 = vpop.f32.mrf.mxu0  ;;  %v4549_v33 = vpop.f32.mrf.mxu1 }
 0x1b7   : > { %4772 = vst [vmem:[#allocation8_spill] sm:$0xff] %v4547_v8  ;;  %v3323_v32 = vadd.f32 %v3322_v2, %v3321_v45 }
 0x1b8   : > { %v3324_v36 = vpop.f32.mrf.mxu0  ;;  %v4551_v11 = vpop.f32.mrf.mxu1 }
 0x1b9   : > { %v4554_v23 = vadd.f32 %v3323_v32, %v4437_v55 }
 0x1ba   : > { %v3325_v49 = vpop.f32.mrf.mxu0  ;;  %v4556_v6 = vpop.f32.mrf.mxu1 }
 0x1bb   : > { %4773 = vst [vmem:[#allocation9_spill] sm:$0xff] %v4554_v23  ;;  %v3326_v63 = vadd.f32 %v3325_v49, %v3324_v36 }
 0x1bc   : > { %v3327_v59 = vpop.f32.mrf.mxu0  ;;  %v4558_v40 = vpop.f32.mrf.mxu1 }
 0x1bd   : > { %v4561_v39 = vadd.f32 %v3326_v63, %v4444_v7 }
 0x1be   : > { %v3328_v56 = vpop.f32.mrf.mxu0  ;;  %v4563_v8 = vpop.f32.mrf.mxu1 }
 0x1bf   : > { %4774 = vst [vmem:[#allocation10_spill] sm:$0xff] %v4561_v39  ;;  %v3329_v45 = vadd.f32 %v3328_v56, %v3327_v59  ;;  %v3363_v59 = vadd.f32 %v4493_v34, %v4488_v44  ;;  %v3360_v44 = vadd.f32 %v4486_v48, %v4481_v10 }
 0x1c0   : > { %v3330_v2 = vpop.f32.mrf.mxu0  ;;  %v4565_v58 = vpop.f32.mrf.mxu1 }
 0x1c1   : > { %v4568_v55 = vadd.f32 %v3329_v45, %v4451_v21  ;;  %v2183_v60 = vadd.f32 %v3363_v59, %v4384_v47  ;;  %v2178_v48 = vadd.f32 %v3360_v44, %v4377_v27 }
 0x1c2   : > { %v3331_v32 = vpop.f32.mrf.mxu0  ;;  %v4570_v23 = vpop.f32.mrf.mxu1 }
 0x1c3   : > { %4775 = vst [vmem:[#allocation11_spill] sm:$0xff] %v4568_v55  ;;  %v3332_v36 = vadd.f32 %v3331_v32, %v3330_v2  ;;  %v3357_v2 = vadd.f32 %v4479_v14, %v4472_v28 }
 0x1c4   : > { %v3333_v49 = vpop.f32.mrf.mxu0  ;;  %v4572_v25 = vpop.f32.mrf.mxu1 }
 0x1c5   : > { %v4575_v7 = vadd.f32 %v3332_v36, %v4458_v37  ;;  %v3366_v36 = vadd.f32 %v4500_v43, %v4495_v31  ;;  %v2175_v14 = vadd.f32 %v3357_v2, %v4370_v20  ;;  %v3375_v31 = vadd.f32 %v4521_v5, %v4516_v1 }
 0x1c6   : > { %v3334_v63 = vpop.f32.mrf.mxu0  ;;  %v4577_v39 = vpop.f32.mrf.mxu1 }
 0x1c7   : > { %4776 = vst [vmem:[#allocation12_spill] sm:$0xff] %v4575_v7  ;;  %v3335_v56 = vadd.f32 %v3334_v63, %v3333_v49  ;;  %v2186_v10 = vadd.f32 %v3366_v36, %v4391_v57  ;;  %v3378_v57 = vadd.f32 %v4528_v24, %v4523_v17  ;;  %v2199_v27 = vadd.f32 %v3375_v31, %v4412_v41 }
 0x1c8   : > { %v3336_v21 = vpop.f32.mrf.mxu0  ;;  %v4581_v45 = vpop.f32.mrf.mxu1  ;;  %v3387_v41 = vadd.f32 %v4549_v33, %v4544_v16  ;;  %v3390_v33 = vadd.f32 %v4556_v6, %v4551_v11 }
 0x1c9   : > { %v4586_v32 = vadd.f32 %v3335_v56, %v4465_v52 }
 0x1ca   : > { %v3337_v55 = vpop.f32.mrf.mxu0  ;;  %v4588_v37 = vpop.f32.mrf.mxu1 }
 0x1cb   : > { %v3338_v7 = vadd.f32 %v3337_v55, %v3336_v21 }
 0x1cc   : > { %v4595_v34 = vpop.f32.mrf.mxu1  ;;  %v3493_v49 = vpop.f32.mrf.mxu0 }
 0x1cd   : > { %v4598_v28 = vadd.f32 %v3338_v7, %v4474_v35  ;;  %v2344_v52 = vadd.f32 %v3493_v49, %v2183_v60  ;;  %v3369_v60 = vadd.f32 %v4507_v62, %v4502_v12  ;;  %v3372_v12 = vadd.f32 %v4514_v53, %v4509_v0 }
 0x1ce   : > { %v4602_v63 = vpop.f32.mrf.mxu1  ;;  %v2335_v56 = vpop.f32.mrf.mxu0 }
 0x1cf   : > { %v2464_v47 = vmax.f32 %v2344_v52, 0.0  ;;  %v2336_v43 = vadd.f32 %v2335_v56, %v2175_v14  ;;  %v2191_v52 = vadd.f32 %v3369_v60, %v4398_v15  ;;  %v3381_v15 = vadd.f32 %v4535_v46, %v4530_v54 }
 0x1d0   : > { %v4612_v35 = vpop.f32.mrf.mxu1  ;;  %v3494_v20 = vpop.f32.mrf.mxu0  ;;  %v2215_v54 = vadd.f32 %v3387_v41, %v4440_v61  ;;  %v3384_v46 = vadd.f32 %v4542_v9, %v4537_v38  ;;  %v3399_v61 = vadd.f32 %v4577_v39, %v4572_v25  ;;  %v3402_v39 = vadd.f32 %v4588_v37, %v4581_v45 }
 0x1d1   : > { %v2973_v1 = vpack.c.bf16 %v2464_v47, %v2464_v47  ;;  %v2462_v5 = vmax.f32 %v2336_v43, 0.0  ;;  %v2347_v55 = vadd.f32 %v3494_v20, %v2186_v10  ;;  %v2202_v47 = vadd.f32 %v3378_v57, %v4419_v18 }
 0x1d2   : > { %v4619_v7 = vpop.f32.mrf.mxu1  ;;  %v2338_v59 = vpop.f32.mrf.mxu0  ;;  %v2194_v20 = vadd.f32 %v3372_v12, %v4405_v26  ;;  %v2218_v12 = vadd.f32 %v3390_v33, %v4447_v3 }
 0x1d3   : > { %2625 = vst.msk [vmem:[%s4610_s22 + $0x8] sm:$0xf] %vm2622_vm0, %v2973_v1  ;;  %v2971_v21 = vpack.c.bf16 %v2462_v5, %v2462_v5  ;;  %v2465_v2 = vmax.f32 %v2347_v55, 0.0  ;;  %v2339_v36 = vadd.f32 %v2338_v59, %v2178_v48 }
 0x1d4   : > { %v4626_v62 = vpop.f32.mrf.mxu1  ;;  %v3497_v44 = vpop.f32.mrf.mxu0 }
 0x1d5   : > { %2623 = vst.msk [vmem:[%s4610_s22] sm:$0xf] %vm2622_vm0, %v2971_v21  ;;  %v2974_v17 = vpack.c.bf16 %v2465_v2, %v2465_v2  ;;  %v2463_v24 = vmax.f32 %v2339_v36, 0.0  ;;  %v2360_v49 = vadd.f32 %v3497_v44, %v2199_v27  ;;  %v2207_v2 = vadd.f32 %v3381_v15, %v4426_v50 }
 0x1d6   : > { %v4631_v14 = vpop.f32.mrf.mxu1  ;;  %v2351_v56 = vpop.f32.mrf.mxu0  ;;  %v3393_v50 = vadd.f32 %v4563_v8, %v4558_v40  ;;  %v2231_v40 = vadd.f32 %v3399_v61, %v4468_v29  ;;  %v3396_v8 = vadd.f32 %v4570_v23, %v4565_v58 }
 0x1d7   : > { %2626 = vst.msk [vmem:[%s4610_s22 + $0xc] sm:$0xf] %vm2622_vm0, %v2974_v17  ;;  %v2972_v0 = vpack.c.bf16 %v2463_v24, %v2463_v24  ;;  %v2468_v53 = vmax.f32 %v2360_v49, 0.0  ;;  %v2352_v31 = vadd.f32 %v2351_v56, %v2191_v52  ;;  %v2210_v49 = vadd.f32 %v3384_v46, %v4433_v51 }
 0x1d8   : > { %v4638_v43 = vpop.f32.mrf.mxu1  ;;  %v3498_v10 = vpop.f32.mrf.mxu0  ;;  %v3411_v29 = vadd.f32 %v4631_v14, %v4626_v62 }
 0x1d9   : > { %2624 = vst.msk [vmem:[%s4610_s22 + $0x4] sm:$0xf] %vm2622_vm0, %v2972_v0  ;;  %v2977_v18 = vpack.c.bf16 %v2468_v53, %v2468_v53  ;;  %v2466_v48 = vmax.f32 %v2352_v31, 0.0  ;;  %v2363_v16 = vadd.f32 %v3498_v10, %v2202_v47 }
 0x1da   : > { %v4647_v60 = vpop.f32.mrf.mxu1  ;;  %v2354_v1 = vpop.f32.mrf.mxu0 }
 0x1db   : > { %2629 = vst.msk [vmem:[%s4610_s22 + $0x18] sm:$0xf] %vm2622_vm0, %v2977_v18  ;;  %v2975_v5 = vpack.c.bf16 %v2466_v48, %v2466_v48  ;;  %v2469_v26 = vmax.f32 %v2363_v16, 0.0  ;;  %v2355_v55 = vadd.f32 %v2354_v1, %v2194_v20  ;;  %v2223_v20 = vadd.f32 %v3393_v50, %v4454_v13 }
 0x1dc   : > { %v4654_v57 = vpop.f32.mrf.mxu1  ;;  %v3501_v59 = vpop.f32.mrf.mxu0  ;;  %v2234_v48 = vadd.f32 %v3402_v39, %v4477_v4  ;;  %v3405_v13 = vadd.f32 %v4602_v63, %v4595_v34  ;;  %v3414_v62 = vadd.f32 %v4647_v60, %v4638_v43  ;;  %v3408_v34 = vadd.f32 %v4619_v7, %v4612_v35 }
 0x1dd   : > { %2627 = vst.msk [vmem:[%s4610_s22 + $0x10] sm:$0xf] %vm2622_vm0, %v2975_v5  ;;  %v2978_v11 = vpack.c.bf16 %v2469_v26, %v2469_v26  ;;  %v2467_v6 = vmax.f32 %v2355_v55, 0.0  ;;  %v2376_v21 = vadd.f32 %v3501_v59, %v2215_v54  ;;  %v2226_v5 = vadd.f32 %v3396_v8, %v4461_v19 }
 0x1de   : > { %v4659_v36 = vpop.f32.mrf.mxu1  ;;  %v2367_v27 = vpop.f32.mrf.mxu0  ;;  %v2250_v61 = vadd.f32 %v3414_v62, %v4505_v42 }
 0x1df   : > { %2630 = vst.msk [vmem:[%s4610_s22 + $0x1c] sm:$0xf] %vm2622_vm0, %v2978_v11  ;;  %v2976_v38 = vpack.c.bf16 %v2467_v6, %v2467_v6  ;;  %v2472_v9 = vmax.f32 %v2376_v21, 0.0  ;;  %v2368_v44 = vadd.f32 %v2367_v27, %v2207_v2  ;;  %v2247_v11 = vadd.f32 %v3411_v29, %v4498_v30 }
 0x1e0   : > { %v4666_v17 = vpop.f32.mrf.mxu1  ;;  %v3502_v24 = vpop.f32.mrf.mxu0  ;;  %v2239_v2 = vadd.f32 %v3405_v13, %v4484_v22  ;;  %v3417_v50 = vadd.f32 %v4659_v36, %v4654_v57 }
 0x1e1   : > { %2628 = vst.msk [vmem:[%s4610_s22 + $0x14] sm:$0xf] %vm2622_vm0, %v2976_v38  ;;  %v2981_v3 = vpack.c.bf16 %v2472_v9, %v2472_v9  ;;  %v2470_v52 = vmax.f32 %v2368_v44, 0.0  ;;  %v2379_v25 = vadd.f32 %v3502_v24, %v2218_v12  ;;  %v4777_v24 = vld [vmem:[#allocation2_spill] sm:$0xff] }
 0x1e2   : > { %v4675_v56 = vpop.f32.mrf.mxu1  ;;  %v2370_v47 = vpop.f32.mrf.mxu0 }
 0x1e3   : > { %2633 = vst.msk [vmem:[%s4610_s22 + $0x28] sm:$0xf] %vm2622_vm0, %v2981_v3  ;;  %v2979_v41 = vpack.c.bf16 %v2470_v52, %v2470_v52  ;;  %v2473_v51 = vmax.f32 %v2379_v25, 0.0  ;;  %v2371_v0 = vadd.f32 %v2370_v47, %v2210_v49  ;;  %v2242_v49 = vadd.f32 %v3408_v34, %v4777_v24 }
 0x1e4   : > { %v3421_v53 = vpop.f32.mrf.mxu1  ;;  %v3505_v31 = vpop.f32.mrf.mxu0  ;;  %v3420_v57 = vadd.f32 %v4675_v56, %v4666_v17 }
 0x1e5   : > { %2631 = vst.msk [vmem:[%s4610_s22 + $0x20] sm:$0xf] %vm2622_vm0, %v2979_v41  ;;  %v2982_v10 = vpack.c.bf16 %v2473_v51, %v2473_v51  ;;  %v2471_v45 = vmax.f32 %v2371_v0, 0.0  ;;  %v2392_v37 = vadd.f32 %v3505_v31, %v2231_v40  ;;  %v4778_v0 = vld [vmem:[#allocation5_spill] sm:$0xff] }
 0x1e6   : > { %v3422_v15 = vpop.f32.mrf.mxu1  ;;  %v2383_v18 = vpop.f32.mrf.mxu0 }
 0x1e7   : > { %2634 = vst.msk [vmem:[%s4610_s22 + $0x2c] sm:$0xf] %vm2622_vm0, %v2982_v10  ;;  %v2980_v58 = vpack.c.bf16 %v2471_v45, %v2471_v45  ;;  %v2476_v23 = vmax.f32 %v2392_v37, 0.0  ;;  %v2384_v16 = vadd.f32 %v2383_v18, %v2223_v20  ;;  %v3423_v38 = vadd.f32 %v3422_v15, %v3421_v53  ;;  %v4779_v45 = vld [vmem:[#allocation3_spill] sm:$0xff]  ;;  %v4780_v18 = vld [vmem:[#allocation6_spill] sm:$0xff] }
 0x1e8   : > { %v3424_v33 = vpop.f32.mrf.mxu1  ;;  %v3506_v1 = vpop.f32.mrf.mxu0  ;;  %v2255_v37 = vadd.f32 %v3417_v50, %v4779_v45 }
 0x1e9   : > { %2632 = vst.msk [vmem:[%s4610_s22 + $0x24] sm:$0xf] %vm2622_vm0, %v2980_v58  ;;  %v2985_v4 = vpack.c.bf16 %v2476_v23, %v2476_v23  ;;  %v2474_v26 = vmax.f32 %v2384_v16, 0.0  ;;  %v2395_v55 = vadd.f32 %v3506_v1, %v2234_v48  ;;  %v2263_v40 = vadd.f32 %v3423_v38, %v4778_v0 }
 0x1ea   : > { %v3425_v14 = vpop.f32.mrf.mxu1  ;;  %v2386_v54 = vpop.f32.mrf.mxu0 }
 0x1eb   : > { %2637 = vst.msk [vmem:[%s4610_s22 + $0x38] sm:$0xf] %vm2622_vm0, %v2985_v4  ;;  %v2983_v46 = vpack.c.bf16 %v2474_v26, %v2474_v26  ;;  %v2477_v59 = vmax.f32 %v2395_v55, 0.0  ;;  %v2387_v19 = vadd.f32 %v2386_v54, %v2226_v5  ;;  %v3426_v52 = vadd.f32 %v3425_v14, %v3424_v33  ;;  %v4781_v33 = vld [vmem:[#allocation4_spill] sm:$0xff]  ;;  %v4782_v14 = vld [vmem:[#allocation9_spill] sm:$0xff] }
 0x1ec   : > { %v3427_v63 = vpop.f32.mrf.mxu1  ;;  %v3509_v6 = vpop.f32.mrf.mxu0  ;;  %v2258_v1 = vadd.f32 %v3420_v57, %v4781_v33 }
 0x1ed   : > { %2635 = vst.msk [vmem:[%s4610_s22 + $0x30] sm:$0xf] %vm2622_vm0, %v2983_v46  ;;  %v2986_v21 = vpack.c.bf16 %v2477_v59, %v2477_v59  ;;  %v2475_v43 = vmax.f32 %v2387_v19, 0.0  ;;  %v2408_v60 = vadd.f32 %v3509_v6, %v2247_v11  ;;  %v2266_v48 = vadd.f32 %v3426_v52, %v4780_v18 }
 0x1ee   : > { %v3428_v27 = vpop.f32.mrf.mxu1  ;;  %v2399_v12 = vpop.f32.mrf.mxu0 }
 0x1ef   : > { %2638 = vst.msk [vmem:[%s4610_s22 + $0x3c] sm:$0xf] %vm2622_vm0, %v2986_v21  ;;  %v2984_v30 = vpack.c.bf16 %v2475_v43, %v2475_v43  ;;  %v2480_v35 = vmax.f32 %v2408_v60, 0.0  ;;  %v2400_v7 = vadd.f32 %v2399_v12, %v2239_v2  ;;  %v3429_v5 = vadd.f32 %v3428_v27, %v3427_v63  ;;  %v4783_v2 = vld [vmem:[#allocation7_spill] sm:$0xff] }
 0x1f0   : > { %v3430_v9 = vpop.f32.mrf.mxu1  ;;  %v3510_v44 = vpop.f32.mrf.mxu0 }
 0x1f1   : > { %2636 = vst.msk [vmem:[%s4610_s22 + $0x34] sm:$0xf] %vm2622_vm0, %v2984_v30  ;;  %v2989_v22 = vpack.c.bf16 %v2480_v35, %v2480_v35  ;;  %v2478_v3 = vmax.f32 %v2400_v7, 0.0  ;;  %v2411_v42 = vadd.f32 %v3510_v44, %v2250_v61  ;;  %v2271_v27 = vadd.f32 %v3429_v5, %v4783_v2  ;;  %v4784_v7 = vld [vmem:[#allocation10_spill] sm:$0xff] }
 0x1f2   : > { %v3431_v25 = vpop.f32.mrf.mxu1  ;;  %v2402_v39 = vpop.f32.mrf.mxu0 }
 0x1f3   : > { %2641 = vst.msk [vmem:[%s4610_s22 + $0x48] sm:$0xf] %vm2622_vm0, %v2989_v22  ;;  %v2987_v47 = vpack.c.bf16 %v2478_v3, %v2478_v3  ;;  %v2481_v41 = vmax.f32 %v2411_v42, 0.0  ;;  %v2403_v51 = vadd.f32 %v2402_v39, %v2242_v49  ;;  %v3432_v34 = vadd.f32 %v3431_v25, %v3430_v9  ;;  %v4785_v49 = vld [vmem:[#allocation8_spill] sm:$0xff] }
 0x1f4   : > { %v3433_v36 = vpop.f32.mrf.mxu1  ;;  %v3513_v8 = vpop.f32.mrf.mxu0 }
 0x1f5   : > { %2639 = vst.msk [vmem:[%s4610_s22 + $0x40] sm:$0xf] %vm2622_vm0, %v2987_v47  ;;  %v2990_v53 = vpack.c.bf16 %v2481_v41, %v2481_v41  ;;  %v2479_v31 = vmax.f32 %v2403_v51, 0.0  ;;  %v2424_v10 = vadd.f32 %v3513_v8, %v2263_v40  ;;  %v2274_v50 = vadd.f32 %v3432_v34, %v4785_v49 }
 0x1f6   : > { %v3434_v20 = vpop.f32.mrf.mxu1  ;;  %v2415_v15 = vpop.f32.mrf.mxu0 }
 0x1f7   : > { %2642 = vst.msk [vmem:[%s4610_s22 + $0x4c] sm:$0xf] %vm2622_vm0, %v2990_v53  ;;  %v2988_v29 = vpack.c.bf16 %v2479_v31, %v2479_v31  ;;  %v2484_v58 = vmax.f32 %v2424_v10, 0.0  ;;  %v3435_v17 = vadd.f32 %v3434_v20, %v3433_v36  ;;  %v2416_v56 = vadd.f32 %v2415_v15, %v2255_v37  ;;  %v4786_v53 = vld [vmem:[#allocation11_spill] sm:$0xff] }
 0x1f8   : > { %v3436_v23 = vpop.f32.mrf.mxu1  ;;  %v3514_v16 = vpop.f32.mrf.mxu0 }
 0x1f9   : > { %2640 = vst.msk [vmem:[%s4610_s22 + $0x44] sm:$0xf] %vm2622_vm0, %v2988_v29  ;;  %v2993_v13 = vpack.c.bf16 %v2484_v58, %v2484_v58  ;;  %v2482_v4 = vmax.f32 %v2416_v56, 0.0  ;;  %v2427_v26 = vadd.f32 %v3514_v16, %v2266_v48  ;;  %v2279_v54 = vadd.f32 %v3435_v17, %v4782_v14  ;;  %v4787_v17 = vld [vmem:[#allocation12_spill] sm:$0xff] }
 0x1fa   : > { %v3437_v55 = vpop.f32.mrf.mxu1  ;;  %v2418_v62 = vpop.f32.mrf.mxu0 }
 0x1fb   : > { %2645 = vst.msk [vmem:[%s4610_s22 + $0x58] sm:$0xf] %vm2622_vm0, %v2993_v13  ;;  %v2991_v46 = vpack.c.bf16 %v2482_v4, %v2482_v4  ;;  %v2485_v59 = vmax.f32 %v2427_v26, 0.0  ;;  %v3438_v19 = vadd.f32 %v3437_v55, %v3436_v23  ;;  %v2419_v11 = vadd.f32 %v2418_v62, %v2258_v1 }
 0x1fc   : > { %v3439_v6 = vpop.f32.mrf.mxu1  ;;  %v3517_v63 = vpop.f32.mrf.mxu0 }
 0x1fd   : > { %2643 = vst.msk [vmem:[%s4610_s22 + $0x50] sm:$0xf] %vm2622_vm0, %v2991_v46  ;;  %v2994_v21 = vpack.c.bf16 %v2485_v59, %v2485_v59  ;;  %v2483_v43 = vmax.f32 %v2419_v11, 0.0  ;;  %v2440_v60 = vadd.f32 %v3517_v63, %v2279_v54  ;;  %v2282_v9 = vadd.f32 %v3438_v19, %v4784_v7 }
 0x1fe   : > { %v3440_v12 = vpop.f32.mrf.mxu1  ;;  %v2431_v61 = vpop.f32.mrf.mxu0 }
 0x1ff   : > { %2646 = vst.msk [vmem:[%s4610_s22 + $0x5c] sm:$0xf] %vm2622_vm0, %v2994_v21  ;;  %v2992_v38 = vpack.c.bf16 %v2483_v43, %v2483_v43  ;;  %v2488_v30 = vmax.f32 %v2440_v60, 0.0  ;;  %v2432_v35 = vadd.f32 %v2431_v61, %v2271_v27  ;;  %v3441_v3 = vadd.f32 %v3440_v12, %v3439_v6 }
 0x200   : > { %v3442_v44 = vpop.f32.mrf.mxu1  ;;  %v3518_v24 = vpop.f32.mrf.mxu0 }
 0x201   : > { %2644 = vst.msk [vmem:[%s4610_s22 + $0x54] sm:$0xf] %vm2622_vm0, %v2992_v38  ;;  %v2997_v22 = vpack.c.bf16 %v2488_v30, %v2488_v30  ;;  %v2486_v42 = vmax.f32 %v2432_v35, 0.0  ;;  %v2443_v52 = vadd.f32 %v3518_v24, %v2282_v9  ;;  %v2287_v31 = vadd.f32 %v3441_v3, %v4786_v53 }
 0x202   : > { %v3443_v25 = vpop.f32.mrf.mxu1  ;;  %v2434_v39 = vpop.f32.mrf.mxu0 }
 0x203   : > { %2649 = vst.msk [vmem:[%s4610_s22 + $0x68] sm:$0xf] %vm2622_vm0, %v2997_v22  ;;  %v2995_v47 = vpack.c.bf16 %v2486_v42, %v2486_v42  ;;  %v2489_v41 = vmax.f32 %v2443_v52, 0.0  ;;  %v2435_v51 = vadd.f32 %v2434_v39, %v2274_v50  ;;  %v3444_v36 = vadd.f32 %v3443_v25, %v3442_v44 }
 0x204   : > { %v3445_v0 = vpop.f32.mrf.mxu1  ;;  %v3521_v40 = vpop.f32.mrf.mxu0 }
 0x205   : > { %2647 = vst.msk [vmem:[%s4610_s22 + $0x60] sm:$0xf] %vm2622_vm0, %v2995_v47  ;;  %v2998_v57 = vpack.c.bf16 %v2489_v41, %v2489_v41  ;;  %v2487_v8 = vmax.f32 %v2435_v51, 0.0  ;;  %v2290_v56 = vadd.f32 %v3444_v36, %v4787_v17 }
 0x206   : > { %v3446_v10 = vpop.f32.mrf.mxu1  ;;  %v2447_v45 = vpop.f32.mrf.mxu0 }
 0x207   : > { %2650 = vst.msk [vmem:[%s4610_s22 + $0x6c] sm:$0xf] %vm2622_vm0, %v2998_v57  ;;  %v2996_v37 = vpack.c.bf16 %v2487_v8, %v2487_v8  ;;  %v3447_v20 = vadd.f32 %v3446_v10, %v3445_v0  ;;  %v2448_v15 = vadd.f32 %v2447_v45, %v2287_v31 }
 0x208   : > { %v3448_v18 = vpop.f32.mrf.mxu1  ;;  %v3522_v48 = vpop.f32.mrf.mxu0 }
 0x209   : > { %2648 = vst.msk [vmem:[%s4610_s22 + $0x64] sm:$0xf] %vm2622_vm0, %v2996_v37  ;;  %v2295_v29 = vadd.f32 %v3447_v20, %v4586_v32  ;;  %v2490_v58 = vmax.f32 %v2448_v15, 0.0 }
 0x20a   : > { %v3449_v23 = vpop.f32.mrf.mxu1  ;;  %v2450_v16 = vpop.f32.mrf.mxu0 }
 0x20b   : > { %v2456_v33 = vadd.f32 %v3521_v40, %v2295_v29  ;;  %v2999_v1 = vpack.c.bf16 %v2490_v58, %v2490_v58  ;;  %v3450_v5 = vadd.f32 %v3449_v23, %v3448_v18  ;;  %v2451_v13 = vadd.f32 %v2450_v16, %v2290_v56 }
 0x20d   : > { %v2492_v4 = vmax.f32 %v2456_v33, 0.0  ;;  %2651 = vst.msk [vmem:[%s4610_s22 + $0x70] sm:$0xf] %vm2622_vm0, %v2999_v1  ;;  %v2298_v26 = vadd.f32 %v3450_v5, %v4598_v28  ;;  %v2491_v55 = vmax.f32 %v2451_v13, 0.0 }
 0x20f   : > { %v3001_v62 = vpack.c.bf16 %v2492_v4, %v2492_v4  ;;  %v2459_v32 = vadd.f32 %v3522_v48, %v2298_v26  ;;  %v3000_v14 = vpack.c.bf16 %v2491_v55, %v2491_v55 }
 0x211   : > { %2653 = vst.msk [vmem:[%s4610_s22 + $0x78] sm:$0xf] %vm2622_vm0, %v3001_v62  ;;  %v2493_v54 = vmax.f32 %v2459_v32, 0.0  ;;  %2652 = vst.msk [vmem:[%s4610_s22 + $0x74] sm:$0xf] %vm2622_vm0, %v3000_v14 }
 0x213   : > { %v3002_v46 = vpack.c.bf16 %v2493_v54, %v2493_v54 }
 0x215   : > { %2654 = vst.msk [vmem:[%s4610_s22 + $0x7c] sm:$0xf] %vm2622_vm0, %v3002_v46 }
 0x216 PF: > { %s13_s12 = sadd.s32 1, %s3834_s12  }
 0x217   : > { %p10_p4 = scmp.ge.s32.totalorder %s13_s12, 4  }
 0x219   :  { %12 = sbr.rel (!%p10_p4) target bundleno = 1 (0x1), region = 62 }

// kernel: _lambda_.5
= control target key start
LH: loop header
LB: loop body
LE: loop exit
PB: predicated region body
PF: predicated region fallthrough
CT: control target
= control target key end

     0   :  { %s1077_s12 = smov 0   ;;  %s1243_s0 = inlined_call_operand.vmem [shape: bf16[512,10], index: 0, kind: input, shape index: {}]   ;;  %s1244_s1 = inlined_call_operand.vmem [shape: bf16[10,256], index: 1, kind: input, shape index: {}]   ;;  %s1245_s2 = inlined_call_operand.vmem [shape: f32[1,256], index: 2, kind: input, shape index: {}]   ;;  %s1246_s3 = inlined_call_operand.vmem [shape: bf16[512,256], index: 3, kind: output, shape index: {}]  }
   0x1 LB: > { %s906_s13 = sadd.s32 4294967295, %s1054_s12   ;;  %p910_p0 = scmp.ge.s32.totalorder %s1054_s12, 1  ;;  %s1054_s12 = sphi %s1077_s12, %s13_s12  }
   0x2   : > { %p138_p1 = scmp.lt.s32.totalorder %s1054_s12, 3 }
   0x4   : > { %p139_p2 = pnand %p910_p0, %p138_p1 }
   0x5   : > { %s911_s18 = sshll.u32 (!%p139_p2), %s906_s13, 5 }
   0x6   : > { %142 = sbr.rel (%p139_p2) target bundleno = 279 (0x117), region = 32  ;;  %p164_p3 = scmp.lt.s32.totalorder (!%p139_p2), %s911_s18, 63 }
   0xb   : > { %v1029_v0 = vld [vmem:[%s1244_s1 + $0x4] ss:$8 sps:$4 sm:$0x1f]   ;;  %vm360_vm0 = vcmask 1044480   ;;  %v1056_v3 = vmov 0   ;;  %s1248_s18 = smov (!%p164_p3, %s911_s18), 63  ;;  %v213_v20 = vlaneseq }
   0xc   : > { %v1031_v1 = vld [vmem:[%s1244_s1] ss:$8 sps:$4 sm:$0x1f]   ;;  %934 = vmatprep.subr.msk.bf16.mxu0 %vm360_vm0, %v1029_v0  ;;  %1018 = vmatprep.subr.msk.bf16.mxu1 %vm360_vm0, %v1029_v0  ;;  %s912_s19 = sshll.u32 %s1248_s18, 2  ;;  %vm311_vm1 = vcmask 80896   ;;  %s985_s25 = sshll.u32 %s1248_s18, 3 }
   0xd   : > { %v362_v2 = vsel %vm360_vm0, %v1031_v1, 0  ;;  %399 = vmatprep.mubr.bf16.mxu0 %v1056_v3  ;;  %479 = vmatprep.mubr.bf16.mxu1 %v1056_v3  ;;  %s1097_s22 = scalar_lea.vmem %s1243_s0, %s912_s19  ;;  %v214_v21 = vshrl.u32 %v213_v20, 7  ;;  %v211_v23 = vld [vmem:[%s1245_s2] sm:$0x3]  ;;  %s1147_s28 = scalar_lea.vmem %s1246_s3, %s985_s25 }
   0xe   : > { %382 = vmatpush1.bf16.msra.mxu0 %v362_v2  ;;  %1019 = vmatpush1.bf16.msra.mxu1 %v362_v2  ;;  %v1032_v4 = vld [vmem:[%s1097_s22] sm:$0xff]   ;;  %v1034_v6 = vld [vmem:[%s1097_s22 + $0x8] sm:$0xff]   ;;  %v1036_v8 = vld [vmem:[%s1097_s22 + $0x10] sm:$0xff]  }
   0xf   : > { %v1033_v5 = vld [vmem:[%s1097_s22 + $0x40] sm:$0xff]   ;;  %v1035_v7 = vld [vmem:[%s1097_s22 + $0x48] sm:$0xff]   ;;  %v1037_v9 = vld [vmem:[%s1097_s22 + $0x50] sm:$0xff]   ;;  %v215_v22 = vsub.s32 0, %v214_v21  ;;  %v219_v24 = vsub.s32 1, %v214_v21 }
  0x10   : > { %v1038_v10 = vld [vmem:[%s1097_s22 + $0x18] sm:$0xff]   ;;  %v1040_v12 = vld [vmem:[%s1097_s22 + $0x20] sm:$0xff]   ;;  %v1042_v14 = vld [vmem:[%s1097_s22 + $0x28] sm:$0xff]  }
  0x11   : > { %935 = vmatmul.mubr.msk.bf16.vlgmr.msra.gmra.mxu0 %vm311_vm1, %v1032_v4  ;;  %943 = vmatmul.mubr.msk.bf16.vlgmr.msra.gmra.mxu1 %vm311_vm1, %v1033_v5  ;;  %v1039_v11 = vld [vmem:[%s1097_s22 + $0x58] sm:$0xff]   ;;  %v1041_v13 = vld [vmem:[%s1097_s22 + $0x60] sm:$0xff]   ;;  %v1043_v15 = vld [vmem:[%s1097_s22 + $0x68] sm:$0xff]   ;;  %v1134_v25 = vrot.slane %v211_v23, %v215_v22  ;;  %v1136_v26 = vrot.slane %v211_v23, %v219_v24 }
  0x12   : > { %409 = vmatprep.mubr.bf16.mxu0 %v1056_v3  ;;  %489 = vmatprep.mubr.bf16.mxu1 %v1056_v3  ;;  %v1044_v16 = vld [vmem:[%s1097_s22 + $0x30] sm:$0xff]   ;;  %v1046_v18 = vld [vmem:[%s1097_s22 + $0x38] sm:$0xff]  }
  0x13   : > { %v1045_v17 = vld [vmem:[%s1097_s22 + $0x70] sm:$0xff]   ;;  %v1047_v19 = vld [vmem:[%s1097_s22 + $0x78] sm:$0xff]  }
  0x19   : > { %936 = vmatmul.mubr.msk.bf16.gmra.mxu0 %vm311_vm1, %v1034_v6  ;;  %944 = vmatmul.mubr.msk.bf16.gmra.mxu1 %vm311_vm1, %v1035_v7 }
  0x1a   : > { %419 = vmatprep.mubr.bf16.mxu0 %v1056_v3  ;;  %499 = vmatprep.mubr.bf16.mxu1 %v1056_v3 }
  0x21   : > { %937 = vmatmul.mubr.msk.bf16.gmra.mxu0 %vm311_vm1, %v1036_v8  ;;  %945 = vmatmul.mubr.msk.bf16.gmra.mxu1 %vm311_vm1, %v1037_v9 }
  0x22   : > { %429 = vmatprep.mubr.bf16.mxu0 %v1056_v3  ;;  %509 = vmatprep.mubr.bf16.mxu1 %v1056_v3 }
  0x29   : > { %938 = vmatmul.mubr.msk.bf16.gmra.mxu0 %vm311_vm1, %v1038_v10  ;;  %946 = vmatmul.mubr.msk.bf16.gmra.mxu1 %vm311_vm1, %v1039_v11 }
  0x2a   : > { %439 = vmatprep.mubr.bf16.mxu0 %v1056_v3  ;;  %519 = vmatprep.mubr.bf16.mxu1 %v1056_v3 }
  0x31   : > { %939 = vmatmul.mubr.msk.bf16.gmra.mxu0 %vm311_vm1, %v1040_v12  ;;  %947 = vmatmul.mubr.msk.bf16.gmra.mxu1 %vm311_vm1, %v1041_v13 }
  0x32   : > { %449 = vmatprep.mubr.bf16.mxu0 %v1056_v3  ;;  %529 = vmatprep.mubr.bf16.mxu1 %v1056_v3 }
  0x39   : > { %940 = vmatmul.mubr.msk.bf16.gmra.mxu0 %vm311_vm1, %v1042_v14  ;;  %948 = vmatmul.mubr.msk.bf16.gmra.mxu1 %vm311_vm1, %v1043_v15 }
  0x3a   : > { %459 = vmatprep.mubr.bf16.mxu0 %v1056_v3  ;;  %539 = vmatprep.mubr.bf16.mxu1 %v1056_v3 }
  0x41   : > { %941 = vmatmul.mubr.msk.bf16.gmra.mxu0 %vm311_vm1, %v1044_v16  ;;  %949 = vmatmul.mubr.msk.bf16.gmra.mxu1 %vm311_vm1, %v1045_v17 }
  0x42   : > { %469 = vmatprep.mubr.bf16.mxu0 %v1056_v3  ;;  %549 = vmatprep.mubr.bf16.mxu1 %v1056_v3 }
  0x49   : > { %942 = vmatmul.mubr.msk.bf16.gmra.mxu0 %vm311_vm1, %v1046_v18  ;;  %950 = vmatmul.mubr.msk.bf16.gmra.mxu1 %vm311_vm1, %v1047_v19 }
  0xd1   : > { %v401_v27 = vpop.f32.mrf.mxu0  ;;  %v481_v29 = vpop.f32.mrf.mxu1 }
  0xd2   : > { %v402_v28 = vadd.f32 %v401_v27, %v1134_v25  ;;  %v482_v30 = vadd.f32 %v481_v29, %v1134_v25 }
  0xd3   : > { %v403_v31 = vpop.f32.mrf.mxu0  ;;  %v483_v33 = vpop.f32.mrf.mxu1 }
  0xd4   : > { %v404_v32 = vadd.f32 %v403_v31, %v1136_v26  ;;  %v484_v34 = vadd.f32 %v483_v33, %v1136_v26  ;;  %v560_v36 = vmax.f32 %v402_v28, 0.0  ;;  %v592_v40 = vmax.f32 %v482_v30, 0.0 }
  0xd5   : > { %v405_v35 = vpop.f32.mrf.mxu0  ;;  %v485_v39 = vpop.f32.mrf.mxu1 }
  0xd6   : > { %v561_v37 = vmax.f32 %v404_v32, 0.0  ;;  %v406_v38 = vadd.f32 %v405_v35, %v1134_v25  ;;  %v593_v41 = vmax.f32 %v484_v34, 0.0  ;;  %v486_v42 = vadd.f32 %v485_v39, %v1134_v25 }
  0xd7   : > { %v407_v43 = vpop.f32.mrf.mxu0  ;;  %v487_v46 = vpop.f32.mrf.mxu1 }
  0xd8   : > { %v986_v44 = vpack.c.bf16 %v561_v37, %v560_v36  ;;  %v408_v45 = vadd.f32 %v407_v43, %v1136_v26  ;;  %v1002_v47 = vpack.c.bf16 %v593_v41, %v592_v40  ;;  %v488_v48 = vadd.f32 %v487_v46, %v1136_v26 }
  0xd9   : > { %v411_v49 = vpop.f32.mrf.mxu0  ;;  %v562_v50 = vmax.f32 %v406_v38, 0.0  ;;  %v491_v53 = vpop.f32.mrf.mxu1  ;;  %v594_v54 = vmax.f32 %v486_v42, 0.0 }
  0xda   : > { %816 = vst [vmem:[%s1147_s28] sm:$0xff] %v986_v44  ;;  %v563_v51 = vmax.f32 %v408_v45, 0.0  ;;  %v412_v52 = vadd.f32 %v411_v49, %v1134_v25  ;;  %832 = vst [vmem:[%s1147_s28 + $0x80] sm:$0xff] %v1002_v47  ;;  %v595_v55 = vmax.f32 %v488_v48, 0.0  ;;  %v492_v56 = vadd.f32 %v491_v53, %v1134_v25 }
  0xdb   : > { %v413_v57 = vpop.f32.mrf.mxu0  ;;  %v493_v60 = vpop.f32.mrf.mxu1 }
  0xdc   : > { %v987_v58 = vpack.c.bf16 %v563_v51, %v562_v50  ;;  %v414_v59 = vadd.f32 %v413_v57, %v1136_v26  ;;  %v1003_v61 = vpack.c.bf16 %v595_v55, %v594_v54  ;;  %v494_v62 = vadd.f32 %v493_v60, %v1136_v26 }
  0xdd   : > { %v415_v63 = vpop.f32.mrf.mxu0  ;;  %v564_v0 = vmax.f32 %v412_v52, 0.0  ;;  %v495_v3 = vpop.f32.mrf.mxu1  ;;  %v596_v4 = vmax.f32 %v492_v56, 0.0 }
  0xde   : > { %817 = vst [vmem:[%s1147_s28 + $0x8] sm:$0xff] %v987_v58  ;;  %v565_v1 = vmax.f32 %v414_v59, 0.0  ;;  %v416_v2 = vadd.f32 %v415_v63, %v1134_v25  ;;  %833 = vst [vmem:[%s1147_s28 + $0x88] sm:$0xff] %v1003_v61  ;;  %v597_v5 = vmax.f32 %v494_v62, 0.0  ;;  %v496_v6 = vadd.f32 %v495_v3, %v1134_v25 }
  0xdf   : > { %v417_v7 = vpop.f32.mrf.mxu0  ;;  %v497_v10 = vpop.f32.mrf.mxu1 }
  0xe0   : > { %v988_v8 = vpack.c.bf16 %v565_v1, %v564_v0  ;;  %v418_v9 = vadd.f32 %v417_v7, %v1136_v26  ;;  %v1004_v11 = vpack.c.bf16 %v597_v5, %v596_v4  ;;  %v498_v12 = vadd.f32 %v497_v10, %v1136_v26 }
  0xe1   : > { %v421_v13 = vpop.f32.mrf.mxu0  ;;  %v566_v14 = vmax.f32 %v416_v2, 0.0  ;;  %v501_v17 = vpop.f32.mrf.mxu1  ;;  %v598_v18 = vmax.f32 %v496_v6, 0.0 }
  0xe2   : > { %818 = vst [vmem:[%s1147_s28 + $0x10] sm:$0xff] %v988_v8  ;;  %v567_v15 = vmax.f32 %v418_v9, 0.0  ;;  %v422_v16 = vadd.f32 %v421_v13, %v1134_v25  ;;  %834 = vst [vmem:[%s1147_s28 + $0x90] sm:$0xff] %v1004_v11  ;;  %v599_v19 = vmax.f32 %v498_v12, 0.0  ;;  %v502_v20 = vadd.f32 %v501_v17, %v1134_v25 }
  0xe3   : > { %v423_v21 = vpop.f32.mrf.mxu0  ;;  %v503_v24 = vpop.f32.mrf.mxu1 }
  0xe4   : > { %v989_v22 = vpack.c.bf16 %v567_v15, %v566_v14  ;;  %v424_v23 = vadd.f32 %v423_v21, %v1136_v26  ;;  %v1005_v27 = vpack.c.bf16 %v599_v19, %v598_v18  ;;  %v504_v28 = vadd.f32 %v503_v24, %v1136_v26 }
  0xe5   : > { %v425_v29 = vpop.f32.mrf.mxu0  ;;  %v568_v30 = vmax.f32 %v422_v16, 0.0  ;;  %v505_v33 = vpop.f32.mrf.mxu1  ;;  %v600_v34 = vmax.f32 %v502_v20, 0.0 }
  0xe6   : > { %819 = vst [vmem:[%s1147_s28 + $0x18] sm:$0xff] %v989_v22  ;;  %v569_v31 = vmax.f32 %v424_v23, 0.0  ;;  %v426_v32 = vadd.f32 %v425_v29, %v1134_v25  ;;  %835 = vst [vmem:[%s1147_s28 + $0x98] sm:$0xff] %v1005_v27  ;;  %v601_v35 = vmax.f32 %v504_v28, 0.0  ;;  %v506_v36 = vadd.f32 %v505_v33, %v1134_v25 }
  0xe7   : > { %v427_v37 = vpop.f32.mrf.mxu0  ;;  %v507_v40 = vpop.f32.mrf.mxu1 }
  0xe8   : > { %v990_v38 = vpack.c.bf16 %v569_v31, %v568_v30  ;;  %v428_v39 = vadd.f32 %v427_v37, %v1136_v26  ;;  %v1006_v41 = vpack.c.bf16 %v601_v35, %v600_v34  ;;  %v508_v42 = vadd.f32 %v507_v40, %v1136_v26 }
  0xe9   : > { %v431_v43 = vpop.f32.mrf.mxu0  ;;  %v570_v44 = vmax.f32 %v426_v32, 0.0  ;;  %v511_v47 = vpop.f32.mrf.mxu1  ;;  %v602_v48 = vmax.f32 %v506_v36, 0.0 }
  0xea   : > { %820 = vst [vmem:[%s1147_s28 + $0x20] sm:$0xff] %v990_v38  ;;  %v571_v45 = vmax.f32 %v428_v39, 0.0  ;;  %v432_v46 = vadd.f32 %v431_v43, %v1134_v25  ;;  %836 = vst [vmem:[%s1147_s28 + $0xa0] sm:$0xff] %v1006_v41  ;;  %v603_v49 = vmax.f32 %v508_v42, 0.0  ;;  %v512_v50 = vadd.f32 %v511_v47, %v1134_v25 }
  0xeb   : > { %v433_v51 = vpop.f32.mrf.mxu0  ;;  %v513_v54 = vpop.f32.mrf.mxu1 }
  0xec   : > { %v991_v52 = vpack.c.bf16 %v571_v45, %v570_v44  ;;  %v434_v53 = vadd.f32 %v433_v51, %v1136_v26  ;;  %v1007_v55 = vpack.c.bf16 %v603_v49, %v602_v48  ;;  %v514_v56 = vadd.f32 %v513_v54, %v1136_v26 }
  0xed   : > { %v435_v57 = vpop.f32.mrf.mxu0  ;;  %v572_v58 = vmax.f32 %v432_v46, 0.0  ;;  %v515_v61 = vpop.f32.mrf.mxu1  ;;  %v604_v62 = vmax.f32 %v512_v50, 0.0 }
  0xee   : > { %821 = vst [vmem:[%s1147_s28 + $0x28] sm:$0xff] %v991_v52  ;;  %v573_v59 = vmax.f32 %v434_v53, 0.0  ;;  %v436_v60 = vadd.f32 %v435_v57, %v1134_v25  ;;  %837 = vst [vmem:[%s1147_s28 + $0xa8] sm:$0xff] %v1007_v55  ;;  %v605_v63 = vmax.f32 %v514_v56, 0.0  ;;  %v516_v0 = vadd.f32 %v515_v61, %v1134_v25 }
  0xef   : > { %v437_v1 = vpop.f32.mrf.mxu0  ;;  %v517_v4 = vpop.f32.mrf.mxu1 }
  0xf0   : > { %v992_v2 = vpack.c.bf16 %v573_v59, %v572_v58  ;;  %v438_v3 = vadd.f32 %v437_v1, %v1136_v26  ;;  %v1008_v5 = vpack.c.bf16 %v605_v63, %v604_v62  ;;  %v518_v6 = vadd.f32 %v517_v4, %v1136_v26 }
  0xf1   : > { %v441_v7 = vpop.f32.mrf.mxu0  ;;  %v574_v8 = vmax.f32 %v436_v60, 0.0  ;;  %v521_v11 = vpop.f32.mrf.mxu1  ;;  %v606_v12 = vmax.f32 %v516_v0, 0.0 }
  0xf2   : > { %822 = vst [vmem:[%s1147_s28 + $0x30] sm:$0xff] %v992_v2  ;;  %v575_v9 = vmax.f32 %v438_v3, 0.0  ;;  %v442_v10 = vadd.f32 %v441_v7, %v1134_v25  ;;  %838 = vst [vmem:[%s1147_s28 + $0xb0] sm:$0xff] %v1008_v5  ;;  %v607_v13 = vmax.f32 %v518_v6, 0.0  ;;  %v522_v14 = vadd.f32 %v521_v11, %v1134_v25 }
  0xf3   : > { %v443_v15 = vpop.f32.mrf.mxu0  ;;  %v523_v18 = vpop.f32.mrf.mxu1 }
  0xf4   : > { %v993_v16 = vpack.c.bf16 %v575_v9, %v574_v8  ;;  %v444_v17 = vadd.f32 %v443_v15, %v1136_v26  ;;  %v1009_v19 = vpack.c.bf16 %v607_v13, %v606_v12  ;;  %v524_v20 = vadd.f32 %v523_v18, %v1136_v26 }
  0xf5   : > { %v445_v21 = vpop.f32.mrf.mxu0  ;;  %v576_v22 = vmax.f32 %v442_v10, 0.0  ;;  %v525_v27 = vpop.f32.mrf.mxu1  ;;  %v608_v28 = vmax.f32 %v522_v14, 0.0 }
  0xf6   : > { %823 = vst [vmem:[%s1147_s28 + $0x38] sm:$0xff] %v993_v16  ;;  %v577_v23 = vmax.f32 %v444_v17, 0.0  ;;  %v446_v24 = vadd.f32 %v445_v21, %v1134_v25  ;;  %839 = vst [vmem:[%s1147_s28 + $0xb8] sm:$0xff] %v1009_v19  ;;  %v609_v29 = vmax.f32 %v524_v20, 0.0  ;;  %v526_v30 = vadd.f32 %v525_v27, %v1134_v25 }
  0xf7   : > { %v447_v31 = vpop.f32.mrf.mxu0  ;;  %v527_v34 = vpop.f32.mrf.mxu1 }
  0xf8   : > { %v994_v32 = vpack.c.bf16 %v577_v23, %v576_v22  ;;  %v448_v33 = vadd.f32 %v447_v31, %v1136_v26  ;;  %v1010_v35 = vpack.c.bf16 %v609_v29, %v608_v28  ;;  %v528_v36 = vadd.f32 %v527_v34, %v1136_v26 }
  0xf9   : > { %v451_v37 = vpop.f32.mrf.mxu0  ;;  %v578_v38 = vmax.f32 %v446_v24, 0.0  ;;  %v531_v41 = vpop.f32.mrf.mxu1  ;;  %v610_v42 = vmax.f32 %v526_v30, 0.0 }
  0xfa   : > { %824 = vst [vmem:[%s1147_s28 + $0x40] sm:$0xff] %v994_v32  ;;  %v579_v39 = vmax.f32 %v448_v33, 0.0  ;;  %v452_v40 = vadd.f32 %v451_v37, %v1134_v25  ;;  %840 = vst [vmem:[%s1147_s28 + $0xc0] sm:$0xff] %v1010_v35  ;;  %v611_v43 = vmax.f32 %v528_v36, 0.0  ;;  %v532_v44 = vadd.f32 %v531_v41, %v1134_v25 }
  0xfb   : > { %v453_v45 = vpop.f32.mrf.mxu0  ;;  %v533_v48 = vpop.f32.mrf.mxu1 }
  0xfc   : > { %v995_v46 = vpack.c.bf16 %v579_v39, %v578_v38  ;;  %v454_v47 = vadd.f32 %v453_v45, %v1136_v26  ;;  %v1011_v49 = vpack.c.bf16 %v611_v43, %v610_v42  ;;  %v534_v50 = vadd.f32 %v533_v48, %v1136_v26 }
  0xfd   : > { %v455_v51 = vpop.f32.mrf.mxu0  ;;  %v580_v52 = vmax.f32 %v452_v40, 0.0  ;;  %v535_v55 = vpop.f32.mrf.mxu1  ;;  %v612_v56 = vmax.f32 %v532_v44, 0.0 }
  0xfe   : > { %825 = vst [vmem:[%s1147_s28 + $0x48] sm:$0xff] %v995_v46  ;;  %v581_v53 = vmax.f32 %v454_v47, 0.0  ;;  %v456_v54 = vadd.f32 %v455_v51, %v1134_v25  ;;  %841 = vst [vmem:[%s1147_s28 + $0xc8] sm:$0xff] %v1011_v49  ;;  %v613_v57 = vmax.f32 %v534_v50, 0.0  ;;  %v536_v58 = vadd.f32 %v535_v55, %v1134_v25 }
  0xff   : > { %v457_v59 = vpop.f32.mrf.mxu0  ;;  %v537_v62 = vpop.f32.mrf.mxu1 }
 0x100   : > { %v996_v60 = vpack.c.bf16 %v581_v53, %v580_v52  ;;  %v458_v61 = vadd.f32 %v457_v59, %v1136_v26  ;;  %v1012_v63 = vpack.c.bf16 %v613_v57, %v612_v56  ;;  %v538_v0 = vadd.f32 %v537_v62, %v1136_v26 }
 0x101   : > { %v461_v1 = vpop.f32.mrf.mxu0  ;;  %v582_v2 = vmax.f32 %v456_v54, 0.0  ;;  %v541_v5 = vpop.f32.mrf.mxu1  ;;  %v614_v6 = vmax.f32 %v536_v58, 0.0 }
 0x102   : > { %826 = vst [vmem:[%s1147_s28 + $0x50] sm:$0xff] %v996_v60  ;;  %v583_v3 = vmax.f32 %v458_v61, 0.0  ;;  %v462_v4 = vadd.f32 %v461_v1, %v1134_v25  ;;  %842 = vst [vmem:[%s1147_s28 + $0xd0] sm:$0xff] %v1012_v63  ;;  %v615_v7 = vmax.f32 %v538_v0, 0.0  ;;  %v542_v8 = vadd.f32 %v541_v5, %v1134_v25 }
 0x103   : > { %v463_v9 = vpop.f32.mrf.mxu0  ;;  %v543_v12 = vpop.f32.mrf.mxu1 }
 0x104   : > { %v997_v10 = vpack.c.bf16 %v583_v3, %v582_v2  ;;  %v464_v11 = vadd.f32 %v463_v9, %v1136_v26  ;;  %v1013_v13 = vpack.c.bf16 %v615_v7, %v614_v6  ;;  %v544_v14 = vadd.f32 %v543_v12, %v1136_v26 }
 0x105   : > { %v465_v15 = vpop.f32.mrf.mxu0  ;;  %v584_v16 = vmax.f32 %v462_v4, 0.0  ;;  %v545_v19 = vpop.f32.mrf.mxu1  ;;  %v616_v20 = vmax.f32 %v542_v8, 0.0 }
 0x106   : > { %827 = vst [vmem:[%s1147_s28 + $0x58] sm:$0xff] %v997_v10  ;;  %v585_v17 = vmax.f32 %v464_v11, 0.0  ;;  %v466_v18 = vadd.f32 %v465_v15, %v1134_v25  ;;  %843 = vst [vmem:[%s1147_s28 + $0xd8] sm:$0xff] %v1013_v13  ;;  %v617_v21 = vmax.f32 %v544_v14, 0.0  ;;  %v546_v22 = vadd.f32 %v545_v19, %v1134_v25 }
 0x107   : > { %v467_v23 = vpop.f32.mrf.mxu0  ;;  %v547_v28 = vpop.f32.mrf.mxu1 }
 0x108   : > { %v998_v24 = vpack.c.bf16 %v585_v17, %v584_v16  ;;  %v468_v27 = vadd.f32 %v467_v23, %v1136_v26  ;;  %v1014_v29 = vpack.c.bf16 %v617_v21, %v616_v20  ;;  %v548_v30 = vadd.f32 %v547_v28, %v1136_v26 }
 0x109   : > { %v471_v31 = vpop.f32.mrf.mxu0  ;;  %v586_v32 = vmax.f32 %v466_v18, 0.0  ;;  %v551_v35 = vpop.f32.mrf.mxu1  ;;  %v618_v36 = vmax.f32 %v546_v22, 0.0 }
 0x10a   : > { %828 = vst [vmem:[%s1147_s28 + $0x60] sm:$0xff] %v998_v24  ;;  %v587_v33 = vmax.f32 %v468_v27, 0.0  ;;  %v472_v34 = vadd.f32 %v471_v31, %v1134_v25  ;;  %844 = vst [vmem:[%s1147_s28 + $0xe0] sm:$0xff] %v1014_v29  ;;  %v619_v37 = vmax.f32 %v548_v30, 0.0  ;;  %v552_v38 = vadd.f32 %v551_v35, %v1134_v25 }
 0x10b   : > { %v473_v39 = vpop.f32.mrf.mxu0  ;;  %v553_v42 = vpop.f32.mrf.mxu1 }
 0x10c   : > { %v999_v40 = vpack.c.bf16 %v587_v33, %v586_v32  ;;  %v474_v41 = vadd.f32 %v473_v39, %v1136_v26  ;;  %v1015_v43 = vpack.c.bf16 %v619_v37, %v618_v36  ;;  %v554_v44 = vadd.f32 %v553_v42, %v1136_v26 }
 0x10d   : > { %v475_v45 = vpop.f32.mrf.mxu0  ;;  %v588_v46 = vmax.f32 %v472_v34, 0.0  ;;  %v555_v49 = vpop.f32.mrf.mxu1  ;;  %v620_v50 = vmax.f32 %v552_v38, 0.0 }
 0x10e   : > { %829 = vst [vmem:[%s1147_s28 + $0x68] sm:$0xff] %v999_v40  ;;  %v589_v47 = vmax.f32 %v474_v41, 0.0  ;;  %v476_v48 = vadd.f32 %v475_v45, %v1134_v25  ;;  %845 = vst [vmem:[%s1147_s28 + $0xe8] sm:$0xff] %v1015_v43  ;;  %v621_v51 = vmax.f32 %v554_v44, 0.0  ;;  %v556_v52 = vadd.f32 %v555_v49, %v1134_v25 }
 0x10f   : > { %v477_v53 = vpop.f32.mrf.mxu0  ;;  %v557_v56 = vpop.f32.mrf.mxu1 }
 0x110   : > { %v1000_v54 = vpack.c.bf16 %v589_v47, %v588_v46  ;;  %v478_v55 = vadd.f32 %v477_v53, %v1136_v26  ;;  %v1016_v57 = vpack.c.bf16 %v621_v51, %v620_v50  ;;  %v558_v58 = vadd.f32 %v557_v56, %v1136_v26 }
 0x111   : > { %v590_v59 = vmax.f32 %v476_v48, 0.0  ;;  %v622_v61 = vmax.f32 %v556_v52, 0.0 }
 0x112   : > { %830 = vst [vmem:[%s1147_s28 + $0x70] sm:$0xff] %v1000_v54  ;;  %v591_v60 = vmax.f32 %v478_v55, 0.0  ;;  %846 = vst [vmem:[%s1147_s28 + $0xf0] sm:$0xff] %v1016_v57  ;;  %v623_v62 = vmax.f32 %v558_v58, 0.0 }
 0x114   : > { %v1001_v63 = vpack.c.bf16 %v591_v60, %v590_v59  ;;  %v1017_v0 = vpack.c.bf16 %v623_v62, %v622_v61 }
 0x116   : > { %831 = vst [vmem:[%s1147_s28 + $0x78] sm:$0xff] %v1001_v63  ;;  %847 = vst [vmem:[%s1147_s28 + $0xf8] sm:$0xff] %v1017_v0 }
 0x117 PF: > { %s13_s12 = sadd.s32 1, %s1054_s12  }
 0x118   : > { %p10_p4 = scmp.ge.s32.totalorder %s13_s12, 4  }
 0x11a   :  { %12 = sbr.rel (!%p10_p4) target bundleno = 1 (0x1), region = 62 }

// kernel: _lambda_.6
= control target key start
LH: loop header
LB: loop body
LE: loop exit
PB: predicated region body
PF: predicated region fallthrough
CT: control target
= control target key end

     0   :  { %s7319_s12 = smov 0   ;;  %s9435_s0 = inlined_call_operand.vmem [shape: bf16[512,2304], index: 0, kind: input, shape index: {}]   ;;  %s9436_s1 = inlined_call_operand.vmem [shape: bf16[2304,192], index: 1, kind: input, shape index: {}]   ;;  %s9437_s2 = inlined_call_operand.vmem [shape: f32[1,192], index: 2, kind: input, shape index: {}]   ;;  %s9438_s3 = inlined_call_operand.vmem [shape: bf16[512,192], index: 3, kind: output, shape index: {}]  }
   0x1 LB: > { %s5733_s13 = sadd.s32 4294967295, %s7297_s12   ;;  %p5737_p0 = scmp.ge.s32.totalorder %s7297_s12, 1  ;;  %s7297_s12 = sphi %s7319_s12, %s13_s12  }
   0x2   : > { %p139_p1 = scmp.lt.s32.totalorder %s7297_s12, 3 }
   0x4   : > { %p140_p2 = pnand %p5737_p0, %p139_p1 }
   0x6   : > { %143 = sbr.rel (%p140_p2) target bundleno = 852 (0x354), region = 32 }
   0xb   : > { %v6427_v0 = vld [vmem:[%s9436_s1 + $0x74] ss:$8 sps:$4 sm:$0xff]   ;;  %v6429_v1 = vld [vmem:[%s9436_s1 + $0x70] ss:$8 sps:$4 sm:$0xff]   ;;  %v6430_v2 = vld [vmem:[%s9436_s1 + $0x64] ss:$8 sps:$4 sm:$0xff]  }
   0xc   : > { %3647 = vmatprep.subr.bf16.mxu0 %v6427_v0  ;;  %6386 = vmatprep.subr.bf16.mxu1 %v6427_v0  ;;  %v6432_v3 = vld [vmem:[%s9436_s1 + $0x60] ss:$8 sps:$4 sm:$0xff]   ;;  %v6433_v4 = vld [vmem:[%s9436_s1 + $0x54] ss:$8 sps:$4 sm:$0xff]   ;;  %s5738_s24 = sshll.u32 %s5733_s13, 5  ;;  %vm5640_vm0 = vcmask 1043456  }
   0xd   : > { %3648 = vmatpush1.bf16.msra.mxu0 %v6429_v1  ;;  %6402 = vmatpush1.bf16.msra.mxu1 %v6429_v1  ;;  %v6435_v5 = vld [vmem:[%s9436_s1 + $0x50] ss:$8 sps:$4 sm:$0xff]   ;;  %p166_p3 = scmp.lt.s32.totalorder %s5738_s24, 63  ;;  %v6436_v6 = vld [vmem:[%s9436_s1 + $0x44] ss:$8 sps:$4 sm:$0xff]   ;;  %vm5641_vm1 = vcmask 523268  }
   0xe   : > { %3649 = vmatprep.subr.bf16.mxu0 %v6430_v2  ;;  %6387 = vmatprep.subr.bf16.mxu1 %v6430_v2  ;;  %v6438_v7 = vld [vmem:[%s9436_s1 + $0x40] ss:$8 sps:$4 sm:$0xff]   ;;  %v6439_v8 = vld [vmem:[%s9436_s1 + $0x34] ss:$8 sps:$4 sm:$0xff]   ;;  %v6441_v9 = vld [vmem:[%s9436_s1 + $0x30] ss:$8 sps:$4 sm:$0xff]  }
   0xf   : > { %s9586_s24 = smov (!%p166_p3, %s5738_s24), 63  ;;  %v6442_v10 = vld [vmem:[%s9436_s1 + $0x24] ss:$8 sps:$4 sm:$0xff]   ;;  %v6444_v11 = vld [vmem:[%s9436_s1 + $0x20] ss:$8 sps:$4 sm:$0xff]   ;;  %vm9272_vm2 = vmor %vm5641_vm1, %vm5640_vm0 }
  0x10   : > { %s6418_s8 = smul.u32 72, %s9586_s24  ;;  %v6445_v12 = vld [vmem:[%s9436_s1 + $0x14] ss:$8 sps:$4 sm:$0xff]   ;;  %v6447_v14 = vld [vmem:[%s9436_s1 + $0x10] ss:$8 sps:$4 sm:$0xff]  }
  0x11   : > { %3650 = vmatpush1.bf16.msra.mxu0 %v6432_v3  ;;  %6403 = vmatpush1.bf16.msra.mxu1 %v6432_v3  ;;  %v6448_v16 = vld [vmem:[%s9436_s1 + $0x4] ss:$8 sps:$4 sm:$0xff]   ;;  %v6450_v17 = vld [vmem:[%s9436_s1] ss:$8 sps:$4 sm:$0xff]   ;;  %v6451_v18 = vld [vmem:[%s9436_s1 + $0xf4] ss:$8 sps:$4 sm:$0xff]  }
  0x12   : > { %3651 = vmatprep.subr.bf16.mxu0 %v6433_v4  ;;  %6388 = vmatprep.subr.bf16.mxu1 %v6433_v4  ;;  %s7369_s16 = scalar_lea.vmem %s9435_s0, %s6418_s8  ;;  %v6453_v19 = vld [vmem:[%s9436_s1 + $0xf0] ss:$8 sps:$4 sm:$0xff]   ;;  %v6454_v20 = vld [vmem:[%s9436_s1 + $0xe4] ss:$8 sps:$4 sm:$0xff]   ;;  %v6456_v21 = vld [vmem:[%s9436_s1 + $0xe0] ss:$8 sps:$4 sm:$0xff]  }
  0x13   : > { %v6477_v13 = vld [vmem:[%s7369_s16 + $0x4] ss:$72 sps:$4 sm:$0xff]   ;;  %v6457_v22 = vld [vmem:[%s9436_s1 + $0xd4] ss:$8 sps:$4 sm:$0xff]   ;;  %v6459_v23 = vld [vmem:[%s9436_s1 + $0xd0] ss:$8 sps:$4 sm:$0xff]  }
  0x14   : > { %v6480_v15 = vld [vmem:[%s7369_s16 + $0x484] ss:$72 sps:$4 sm:$0xff]   ;;  %3679 = vmatprep.mubr.bf16.mxu0 %v6477_v13  ;;  %v6462_v25 = vld [vmem:[%s9436_s1 + $0xc0] ss:$8 sps:$4 sm:$0xff]   ;;  %v6463_v26 = vld [vmem:[%s9436_s1 + $0xb4] ss:$8 sps:$4 sm:$0xff]  }
  0x15   : > { %3652 = vmatpush1.bf16.msra.mxu0 %v6435_v5  ;;  %6404 = vmatpush1.bf16.msra.mxu1 %v6435_v5  ;;  %v6460_v24 = vld [vmem:[%s9436_s1 + $0xc4] ss:$8 sps:$4 sm:$0xff]   ;;  %v6465_v27 = vld [vmem:[%s9436_s1 + $0xb0] ss:$8 sps:$4 sm:$0xff]   ;;  %v6468_v29 = vld [vmem:[%s9436_s1 + $0xa0] ss:$8 sps:$4 sm:$0xff]  }
  0x16   : > { %3653 = vmatprep.subr.bf16.mxu0 %v6436_v6  ;;  %6389 = vmatprep.subr.bf16.mxu1 %v6436_v6  ;;  %v6466_v28 = vld [vmem:[%s9436_s1 + $0xa4] ss:$8 sps:$4 sm:$0xff]   ;;  %v6469_v30 = vld [vmem:[%s9436_s1 + $0x94] ss:$8 sps:$4 sm:$0xff]   ;;  %v6471_v31 = vld [vmem:[%s9436_s1 + $0x90] ss:$8 sps:$4 sm:$0xff]  }
  0x17   : > { %3759 = vmatprep.mubr.bf16.mxu1 %v6480_v15  ;;  %v6472_v32 = vld [vmem:[%s9436_s1 + $0x84] ss:$8 sps:$4 sm:$0xff]   ;;  %v6474_v33 = vld [vmem:[%s9436_s1 + $0x80] ss:$8 sps:$4 sm:$0xff]   ;;  %v6483_v34 = vld [vmem:[%s9436_s1 + $0x174] ss:$8 sps:$4 sm:$0xff]  }
  0x18   : > { %v6475_v35 = vld [vmem:[%s7369_s16] ss:$72 sps:$4 sm:$0xff]   ;;  %v6486_v36 = vld [vmem:[%s9436_s1 + $0x274] ss:$8 sps:$4 sm:$0xff]   ;;  %v6481_v38 = vld [vmem:[%s9436_s1 + $0x170] ss:$8 sps:$4 sm:$0xff]  }
  0x19   : > { %3654 = vmatpush1.bf16.msra.mxu0 %v6438_v7  ;;  %6405 = vmatpush1.bf16.msra.mxu1 %v6438_v7  ;;  %v6478_v37 = vld [vmem:[%s7369_s16 + $0x480] ss:$72 sps:$4 sm:$0xff]   ;;  %v6484_v39 = vld [vmem:[%s9436_s1 + $0x270] ss:$8 sps:$4 sm:$0xff]   ;;  %v6489_v40 = vld [vmem:[%s9436_s1 + $0x164] ss:$8 sps:$4 sm:$0xff]  }
  0x1a   : > { %3655 = vmatprep.subr.bf16.mxu0 %v6439_v8  ;;  %6390 = vmatprep.subr.bf16.mxu1 %v6439_v8  ;;  %v6492_v41 = vld [vmem:[%s9436_s1 + $0x264] ss:$8 sps:$4 sm:$0xff]   ;;  %v6493_v42 = vld [vmem:[%s7369_s16 + $0x94] ss:$72 sps:$4 sm:$0xff]   ;;  %v6487_v44 = vld [vmem:[%s9436_s1 + $0x160] ss:$8 sps:$4 sm:$0xff]  }
  0x1b   : > { %v6495_v43 = vld [vmem:[%s7369_s16 + $0x514] ss:$72 sps:$4 sm:$0xff]   ;;  %v6490_v45 = vld [vmem:[%s9436_s1 + $0x260] ss:$8 sps:$4 sm:$0xff]   ;;  %v6497_v47 = vld [vmem:[%s7369_s16 + $0x90] ss:$72 sps:$4 sm:$0xff]  }
  0x1c   : > { %v6501_v46 = vld [vmem:[%s9436_s1 + $0x154] ss:$8 sps:$4 sm:$0xff]   ;;  %v6498_v49 = vld [vmem:[%s7369_s16 + $0x510] ss:$72 sps:$4 sm:$0xff]   ;;  %v6507_v52 = vld [vmem:[%s9436_s1 + $0x144] ss:$8 sps:$4 sm:$0xff]  }
  0x1d   : > { %3656 = vmatpush1.bf16.msra.mxu0 %v6441_v9  ;;  %6406 = vmatpush1.bf16.msra.mxu1 %v6441_v9  ;;  %v6504_v48 = vld [vmem:[%s9436_s1 + $0x254] ss:$8 sps:$4 sm:$0xff]   ;;  %v6499_v50 = vld [vmem:[%s9436_s1 + $0x150] ss:$8 sps:$4 sm:$0xff]   ;;  %v6510_v53 = vld [vmem:[%s9436_s1 + $0x244] ss:$8 sps:$4 sm:$0xff]  }
  0x1e   : > { %3657 = vmatprep.subr.bf16.mxu0 %v6442_v10  ;;  %6391 = vmatprep.subr.bf16.mxu1 %v6442_v10  ;;  %v6502_v51 = vld [vmem:[%s9436_s1 + $0x250] ss:$8 sps:$4 sm:$0xff]   ;;  %v6511_v54 = vld [vmem:[%s7369_s16 + $0x124] ss:$72 sps:$4 sm:$0xff]   ;;  %v6505_v56 = vld [vmem:[%s9436_s1 + $0x140] ss:$8 sps:$4 sm:$0xff]  }
  0x1f   : > { %v6513_v55 = vld [vmem:[%s7369_s16 + $0x5a4] ss:$72 sps:$4 sm:$0xff]   ;;  %v6508_v57 = vld [vmem:[%s9436_s1 + $0x240] ss:$8 sps:$4 sm:$0xff]   ;;  %v6519_v58 = vld [vmem:[%s9436_s1 + $0x134] ss:$8 sps:$4 sm:$0xff]  }
  0x20   : > { %v6515_v59 = vld [vmem:[%s7369_s16 + $0x120] ss:$72 sps:$4 sm:$0xff]   ;;  %v6522_v60 = vld [vmem:[%s9436_s1 + $0x234] ss:$8 sps:$4 sm:$0xff]   ;;  %v6517_v62 = vld [vmem:[%s9436_s1 + $0x130] ss:$8 sps:$4 sm:$0xff]  }
  0x21   : > { %3658 = vmatpush1.bf16.msra.mxu0 %v6444_v11  ;;  %6407 = vmatpush1.bf16.msra.mxu1 %v6444_v11  ;;  %v6516_v61 = vld [vmem:[%s7369_s16 + $0x5a0] ss:$72 sps:$4 sm:$0xff]   ;;  %v6520_v63 = vld [vmem:[%s9436_s1 + $0x230] ss:$8 sps:$4 sm:$0xff]   ;;  %v6525_v0 = vld [vmem:[%s9436_s1 + $0x124] ss:$8 sps:$4 sm:$0xff]  }
  0x22   : > { %3659 = vmatprep.subr.bf16.mxu0 %v6445_v12  ;;  %6392 = vmatprep.subr.bf16.mxu1 %v6445_v12  ;;  %v6528_v1 = vld [vmem:[%s9436_s1 + $0x224] ss:$8 sps:$4 sm:$0xff]   ;;  %v6529_v2 = vld [vmem:[%s7369_s16 + $0x1b4] ss:$72 sps:$4 sm:$0xff]   ;;  %v6523_v4 = vld [vmem:[%s9436_s1 + $0x120] ss:$8 sps:$4 sm:$0xff]  }
  0x23   : > { %v6531_v3 = vld [vmem:[%s7369_s16 + $0x634] ss:$72 sps:$4 sm:$0xff]   ;;  %v6526_v5 = vld [vmem:[%s9436_s1 + $0x220] ss:$8 sps:$4 sm:$0xff]   ;;  %v6533_v7 = vld [vmem:[%s7369_s16 + $0x1b0] ss:$72 sps:$4 sm:$0xff]  }
  0x24   : > { %v6537_v6 = vld [vmem:[%s9436_s1 + $0x114] ss:$8 sps:$4 sm:$0xff]   ;;  %v6534_v9 = vld [vmem:[%s7369_s16 + $0x630] ss:$72 sps:$4 sm:$0xff]   ;;  %v6543_v12 = vld [vmem:[%s9436_s1 + $0x104] ss:$8 sps:$4 sm:$0xff]  }
  0x25   : > { %3660 = vmatpush1.bf16.msra.mxu0 %v6447_v14  ;;  %6408 = vmatpush1.bf16.msra.mxu1 %v6447_v14  ;;  %v6540_v8 = vld [vmem:[%s9436_s1 + $0x214] ss:$8 sps:$4 sm:$0xff]   ;;  %v6535_v10 = vld [vmem:[%s9436_s1 + $0x110] ss:$8 sps:$4 sm:$0xff]   ;;  %v6546_v13 = vld [vmem:[%s9436_s1 + $0x204] ss:$8 sps:$4 sm:$0xff]  }
  0x26   : > { %3661 = vmatprep.subr.bf16.mxu0 %v6448_v16  ;;  %6393 = vmatprep.subr.bf16.mxu1 %v6448_v16  ;;  %v6538_v11 = vld [vmem:[%s9436_s1 + $0x210] ss:$8 sps:$4 sm:$0xff]   ;;  %v6547_v14 = vld [vmem:[%s7369_s16 + $0x244] ss:$72 sps:$4 sm:$0xff]   ;;  %v6541_v16 = vld [vmem:[%s9436_s1 + $0x100] ss:$8 sps:$4 sm:$0xff]  }
  0x27   : > { %v6549_v15 = vld [vmem:[%s7369_s16 + $0x6c4] ss:$72 sps:$4 sm:$0xff]  }
  0x29   : > { %3662 = vmatpush1.bf16.msra.mxu0 %v6450_v17  ;;  %6409 = vmatpush1.bf16.msra.mxu1 %v6450_v17  ;;  %v6544_v17 = vld [vmem:[%s9436_s1 + $0x200] ss:$8 sps:$4 sm:$0xff]  }
  0x2a   : > { %3663 = vmatprep.subr.bf16.mxu0 %v6451_v18  ;;  %6394 = vmatprep.subr.bf16.mxu1 %v6451_v18  ;;  %v6551_v18 = vld [vmem:[%s7369_s16 + $0x240] ss:$72 sps:$4 sm:$0xff]  }
  0x2d   : > { %3664 = vmatpush2.bf16.msra.mxu0 %v6453_v19  ;;  %6410 = vmatpush2.bf16.msra.mxu1 %v6453_v19  ;;  %v6555_v19 = vld [vmem:[%s9436_s1 + $0x1f4] ss:$8 sps:$4 sm:$0xff]  }
  0x2e   : > { %3665 = vmatprep.subr.bf16.mxu0 %v6454_v20  ;;  %6395 = vmatprep.subr.bf16.mxu1 %v6454_v20  ;;  %v6558_v20 = vld [vmem:[%s9436_s1 + $0x2f4] ss:$8 sps:$4 sm:$0xff]  }
  0x31   : > { %3666 = vmatpush2.bf16.msra.mxu0 %v6456_v21  ;;  %6411 = vmatpush2.bf16.msra.mxu1 %v6456_v21  ;;  %v6552_v21 = vld [vmem:[%s7369_s16 + $0x6c0] ss:$72 sps:$4 sm:$0xff]  }
  0x32   : > { %3667 = vmatprep.subr.bf16.mxu0 %v6457_v22  ;;  %6396 = vmatprep.subr.bf16.mxu1 %v6457_v22  ;;  %v6553_v22 = vld [vmem:[%s9436_s1 + $0x1f0] ss:$8 sps:$4 sm:$0xff]  }
  0x35   : > { %3668 = vmatpush2.bf16.msra.mxu0 %v6459_v23  ;;  %6412 = vmatpush2.bf16.msra.mxu1 %v6459_v23  ;;  %v6556_v23 = vld [vmem:[%s9436_s1 + $0x2f0] ss:$8 sps:$4 sm:$0xff]  }
  0x36   : > { %3669 = vmatprep.subr.bf16.mxu0 %v6460_v24  ;;  %6397 = vmatprep.subr.bf16.mxu1 %v6460_v24  ;;  %v6561_v24 = vld [vmem:[%s9436_s1 + $0x1e4] ss:$8 sps:$4 sm:$0xff]  }
  0x39   : > { %3670 = vmatpush2.bf16.msra.mxu0 %v6462_v25  ;;  %6413 = vmatpush2.bf16.msra.mxu1 %v6462_v25  ;;  %v6564_v25 = vld [vmem:[%s9436_s1 + $0x2e4] ss:$8 sps:$4 sm:$0xff]  }
  0x3a   : > { %3671 = vmatprep.subr.bf16.mxu0 %v6463_v26  ;;  %6398 = vmatprep.subr.bf16.mxu1 %v6463_v26  ;;  %v6565_v26 = vld [vmem:[%s7369_s16 + $0x2d4] ss:$72 sps:$4 sm:$0xff]  }
  0x3d   : > { %3672 = vmatpush2.bf16.msra.mxu0 %v6465_v27  ;;  %6414 = vmatpush2.bf16.msra.mxu1 %v6465_v27  ;;  %v6567_v27 = vld [vmem:[%s7369_s16 + $0x754] ss:$72 sps:$4 sm:$0xff]  }
  0x3e   : > { %3673 = vmatprep.subr.bf16.mxu0 %v6466_v28  ;;  %6399 = vmatprep.subr.bf16.mxu1 %v6466_v28  ;;  %v6559_v28 = vld [vmem:[%s9436_s1 + $0x1e0] ss:$8 sps:$4 sm:$0xff]  }
  0x41   : > { %3674 = vmatpush2.bf16.msra.mxu0 %v6468_v29  ;;  %6415 = vmatpush2.bf16.msra.mxu1 %v6468_v29  ;;  %v6562_v29 = vld [vmem:[%s9436_s1 + $0x2e0] ss:$8 sps:$4 sm:$0xff]  }
  0x42   : > { %3675 = vmatprep.subr.bf16.mxu0 %v6469_v30  ;;  %6400 = vmatprep.subr.bf16.mxu1 %v6469_v30  ;;  %v6573_v30 = vld [vmem:[%s9436_s1 + $0x1d4] ss:$8 sps:$4 sm:$0xff]  }
  0x45   : > { %3676 = vmatpush2.bf16.msra.mxu0 %v6471_v31  ;;  %6416 = vmatpush2.bf16.msra.mxu1 %v6471_v31  ;;  %v6569_v31 = vld [vmem:[%s7369_s16 + $0x2d0] ss:$72 sps:$4 sm:$0xff]  }
  0x46   : > { %3677 = vmatprep.subr.bf16.mxu0 %v6472_v32  ;;  %6401 = vmatprep.subr.bf16.mxu1 %v6472_v32  ;;  %v6576_v32 = vld [vmem:[%s9436_s1 + $0x2d4] ss:$8 sps:$4 sm:$0xff]  }
  0x49   : > { %3678 = vmatpush2.bf16.msra.mxu0 %v6474_v33  ;;  %6417 = vmatpush2.bf16.msra.mxu1 %v6474_v33  ;;  %v6570_v33 = vld [vmem:[%s7369_s16 + $0x750] ss:$72 sps:$4 sm:$0xff]  }
  0x4a   : > { %3840 = vmatprep.subr.bf16.mxu1 %v6483_v34  ;;  %4033 = vmatprep.subr.bf16.mxu0 %v6486_v36  ;;  %v6571_v34 = vld [vmem:[%s9436_s1 + $0x1d0] ss:$8 sps:$4 sm:$0xff]   ;;  %v6579_v36 = vld [vmem:[%s9436_s1 + $0x1c4] ss:$8 sps:$4 sm:$0xff]  }
  0x4c   : > { %3680 = vmatmul.mubr.bf16.vlgmr.msra.gmra.mxu0 %v6475_v35  ;;  %3760 = vmatmul.mubr.bf16.vlgmr.msra.gmra.mxu1 %v6478_v37  ;;  %v6574_v35 = vld [vmem:[%s9436_s1 + $0x2d0] ss:$8 sps:$4 sm:$0xff]   ;;  %v6582_v37 = vld [vmem:[%s9436_s1 + $0x2c4] ss:$8 sps:$4 sm:$0xff]  }
  0x4d   : > { %3841 = vmatpush1.bf16.msra.mxu1 %v6481_v38  ;;  %4034 = vmatpush1.bf16.msra.mxu0 %v6484_v39  ;;  %v6583_v38 = vld [vmem:[%s7369_s16 + $0x364] ss:$72 sps:$4 sm:$0xff]  }
  0x4e   : > { %3842 = vmatprep.subr.bf16.mxu1 %v6489_v40  ;;  %4035 = vmatprep.subr.bf16.mxu0 %v6492_v41  ;;  %v6585_v39 = vld [vmem:[%s7369_s16 + $0x7e4] ss:$72 sps:$4 sm:$0xff]   ;;  %v6577_v40 = vld [vmem:[%s9436_s1 + $0x1c0] ss:$8 sps:$4 sm:$0xff]  }
  0x4f   : > { %3689 = vmatprep.mubr.bf16.mxu0 %v6493_v42  ;;  %3769 = vmatprep.mubr.bf16.mxu1 %v6495_v43  ;;  %v6580_v41 = vld [vmem:[%s9436_s1 + $0x2c0] ss:$8 sps:$4 sm:$0xff]   ;;  %v6591_v43 = vld [vmem:[%s9436_s1 + $0x1b4] ss:$8 sps:$4 sm:$0xff]  }
  0x50   : > { %v6587_v42 = vld [vmem:[%s7369_s16 + $0x360] ss:$72 sps:$4 sm:$0xff]  }
  0x51   : > { %3843 = vmatpush1.bf16.msra.mxu1 %v6487_v44  ;;  %4036 = vmatpush1.bf16.msra.mxu0 %v6490_v45  ;;  %v6594_v44 = vld [vmem:[%s9436_s1 + $0x2b4] ss:$8 sps:$4 sm:$0xff]   ;;  %v6588_v45 = vld [vmem:[%s7369_s16 + $0x7e0] ss:$72 sps:$4 sm:$0xff]  }
  0x52   : > { %3844 = vmatprep.subr.bf16.mxu1 %v6501_v46  ;;  %4037 = vmatprep.subr.bf16.mxu0 %v6504_v48  ;;  %v6589_v46 = vld [vmem:[%s9436_s1 + $0x1b0] ss:$8 sps:$4 sm:$0xff]   ;;  %v6597_v48 = vld [vmem:[%s9436_s1 + $0x1a4] ss:$8 sps:$4 sm:$0xff]  }
  0x54   : > { %3690 = vmatmul.mubr.bf16.gmra.mxu0 %v6497_v47  ;;  %3770 = vmatmul.mubr.bf16.gmra.mxu1 %v6498_v49  ;;  %v6592_v47 = vld [vmem:[%s9436_s1 + $0x2b0] ss:$8 sps:$4 sm:$0xff]   ;;  %v6600_v49 = vld [vmem:[%s9436_s1 + $0x2a4] ss:$8 sps:$4 sm:$0xff]  }
  0x55   : > { %3845 = vmatpush1.bf16.msra.mxu1 %v6499_v50  ;;  %4038 = vmatpush1.bf16.msra.mxu0 %v6502_v51  ;;  %v6601_v50 = vld [vmem:[%s7369_s16 + $0x3f4] ss:$72 sps:$4 sm:$0xff]  }
  0x56   : > { %3846 = vmatprep.subr.bf16.mxu1 %v6507_v52  ;;  %4039 = vmatprep.subr.bf16.mxu0 %v6510_v53  ;;  %v6603_v51 = vld [vmem:[%s7369_s16 + $0x874] ss:$72 sps:$4 sm:$0xff]   ;;  %v6595_v52 = vld [vmem:[%s9436_s1 + $0x1a0] ss:$8 sps:$4 sm:$0xff]  }
  0x57   : > { %3699 = vmatprep.mubr.bf16.mxu0 %v6511_v54  ;;  %3779 = vmatprep.mubr.bf16.mxu1 %v6513_v55  ;;  %v6598_v53 = vld [vmem:[%s9436_s1 + $0x2a0] ss:$8 sps:$4 sm:$0xff]   ;;  %v6609_v54 = vld [vmem:[%s9436_s1 + $0x194] ss:$8 sps:$4 sm:$0xff]   ;;  %v6605_v55 = vld [vmem:[%s7369_s16 + $0x3f0] ss:$72 sps:$4 sm:$0xff]  }
  0x59   : > { %3847 = vmatpush1.bf16.msra.mxu1 %v6505_v56  ;;  %4040 = vmatpush1.bf16.msra.mxu0 %v6508_v57  ;;  %v6612_v56 = vld [vmem:[%s9436_s1 + $0x294] ss:$8 sps:$4 sm:$0xff]   ;;  %v6606_v57 = vld [vmem:[%s7369_s16 + $0x870] ss:$72 sps:$4 sm:$0xff]  }
  0x5a   : > { %3848 = vmatprep.subr.bf16.mxu1 %v6519_v58  ;;  %4041 = vmatprep.subr.bf16.mxu0 %v6522_v60  ;;  %v6607_v58 = vld [vmem:[%s9436_s1 + $0x190] ss:$8 sps:$4 sm:$0xff]   ;;  %v6615_v60 = vld [vmem:[%s9436_s1 + $0x184] ss:$8 sps:$4 sm:$0xff]  }
  0x5c   : > { %3700 = vmatmul.mubr.bf16.gmra.mxu0 %v6515_v59  ;;  %3780 = vmatmul.mubr.bf16.gmra.mxu1 %v6516_v61  ;;  %v6610_v59 = vld [vmem:[%s9436_s1 + $0x290] ss:$8 sps:$4 sm:$0xff]   ;;  %v6618_v61 = vld [vmem:[%s9436_s1 + $0x284] ss:$8 sps:$4 sm:$0xff]  }
  0x5d   : > { %3849 = vmatpush1.bf16.msra.mxu1 %v6517_v62  ;;  %4042 = vmatpush1.bf16.msra.mxu0 %v6520_v63  ;;  %v6621_v62 = vld [vmem:[%s7369_s16 + $0xc] ss:$72 sps:$4 sm:$0xff]  }
  0x5e   : > { %3850 = vmatprep.subr.bf16.mxu1 %v6525_v0  ;;  %4043 = vmatprep.subr.bf16.mxu0 %v6528_v1  ;;  %v6624_v63 = vld [vmem:[%s7369_s16 + $0x14] ss:$72 sps:$4 sm:$0xff]   ;;  %v6613_v0 = vld [vmem:[%s9436_s1 + $0x180] ss:$8 sps:$4 sm:$0xff]  }
  0x5f   : > { %3709 = vmatprep.mubr.bf16.mxu0 %v6529_v2  ;;  %3789 = vmatprep.mubr.bf16.mxu1 %v6531_v3  ;;  %v6616_v1 = vld [vmem:[%s9436_s1 + $0x280] ss:$8 sps:$4 sm:$0xff]   ;;  %v6627_v3 = vld [vmem:[%s9436_s1 + $0x374] ss:$8 sps:$4 sm:$0xff]  }
  0x60   : > { %v6619_v2 = vld [vmem:[%s7369_s16 + $0x8] ss:$72 sps:$4 sm:$0xff]  }
  0x61   : > { %3851 = vmatpush1.bf16.msra.mxu1 %v6523_v4  ;;  %4044 = vmatpush1.bf16.msra.mxu0 %v6526_v5  ;;  %v6630_v4 = vld [vmem:[%s9436_s1 + $0x474] ss:$8 sps:$4 sm:$0xff]   ;;  %v6622_v5 = vld [vmem:[%s7369_s16 + $0x10] ss:$72 sps:$4 sm:$0xff]  }
  0x62   : > { %3852 = vmatprep.subr.bf16.mxu1 %v6537_v6  ;;  %4045 = vmatprep.subr.bf16.mxu0 %v6540_v8  ;;  %v6625_v6 = vld [vmem:[%s9436_s1 + $0x370] ss:$8 sps:$4 sm:$0xff]   ;;  %v6631_v8 = vld [vmem:[%s7369_s16 + $0x9c] ss:$72 sps:$4 sm:$0xff]  }
  0x64   : > { %3710 = vmatmul.mubr.bf16.gmra.mxu0 %v6533_v7  ;;  %3790 = vmatmul.mubr.bf16.gmra.mxu1 %v6534_v9  ;;  %v6628_v7 = vld [vmem:[%s9436_s1 + $0x470] ss:$8 sps:$4 sm:$0xff]   ;;  %v6633_v9 = vld [vmem:[%s7369_s16 + $0xa4] ss:$72 sps:$4 sm:$0xff]  }
  0x65   : > { %3853 = vmatpush1.bf16.msra.mxu1 %v6535_v10  ;;  %4046 = vmatpush1.bf16.msra.mxu0 %v6538_v11  ;;  %v6639_v10 = vld [vmem:[%s9436_s1 + $0x364] ss:$8 sps:$4 sm:$0xff]  }
  0x66   : > { %3854 = vmatprep.subr.bf16.mxu1 %v6543_v12  ;;  %4047 = vmatprep.subr.bf16.mxu0 %v6546_v13  ;;  %v6642_v11 = vld [vmem:[%s9436_s1 + $0x464] ss:$8 sps:$4 sm:$0xff]   ;;  %v6637_v12 = vld [vmem:[%s9436_s1 + $0x360] ss:$8 sps:$4 sm:$0xff]  }
  0x67   : > { %3719 = vmatprep.mubr.bf16.mxu0 %v6547_v14  ;;  %3799 = vmatprep.mubr.bf16.mxu1 %v6549_v15  ;;  %v6640_v13 = vld [vmem:[%s9436_s1 + $0x460] ss:$8 sps:$4 sm:$0xff]   ;;  %v6651_v14 = vld [vmem:[%s9436_s1 + $0x354] ss:$8 sps:$4 sm:$0xff]  }
  0x68   : > { %v6635_v15 = vld [vmem:[%s7369_s16 + $0x98] ss:$72 sps:$4 sm:$0xff]  }
  0x69   : > { %3855 = vmatpush1.bf16.msra.mxu1 %v6541_v16  ;;  %4048 = vmatpush1.bf16.msra.mxu0 %v6544_v17  ;;  %v6654_v16 = vld [vmem:[%s9436_s1 + $0x454] ss:$8 sps:$4 sm:$0xff]   ;;  %v6636_v17 = vld [vmem:[%s7369_s16 + $0xa0] ss:$72 sps:$4 sm:$0xff]  }
  0x6a   : > { %3856 = vmatprep.subr.bf16.mxu1 %v6555_v19  ;;  %4049 = vmatprep.subr.bf16.mxu0 %v6558_v20  ;;  %v6645_v19 = vld [vmem:[%s7369_s16 + $0x134] ss:$72 sps:$4 sm:$0xff]   ;;  %v6649_v20 = vld [vmem:[%s9436_s1 + $0x350] ss:$8 sps:$4 sm:$0xff]  }
  0x6c   : > { %3720 = vmatmul.mubr.bf16.gmra.mxu0 %v6551_v18  ;;  %3800 = vmatmul.mubr.bf16.gmra.mxu1 %v6552_v21  ;;  %v6643_v18 = vld [vmem:[%s7369_s16 + $0x12c] ss:$72 sps:$4 sm:$0xff]   ;;  %v6652_v21 = vld [vmem:[%s9436_s1 + $0x450] ss:$8 sps:$4 sm:$0xff]  }
  0x6d   : > { %3857 = vmatpush2.bf16.msra.mxu1 %v6553_v22  ;;  %4050 = vmatpush2.bf16.msra.mxu0 %v6556_v23  ;;  %v6663_v22 = vld [vmem:[%s9436_s1 + $0x344] ss:$8 sps:$4 sm:$0xff]  }
  0x6e   : > { %3858 = vmatprep.subr.bf16.mxu1 %v6561_v24  ;;  %4051 = vmatprep.subr.bf16.mxu0 %v6564_v25  ;;  %v6666_v23 = vld [vmem:[%s9436_s1 + $0x444] ss:$8 sps:$4 sm:$0xff]   ;;  %v6661_v24 = vld [vmem:[%s9436_s1 + $0x340] ss:$8 sps:$4 sm:$0xff]  }
  0x6f   : > { %3729 = vmatprep.mubr.bf16.mxu0 %v6565_v26  ;;  %3809 = vmatprep.mubr.bf16.mxu1 %v6567_v27  ;;  %v6647_v25 = vld [vmem:[%s7369_s16 + $0x128] ss:$72 sps:$4 sm:$0xff]  }
  0x70   : > { %v6648_v26 = vld [vmem:[%s7369_s16 + $0x130] ss:$72 sps:$4 sm:$0xff]   ;;  %v6664_v27 = vld [vmem:[%s9436_s1 + $0x440] ss:$8 sps:$4 sm:$0xff]  }
  0x71   : > { %3859 = vmatpush2.bf16.msra.mxu1 %v6559_v28  ;;  %4052 = vmatpush2.bf16.msra.mxu0 %v6562_v29  ;;  %v6675_v28 = vld [vmem:[%s9436_s1 + $0x334] ss:$8 sps:$4 sm:$0xff]  }
  0x72   : > { %3860 = vmatprep.subr.bf16.mxu1 %v6573_v30  ;;  %4053 = vmatprep.subr.bf16.mxu0 %v6576_v32  ;;  %v6678_v29 = vld [vmem:[%s9436_s1 + $0x434] ss:$8 sps:$4 sm:$0xff]   ;;  %v6673_v32 = vld [vmem:[%s9436_s1 + $0x330] ss:$8 sps:$4 sm:$0xff]  }
  0x73   : > { %v6655_v30 = vld [vmem:[%s7369_s16 + $0x1bc] ss:$72 sps:$4 sm:$0xff]  }
  0x74   : > { %3730 = vmatmul.mubr.bf16.gmra.mxu0 %v6569_v31  ;;  %3810 = vmatmul.mubr.bf16.gmra.mxu1 %v6570_v33  ;;  %v6657_v31 = vld [vmem:[%s7369_s16 + $0x1c4] ss:$72 sps:$4 sm:$0xff]   ;;  %v6676_v33 = vld [vmem:[%s9436_s1 + $0x430] ss:$8 sps:$4 sm:$0xff]  }
  0x75   : > { %3861 = vmatpush2.bf16.msra.mxu1 %v6571_v34  ;;  %4054 = vmatpush2.bf16.msra.mxu0 %v6574_v35  ;;  %v6687_v34 = vld [vmem:[%s9436_s1 + $0x324] ss:$8 sps:$4 sm:$0xff]  }
  0x76   : > { %3862 = vmatprep.subr.bf16.mxu1 %v6579_v36  ;;  %4055 = vmatprep.subr.bf16.mxu0 %v6582_v37  ;;  %v6690_v35 = vld [vmem:[%s9436_s1 + $0x424] ss:$8 sps:$4 sm:$0xff]   ;;  %v6685_v36 = vld [vmem:[%s9436_s1 + $0x320] ss:$8 sps:$4 sm:$0xff]  }
  0x77   : > { %3739 = vmatprep.mubr.bf16.mxu0 %v6583_v38  ;;  %3819 = vmatprep.mubr.bf16.mxu1 %v6585_v39  ;;  %v6688_v37 = vld [vmem:[%s9436_s1 + $0x420] ss:$8 sps:$4 sm:$0xff]  }
  0x78   : > { %v6659_v38 = vld [vmem:[%s7369_s16 + $0x1b8] ss:$72 sps:$4 sm:$0xff]  }
  0x79   : > { %3863 = vmatpush2.bf16.msra.mxu1 %v6577_v40  ;;  %4056 = vmatpush2.bf16.msra.mxu0 %v6580_v41  ;;  %v6660_v39 = vld [vmem:[%s7369_s16 + $0x1c0] ss:$72 sps:$4 sm:$0xff]   ;;  %v6699_v40 = vld [vmem:[%s9436_s1 + $0x314] ss:$8 sps:$4 sm:$0xff]  }
  0x7a   : > { %3864 = vmatprep.subr.bf16.mxu1 %v6591_v43  ;;  %4057 = vmatprep.subr.bf16.mxu0 %v6594_v44  ;;  %v6702_v41 = vld [vmem:[%s9436_s1 + $0x414] ss:$8 sps:$4 sm:$0xff]   ;;  %v6697_v44 = vld [vmem:[%s9436_s1 + $0x310] ss:$8 sps:$4 sm:$0xff]  }
  0x7b   : > { %v6669_v43 = vld [vmem:[%s7369_s16 + $0x254] ss:$72 sps:$4 sm:$0xff]  }
  0x7c   : > { %3740 = vmatmul.mubr.bf16.gmra.mxu0 %v6587_v42  ;;  %3820 = vmatmul.mubr.bf16.gmra.mxu1 %v6588_v45  ;;  %v6667_v42 = vld [vmem:[%s7369_s16 + $0x24c] ss:$72 sps:$4 sm:$0xff]   ;;  %v6700_v45 = vld [vmem:[%s9436_s1 + $0x410] ss:$8 sps:$4 sm:$0xff]  }
  0x7d   : > { %3865 = vmatpush2.bf16.msra.mxu1 %v6589_v46  ;;  %4058 = vmatpush2.bf16.msra.mxu0 %v6592_v47  ;;  %v6711_v46 = vld [vmem:[%s9436_s1 + $0x304] ss:$8 sps:$4 sm:$0xff]  }
  0x7e   : > { %3866 = vmatprep.subr.bf16.mxu1 %v6597_v48  ;;  %4059 = vmatprep.subr.bf16.mxu0 %v6600_v49  ;;  %v6714_v47 = vld [vmem:[%s9436_s1 + $0x404] ss:$8 sps:$4 sm:$0xff]   ;;  %v6709_v48 = vld [vmem:[%s9436_s1 + $0x300] ss:$8 sps:$4 sm:$0xff]  }
  0x7f   : > { %3749 = vmatprep.mubr.bf16.mxu0 %v6601_v50  ;;  %3829 = vmatprep.mubr.bf16.mxu1 %v6603_v51  ;;  %v6671_v49 = vld [vmem:[%s7369_s16 + $0x248] ss:$72 sps:$4 sm:$0xff]  }
  0x80   : > { %v6672_v50 = vld [vmem:[%s7369_s16 + $0x250] ss:$72 sps:$4 sm:$0xff]   ;;  %v6712_v51 = vld [vmem:[%s9436_s1 + $0x400] ss:$8 sps:$4 sm:$0xff]  }
  0x81   : > { %3867 = vmatpush2.bf16.msra.mxu1 %v6595_v52  ;;  %4060 = vmatpush2.bf16.msra.mxu0 %v6598_v53  ;;  %v6723_v52 = vld [vmem:[%s9436_s1 + $0x3f4] ss:$8 sps:$4 sm:$0xff]  }
  0x82   : > { %3868 = vmatprep.subr.bf16.mxu1 %v6609_v54  ;;  %4061 = vmatprep.subr.bf16.mxu0 %v6612_v56  ;;  %v6726_v53 = vld [vmem:[%s9436_s1 + $0x4f4] ss:$8 sps:$4 sm:$0xff]   ;;  %v6721_v56 = vld [vmem:[%s9436_s1 + $0x3f0] ss:$8 sps:$4 sm:$0xff]  }
  0x83   : > { %v6679_v54 = vld [vmem:[%s7369_s16 + $0x2dc] ss:$72 sps:$4 sm:$0xff]  }
  0x84   : > { %3750 = vmatmul.mubr.bf16.gmra.mxu0 %v6605_v55  ;;  %3830 = vmatmul.mubr.bf16.gmra.mxu1 %v6606_v57  ;;  %v6681_v55 = vld [vmem:[%s7369_s16 + $0x2e4] ss:$72 sps:$4 sm:$0xff]   ;;  %v6724_v57 = vld [vmem:[%s9436_s1 + $0x4f0] ss:$8 sps:$4 sm:$0xff]  }
  0x85   : > { %3869 = vmatpush2.bf16.msra.mxu1 %v6607_v58  ;;  %4062 = vmatpush2.bf16.msra.mxu0 %v6610_v59  ;;  %v6735_v58 = vld [vmem:[%s9436_s1 + $0x3e4] ss:$8 sps:$4 sm:$0xff]  }
  0x86   : > { %3870 = vmatprep.subr.bf16.mxu1 %v6615_v60  ;;  %4063 = vmatprep.subr.bf16.mxu0 %v6618_v61  ;;  %v6738_v59 = vld [vmem:[%s9436_s1 + $0x4e4] ss:$8 sps:$4 sm:$0xff]   ;;  %v6733_v60 = vld [vmem:[%s9436_s1 + $0x3e0] ss:$8 sps:$4 sm:$0xff]  }
  0x87   : > { %3872 = vmatprep.mubr.bf16.mxu1 %v6621_v62  ;;  %4065 = vmatprep.mubr.bf16.mxu0 %v6624_v63  ;;  %v6736_v61 = vld [vmem:[%s9436_s1 + $0x4e0] ss:$8 sps:$4 sm:$0xff]  }
  0x88   : > { %v6683_v62 = vld [vmem:[%s7369_s16 + $0x2d8] ss:$72 sps:$4 sm:$0xff]  }
  0x89   : > { %3871 = vmatpush2.bf16.msra.mxu1 %v6613_v0  ;;  %4064 = vmatpush2.bf16.msra.mxu0 %v6616_v1  ;;  %v6684_v63 = vld [vmem:[%s7369_s16 + $0x2e0] ss:$72 sps:$4 sm:$0xff]   ;;  %v6747_v0 = vld [vmem:[%s9436_s1 + $0x3d4] ss:$8 sps:$4 sm:$0xff]  }
  0x8a   : > { %4226 = vmatprep.subr.bf16.mxu1 %v6627_v3  ;;  %4419 = vmatprep.subr.bf16.mxu0 %v6630_v4  ;;  %v6750_v1 = vld [vmem:[%s9436_s1 + $0x4d4] ss:$8 sps:$4 sm:$0xff]   ;;  %v6745_v4 = vld [vmem:[%s9436_s1 + $0x3d0] ss:$8 sps:$4 sm:$0xff]  }
  0x8b   : > { %v6693_v3 = vld [vmem:[%s7369_s16 + $0x374] ss:$72 sps:$4 sm:$0xff]  }
  0x8c   : > { %3873 = vmatmul.mubr.bf16.vlgmr.msra.gmra.mxu1 %v6619_v2  ;;  %4066 = vmatmul.mubr.bf16.vlgmr.msra.gmra.mxu0 %v6622_v5  ;;  %v6691_v2 = vld [vmem:[%s7369_s16 + $0x36c] ss:$72 sps:$4 sm:$0xff]   ;;  %v6748_v5 = vld [vmem:[%s9436_s1 + $0x4d0] ss:$8 sps:$4 sm:$0xff]  }
  0x8d   : > { %4227 = vmatpush1.bf16.msra.mxu1 %v6625_v6  ;;  %4420 = vmatpush1.bf16.msra.mxu0 %v6628_v7  ;;  %v6759_v6 = vld [vmem:[%s9436_s1 + $0x3c4] ss:$8 sps:$4 sm:$0xff]  }
  0x8e   : > { %3882 = vmatprep.mubr.bf16.mxu1 %v6631_v8  ;;  %4075 = vmatprep.mubr.bf16.mxu0 %v6633_v9  ;;  %v6762_v7 = vld [vmem:[%s9436_s1 + $0x4c4] ss:$8 sps:$4 sm:$0xff]   ;;  %v6757_v8 = vld [vmem:[%s9436_s1 + $0x3c0] ss:$8 sps:$4 sm:$0xff]  }
  0x8f   : > { %4228 = vmatprep.subr.bf16.mxu1 %v6639_v10  ;;  %4421 = vmatprep.subr.bf16.mxu0 %v6642_v11  ;;  %v6695_v9 = vld [vmem:[%s7369_s16 + $0x368] ss:$72 sps:$4 sm:$0xff]  }
  0x90   : > { %v6696_v10 = vld [vmem:[%s7369_s16 + $0x370] ss:$72 sps:$4 sm:$0xff]   ;;  %v6760_v11 = vld [vmem:[%s9436_s1 + $0x4c0] ss:$8 sps:$4 sm:$0xff]  }
  0x91   : > { %4229 = vmatpush1.bf16.msra.mxu1 %v6637_v12  ;;  %4422 = vmatpush1.bf16.msra.mxu0 %v6640_v13  ;;  %v6703_v12 = vld [vmem:[%s7369_s16 + $0x3fc] ss:$72 sps:$4 sm:$0xff]  }
  0x92   : > { %4230 = vmatprep.subr.bf16.mxu1 %v6651_v14  ;;  %4423 = vmatprep.subr.bf16.mxu0 %v6654_v16  ;;  %v6771_v13 = vld [vmem:[%s9436_s1 + $0x3b4] ss:$8 sps:$4 sm:$0xff]   ;;  %v6769_v16 = vld [vmem:[%s9436_s1 + $0x3b0] ss:$8 sps:$4 sm:$0xff]  }
  0x93   : > { %v6774_v14 = vld [vmem:[%s9436_s1 + $0x4b4] ss:$8 sps:$4 sm:$0xff]  }
  0x94   : > { %3883 = vmatmul.mubr.bf16.gmra.mxu1 %v6635_v15  ;;  %4076 = vmatmul.mubr.bf16.gmra.mxu0 %v6636_v17  ;;  %v6705_v15 = vld [vmem:[%s7369_s16 + $0x404] ss:$72 sps:$4 sm:$0xff]   ;;  %v6772_v17 = vld [vmem:[%s9436_s1 + $0x4b0] ss:$8 sps:$4 sm:$0xff]  }
  0x95   : > { %3892 = vmatprep.mubr.bf16.mxu1 %v6643_v18  ;;  %4085 = vmatprep.mubr.bf16.mxu0 %v6645_v19  ;;  %v6783_v18 = vld [vmem:[%s9436_s1 + $0x3a4] ss:$8 sps:$4 sm:$0xff]  }
  0x96   : > { %4231 = vmatpush1.bf16.msra.mxu1 %v6649_v20  ;;  %4424 = vmatpush1.bf16.msra.mxu0 %v6652_v21  ;;  %v6786_v19 = vld [vmem:[%s9436_s1 + $0x4a4] ss:$8 sps:$4 sm:$0xff]   ;;  %v6781_v20 = vld [vmem:[%s9436_s1 + $0x3a0] ss:$8 sps:$4 sm:$0xff]  }
  0x97   : > { %4232 = vmatprep.subr.bf16.mxu1 %v6663_v22  ;;  %4425 = vmatprep.subr.bf16.mxu0 %v6666_v23  ;;  %v6707_v21 = vld [vmem:[%s7369_s16 + $0x3f8] ss:$72 sps:$4 sm:$0xff]  }
  0x98   : > { %v6708_v22 = vld [vmem:[%s7369_s16 + $0x400] ss:$72 sps:$4 sm:$0xff]  }
  0x99   : > { %v6784_v23 = vld [vmem:[%s9436_s1 + $0x4a0] ss:$8 sps:$4 sm:$0xff]  }
  0x9a   : > { %4233 = vmatpush1.bf16.msra.mxu1 %v6661_v24  ;;  %4426 = vmatpush1.bf16.msra.mxu0 %v6664_v27  ;;  %v6795_v24 = vld [vmem:[%s9436_s1 + $0x394] ss:$8 sps:$4 sm:$0xff]  }
  0x9b   : > { %4234 = vmatprep.subr.bf16.mxu1 %v6675_v28  ;;  %4427 = vmatprep.subr.bf16.mxu0 %v6678_v29  ;;  %v6717_v27 = vld [vmem:[%s7369_s16 + $0x494] ss:$72 sps:$4 sm:$0xff]   ;;  %v6793_v28 = vld [vmem:[%s9436_s1 + $0x390] ss:$8 sps:$4 sm:$0xff]  }
  0x9c   : > { %3893 = vmatmul.mubr.bf16.gmra.mxu1 %v6647_v25  ;;  %4086 = vmatmul.mubr.bf16.gmra.mxu0 %v6648_v26  ;;  %v6798_v25 = vld [vmem:[%s9436_s1 + $0x494] ss:$8 sps:$4 sm:$0xff]   ;;  %v6796_v29 = vld [vmem:[%s9436_s1 + $0x490] ss:$8 sps:$4 sm:$0xff]  }
  0x9d   : > { %3902 = vmatprep.mubr.bf16.mxu1 %v6655_v30  ;;  %4095 = vmatprep.mubr.bf16.mxu0 %v6657_v31  ;;  %v6715_v26 = vld [vmem:[%s7369_s16 + $0x48c] ss:$72 sps:$4 sm:$0xff]  }
  0x9e   : > { %4235 = vmatpush1.bf16.msra.mxu1 %v6673_v32  ;;  %4428 = vmatpush1.bf16.msra.mxu0 %v6676_v33  ;;  %v6807_v30 = vld [vmem:[%s9436_s1 + $0x384] ss:$8 sps:$4 sm:$0xff]   ;;  %v6805_v32 = vld [vmem:[%s9436_s1 + $0x380] ss:$8 sps:$4 sm:$0xff]  }
  0x9f   : > { %4236 = vmatprep.subr.bf16.mxu1 %v6687_v34  ;;  %4429 = vmatprep.subr.bf16.mxu0 %v6690_v35  ;;  %v6810_v31 = vld [vmem:[%s9436_s1 + $0x484] ss:$8 sps:$4 sm:$0xff]   ;;  %v6719_v33 = vld [vmem:[%s7369_s16 + $0x488] ss:$72 sps:$4 sm:$0xff]   ;;  %v6819_v35 = vld [vmem:[%s9436_s1 + $0x574] ss:$8 sps:$4 sm:$0xff]  }
  0xa0   : > { %v6808_v34 = vld [vmem:[%s9436_s1 + $0x480] ss:$8 sps:$4 sm:$0xff]  }
  0xa2   : > { %4237 = vmatpush1.bf16.msra.mxu1 %v6685_v36  ;;  %4430 = vmatpush1.bf16.msra.mxu0 %v6688_v37  ;;  %v6822_v36 = vld [vmem:[%s9436_s1 + $0x674] ss:$8 sps:$4 sm:$0xff]   ;;  %v6720_v37 = vld [vmem:[%s7369_s16 + $0x490] ss:$72 sps:$4 sm:$0xff]  }
  0xa3   : > { %4238 = vmatprep.subr.bf16.mxu1 %v6699_v40  ;;  %4431 = vmatprep.subr.bf16.mxu0 %v6702_v41  ;;  %v6731_v40 = vld [vmem:[%s7369_s16 + $0x518] ss:$72 sps:$4 sm:$0xff]  }
  0xa4   : > { %3903 = vmatmul.mubr.bf16.gmra.mxu1 %v6659_v38  ;;  %4096 = vmatmul.mubr.bf16.gmra.mxu0 %v6660_v39  ;;  %v6727_v38 = vld [vmem:[%s7369_s16 + $0x51c] ss:$72 sps:$4 sm:$0xff]   ;;  %v6732_v41 = vld [vmem:[%s7369_s16 + $0x520] ss:$72 sps:$4 sm:$0xff]  }
  0xa5   : > { %3912 = vmatprep.mubr.bf16.mxu1 %v6667_v42  ;;  %4105 = vmatprep.mubr.bf16.mxu0 %v6669_v43  ;;  %v6729_v39 = vld [vmem:[%s7369_s16 + $0x524] ss:$72 sps:$4 sm:$0xff]   ;;  %v6741_v43 = vld [vmem:[%s7369_s16 + $0x5b4] ss:$72 sps:$4 sm:$0xff]  }
  0xa6   : > { %4239 = vmatpush1.bf16.msra.mxu1 %v6697_v44  ;;  %4432 = vmatpush1.bf16.msra.mxu0 %v6700_v45  ;;  %v6739_v42 = vld [vmem:[%s7369_s16 + $0x5ac] ss:$72 sps:$4 sm:$0xff]   ;;  %v6743_v44 = vld [vmem:[%s7369_s16 + $0x5a8] ss:$72 sps:$4 sm:$0xff]  }
  0xa7   : > { %4240 = vmatprep.subr.bf16.mxu1 %v6711_v46  ;;  %4433 = vmatprep.subr.bf16.mxu0 %v6714_v47  ;;  %v6744_v45 = vld [vmem:[%s7369_s16 + $0x5b0] ss:$72 sps:$4 sm:$0xff]   ;;  %v6751_v46 = vld [vmem:[%s7369_s16 + $0x63c] ss:$72 sps:$4 sm:$0xff]  }
  0xa8   : > { %v6753_v47 = vld [vmem:[%s7369_s16 + $0x644] ss:$72 sps:$4 sm:$0xff]  }
  0xaa   : > { %4241 = vmatpush1.bf16.msra.mxu1 %v6709_v48  ;;  %4434 = vmatpush1.bf16.msra.mxu0 %v6712_v51  ;;  %v6755_v48 = vld [vmem:[%s7369_s16 + $0x638] ss:$72 sps:$4 sm:$0xff]   ;;  %v6765_v51 = vld [vmem:[%s7369_s16 + $0x6d4] ss:$72 sps:$4 sm:$0xff]  }
  0xab   : > { %4242 = vmatprep.subr.bf16.mxu1 %v6723_v52  ;;  %4435 = vmatprep.subr.bf16.mxu0 %v6726_v53  ;;  %v6767_v52 = vld [vmem:[%s7369_s16 + $0x6c8] ss:$72 sps:$4 sm:$0xff]  }
  0xac   : > { %3913 = vmatmul.mubr.bf16.gmra.mxu1 %v6671_v49  ;;  %4106 = vmatmul.mubr.bf16.gmra.mxu0 %v6672_v50  ;;  %v6756_v49 = vld [vmem:[%s7369_s16 + $0x640] ss:$72 sps:$4 sm:$0xff]   ;;  %v6763_v50 = vld [vmem:[%s7369_s16 + $0x6cc] ss:$72 sps:$4 sm:$0xff]   ;;  %v6768_v53 = vld [vmem:[%s7369_s16 + $0x6d0] ss:$72 sps:$4 sm:$0xff]  }
  0xad   : > { %3922 = vmatprep.mubr.bf16.mxu1 %v6679_v54  ;;  %4115 = vmatprep.mubr.bf16.mxu0 %v6681_v55  ;;  %v6775_v54 = vld [vmem:[%s7369_s16 + $0x75c] ss:$72 sps:$4 sm:$0xff]  }
  0xae   : > { %4243 = vmatpush2.bf16.msra.mxu1 %v6721_v56  ;;  %4436 = vmatpush2.bf16.msra.mxu0 %v6724_v57  ;;  %v6777_v55 = vld [vmem:[%s7369_s16 + $0x764] ss:$72 sps:$4 sm:$0xff]   ;;  %v6779_v56 = vld [vmem:[%s7369_s16 + $0x758] ss:$72 sps:$4 sm:$0xff]  }
  0xaf   : > { %4244 = vmatprep.subr.bf16.mxu1 %v6735_v58  ;;  %4437 = vmatprep.subr.bf16.mxu0 %v6738_v59  ;;  %v6780_v57 = vld [vmem:[%s7369_s16 + $0x760] ss:$72 sps:$4 sm:$0xff]   ;;  %v6787_v58 = vld [vmem:[%s7369_s16 + $0x7ec] ss:$72 sps:$4 sm:$0xff]  }
  0xb0   : > { %v6789_v59 = vld [vmem:[%s7369_s16 + $0x7f4] ss:$72 sps:$4 sm:$0xff]  }
  0xb2   : > { %4245 = vmatpush2.bf16.msra.mxu1 %v6733_v60  ;;  %4438 = vmatpush2.bf16.msra.mxu0 %v6736_v61  ;;  %v6791_v60 = vld [vmem:[%s7369_s16 + $0x7e8] ss:$72 sps:$4 sm:$0xff]  }
  0xb3   : > { %4246 = vmatprep.subr.bf16.mxu1 %v6747_v0  ;;  %4439 = vmatprep.subr.bf16.mxu0 %v6750_v1  ;;  %v6792_v61 = vld [vmem:[%s7369_s16 + $0x7f0] ss:$72 sps:$4 sm:$0xff]   ;;  %v757_v0 = vlaneseq }
  0xb4   : > { %3923 = vmatmul.mubr.bf16.gmra.mxu1 %v6683_v62  ;;  %4116 = vmatmul.mubr.bf16.gmra.mxu0 %v6684_v63  ;;  %v6799_v62 = vld [vmem:[%s7369_s16 + $0x87c] ss:$72 sps:$4 sm:$0xff]   ;;  %v6803_v1 = vld [vmem:[%s7369_s16 + $0x878] ss:$72 sps:$4 sm:$0xff]  }
  0xb5   : > { %3932 = vmatprep.mubr.bf16.mxu1 %v6691_v2  ;;  %4125 = vmatprep.mubr.bf16.mxu0 %v6693_v3  ;;  %v6801_v63 = vld [vmem:[%s7369_s16 + $0x884] ss:$72 sps:$4 sm:$0xff]   ;;  %v6804_v2 = vld [vmem:[%s7369_s16 + $0x880] ss:$72 sps:$4 sm:$0xff]  }
  0xb6   : > { %4247 = vmatpush2.bf16.msra.mxu1 %v6745_v4  ;;  %4440 = vmatpush2.bf16.msra.mxu0 %v6748_v5  ;;  %v6813_v3 = vld [vmem:[%s7369_s16 + $0x1c] ss:$72 sps:$4 sm:$0xff]   ;;  %v758_v5 = vshrl.u32 %v757_v0, 7 }
  0xb7   : > { %4248 = vmatprep.subr.bf16.mxu1 %v6759_v6  ;;  %4441 = vmatprep.subr.bf16.mxu0 %v6762_v7  ;;  %v6816_v4 = vld [vmem:[%s7369_s16 + $0x24] ss:$72 sps:$4 sm:$0xff]   ;;  %v6811_v7 = vld [vmem:[%s7369_s16 + $0x18] ss:$72 sps:$4 sm:$0xff]  }
  0xb8   : > { %v759_v6 = vsub.s32 0, %v758_v5  ;;  %v6879_v0 = vld [vmem:[%s9436_s1 + $0x524] ss:$8 sps:$4 sm:$0xff]  }
  0xba   : > { %4249 = vmatpush2.bf16.msra.mxu1 %v6757_v8  ;;  %4442 = vmatpush2.bf16.msra.mxu0 %v6760_v11  ;;  %v755_v8 = vld [vmem:[%s9437_s2] sm:$0x3]  ;;  %v763_v11 = vsub.s32 1, %v758_v5 }
  0xbb   : > { %4250 = vmatprep.subr.bf16.mxu1 %v6771_v13  ;;  %4443 = vmatprep.subr.bf16.mxu0 %v6774_v14  ;;  %v6823_v13 = vld [vmem:[%s7369_s16 + $0xac] ss:$72 sps:$4 sm:$0xff]   ;;  %v7931_v14 = vrot.slane %v755_v8, %v759_v6  ;;  %v6877_v5 = vld [vmem:[%s9436_s1 + $0x520] ss:$8 sps:$4 sm:$0xff]  }
  0xbc   : > { %3933 = vmatmul.mubr.bf16.gmra.mxu1 %v6695_v9  ;;  %4126 = vmatmul.mubr.bf16.gmra.mxu0 %v6696_v10  ;;  %v6814_v9 = vld [vmem:[%s7369_s16 + $0x20] ss:$72 sps:$4 sm:$0xff]   ;;  %v6817_v10 = vld [vmem:[%s9436_s1 + $0x570] ss:$8 sps:$4 sm:$0xff]  }
  0xbd   : > { %3942 = vmatprep.mubr.bf16.mxu1 %v6703_v12  ;;  %4135 = vmatprep.mubr.bf16.mxu0 %v6705_v15  ;;  %v6820_v12 = vld [vmem:[%s9436_s1 + $0x670] ss:$8 sps:$4 sm:$0xff]   ;;  %v6825_v15 = vld [vmem:[%s7369_s16 + $0xb4] ss:$72 sps:$4 sm:$0xff]   ;;  %v6880_v6 = vld [vmem:[%s9436_s1 + $0x620] ss:$8 sps:$4 sm:$0xff]  }
  0xbe   : > { %4251 = vmatpush2.bf16.msra.mxu1 %v6769_v16  ;;  %4444 = vmatpush2.bf16.msra.mxu0 %v6772_v17  ;;  %v6831_v16 = vld [vmem:[%s9436_s1 + $0x564] ss:$8 sps:$4 sm:$0xff]   ;;  %v7937_v17 = vrot.slane %v755_v8, %v763_v11  ;;  %v6852_v11 = vld [vmem:[%s7369_s16 + $0x1d0] ss:$72 sps:$4 sm:$0xff]  }
  0xbf   : > { %4252 = vmatprep.subr.bf16.mxu1 %v6783_v18  ;;  %4445 = vmatprep.subr.bf16.mxu0 %v6786_v19  ;;  %v6829_v18 = vld [vmem:[%s9436_s1 + $0x560] ss:$8 sps:$4 sm:$0xff]  }
  0xc0   : > { %v6832_v19 = vld [vmem:[%s9436_s1 + $0x660] ss:$8 sps:$4 sm:$0xff]  }
  0xc2   : > { %4253 = vmatpush2.bf16.msra.mxu1 %v6781_v20  ;;  %4446 = vmatpush2.bf16.msra.mxu0 %v6784_v23  ;;  %v6834_v20 = vld [vmem:[%s9436_s1 + $0x664] ss:$8 sps:$4 sm:$0xff]   ;;  %v6843_v23 = vld [vmem:[%s9436_s1 + $0x554] ss:$8 sps:$4 sm:$0xff]  }
  0xc3   : > { %4254 = vmatprep.subr.bf16.mxu1 %v6795_v24  ;;  %4447 = vmatprep.subr.bf16.mxu0 %v6798_v25  ;;  %v6846_v24 = vld [vmem:[%s9436_s1 + $0x654] ss:$8 sps:$4 sm:$0xff]  }
  0xc4   : > { %3943 = vmatmul.mubr.bf16.gmra.mxu1 %v6707_v21  ;;  %4136 = vmatmul.mubr.bf16.gmra.mxu0 %v6708_v22 }
  0xc5   : > { %3952 = vmatprep.mubr.bf16.mxu1 %v6715_v26  ;;  %4145 = vmatprep.mubr.bf16.mxu0 %v6717_v27 }
  0xc6   : > { %4255 = vmatpush2.bf16.msra.mxu1 %v6793_v28  ;;  %4448 = vmatpush2.bf16.msra.mxu0 %v6796_v29  ;;  %v6827_v29 = vld [vmem:[%s7369_s16 + $0xa8] ss:$72 sps:$4 sm:$0xff]  }
  0xc7   : > { %4256 = vmatprep.subr.bf16.mxu1 %v6807_v30  ;;  %4449 = vmatprep.subr.bf16.mxu0 %v6810_v31  ;;  %v6828_v30 = vld [vmem:[%s7369_s16 + $0xb0] ss:$72 sps:$4 sm:$0xff]  }
  0xca   : > { %4257 = vmatpush2.bf16.msra.mxu1 %v6805_v32  ;;  %4450 = vmatpush2.bf16.msra.mxu0 %v6808_v34  ;;  %v6835_v34 = vld [vmem:[%s7369_s16 + $0x13c] ss:$72 sps:$4 sm:$0xff]  }
  0xcb   : > { %4612 = vmatprep.subr.bf16.mxu1 %v6819_v35  ;;  %4805 = vmatprep.subr.bf16.mxu0 %v6822_v36  ;;  %v6837_v35 = vld [vmem:[%s7369_s16 + $0x144] ss:$72 sps:$4 sm:$0xff]   ;;  %v6841_v36 = vld [vmem:[%s9436_s1 + $0x550] ss:$8 sps:$4 sm:$0xff]  }
  0xcc   : > { %3953 = vmatmul.mubr.bf16.gmra.mxu1 %v6719_v33  ;;  %4146 = vmatmul.mubr.bf16.gmra.mxu0 %v6720_v37 }
  0xcd   : > { %3962 = vmatprep.mubr.bf16.mxu1 %v6727_v38  ;;  %4155 = vmatprep.mubr.bf16.mxu0 %v6729_v39  ;;  %v6844_v39 = vld [vmem:[%s9436_s1 + $0x650] ss:$8 sps:$4 sm:$0xff]  }
  0xd4   : > { %3963 = vmatmul.mubr.bf16.gmra.mxu1 %v6731_v40  ;;  %4156 = vmatmul.mubr.bf16.gmra.mxu0 %v6732_v41  ;;  %v6855_v40 = vld [vmem:[%s9436_s1 + $0x544] ss:$8 sps:$4 sm:$0xff]  }
  0xd5   : > { %3972 = vmatprep.mubr.bf16.mxu1 %v6739_v42  ;;  %4165 = vmatprep.mubr.bf16.mxu0 %v6741_v43  ;;  %v6858_v41 = vld [vmem:[%s9436_s1 + $0x644] ss:$8 sps:$4 sm:$0xff]  }
  0xdc   : > { %3973 = vmatmul.mubr.bf16.gmra.mxu1 %v6743_v44  ;;  %4166 = vmatmul.mubr.bf16.gmra.mxu0 %v6744_v45  ;;  %v6853_v45 = vld [vmem:[%s9436_s1 + $0x540] ss:$8 sps:$4 sm:$0xff]  }
  0xdd   : > { %3982 = vmatprep.mubr.bf16.mxu1 %v6751_v46  ;;  %4175 = vmatprep.mubr.bf16.mxu0 %v6753_v47  ;;  %v6856_v46 = vld [vmem:[%s9436_s1 + $0x640] ss:$8 sps:$4 sm:$0xff]  }
  0xe4   : > { %3983 = vmatmul.mubr.bf16.gmra.mxu1 %v6755_v48  ;;  %4176 = vmatmul.mubr.bf16.gmra.mxu0 %v6756_v49 }
  0xe5   : > { %3992 = vmatprep.mubr.bf16.mxu1 %v6763_v50  ;;  %4185 = vmatprep.mubr.bf16.mxu0 %v6765_v51  ;;  %v6839_v50 = vld [vmem:[%s7369_s16 + $0x138] ss:$72 sps:$4 sm:$0xff]  }
  0xe6   : > { %v6840_v51 = vld [vmem:[%s7369_s16 + $0x140] ss:$72 sps:$4 sm:$0xff]  }
  0xec   : > { %3993 = vmatmul.mubr.bf16.gmra.mxu1 %v6767_v52  ;;  %4186 = vmatmul.mubr.bf16.gmra.mxu0 %v6768_v53  ;;  %v6867_v53 = vld [vmem:[%s9436_s1 + $0x534] ss:$8 sps:$4 sm:$0xff]  }
  0xed   : > { %4002 = vmatprep.mubr.bf16.mxu1 %v6775_v54  ;;  %4195 = vmatprep.mubr.bf16.mxu0 %v6777_v55  ;;  %v6870_v54 = vld [vmem:[%s9436_s1 + $0x634] ss:$8 sps:$4 sm:$0xff]  }
  0xf4   : > { %4003 = vmatmul.mubr.bf16.gmra.mxu1 %v6779_v56  ;;  %4196 = vmatmul.mubr.bf16.gmra.mxu0 %v6780_v57 }
  0xf5   : > { %4012 = vmatprep.mubr.bf16.mxu1 %v6787_v58  ;;  %4205 = vmatprep.mubr.bf16.mxu0 %v6789_v59  ;;  %v6847_v58 = vld [vmem:[%s7369_s16 + $0x1cc] ss:$72 sps:$4 sm:$0xff]  }
  0xf6   : > { %v6849_v59 = vld [vmem:[%s7369_s16 + $0x1d4] ss:$72 sps:$4 sm:$0xff]  }
  0xfc   : > { %4013 = vmatmul.mubr.bf16.gmra.mxu1 %v6791_v60  ;;  %4206 = vmatmul.mubr.bf16.gmra.mxu0 %v6792_v61  ;;  %v6865_v60 = vld [vmem:[%s9436_s1 + $0x530] ss:$8 sps:$4 sm:$0xff]  }
  0xfd   : > { %4022 = vmatprep.mubr.bf16.mxu1 %v6799_v62  ;;  %4215 = vmatprep.mubr.bf16.mxu0 %v6801_v63  ;;  %v6868_v63 = vld [vmem:[%s9436_s1 + $0x630] ss:$8 sps:$4 sm:$0xff]  }
 0x104   : > { %4023 = vmatmul.mubr.bf16.gmra.mxu1 %v6803_v1  ;;  %4216 = vmatmul.mubr.bf16.gmra.mxu0 %v6804_v2  ;;  %v6882_v1 = vld [vmem:[%s9436_s1 + $0x624] ss:$8 sps:$4 sm:$0xff]  }
 0x105   : > { %4258 = vmatprep.mubr.bf16.mxu1 %v6813_v3  ;;  %4451 = vmatprep.mubr.bf16.mxu0 %v6816_v4 }
 0x10c   : > { %v7948_v21 = vpop.f32.mrf.mxu0  ;;  %v3761_v22 = vpop.f32.mrf.mxu1  ;;  %4259 = vmatmul.mubr.bf16.vlgmr.msra.gmra.mxu1 %v6811_v7  ;;  %4452 = vmatmul.mubr.bf16.vlgmr.msra.gmra.mxu0 %v6814_v9 }
 0x10d   : > { %v7957_v25 = vadd.f32 %v3761_v22, %v7931_v14  ;;  %4613 = vmatpush1.bf16.msra.mxu1 %v6817_v10  ;;  %4806 = vmatpush1.bf16.msra.mxu0 %v6820_v12  ;;  %v6851_v10 = vld [vmem:[%s7369_s16 + $0x1c8] ss:$72 sps:$4 sm:$0xff]   ;;  %v6864_v22 = vld [vmem:[%s7369_s16 + $0x264] ss:$72 sps:$4 sm:$0xff]  }
 0x10e   : > { %v7959_v26 = vpop.f32.mrf.mxu0  ;;  %v3763_v27 = vpop.f32.mrf.mxu1  ;;  %4268 = vmatprep.mubr.bf16.mxu1 %v6823_v13  ;;  %4461 = vmatprep.mubr.bf16.mxu0 %v6825_v15  ;;  %v6891_v13 = vld [vmem:[%s9436_s1 + $0x514] ss:$8 sps:$4 sm:$0xff]  }
 0x10f   : > { %v7962_v28 = vadd.f32 %v3763_v27, %v7937_v17  ;;  %4614 = vmatprep.subr.bf16.mxu1 %v6831_v16  ;;  %4807 = vmatprep.subr.bf16.mxu0 %v6834_v20  ;;  %v6894_v15 = vld [vmem:[%s9436_s1 + $0x614] ss:$8 sps:$4 sm:$0xff]  }
 0x110   : > { %v7966_v31 = vpop.f32.mrf.mxu0  ;;  %v3765_v32 = vpop.f32.mrf.mxu1  ;;  %v6861_v20 = vld [vmem:[%s7369_s16 + $0x25c] ss:$72 sps:$4 sm:$0xff]  }
 0x111   : > { %v7969_v33 = vadd.f32 %v3765_v32, %v7931_v14  ;;  %4615 = vmatpush1.bf16.msra.mxu1 %v6829_v18  ;;  %4808 = vmatpush1.bf16.msra.mxu0 %v6832_v19  ;;  %v6906_v32 = vld [vmem:[%s9436_s1 + $0x604] ss:$8 sps:$4 sm:$0xff]  }
 0x112   : > { %v7976_v37 = vpop.f32.mrf.mxu0  ;;  %v3767_v38 = vpop.f32.mrf.mxu1  ;;  %4616 = vmatprep.subr.bf16.mxu1 %v6843_v23  ;;  %4809 = vmatprep.subr.bf16.mxu0 %v6846_v24  ;;  %v6889_v23 = vld [vmem:[%s9436_s1 + $0x510] ss:$8 sps:$4 sm:$0xff]  }
 0x113   : > { %v7988_v42 = vadd.f32 %v3767_v38, %v7937_v17  ;;  %v6901_v38 = vld [vmem:[%s9436_s1 + $0x500] ss:$8 sps:$4 sm:$0xff]  }
 0x114   : > { %v7990_v43 = vpop.f32.mrf.mxu0  ;;  %v3771_v44 = vpop.f32.mrf.mxu1  ;;  %4269 = vmatmul.mubr.bf16.gmra.mxu1 %v6827_v29  ;;  %4462 = vmatmul.mubr.bf16.gmra.mxu0 %v6828_v30  ;;  %v6892_v29 = vld [vmem:[%s9436_s1 + $0x610] ss:$8 sps:$4 sm:$0xff]   ;;  %v6903_v30 = vld [vmem:[%s9436_s1 + $0x504] ss:$8 sps:$4 sm:$0xff]  }
 0x115   : > { %v7999_v47 = vadd.f32 %v3771_v44, %v7931_v14  ;;  %4278 = vmatprep.mubr.bf16.mxu1 %v6835_v34  ;;  %4471 = vmatprep.mubr.bf16.mxu0 %v6837_v35 }
 0x116   : > { %v8001_v48 = vpop.f32.mrf.mxu0  ;;  %v3773_v49 = vpop.f32.mrf.mxu1  ;;  %4617 = vmatpush1.bf16.msra.mxu1 %v6841_v36  ;;  %4810 = vmatpush1.bf16.msra.mxu0 %v6844_v39  ;;  %v6904_v39 = vld [vmem:[%s9436_s1 + $0x600] ss:$8 sps:$4 sm:$0xff]  }
 0x117   : > { %v8006_v52 = vadd.f32 %v3773_v49, %v7937_v17  ;;  %4618 = vmatprep.subr.bf16.mxu1 %v6855_v40  ;;  %4811 = vmatprep.subr.bf16.mxu0 %v6858_v41 }
 0x118   : > { %v8014_v55 = vpop.f32.mrf.mxu0  ;;  %v3775_v56 = vpop.f32.mrf.mxu1 }
 0x119   : > { %v8017_v57 = vadd.f32 %v3775_v56, %v7931_v14 }
 0x11a   : > { %v8024_v61 = vpop.f32.mrf.mxu0  ;;  %v3777_v62 = vpop.f32.mrf.mxu1  ;;  %4619 = vmatpush1.bf16.msra.mxu1 %v6853_v45  ;;  %4812 = vmatpush1.bf16.msra.mxu0 %v6856_v46  ;;  %v6859_v45 = vld [vmem:[%s7369_s16 + $0x258] ss:$72 sps:$4 sm:$0xff]  }
 0x11b   : > { %v8036_v2 = vadd.f32 %v3777_v62, %v7937_v17  ;;  %4620 = vmatprep.subr.bf16.mxu1 %v6867_v53  ;;  %4813 = vmatprep.subr.bf16.mxu0 %v6870_v54  ;;  %v6862_v46 = vld [vmem:[%s7369_s16 + $0x260] ss:$72 sps:$4 sm:$0xff]  }
 0x11c   : > { %v8038_v3 = vpop.f32.mrf.mxu0  ;;  %v3781_v4 = vpop.f32.mrf.mxu1  ;;  %4279 = vmatmul.mubr.bf16.gmra.mxu1 %v6839_v50  ;;  %4472 = vmatmul.mubr.bf16.gmra.mxu0 %v6840_v51  ;;  %v6915_v50 = vld [vmem:[%s9436_s1 + $0x5f4] ss:$8 sps:$4 sm:$0xff]  }
 0x11d   : > { %v8047_v7 = vadd.f32 %v3781_v4, %v7931_v14  ;;  %4288 = vmatprep.mubr.bf16.mxu1 %v6847_v58  ;;  %4481 = vmatprep.mubr.bf16.mxu0 %v6849_v59  ;;  %v6918_v51 = vld [vmem:[%s9436_s1 + $0x6f4] ss:$8 sps:$4 sm:$0xff]   ;;  %v6930_v4 = vld [vmem:[%s9436_s1 + $0x6e4] ss:$8 sps:$4 sm:$0xff]  }
 0x11e   : > { %v8049_v8 = vpop.f32.mrf.mxu0  ;;  %v3783_v9 = vpop.f32.mrf.mxu1  ;;  %4621 = vmatpush1.bf16.msra.mxu1 %v6865_v60  ;;  %4814 = vmatpush1.bf16.msra.mxu0 %v6868_v63  ;;  %v6873_v58 = vld [vmem:[%s7369_s16 + $0x2ec] ss:$72 sps:$4 sm:$0xff]   ;;  %v6913_v60 = vld [vmem:[%s9436_s1 + $0x5f0] ss:$8 sps:$4 sm:$0xff]  }
 0x11f   : > { %v8054_v12 = vadd.f32 %v3783_v9, %v7937_v17  ;;  %4622 = vmatprep.subr.bf16.mxu1 %v6879_v0  ;;  %4815 = vmatprep.subr.bf16.mxu0 %v6882_v1  ;;  %v6876_v59 = vld [vmem:[%s7369_s16 + $0x2f4] ss:$72 sps:$4 sm:$0xff]   ;;  %v6916_v0 = vld [vmem:[%s9436_s1 + $0x6f0] ss:$8 sps:$4 sm:$0xff]   ;;  %v6927_v1 = vld [vmem:[%s9436_s1 + $0x5e4] ss:$8 sps:$4 sm:$0xff]  }
 0x120   : > { %v8062_v16 = vpop.f32.mrf.mxu0  ;;  %v3785_v18 = vpop.f32.mrf.mxu1 }
 0x121   : > { %v8065_v19 = vadd.f32 %v3785_v18, %v7931_v14 }
 0x122   : > { %v8072_v24 = vpop.f32.mrf.mxu0  ;;  %v3787_v27 = vpop.f32.mrf.mxu1  ;;  %4623 = vmatpush1.bf16.msra.mxu1 %v6877_v5  ;;  %4816 = vmatpush1.bf16.msra.mxu0 %v6880_v6 }
 0x123   : > { %v8084_v34 = vadd.f32 %v3787_v27, %v7937_v17  ;;  %4624 = vmatprep.subr.bf16.mxu1 %v6891_v13  ;;  %4817 = vmatprep.subr.bf16.mxu0 %v6894_v15  ;;  %v6939_v27 = vld [vmem:[%s9436_s1 + $0x5d4] ss:$8 sps:$4 sm:$0xff]  }
 0x124   : > { %v8086_v35 = vpop.f32.mrf.mxu0  ;;  %v3791_v36 = vpop.f32.mrf.mxu1  ;;  %4289 = vmatmul.mubr.bf16.gmra.mxu1 %v6851_v10  ;;  %4482 = vmatmul.mubr.bf16.gmra.mxu0 %v6852_v11  ;;  %v6925_v10 = vld [vmem:[%s9436_s1 + $0x5e0] ss:$8 sps:$4 sm:$0xff]  }
 0x125   : > { %v8095_v40 = vadd.f32 %v3791_v36, %v7931_v14  ;;  %4298 = vmatprep.mubr.bf16.mxu1 %v6861_v20  ;;  %4491 = vmatprep.mubr.bf16.mxu0 %v6864_v22  ;;  %v6928_v11 = vld [vmem:[%s9436_s1 + $0x6e0] ss:$8 sps:$4 sm:$0xff]   ;;  %v6874_v22 = vld [vmem:[%s7369_s16 + $0x2f0] ss:$72 sps:$4 sm:$0xff]  }
 0x126   : > { %v8097_v41 = vpop.f32.mrf.mxu0  ;;  %v3793_v44 = vpop.f32.mrf.mxu1  ;;  %4625 = vmatpush1.bf16.msra.mxu1 %v6889_v23  ;;  %4818 = vmatpush1.bf16.msra.mxu0 %v6892_v29  ;;  %v6871_v20 = vld [vmem:[%s7369_s16 + $0x2e8] ss:$72 sps:$4 sm:$0xff]   ;;  %v6942_v29 = vld [vmem:[%s9436_s1 + $0x6d4] ss:$8 sps:$4 sm:$0xff]  }
 0x127   : > { %v8102_v49 = vadd.f32 %v3793_v44, %v7937_v17  ;;  %4626 = vmatprep.subr.bf16.mxu1 %v6903_v30  ;;  %4819 = vmatprep.subr.bf16.mxu0 %v6906_v32  ;;  %v6937_v44 = vld [vmem:[%s9436_s1 + $0x5d0] ss:$8 sps:$4 sm:$0xff]  }
 0x128   : > { %v8110_v53 = vpop.f32.mrf.mxu0  ;;  %v3795_v54 = vpop.f32.mrf.mxu1 }
 0x129   : > { %9439 = vst [vmem:[#allocation2_spill] sm:$0xff] %v8102_v49  ;;  %v8113_v56 = vadd.f32 %v3795_v54, %v7931_v14  ;;  %v6954_v54 = vld [vmem:[%s9436_s1 + $0x6c4] ss:$8 sps:$4 sm:$0xff]  }
 0x12a   : > { %v8120_v62 = vpop.f32.mrf.mxu0  ;;  %v3797_v63 = vpop.f32.mrf.mxu1  ;;  %4627 = vmatpush1.bf16.msra.mxu1 %v6901_v38  ;;  %4820 = vmatpush1.bf16.msra.mxu0 %v6904_v39  ;;  %v6885_v38 = vld [vmem:[%s7369_s16 + $0x37c] ss:$72 sps:$4 sm:$0xff]  }
 0x12b   : > { %9440 = vst [vmem:[#allocation3_spill] sm:$0xff] %v8113_v56  ;;  %v8132_v5 = vadd.f32 %v3797_v63, %v7937_v17  ;;  %4628 = vmatprep.subr.bf16.mxu1 %v6915_v50  ;;  %4821 = vmatprep.subr.bf16.mxu0 %v6918_v51  ;;  %v6888_v39 = vld [vmem:[%s7369_s16 + $0x384] ss:$72 sps:$4 sm:$0xff]   ;;  %v6940_v50 = vld [vmem:[%s9436_s1 + $0x6d0] ss:$8 sps:$4 sm:$0xff]  }
 0x12c   : > { %v8134_v6 = vpop.f32.mrf.mxu0  ;;  %v3801_v9 = vpop.f32.mrf.mxu1  ;;  %4299 = vmatmul.mubr.bf16.gmra.mxu1 %v6859_v45  ;;  %4492 = vmatmul.mubr.bf16.gmra.mxu0 %v6862_v46  ;;  %v6951_v51 = vld [vmem:[%s9436_s1 + $0x5c4] ss:$8 sps:$4 sm:$0xff]   ;;  %v6949_v63 = vld [vmem:[%s9436_s1 + $0x5c0] ss:$8 sps:$4 sm:$0xff]  }
 0x12d   : > { %9441 = vst [vmem:[#allocation4_spill] sm:$0xff] %v8132_v5  ;;  %v8143_v13 = vadd.f32 %v3801_v9, %v7931_v14  ;;  %4308 = vmatprep.mubr.bf16.mxu1 %v6873_v58  ;;  %4501 = vmatprep.mubr.bf16.mxu0 %v6876_v59  ;;  %v6922_v5 = vld [vmem:[%s7369_s16 + $0x530] ss:$72 sps:$4 sm:$0xff]  }
 0x12e   : > { %v8145_v15 = vpop.f32.mrf.mxu0  ;;  %v3803_v18 = vpop.f32.mrf.mxu1  ;;  %4629 = vmatpush2.bf16.msra.mxu1 %v6913_v60  ;;  %4822 = vmatpush2.bf16.msra.mxu0 %v6916_v0  ;;  %v6952_v0 = vld [vmem:[%s9436_s1 + $0x6c0] ss:$8 sps:$4 sm:$0xff]  }
 0x12f   : > { %9442 = vst [vmem:[#allocation5_spill] sm:$0xff] %v8143_v13  ;;  %v8150_v23 = vadd.f32 %v3803_v18, %v7937_v17  ;;  %4630 = vmatprep.subr.bf16.mxu1 %v6927_v1  ;;  %4823 = vmatprep.subr.bf16.mxu0 %v6930_v4 }
 0x130   : > { %v8158_v30 = vpop.f32.mrf.mxu0  ;;  %v3805_v32 = vpop.f32.mrf.mxu1 }
 0x131   : > { %9443 = vst [vmem:[#allocation6_spill] sm:$0xff] %v8150_v23  ;;  %v8161_v36 = vadd.f32 %v3805_v32, %v7931_v14 }
 0x132   : > { %v8168_v45 = vpop.f32.mrf.mxu0  ;;  %v3807_v46 = vpop.f32.mrf.mxu1  ;;  %4631 = vmatpush2.bf16.msra.mxu1 %v6925_v10  ;;  %4824 = vmatpush2.bf16.msra.mxu0 %v6928_v11  ;;  %v6883_v10 = vld [vmem:[%s7369_s16 + $0x378] ss:$72 sps:$4 sm:$0xff]  }
 0x133   : > { %9444 = vst [vmem:[#allocation7_spill] sm:$0xff] %v8161_v36  ;;  %v8180_v58 = vadd.f32 %v3807_v46, %v7937_v17  ;;  %4632 = vmatprep.subr.bf16.mxu1 %v6939_v27  ;;  %4825 = vmatprep.subr.bf16.mxu0 %v6942_v29  ;;  %v6886_v11 = vld [vmem:[%s7369_s16 + $0x380] ss:$72 sps:$4 sm:$0xff]  }
 0x134   : > { %v8182_v59 = vpop.f32.mrf.mxu0  ;;  %v3811_v60 = vpop.f32.mrf.mxu1  ;;  %4309 = vmatmul.mubr.bf16.gmra.mxu1 %v6871_v20  ;;  %4502 = vmatmul.mubr.bf16.gmra.mxu0 %v6874_v22  ;;  %v6963_v20 = vld [vmem:[%s9436_s1 + $0x5b4] ss:$8 sps:$4 sm:$0xff]   ;;  %v7000_v36 = vld [vmem:[%s9436_s1 + $0x680] ss:$8 sps:$4 sm:$0xff]  }
 0x135   : > { %9445 = vst [vmem:[#allocation8_spill] sm:$0xff] %v8180_v58  ;;  %v8191_v1 = vadd.f32 %v3811_v60, %v7931_v14  ;;  %4318 = vmatprep.mubr.bf16.mxu1 %v6885_v38  ;;  %4511 = vmatprep.mubr.bf16.mxu0 %v6888_v39  ;;  %v6966_v22 = vld [vmem:[%s9436_s1 + $0x6b4] ss:$8 sps:$4 sm:$0xff]   ;;  %v6978_v60 = vld [vmem:[%s9436_s1 + $0x6a4] ss:$8 sps:$4 sm:$0xff]  }
 0x136   : > { %v8193_v4 = vpop.f32.mrf.mxu0  ;;  %v3813_v9 = vpop.f32.mrf.mxu1  ;;  %4633 = vmatpush2.bf16.msra.mxu1 %v6937_v44  ;;  %4826 = vmatpush2.bf16.msra.mxu0 %v6940_v50  ;;  %v6897_v38 = vld [vmem:[%s7369_s16 + $0x40c] ss:$72 sps:$4 sm:$0xff]   ;;  %v6961_v44 = vld [vmem:[%s9436_s1 + $0x5b0] ss:$8 sps:$4 sm:$0xff]   ;;  %v6997_v58 = vld [vmem:[%s9436_s1 + $0x580] ss:$8 sps:$4 sm:$0xff]  }
 0x137   : > { %9446 = vst [vmem:[#allocation9_spill] sm:$0xff] %v8191_v1  ;;  %v8198_v18 = vadd.f32 %v3813_v9, %v7937_v17  ;;  %4634 = vmatprep.subr.bf16.mxu1 %v6951_v51  ;;  %4827 = vmatprep.subr.bf16.mxu0 %v6954_v54  ;;  %v6900_v39 = vld [vmem:[%s7369_s16 + $0x414] ss:$72 sps:$4 sm:$0xff]   ;;  %v6964_v51 = vld [vmem:[%s9436_s1 + $0x6b0] ss:$8 sps:$4 sm:$0xff]  }
 0x138   : > { %v8206_v27 = vpop.f32.mrf.mxu0  ;;  %v3815_v29 = vpop.f32.mrf.mxu1  ;;  %v6975_v54 = vld [vmem:[%s9436_s1 + $0x5a4] ss:$8 sps:$4 sm:$0xff]  }
 0x139   : > { %9447 = vst [vmem:[#allocation10_spill] sm:$0xff] %v8198_v18  ;;  %v8209_v32 = vadd.f32 %v3815_v29, %v7931_v14  ;;  %v6973_v29 = vld [vmem:[%s9436_s1 + $0x5a0] ss:$8 sps:$4 sm:$0xff]  }
 0x13a   : > { %v8216_v46 = vpop.f32.mrf.mxu0  ;;  %v3817_v50 = vpop.f32.mrf.mxu1  ;;  %4635 = vmatpush2.bf16.msra.mxu1 %v6949_v63  ;;  %4828 = vmatpush2.bf16.msra.mxu0 %v6952_v0 }
 0x13b   : > { %9448 = vst [vmem:[#allocation11_spill] sm:$0xff] %v8209_v32  ;;  %v8228_v9 = vadd.f32 %v3817_v50, %v7937_v17  ;;  %4636 = vmatprep.subr.bf16.mxu1 %v6963_v20  ;;  %4829 = vmatprep.subr.bf16.mxu0 %v6966_v22  ;;  %v6976_v32 = vld [vmem:[%s9436_s1 + $0x6a0] ss:$8 sps:$4 sm:$0xff]  }
 0x13c   : > { %v8230_v63 = vpop.f32.mrf.mxu0  ;;  %v3821_v0 = vpop.f32.mrf.mxu1  ;;  %4319 = vmatmul.mubr.bf16.gmra.mxu1 %v6883_v10  ;;  %4512 = vmatmul.mubr.bf16.gmra.mxu0 %v6886_v11  ;;  %v6895_v10 = vld [vmem:[%s7369_s16 + $0x408] ss:$72 sps:$4 sm:$0xff]  }
 0x13d   : > { %9449 = vst [vmem:[#allocation12_spill] sm:$0xff] %v8228_v9  ;;  %v8239_v18 = vadd.f32 %v3821_v0, %v7931_v14  ;;  %4328 = vmatprep.mubr.bf16.mxu1 %v6897_v38  ;;  %4521 = vmatprep.mubr.bf16.mxu0 %v6900_v39  ;;  %v6898_v11 = vld [vmem:[%s7369_s16 + $0x410] ss:$72 sps:$4 sm:$0xff]   ;;  %v6987_v0 = vld [vmem:[%s9436_s1 + $0x594] ss:$8 sps:$4 sm:$0xff]  }
 0x13e   : > { %v8241_v20 = vpop.f32.mrf.mxu0  ;;  %v3823_v22 = vpop.f32.mrf.mxu1  ;;  %4637 = vmatpush2.bf16.msra.mxu1 %v6961_v44  ;;  %4830 = vmatpush2.bf16.msra.mxu0 %v6964_v51  ;;  %v6990_v38 = vld [vmem:[%s9436_s1 + $0x694] ss:$8 sps:$4 sm:$0xff]   ;;  %v6912_v51 = vld [vmem:[%s7369_s16 + $0x4a4] ss:$72 sps:$4 sm:$0xff]  }
 0x13f   : > { %9450 = vst [vmem:[#allocation13_spill] sm:$0xff] %v8239_v18  ;;  %v8246_v50 = vadd.f32 %v3823_v22, %v7937_v17  ;;  %4638 = vmatprep.subr.bf16.mxu1 %v6975_v54  ;;  %4831 = vmatprep.subr.bf16.mxu0 %v6978_v60  ;;  %v6909_v44 = vld [vmem:[%s7369_s16 + $0x49c] ss:$72 sps:$4 sm:$0xff]   ;;  %v6985_v54 = vld [vmem:[%s9436_s1 + $0x590] ss:$8 sps:$4 sm:$0xff]  }
 0x140   : > { %v8254_v39 = vpop.f32.mrf.mxu0  ;;  %v3825_v18 = vpop.f32.mrf.mxu1 }
 0x141   : > { %9451 = vst [vmem:[#allocation14_spill] sm:$0xff] %v8246_v50  ;;  %v8257_v9 = vadd.f32 %v3825_v18, %v7931_v14  ;;  %v6988_v50 = vld [vmem:[%s9436_s1 + $0x690] ss:$8 sps:$4 sm:$0xff]   ;;  %v6999_v18 = vld [vmem:[%s9436_s1 + $0x584] ss:$8 sps:$4 sm:$0xff]  }
 0x142   : > { %v8264_v60 = vpop.f32.mrf.mxu0  ;;  %v3827_v22 = vpop.f32.mrf.mxu1  ;;  %4639 = vmatpush2.bf16.msra.mxu1 %v6973_v29  ;;  %4832 = vmatpush2.bf16.msra.mxu0 %v6976_v32 }
 0x143   : > { %9452 = vst [vmem:[#allocation15_spill] sm:$0xff] %v8257_v9  ;;  %v7002_v9 = vld [vmem:[%s9436_s1 + $0x684] ss:$8 sps:$4 sm:$0xff]   ;;  %v8276_v1 = vadd.f32 %v3827_v22, %v7937_v17  ;;  %4640 = vmatprep.subr.bf16.mxu1 %v6987_v0  ;;  %4833 = vmatprep.subr.bf16.mxu0 %v6990_v38 }
 0x144   : > { %v8278_v32 = vpop.f32.mrf.mxu0  ;;  %v3831_v29 = vpop.f32.mrf.mxu1  ;;  %4329 = vmatmul.mubr.bf16.gmra.mxu1 %v6895_v10  ;;  %4522 = vmatmul.mubr.bf16.gmra.mxu0 %v6898_v11  ;;  %v6907_v10 = vld [vmem:[%s7369_s16 + $0x498] ss:$72 sps:$4 sm:$0xff]  }
 0x145   : > { %9453 = vst [vmem:[#allocation16_spill] sm:$0xff] %v8276_v1  ;;  %v8287_v23 = vadd.f32 %v3831_v29, %v7931_v14  ;;  %4338 = vmatprep.mubr.bf16.mxu1 %v6909_v44  ;;  %4531 = vmatprep.mubr.bf16.mxu0 %v6912_v51  ;;  %v6910_v11 = vld [vmem:[%s7369_s16 + $0x4a0] ss:$72 sps:$4 sm:$0xff]   ;;  %v7011_v29 = vld [vmem:[%s9436_s1 + $0x774] ss:$8 sps:$4 sm:$0xff]  }
 0x146   : > { %v8289_v0 = vpop.f32.mrf.mxu0  ;;  %v3833_v38 = vpop.f32.mrf.mxu1  ;;  %4641 = vmatpush2.bf16.msra.mxu1 %v6985_v54  ;;  %4834 = vmatpush2.bf16.msra.mxu0 %v6988_v50  ;;  %v7014_v44 = vld [vmem:[%s9436_s1 + $0x874] ss:$8 sps:$4 sm:$0xff]  }
 0x147   : > { %9454 = vst [vmem:[#allocation17_spill] sm:$0xff] %v8287_v23  ;;  %v8294_v22 = vadd.f32 %v3833_v38, %v7937_v17  ;;  %4642 = vmatprep.subr.bf16.mxu1 %v6999_v18  ;;  %4835 = vmatprep.subr.bf16.mxu0 %v7002_v9  ;;  %v6921_v50 = vld [vmem:[%s7369_s16 + $0x52c] ss:$72 sps:$4 sm:$0xff]   ;;  %v3682_v9 = vadd.f32 %v7948_v21, %v7931_v14 }
 0x148   : > { %v8302_v51 = vpop.f32.mrf.mxu0  ;;  %v3835_v23 = vpop.f32.mrf.mxu1  ;;  %v6924_v54 = vld [vmem:[%s7369_s16 + $0x534] ss:$72 sps:$4 sm:$0xff]  }
 0x149   : > { %9455 = vst [vmem:[#allocation18_spill] sm:$0xff] %v8294_v22  ;;  %v8305_v1 = vadd.f32 %v3835_v23, %v7931_v14 }
 0x14a   : > { %v8309_v38 = vpop.f32.mrf.mxu0  ;;  %v3837_v18 = vpop.f32.mrf.mxu1  ;;  %4643 = vmatpush2.bf16.msra.mxu1 %v6997_v58  ;;  %4836 = vmatpush2.bf16.msra.mxu0 %v7000_v36 }
 0x14b   : > { %9456 = vst [vmem:[#allocation19_spill] sm:$0xff] %v8305_v1  ;;  %v8314_v22 = vadd.f32 %v3837_v18, %v7937_v17  ;;  %4998 = vmatprep.subr.bf16.mxu1 %v7011_v29  ;;  %5191 = vmatprep.subr.bf16.mxu0 %v7014_v44  ;;  %v3684_v1 = vadd.f32 %v7959_v26, %v7937_v17 }
 0x14c   : > { %v3874_v13 = vpop.f32.mrf.mxu1  ;;  %v4067_v23 = vpop.f32.mrf.mxu0  ;;  %4339 = vmatmul.mubr.bf16.gmra.mxu1 %v6907_v10  ;;  %4532 = vmatmul.mubr.bf16.gmra.mxu0 %v6910_v11  ;;  %v3686_v18 = vadd.f32 %v7966_v31, %v7931_v14  ;;  %v3688_v26 = vadd.f32 %v7976_v37, %v7937_v17  ;;  %v3692_v31 = vadd.f32 %v7990_v43, %v7931_v14 }
 0x14d   : > { %9457 = vst [vmem:[#allocation20_spill] sm:$0xff] %v8314_v22  ;;  %v3875_v58 = vadd.f32 %v3874_v13, %v3682_v9  ;;  %4348 = vmatprep.mubr.bf16.mxu1 %v6921_v50  ;;  %4541 = vmatprep.mubr.bf16.mxu0 %v6924_v54  ;;  %v6919_v22 = vld [vmem:[%s7369_s16 + $0x528] ss:$72 sps:$4 sm:$0xff]   ;;  %v6933_v50 = vld [vmem:[%s7369_s16 + $0x5bc] ss:$72 sps:$4 sm:$0xff]   ;;  %v3694_v37 = vadd.f32 %v8001_v48, %v7937_v17 }
 0x14e   : > { %v3876_v21 = vpop.f32.mrf.mxu1  ;;  %v4069_v36 = vpop.f32.mrf.mxu0  ;;  %v6936_v54 = vld [vmem:[%s7369_s16 + $0x5c4] ss:$72 sps:$4 sm:$0xff]   ;;  %v3698_v48 = vadd.f32 %v8024_v61, %v7937_v17  ;;  %v3704_v61 = vadd.f32 %v8049_v8, %v7937_v17  ;;  %v3708_v8 = vadd.f32 %v8072_v24, %v7937_v17  ;;  %v3714_v24 = vadd.f32 %v8097_v41, %v7937_v17 }
 0x14f   : > { %v8320_v29 = vadd.f32 %v4067_v23, %v3875_v58  ;;  %v3877_v44 = vadd.f32 %v3876_v21, %v3684_v1  ;;  %v3718_v41 = vadd.f32 %v8120_v62, %v7937_v17  ;;  %v3724_v62 = vadd.f32 %v8145_v15, %v7937_v17 }
 0x150   : > { %v3878_v10 = vpop.f32.mrf.mxu1  ;;  %v4071_v11 = vpop.f32.mrf.mxu0  ;;  %v3728_v15 = vadd.f32 %v8168_v45, %v7937_v17  ;;  %v3734_v45 = vadd.f32 %v8193_v4, %v7937_v17  ;;  %v3738_v4 = vadd.f32 %v8216_v46, %v7937_v17  ;;  %v3744_v46 = vadd.f32 %v8241_v20, %v7937_v17 }
 0x151   : > { %v8326_v56 = vadd.f32 %v4069_v36, %v3877_v44  ;;  %v3879_v13 = vadd.f32 %v3878_v10, %v3686_v18  ;;  %v3696_v10 = vadd.f32 %v8014_v55, %v7931_v14  ;;  %v3702_v55 = vadd.f32 %v8038_v3, %v7931_v14 }
 0x152   : > { %v3880_v9 = vpop.f32.mrf.mxu1  ;;  %v4073_v49 = vpop.f32.mrf.mxu0  ;;  %v3748_v20 = vadd.f32 %v8264_v60, %v7937_v17  ;;  %v3754_v60 = vadd.f32 %v8289_v0, %v7937_v17  ;;  %v3758_v0 = vadd.f32 %v8309_v38, %v7937_v17  ;;  %v7023_v17 = vld [vmem:[%s9436_s1 + $0x764] ss:$8 sps:$4 sm:$0xff]  }
 0x153   : > { %v8332_v23 = vadd.f32 %v4071_v11, %v3879_v13  ;;  %v3881_v1 = vadd.f32 %v3880_v9, %v3688_v26  ;;  %v7026_v38 = vld [vmem:[%s9436_s1 + $0x864] ss:$8 sps:$4 sm:$0xff]  }
 0x154   : > { %v3884_v58 = vpop.f32.mrf.mxu1  ;;  %v4077_v21 = vpop.f32.mrf.mxu0  ;;  %4349 = vmatmul.mubr.bf16.gmra.mxu1 %v6919_v22  ;;  %4542 = vmatmul.mubr.bf16.gmra.mxu0 %v6922_v5  ;;  %v6931_v22 = vld [vmem:[%s7369_s16 + $0x5b8] ss:$72 sps:$4 sm:$0xff]  }
 0x155   : > { %v8336_v36 = vadd.f32 %v4073_v49, %v3881_v1  ;;  %v3885_v18 = vadd.f32 %v3884_v58, %v3692_v31  ;;  %4358 = vmatprep.mubr.bf16.mxu1 %v6933_v50  ;;  %4551 = vmatprep.mubr.bf16.mxu0 %v6936_v54  ;;  %v6934_v5 = vld [vmem:[%s7369_s16 + $0x5c0] ss:$72 sps:$4 sm:$0xff]   ;;  %v6945_v50 = vld [vmem:[%s7369_s16 + $0x64c] ss:$72 sps:$4 sm:$0xff]  }
 0x156   : > { %v3886_v43 = vpop.f32.mrf.mxu1  ;;  %v4079_v44 = vpop.f32.mrf.mxu0  ;;  %v6948_v54 = vld [vmem:[%s7369_s16 + $0x654] ss:$72 sps:$4 sm:$0xff]  }
 0x157   : > { %v8340_v11 = vadd.f32 %v4077_v21, %v3885_v18  ;;  %v3887_v26 = vadd.f32 %v3886_v43, %v3694_v37 }
 0x158   : > { %v3888_v13 = vpop.f32.mrf.mxu1  ;;  %v4081_v9 = vpop.f32.mrf.mxu0 }
 0x159   : > { %v8346_v49 = vadd.f32 %v4079_v44, %v3887_v26  ;;  %v3889_v31 = vadd.f32 %v3888_v13, %v3696_v10  ;;  %v3706_v13 = vadd.f32 %v8062_v16, %v7931_v14  ;;  %v3712_v16 = vadd.f32 %v8086_v35, %v7931_v14 }
 0x15a   : > { %v3890_v1 = vpop.f32.mrf.mxu1  ;;  %v4083_v58 = vpop.f32.mrf.mxu0 }
 0x15b   : > { %v8352_v21 = vadd.f32 %v4081_v9, %v3889_v31  ;;  %v3891_v37 = vadd.f32 %v3890_v1, %v3698_v48 }
 0x15c   : > { %v3894_v18 = vpop.f32.mrf.mxu1  ;;  %v4087_v43 = vpop.f32.mrf.mxu0  ;;  %4359 = vmatmul.mubr.bf16.gmra.mxu1 %v6931_v22  ;;  %4552 = vmatmul.mubr.bf16.gmra.mxu0 %v6934_v5  ;;  %v6943_v22 = vld [vmem:[%s7369_s16 + $0x648] ss:$72 sps:$4 sm:$0xff]  }
 0x15d   : > { %v8356_v44 = vadd.f32 %v4083_v58, %v3891_v37  ;;  %v3895_v10 = vadd.f32 %v3894_v18, %v3702_v55  ;;  %4368 = vmatprep.mubr.bf16.mxu1 %v6945_v50  ;;  %4561 = vmatprep.mubr.bf16.mxu0 %v6948_v54  ;;  %v6946_v5 = vld [vmem:[%s7369_s16 + $0x650] ss:$72 sps:$4 sm:$0xff]   ;;  %v6957_v50 = vld [vmem:[%s7369_s16 + $0x6dc] ss:$72 sps:$4 sm:$0xff]  }
 0x15e   : > { %v3896_v3 = vpop.f32.mrf.mxu1  ;;  %v4089_v26 = vpop.f32.mrf.mxu0  ;;  %v6960_v54 = vld [vmem:[%s7369_s16 + $0x6e4] ss:$72 sps:$4 sm:$0xff]  }
 0x15f   : > { %v8360_v9 = vadd.f32 %v4087_v43, %v3895_v10  ;;  %v3897_v48 = vadd.f32 %v3896_v3, %v3704_v61 }
 0x160   : > { %v3898_v31 = vpop.f32.mrf.mxu1  ;;  %v4091_v1 = vpop.f32.mrf.mxu0 }
 0x161   : > { %v8366_v58 = vadd.f32 %v4089_v26, %v3897_v48  ;;  %v3899_v55 = vadd.f32 %v3898_v31, %v3706_v13  ;;  %v3716_v31 = vadd.f32 %v8110_v53, %v7931_v14  ;;  %v3722_v53 = vadd.f32 %v8134_v6, %v7931_v14 }
 0x162   : > { %v3900_v37 = vpop.f32.mrf.mxu1  ;;  %v4093_v18 = vpop.f32.mrf.mxu0 }
 0x163   : > { %v8372_v43 = vadd.f32 %v4091_v1, %v3899_v55  ;;  %v3901_v61 = vadd.f32 %v3900_v37, %v3708_v8 }
 0x164   : > { %v3904_v10 = vpop.f32.mrf.mxu1  ;;  %v4097_v3 = vpop.f32.mrf.mxu0  ;;  %4369 = vmatmul.mubr.bf16.gmra.mxu1 %v6943_v22  ;;  %4562 = vmatmul.mubr.bf16.gmra.mxu0 %v6946_v5  ;;  %v6955_v22 = vld [vmem:[%s7369_s16 + $0x6d8] ss:$72 sps:$4 sm:$0xff]  }
 0x165   : > { %v8376_v26 = vadd.f32 %v4093_v18, %v3901_v61  ;;  %v3905_v13 = vadd.f32 %v3904_v10, %v3712_v16  ;;  %4378 = vmatprep.mubr.bf16.mxu1 %v6957_v50  ;;  %4571 = vmatprep.mubr.bf16.mxu0 %v6960_v54  ;;  %v6958_v5 = vld [vmem:[%s7369_s16 + $0x6e0] ss:$72 sps:$4 sm:$0xff]   ;;  %v6969_v50 = vld [vmem:[%s7369_s16 + $0x76c] ss:$72 sps:$4 sm:$0xff]  }
 0x166   : > { %v3906_v35 = vpop.f32.mrf.mxu1  ;;  %v4099_v48 = vpop.f32.mrf.mxu0  ;;  %v6972_v54 = vld [vmem:[%s7369_s16 + $0x774] ss:$72 sps:$4 sm:$0xff]  }
 0x167   : > { %v8380_v1 = vadd.f32 %v4097_v3, %v3905_v13  ;;  %v3907_v8 = vadd.f32 %v3906_v35, %v3714_v24 }
 0x168   : > { %v3908_v55 = vpop.f32.mrf.mxu1  ;;  %v4101_v37 = vpop.f32.mrf.mxu0 }
 0x169   : > { %v8386_v18 = vadd.f32 %v4099_v48, %v3907_v8  ;;  %v3909_v16 = vadd.f32 %v3908_v55, %v3716_v31  ;;  %v3726_v55 = vadd.f32 %v8158_v30, %v7931_v14  ;;  %v3732_v30 = vadd.f32 %v8182_v59, %v7931_v14 }
 0x16a   : > { %v3910_v61 = vpop.f32.mrf.mxu1  ;;  %v4103_v10 = vpop.f32.mrf.mxu0 }
 0x16b   : > { %v8392_v3 = vadd.f32 %v4101_v37, %v3909_v16  ;;  %v3911_v24 = vadd.f32 %v3910_v61, %v3718_v41  ;;  %v6967_v16 = vld [vmem:[%s7369_s16 + $0x768] ss:$72 sps:$4 sm:$0xff]  }
 0x16c   : > { %v3914_v13 = vpop.f32.mrf.mxu1  ;;  %v4107_v35 = vpop.f32.mrf.mxu0  ;;  %4379 = vmatmul.mubr.bf16.gmra.mxu1 %v6955_v22  ;;  %4572 = vmatmul.mubr.bf16.gmra.mxu0 %v6958_v5  ;;  %v6970_v61 = vld [vmem:[%s7369_s16 + $0x770] ss:$72 sps:$4 sm:$0xff]  }
 0x16d   : > { %v8396_v48 = vadd.f32 %v4103_v10, %v3911_v24  ;;  %v3915_v31 = vadd.f32 %v3914_v13, %v3722_v53  ;;  %4388 = vmatprep.mubr.bf16.mxu1 %v6969_v50  ;;  %4581 = vmatprep.mubr.bf16.mxu0 %v6972_v54  ;;  %v6981_v50 = vld [vmem:[%s7369_s16 + $0x7fc] ss:$72 sps:$4 sm:$0xff]  }
 0x16e   : > { %v3916_v6 = vpop.f32.mrf.mxu1  ;;  %v4109_v8 = vpop.f32.mrf.mxu0  ;;  %v6984_v54 = vld [vmem:[%s7369_s16 + $0x804] ss:$72 sps:$4 sm:$0xff]  }
 0x16f   : > { %v8400_v37 = vadd.f32 %v4107_v35, %v3915_v31  ;;  %v3917_v41 = vadd.f32 %v3916_v6, %v3724_v62 }
 0x170   : > { %v3918_v22 = vpop.f32.mrf.mxu1  ;;  %v4111_v5 = vpop.f32.mrf.mxu0 }
 0x171   : > { %v8406_v10 = vadd.f32 %v4109_v8, %v3917_v41  ;;  %v3919_v53 = vadd.f32 %v3918_v22, %v3726_v55  ;;  %v3736_v22 = vadd.f32 %v8206_v27, %v7931_v14  ;;  %v3742_v27 = vadd.f32 %v8230_v63, %v7931_v14 }
 0x172   : > { %v3920_v24 = vpop.f32.mrf.mxu1  ;;  %v4113_v13 = vpop.f32.mrf.mxu0 }
 0x173   : > { %v8412_v35 = vadd.f32 %v4111_v5, %v3919_v53  ;;  %v3921_v62 = vadd.f32 %v3920_v24, %v3728_v15  ;;  %v6979_v53 = vld [vmem:[%s7369_s16 + $0x7f8] ss:$72 sps:$4 sm:$0xff]  }
 0x174   : > { %v3924_v31 = vpop.f32.mrf.mxu1  ;;  %v4117_v6 = vpop.f32.mrf.mxu0  ;;  %4389 = vmatmul.mubr.bf16.gmra.mxu1 %v6967_v16  ;;  %4582 = vmatmul.mubr.bf16.gmra.mxu0 %v6970_v61  ;;  %v6982_v24 = vld [vmem:[%s7369_s16 + $0x800] ss:$72 sps:$4 sm:$0xff]  }
 0x175   : > { %v8416_v8 = vadd.f32 %v4113_v13, %v3921_v62  ;;  %v3925_v55 = vadd.f32 %v3924_v31, %v3732_v30  ;;  %4398 = vmatprep.mubr.bf16.mxu1 %v6981_v50  ;;  %4591 = vmatprep.mubr.bf16.mxu0 %v6984_v54  ;;  %v6993_v50 = vld [vmem:[%s7369_s16 + $0x88c] ss:$72 sps:$4 sm:$0xff]  }
 0x176   : > { %v3926_v59 = vpop.f32.mrf.mxu1  ;;  %v4119_v41 = vpop.f32.mrf.mxu0  ;;  %v6996_v54 = vld [vmem:[%s7369_s16 + $0x894] ss:$72 sps:$4 sm:$0xff]  }
 0x177   : > { %v8420_v5 = vadd.f32 %v4117_v6, %v3925_v55  ;;  %v3927_v15 = vadd.f32 %v3926_v59, %v3734_v45 }
 0x178   : > { %v3928_v16 = vpop.f32.mrf.mxu1  ;;  %v4121_v61 = vpop.f32.mrf.mxu0 }
 0x179   : > { %v8426_v13 = vadd.f32 %v4119_v41, %v3927_v15  ;;  %v3929_v30 = vadd.f32 %v3928_v16, %v3736_v22  ;;  %v3746_v16 = vadd.f32 %v8254_v39, %v7931_v14  ;;  %v3752_v39 = vadd.f32 %v8278_v32, %v7931_v14 }
 0x17a   : > { %v3930_v62 = vpop.f32.mrf.mxu1  ;;  %v4123_v31 = vpop.f32.mrf.mxu0 }
 0x17b   : > { %v8432_v6 = vadd.f32 %v4121_v61, %v3929_v30  ;;  %v3931_v45 = vadd.f32 %v3930_v62, %v3738_v4  ;;  %v6991_v30 = vld [vmem:[%s7369_s16 + $0x888] ss:$72 sps:$4 sm:$0xff]  }
 0x17c   : > { %v3934_v55 = vpop.f32.mrf.mxu1  ;;  %v4127_v59 = vpop.f32.mrf.mxu0  ;;  %4399 = vmatmul.mubr.bf16.gmra.mxu1 %v6979_v53  ;;  %4592 = vmatmul.mubr.bf16.gmra.mxu0 %v6982_v24  ;;  %v6994_v62 = vld [vmem:[%s7369_s16 + $0x890] ss:$72 sps:$4 sm:$0xff]  }
 0x17d   : > { %v8436_v41 = vadd.f32 %v4123_v31, %v3931_v45  ;;  %v3935_v22 = vadd.f32 %v3934_v55, %v3742_v27  ;;  %4408 = vmatprep.mubr.bf16.mxu1 %v6993_v50  ;;  %4601 = vmatprep.mubr.bf16.mxu0 %v6996_v54  ;;  %v7005_v50 = vld [vmem:[%s7369_s16 + $0x2c] ss:$72 sps:$4 sm:$0xff]  }
 0x17e   : > { %v3936_v63 = vpop.f32.mrf.mxu1  ;;  %v4129_v15 = vpop.f32.mrf.mxu0  ;;  %v7008_v54 = vld [vmem:[%s7369_s16 + $0x34] ss:$72 sps:$4 sm:$0xff]  }
 0x17f   : > { %v8440_v61 = vadd.f32 %v4127_v59, %v3935_v22  ;;  %v3937_v4 = vadd.f32 %v3936_v63, %v3744_v46 }
 0x180   : > { %v3938_v53 = vpop.f32.mrf.mxu1  ;;  %v4131_v24 = vpop.f32.mrf.mxu0 }
 0x181   : > { %v8446_v31 = vadd.f32 %v4129_v15, %v3937_v4  ;;  %v3939_v27 = vadd.f32 %v3938_v53, %v3746_v16  ;;  %v3756_v53 = vadd.f32 %v8302_v51, %v7931_v14  ;;  %v7012_v14 = vld [vmem:[%s9436_s1 + $0x870] ss:$8 sps:$4 sm:$0xff]  }
 0x182   : > { %v3940_v45 = vpop.f32.mrf.mxu1  ;;  %v4133_v55 = vpop.f32.mrf.mxu0 }
 0x183   : > { %v8452_v59 = vadd.f32 %v4131_v24, %v3939_v27  ;;  %v3941_v46 = vadd.f32 %v3940_v45, %v3748_v20  ;;  %v7003_v27 = vld [vmem:[%s7369_s16 + $0x28] ss:$72 sps:$4 sm:$0xff]  }
 0x184   : > { %v3944_v22 = vpop.f32.mrf.mxu1  ;;  %v4137_v63 = vpop.f32.mrf.mxu0  ;;  %4409 = vmatmul.mubr.bf16.gmra.mxu1 %v6991_v30  ;;  %4602 = vmatmul.mubr.bf16.gmra.mxu0 %v6994_v62  ;;  %v7006_v45 = vld [vmem:[%s7369_s16 + $0x30] ss:$72 sps:$4 sm:$0xff]  }
 0x185   : > { %v8456_v15 = vadd.f32 %v4133_v55, %v3941_v46  ;;  %v3945_v16 = vadd.f32 %v3944_v22, %v3752_v39  ;;  %4644 = vmatprep.mubr.bf16.mxu1 %v7005_v50  ;;  %4837 = vmatprep.mubr.bf16.mxu0 %v7008_v54  ;;  %v7009_v54 = vld [vmem:[%s9436_s1 + $0x770] ss:$8 sps:$4 sm:$0xff]   ;;  %v7017_v46 = vld [vmem:[%s7369_s16 + $0xbc] ss:$72 sps:$4 sm:$0xff]  }
 0x186   : > { %v3946_v4 = vpop.f32.mrf.mxu1  ;;  %v4139_v32 = vpop.f32.mrf.mxu0  ;;  %v7020_v22 = vld [vmem:[%s7369_s16 + $0xc4] ss:$72 sps:$4 sm:$0xff]  }
 0x187   : > { %v8460_v24 = vadd.f32 %v4137_v63, %v3945_v16  ;;  %v3947_v20 = vadd.f32 %v3946_v4, %v3754_v60 }
 0x188   : > { %v3948_v30 = vpop.f32.mrf.mxu1  ;;  %v4141_v62 = vpop.f32.mrf.mxu0 }
 0x189   : > { %v8466_v55 = vadd.f32 %v4139_v32, %v3947_v20  ;;  %v3949_v50 = vadd.f32 %v3948_v30, %v3756_v53  ;;  %v7021_v20 = vld [vmem:[%s9436_s1 + $0x760] ss:$8 sps:$4 sm:$0xff]  }
 0x18a   : > { %v3950_v51 = vpop.f32.mrf.mxu1  ;;  %v4143_v39 = vpop.f32.mrf.mxu0  ;;  %v7024_v30 = vld [vmem:[%s9436_s1 + $0x860] ss:$8 sps:$4 sm:$0xff]  }
 0x18b   : > { %v8476_v63 = vadd.f32 %v4141_v62, %v3949_v50  ;;  %v3951_v60 = vadd.f32 %v3950_v51, %v3758_v0  ;;  %v7015_v51 = vld [vmem:[%s7369_s16 + $0xb8] ss:$72 sps:$4 sm:$0xff]  }
 0x18c   : > { %v3954_v16 = vpop.f32.mrf.mxu1  ;;  %v4147_v4 = vpop.f32.mrf.mxu0  ;;  %4645 = vmatmul.mubr.bf16.vlgmr.msra.gmra.mxu1 %v7003_v27  ;;  %4838 = vmatmul.mubr.bf16.vlgmr.msra.gmra.mxu0 %v7006_v45  ;;  %v7038_v27 = vld [vmem:[%s9436_s1 + $0x854] ss:$8 sps:$4 sm:$0xff]  }
 0x18d   : > { %9458 = vst [vmem:[#allocation21_spill] sm:$0xff] %v8476_v63  ;;  %v8484_v32 = vadd.f32 %v4143_v39, %v3951_v60  ;;  %v3955_v53 = vadd.f32 %v3954_v16, %v7957_v25  ;;  %4999 = vmatpush1.bf16.msra.mxu1 %v7009_v54  ;;  %5192 = vmatpush1.bf16.msra.mxu0 %v7012_v14  ;;  %v7035_v25 = vld [vmem:[%s9436_s1 + $0x754] ss:$8 sps:$4 sm:$0xff]   ;;  %v7018_v39 = vld [vmem:[%s7369_s16 + $0xc0] ss:$72 sps:$4 sm:$0xff]  }
 0x18e   : > { %v3956_v62 = vpop.f32.mrf.mxu1  ;;  %v4149_v0 = vpop.f32.mrf.mxu0  ;;  %4654 = vmatprep.mubr.bf16.mxu1 %v7017_v46  ;;  %4847 = vmatprep.mubr.bf16.mxu0 %v7020_v22  ;;  %v7029_v60 = vld [vmem:[%s7369_s16 + $0x14c] ss:$72 sps:$4 sm:$0xff]  }
 0x18f   : > { %9459 = vst [vmem:[#allocation22_spill] sm:$0xff] %v8484_v32  ;;  %v8499_v45 = vadd.f32 %v4147_v4, %v3955_v53  ;;  %v3957_v50 = vadd.f32 %v3956_v62, %v7962_v28  ;;  %5000 = vmatprep.subr.bf16.mxu1 %v7023_v17  ;;  %5193 = vmatprep.subr.bf16.mxu0 %v7026_v38  ;;  %v7032_v16 = vld [vmem:[%s7369_s16 + $0x154] ss:$72 sps:$4 sm:$0xff]   ;;  %v7033_v28 = vld [vmem:[%s9436_s1 + $0x750] ss:$8 sps:$4 sm:$0xff]  }
 0x190   : > { %v3958_v54 = vpop.f32.mrf.mxu1  ;;  %v4151_v14 = vpop.f32.mrf.mxu0  ;;  %v7036_v17 = vld [vmem:[%s9436_s1 + $0x850] ss:$8 sps:$4 sm:$0xff]   ;;  %v7047_v4 = vld [vmem:[%s9436_s1 + $0x744] ss:$8 sps:$4 sm:$0xff]  }
 0x191   : > { %v8504_v46 = vadd.f32 %v4149_v0, %v3957_v50  ;;  %v3959_v22 = vadd.f32 %v3958_v54, %v7969_v33  ;;  %5001 = vmatpush1.bf16.msra.mxu1 %v7021_v20  ;;  %5194 = vmatpush1.bf16.msra.mxu0 %v7024_v30  ;;  %v7050_v53 = vld [vmem:[%s9436_s1 + $0x844] ss:$8 sps:$4 sm:$0xff]   ;;  %v7059_v50 = vld [vmem:[%s9436_s1 + $0x734] ss:$8 sps:$4 sm:$0xff]  }
 0x192   : > { %v3960_v32 = vpop.f32.mrf.mxu1  ;;  %v4153_v63 = vpop.f32.mrf.mxu0  ;;  %5002 = vmatprep.subr.bf16.mxu1 %v7035_v25  ;;  %5195 = vmatprep.subr.bf16.mxu0 %v7038_v27  ;;  %v7045_v25 = vld [vmem:[%s9436_s1 + $0x740] ss:$8 sps:$4 sm:$0xff]   ;;  %v7062_v54 = vld [vmem:[%s9436_s1 + $0x834] ss:$8 sps:$4 sm:$0xff]  }
 0x193   : > { %v8515_v38 = vadd.f32 %v4151_v14, %v3959_v22  ;;  %v3961_v33 = vadd.f32 %v3960_v32, %v7988_v42  ;;  %v7030_v22 = vld [vmem:[%s7369_s16 + $0x150] ss:$72 sps:$4 sm:$0xff]  }
 0x194   : > { %v3964_v20 = vpop.f32.mrf.mxu1  ;;  %v4157_v30 = vpop.f32.mrf.mxu0  ;;  %4655 = vmatmul.mubr.bf16.gmra.mxu1 %v7015_v51  ;;  %4848 = vmatmul.mubr.bf16.gmra.mxu0 %v7018_v39  ;;  %v7027_v39 = vld [vmem:[%s7369_s16 + $0x148] ss:$72 sps:$4 sm:$0xff]  }
 0x195   : > { %v8524_v62 = vadd.f32 %v4153_v63, %v3961_v33  ;;  %v3965_v0 = vadd.f32 %v3964_v20, %v7999_v47  ;;  %4664 = vmatprep.mubr.bf16.mxu1 %v7029_v60  ;;  %4857 = vmatprep.mubr.bf16.mxu0 %v7032_v16  ;;  %v7048_v63 = vld [vmem:[%s9436_s1 + $0x840] ss:$8 sps:$4 sm:$0xff]  }
 0x196   : > { %v3966_v42 = vpop.f32.mrf.mxu1  ;;  %v4159_v32 = vpop.f32.mrf.mxu0  ;;  %5003 = vmatpush1.bf16.msra.mxu1 %v7033_v28  ;;  %5196 = vmatpush1.bf16.msra.mxu0 %v7036_v17  ;;  %v7041_v28 = vld [vmem:[%s7369_s16 + $0x1dc] ss:$72 sps:$4 sm:$0xff]  }
 0x197   : > { %v8533_v27 = vadd.f32 %v4157_v30, %v3965_v0  ;;  %v3967_v47 = vadd.f32 %v3966_v42, %v8006_v52  ;;  %5004 = vmatprep.subr.bf16.mxu1 %v7047_v4  ;;  %5197 = vmatprep.subr.bf16.mxu0 %v7050_v53  ;;  %v7044_v52 = vld [vmem:[%s7369_s16 + $0x1e4] ss:$72 sps:$4 sm:$0xff]   ;;  %v7057_v4 = vld [vmem:[%s9436_s1 + $0x730] ss:$8 sps:$4 sm:$0xff]  }
 0x198   : > { %v3968_v14 = vpop.f32.mrf.mxu1  ;;  %v4161_v51 = vpop.f32.mrf.mxu0  ;;  %v7060_v53 = vld [vmem:[%s9436_s1 + $0x830] ss:$8 sps:$4 sm:$0xff]   ;;  %v7074_v0 = vld [vmem:[%s9436_s1 + $0x824] ss:$8 sps:$4 sm:$0xff]  }
 0x199   : > { %v8544_v60 = vadd.f32 %v4159_v32, %v3967_v47  ;;  %v3969_v16 = vadd.f32 %v3968_v14, %v8017_v57  ;;  %v7071_v57 = vld [vmem:[%s9436_s1 + $0x724] ss:$8 sps:$4 sm:$0xff]  }
 0x19a   : > { %v3970_v17 = vpop.f32.mrf.mxu1  ;;  %v4163_v33 = vpop.f32.mrf.mxu0  ;;  %5005 = vmatpush1.bf16.msra.mxu1 %v7045_v25  ;;  %5198 = vmatpush1.bf16.msra.mxu0 %v7048_v63 }
 0x19b   : > { %v8555_v20 = vadd.f32 %v4161_v51, %v3969_v16  ;;  %v3971_v30 = vadd.f32 %v3970_v17, %v8036_v2  ;;  %5006 = vmatprep.subr.bf16.mxu1 %v7059_v50  ;;  %5199 = vmatprep.subr.bf16.mxu0 %v7062_v54  ;;  %v7069_v50 = vld [vmem:[%s9436_s1 + $0x720] ss:$8 sps:$4 sm:$0xff]   ;;  %v7083_v51 = vld [vmem:[%s9436_s1 + $0x714] ss:$8 sps:$4 sm:$0xff]  }
 0x19c   : > { %v3974_v42 = vpop.f32.mrf.mxu1  ;;  %v4167_v32 = vpop.f32.mrf.mxu0  ;;  %4665 = vmatmul.mubr.bf16.gmra.mxu1 %v7027_v39  ;;  %4858 = vmatmul.mubr.bf16.gmra.mxu0 %v7030_v22  ;;  %v7072_v54 = vld [vmem:[%s9436_s1 + $0x820] ss:$8 sps:$4 sm:$0xff]   ;;  %v7086_v39 = vld [vmem:[%s9436_s1 + $0x814] ss:$8 sps:$4 sm:$0xff]  }
 0x19d   : > { %v8564_v25 = vadd.f32 %v4163_v33, %v3971_v30  ;;  %v3975_v63 = vadd.f32 %v3974_v42, %v8047_v7  ;;  %4674 = vmatprep.mubr.bf16.mxu1 %v7041_v28  ;;  %4867 = vmatprep.mubr.bf16.mxu0 %v7044_v52  ;;  %v7039_v28 = vld [vmem:[%s7369_s16 + $0x1d8] ss:$72 sps:$4 sm:$0xff]  }
 0x19e   : > { %v3976_v2 = vpop.f32.mrf.mxu1  ;;  %v4169_v47 = vpop.f32.mrf.mxu0  ;;  %5007 = vmatpush1.bf16.msra.mxu1 %v7057_v4  ;;  %5200 = vmatpush1.bf16.msra.mxu0 %v7060_v53  ;;  %v7042_v52 = vld [vmem:[%s7369_s16 + $0x1e0] ss:$72 sps:$4 sm:$0xff]   ;;  %v7053_v4 = vld [vmem:[%s7369_s16 + $0x26c] ss:$72 sps:$4 sm:$0xff]  }
 0x19f   : > { %v8573_v14 = vadd.f32 %v4167_v32, %v3975_v63  ;;  %v3977_v7 = vadd.f32 %v3976_v2, %v8054_v12  ;;  %5008 = vmatprep.subr.bf16.mxu1 %v7071_v57  ;;  %5201 = vmatprep.subr.bf16.mxu0 %v7074_v0  ;;  %v7056_v12 = vld [vmem:[%s7369_s16 + $0x274] ss:$72 sps:$4 sm:$0xff]   ;;  %v7081_v57 = vld [vmem:[%s9436_s1 + $0x710] ss:$8 sps:$4 sm:$0xff]   ;;  %v7098_v63 = vld [vmem:[%s9436_s1 + $0x804] ss:$8 sps:$4 sm:$0xff]  }
 0x1a0   : > { %v3978_v22 = vpop.f32.mrf.mxu1  ;;  %v4171_v16 = vpop.f32.mrf.mxu0  ;;  %v7084_v0 = vld [vmem:[%s9436_s1 + $0x810] ss:$8 sps:$4 sm:$0xff]  }
 0x1a1   : > { %v8584_v17 = vadd.f32 %v4169_v47, %v3977_v7  ;;  %v3979_v33 = vadd.f32 %v3978_v22, %v8065_v19  ;;  %v7095_v19 = vld [vmem:[%s9436_s1 + $0x704] ss:$8 sps:$4 sm:$0xff]  }
 0x1a2   : > { %v3980_v53 = vpop.f32.mrf.mxu1  ;;  %v4173_v30 = vpop.f32.mrf.mxu0  ;;  %5009 = vmatpush1.bf16.msra.mxu1 %v7069_v50  ;;  %5202 = vmatpush1.bf16.msra.mxu0 %v7072_v54 }
 0x1a3   : > { %v8595_v42 = vadd.f32 %v4171_v16, %v3979_v33  ;;  %v3981_v32 = vadd.f32 %v3980_v53, %v8084_v34  ;;  %5010 = vmatprep.subr.bf16.mxu1 %v7083_v51  ;;  %5203 = vmatprep.subr.bf16.mxu0 %v7086_v39  ;;  %v7093_v51 = vld [vmem:[%s9436_s1 + $0x700] ss:$8 sps:$4 sm:$0xff]   ;;  %v7054_v53 = vld [vmem:[%s7369_s16 + $0x270] ss:$72 sps:$4 sm:$0xff]  }
 0x1a4   : > { %v3984_v2 = vpop.f32.mrf.mxu1  ;;  %v4177_v47 = vpop.f32.mrf.mxu0  ;;  %4675 = vmatmul.mubr.bf16.gmra.mxu1 %v7039_v28  ;;  %4868 = vmatmul.mubr.bf16.gmra.mxu0 %v7042_v52  ;;  %v7096_v39 = vld [vmem:[%s9436_s1 + $0x800] ss:$8 sps:$4 sm:$0xff]   ;;  %v7107_v28 = vld [vmem:[%s9436_s1 + $0x7f4] ss:$8 sps:$4 sm:$0xff]  }
 0x1a5   : > { %v8604_v50 = vadd.f32 %v4173_v30, %v3981_v32  ;;  %v3985_v54 = vadd.f32 %v3984_v2, %v8095_v40  ;;  %4684 = vmatprep.mubr.bf16.mxu1 %v7053_v4  ;;  %4877 = vmatprep.mubr.bf16.mxu0 %v7056_v12  ;;  %v9461_v40 = vld [vmem:[#allocation2_spill] sm:$0xff]  ;;  %v7110_v52 = vld [vmem:[%s9436_s1 + $0x8f4] ss:$8 sps:$4 sm:$0xff]   ;;  %v7051_v12 = vld [vmem:[%s7369_s16 + $0x268] ss:$72 sps:$4 sm:$0xff]  }
 0x1a6   : > { %v3986_v34 = vpop.f32.mrf.mxu1  ;;  %v4179_v7 = vpop.f32.mrf.mxu0  ;;  %5011 = vmatpush1.bf16.msra.mxu1 %v7081_v57  ;;  %5204 = vmatpush1.bf16.msra.mxu0 %v7084_v0  ;;  %v9463_v57 = vld [vmem:[#allocation3_spill] sm:$0xff]  ;;  %v7065_v32 = vld [vmem:[%s7369_s16 + $0x2fc] ss:$72 sps:$4 sm:$0xff]  }
 0x1a7   : > { %v8613_v22 = vadd.f32 %v4177_v47, %v3985_v54  ;;  %v3987_v16 = vadd.f32 %v3986_v34, %v9461_v40  ;;  %5012 = vmatprep.subr.bf16.mxu1 %v7095_v19  ;;  %5205 = vmatprep.subr.bf16.mxu0 %v7098_v63  ;;  %v7068_v2 = vld [vmem:[%s7369_s16 + $0x304] ss:$72 sps:$4 sm:$0xff]   ;;  %v7105_v47 = vld [vmem:[%s9436_s1 + $0x7f0] ss:$8 sps:$4 sm:$0xff]  }
 0x1a8   : > { %v3988_v33 = vpop.f32.mrf.mxu1  ;;  %v4181_v4 = vpop.f32.mrf.mxu0  ;;  %v7108_v54 = vld [vmem:[%s9436_s1 + $0x8f0] ss:$8 sps:$4 sm:$0xff]  }
 0x1a9   : > { %9460 = vst [vmem:[#allocation23_spill] sm:$0xff] %v8613_v22  ;;  %v8624_v30 = vadd.f32 %v4179_v7, %v3987_v16  ;;  %v3989_v0 = vadd.f32 %v3988_v33, %v9463_v57  ;;  %v9465_v7 = vld [vmem:[#allocation4_spill] sm:$0xff]  ;;  %v7119_v16 = vld [vmem:[%s9436_s1 + $0x7e4] ss:$8 sps:$4 sm:$0xff]  }
 0x1aa   : > { %v3990_v19 = vpop.f32.mrf.mxu1  ;;  %v4183_v63 = vpop.f32.mrf.mxu0  ;;  %5013 = vmatpush1.bf16.msra.mxu1 %v7093_v51  ;;  %5206 = vmatpush1.bf16.msra.mxu0 %v7096_v39  ;;  %v7122_v51 = vld [vmem:[%s9436_s1 + $0x8e4] ss:$8 sps:$4 sm:$0xff]  }
 0x1ab   : > { %9462 = vst [vmem:[#allocation2_spill] sm:$0xff] %v8624_v30  ;;  %v8635_v34 = vadd.f32 %v4181_v4, %v3989_v0  ;;  %v3991_v40 = vadd.f32 %v3990_v19, %v9465_v7  ;;  %5014 = vmatprep.subr.bf16.mxu1 %v7107_v28  ;;  %5207 = vmatprep.subr.bf16.mxu0 %v7110_v52  ;;  %v9467_v4 = vld [vmem:[#allocation5_spill] sm:$0xff]  ;;  %v7117_v19 = vld [vmem:[%s9436_s1 + $0x7e0] ss:$8 sps:$4 sm:$0xff]  }
 0x1ac   : > { %v3994_v39 = vpop.f32.mrf.mxu1  ;;  %v4187_v33 = vpop.f32.mrf.mxu0  ;;  %4685 = vmatmul.mubr.bf16.gmra.mxu1 %v7051_v12  ;;  %4878 = vmatmul.mubr.bf16.gmra.mxu0 %v7054_v53  ;;  %v7120_v12 = vld [vmem:[%s9436_s1 + $0x8e0] ss:$8 sps:$4 sm:$0xff]  }
 0x1ad   : > { %9464 = vst [vmem:[#allocation3_spill] sm:$0xff] %v8635_v34  ;;  %v8644_v57 = vadd.f32 %v4183_v63, %v3991_v40  ;;  %v3995_v0 = vadd.f32 %v3994_v39, %v9467_v4  ;;  %4694 = vmatprep.mubr.bf16.mxu1 %v7065_v32  ;;  %4887 = vmatprep.mubr.bf16.mxu0 %v7068_v2  ;;  %v9469_v32 = vld [vmem:[#allocation6_spill] sm:$0xff]  ;;  %v7131_v2 = vld [vmem:[%s9436_s1 + $0x7d4] ss:$8 sps:$4 sm:$0xff]  }
 0x1ae   : > { %v3996_v28 = vpop.f32.mrf.mxu1  ;;  %v4189_v52 = vpop.f32.mrf.mxu0  ;;  %5015 = vmatpush2.bf16.msra.mxu1 %v7105_v47  ;;  %5208 = vmatpush2.bf16.msra.mxu0 %v7108_v54  ;;  %v7134_v47 = vld [vmem:[%s9436_s1 + $0x8d4] ss:$8 sps:$4 sm:$0xff]   ;;  %v7063_v40 = vld [vmem:[%s7369_s16 + $0x2f8] ss:$72 sps:$4 sm:$0xff]  }
 0x1af   : > { %9466 = vst [vmem:[#allocation4_spill] sm:$0xff] %v8644_v57  ;;  %v8653_v53 = vadd.f32 %v4187_v33, %v3995_v0  ;;  %v3997_v63 = vadd.f32 %v3996_v28, %v9469_v32  ;;  %5016 = vmatprep.subr.bf16.mxu1 %v7119_v16  ;;  %5209 = vmatprep.subr.bf16.mxu0 %v7122_v51  ;;  %v7066_v39 = vld [vmem:[%s7369_s16 + $0x300] ss:$72 sps:$4 sm:$0xff]   ;;  %v7080_v28 = vld [vmem:[%s7369_s16 + $0x394] ss:$72 sps:$4 sm:$0xff]  }
 0x1b0   : > { %v3998_v54 = vpop.f32.mrf.mxu1  ;;  %v4191_v7 = vpop.f32.mrf.mxu0  ;;  %v9471_v33 = vld [vmem:[#allocation7_spill] sm:$0xff]  ;;  %v7129_v32 = vld [vmem:[%s9436_s1 + $0x7d0] ss:$8 sps:$4 sm:$0xff]  }
 0x1b1   : > { %9468 = vst [vmem:[#allocation5_spill] sm:$0xff] %v8653_v53  ;;  %v8664_v4 = vadd.f32 %v4189_v52, %v3997_v63  ;;  %v3999_v0 = vadd.f32 %v3998_v54, %v9471_v33  ;;  %v7077_v53 = vld [vmem:[%s7369_s16 + $0x38c] ss:$72 sps:$4 sm:$0xff]   ;;  %v7132_v57 = vld [vmem:[%s9436_s1 + $0x8d0] ss:$8 sps:$4 sm:$0xff]  }
 0x1b2   : > { %v4000_v16 = vpop.f32.mrf.mxu1  ;;  %v4193_v51 = vpop.f32.mrf.mxu0  ;;  %5017 = vmatpush2.bf16.msra.mxu1 %v7117_v19  ;;  %5210 = vmatpush2.bf16.msra.mxu0 %v7120_v12  ;;  %v9473_v52 = vld [vmem:[#allocation8_spill] sm:$0xff]  ;;  %v7143_v54 = vld [vmem:[%s9436_s1 + $0x7c4] ss:$8 sps:$4 sm:$0xff]  }
 0x1b3   : > { %9470 = vst [vmem:[#allocation6_spill] sm:$0xff] %v8664_v4  ;;  %v8675_v34 = vadd.f32 %v4191_v7, %v3999_v0  ;;  %v4001_v63 = vadd.f32 %v4000_v16, %v9473_v52  ;;  %5018 = vmatprep.subr.bf16.mxu1 %v7131_v2  ;;  %5211 = vmatprep.subr.bf16.mxu0 %v7134_v47  ;;  %v7146_v19 = vld [vmem:[%s9436_s1 + $0x8c4] ss:$8 sps:$4 sm:$0xff]   ;;  %v9475_v7 = vld [vmem:[#allocation9_spill] sm:$0xff]  ;;  %v7141_v16 = vld [vmem:[%s9436_s1 + $0x7c0] ss:$8 sps:$4 sm:$0xff]  }
 0x1b4   : > { %v4004_v12 = vpop.f32.mrf.mxu1  ;;  %v4197_v33 = vpop.f32.mrf.mxu0  ;;  %4695 = vmatmul.mubr.bf16.gmra.mxu1 %v7063_v40  ;;  %4888 = vmatmul.mubr.bf16.gmra.mxu0 %v7066_v39  ;;  %v7144_v40 = vld [vmem:[%s9436_s1 + $0x8c0] ss:$8 sps:$4 sm:$0xff]  }
 0x1b5   : > { %9472 = vst [vmem:[#allocation7_spill] sm:$0xff] %v8675_v34  ;;  %v8684_v4 = vadd.f32 %v4193_v51, %v4001_v63  ;;  %v4005_v0 = vadd.f32 %v4004_v12, %v9475_v7  ;;  %4704 = vmatprep.mubr.bf16.mxu1 %v7077_v53  ;;  %4897 = vmatprep.mubr.bf16.mxu0 %v7080_v28  ;;  %v9477_v53 = vld [vmem:[#allocation10_spill] sm:$0xff]  ;;  %v7155_v28 = vld [vmem:[%s9436_s1 + $0x7b4] ss:$8 sps:$4 sm:$0xff]   ;;  %v7075_v63 = vld [vmem:[%s7369_s16 + $0x388] ss:$72 sps:$4 sm:$0xff]  }
 0x1b6   : > { %v4006_v2 = vpop.f32.mrf.mxu1  ;;  %v4199_v47 = vpop.f32.mrf.mxu0  ;;  %5019 = vmatpush2.bf16.msra.mxu1 %v7129_v32  ;;  %5212 = vmatpush2.bf16.msra.mxu0 %v7132_v57  ;;  %v7158_v57 = vld [vmem:[%s9436_s1 + $0x8b4] ss:$8 sps:$4 sm:$0xff]   ;;  %v7078_v12 = vld [vmem:[%s7369_s16 + $0x390] ss:$72 sps:$4 sm:$0xff]  }
 0x1b7   : > { %9474 = vst [vmem:[#allocation8_spill] sm:$0xff] %v8684_v4  ;;  %v8693_v39 = vadd.f32 %v4197_v33, %v4005_v0  ;;  %v4007_v51 = vadd.f32 %v4006_v2, %v9477_v53  ;;  %5020 = vmatprep.subr.bf16.mxu1 %v7143_v54  ;;  %5213 = vmatprep.subr.bf16.mxu0 %v7146_v19  ;;  %v9479_v33 = vld [vmem:[#allocation11_spill] sm:$0xff]  ;;  %v7153_v53 = vld [vmem:[%s9436_s1 + $0x7b0] ss:$8 sps:$4 sm:$0xff]  }
 0x1b8   : > { %v4008_v32 = vpop.f32.mrf.mxu1  ;;  %v4201_v52 = vpop.f32.mrf.mxu0  ;;  %v7092_v2 = vld [vmem:[%s7369_s16 + $0x424] ss:$72 sps:$4 sm:$0xff]   ;;  %v7156_v4 = vld [vmem:[%s9436_s1 + $0x8b0] ss:$8 sps:$4 sm:$0xff]  }
 0x1b9   : > { %9476 = vst [vmem:[#allocation9_spill] sm:$0xff] %v8693_v39  ;;  %v8704_v7 = vadd.f32 %v4199_v47, %v4007_v51  ;;  %v4009_v0 = vadd.f32 %v4008_v32, %v9479_v33  ;;  %v7089_v39 = vld [vmem:[%s7369_s16 + $0x41c] ss:$72 sps:$4 sm:$0xff]   ;;  %v9481_v47 = vld [vmem:[#allocation12_spill] sm:$0xff] }
 0x1ba   : > { %v4010_v54 = vpop.f32.mrf.mxu1  ;;  %v4203_v19 = vpop.f32.mrf.mxu0  ;;  %5021 = vmatpush2.bf16.msra.mxu1 %v7141_v16  ;;  %5214 = vmatpush2.bf16.msra.mxu0 %v7144_v40  ;;  %v7167_v32 = vld [vmem:[%s9436_s1 + $0x7a4] ss:$8 sps:$4 sm:$0xff]  }
 0x1bb   : > { %9478 = vst [vmem:[#allocation10_spill] sm:$0xff] %v8704_v7  ;;  %v8715_v34 = vadd.f32 %v4201_v52, %v4009_v0  ;;  %v4011_v51 = vadd.f32 %v4010_v54, %v9481_v47  ;;  %5022 = vmatprep.subr.bf16.mxu1 %v7155_v28  ;;  %5215 = vmatprep.subr.bf16.mxu0 %v7158_v57  ;;  %v7170_v16 = vld [vmem:[%s9436_s1 + $0x8a4] ss:$8 sps:$4 sm:$0xff]   ;;  %v9483_v52 = vld [vmem:[#allocation13_spill] sm:$0xff]  ;;  %v7165_v54 = vld [vmem:[%s9436_s1 + $0x7a0] ss:$8 sps:$4 sm:$0xff]  }
 0x1bc   : > { %v4014_v40 = vpop.f32.mrf.mxu1  ;;  %v4207_v33 = vpop.f32.mrf.mxu0  ;;  %4705 = vmatmul.mubr.bf16.gmra.mxu1 %v7075_v63  ;;  %4898 = vmatmul.mubr.bf16.gmra.mxu0 %v7078_v12  ;;  %v7168_v63 = vld [vmem:[%s9436_s1 + $0x8a0] ss:$8 sps:$4 sm:$0xff]  }
 0x1bd   : > { %9480 = vst [vmem:[#allocation11_spill] sm:$0xff] %v8715_v34  ;;  %v8724_v7 = vadd.f32 %v4203_v19, %v4011_v51  ;;  %v4015_v0 = vadd.f32 %v4014_v40, %v9483_v52  ;;  %4714 = vmatprep.mubr.bf16.mxu1 %v7089_v39  ;;  %4907 = vmatprep.mubr.bf16.mxu0 %v7092_v2  ;;  %v9485_v39 = vld [vmem:[#allocation14_spill] sm:$0xff]  ;;  %v7179_v2 = vld [vmem:[%s9436_s1 + $0x794] ss:$8 sps:$4 sm:$0xff]  }
 0x1be   : > { %v4016_v28 = vpop.f32.mrf.mxu1  ;;  %v4209_v57 = vpop.f32.mrf.mxu0  ;;  %5023 = vmatpush2.bf16.msra.mxu1 %v7153_v53  ;;  %5216 = vmatpush2.bf16.msra.mxu0 %v7156_v4  ;;  %v7182_v4 = vld [vmem:[%s9436_s1 + $0x894] ss:$8 sps:$4 sm:$0xff]   ;;  %v7087_v51 = vld [vmem:[%s7369_s16 + $0x418] ss:$72 sps:$4 sm:$0xff]  }
 0x1bf   : > { %9482 = vst [vmem:[#allocation12_spill] sm:$0xff] %v8724_v7  ;;  %v8733_v12 = vadd.f32 %v4207_v33, %v4015_v0  ;;  %v4017_v19 = vadd.f32 %v4016_v28, %v9485_v39  ;;  %5024 = vmatprep.subr.bf16.mxu1 %v7167_v32  ;;  %5217 = vmatprep.subr.bf16.mxu0 %v7170_v16  ;;  %v7090_v40 = vld [vmem:[%s7369_s16 + $0x420] ss:$72 sps:$4 sm:$0xff]   ;;  %v7104_v28 = vld [vmem:[%s7369_s16 + $0x4b4] ss:$72 sps:$4 sm:$0xff]  }
 0x1c0   : > { %v4018_v53 = vpop.f32.mrf.mxu1  ;;  %v4211_v47 = vpop.f32.mrf.mxu0  ;;  %v9487_v33 = vld [vmem:[#allocation15_spill] sm:$0xff]  ;;  %v7177_v39 = vld [vmem:[%s9436_s1 + $0x790] ss:$8 sps:$4 sm:$0xff]  }
 0x1c1   : > { %9484 = vst [vmem:[#allocation13_spill] sm:$0xff] %v8733_v12  ;;  %v8744_v52 = vadd.f32 %v4209_v57, %v4017_v19  ;;  %v4019_v0 = vadd.f32 %v4018_v53, %v9487_v33  ;;  %v7101_v12 = vld [vmem:[%s7369_s16 + $0x4ac] ss:$72 sps:$4 sm:$0xff]   ;;  %v7180_v7 = vld [vmem:[%s9436_s1 + $0x890] ss:$8 sps:$4 sm:$0xff]  }
 0x1c2   : > { %v4020_v32 = vpop.f32.mrf.mxu1  ;;  %v4213_v16 = vpop.f32.mrf.mxu0  ;;  %5025 = vmatpush2.bf16.msra.mxu1 %v7165_v54  ;;  %5218 = vmatpush2.bf16.msra.mxu0 %v7168_v63  ;;  %v9489_v57 = vld [vmem:[#allocation16_spill] sm:$0xff]  ;;  %v7191_v53 = vld [vmem:[%s9436_s1 + $0x784] ss:$8 sps:$4 sm:$0xff]  }
 0x1c3   : > { %9486 = vst [vmem:[#allocation14_spill] sm:$0xff] %v8744_v52  ;;  %v8755_v34 = vadd.f32 %v4211_v47, %v4019_v0  ;;  %v4021_v19 = vadd.f32 %v4020_v32, %v9489_v57  ;;  %5026 = vmatprep.subr.bf16.mxu1 %v7179_v2  ;;  %5219 = vmatprep.subr.bf16.mxu0 %v7182_v4  ;;  %v7194_v54 = vld [vmem:[%s9436_s1 + $0x884] ss:$8 sps:$4 sm:$0xff]   ;;  %v9491_v47 = vld [vmem:[#allocation17_spill] sm:$0xff]  ;;  %v7189_v32 = vld [vmem:[%s9436_s1 + $0x780] ss:$8 sps:$4 sm:$0xff]  }
 0x1c4   : > { %v4024_v63 = vpop.f32.mrf.mxu1  ;;  %v4217_v33 = vpop.f32.mrf.mxu0  ;;  %4715 = vmatmul.mubr.bf16.gmra.mxu1 %v7087_v51  ;;  %4908 = vmatmul.mubr.bf16.gmra.mxu0 %v7090_v40  ;;  %v7192_v51 = vld [vmem:[%s9436_s1 + $0x880] ss:$8 sps:$4 sm:$0xff]  }
 0x1c5   : > { %9488 = vst [vmem:[#allocation15_spill] sm:$0xff] %v8755_v34  ;;  %v8764_v52 = vadd.f32 %v4213_v16, %v4021_v19  ;;  %v4025_v0 = vadd.f32 %v4024_v63, %v9491_v47  ;;  %4724 = vmatprep.mubr.bf16.mxu1 %v7101_v12  ;;  %4917 = vmatprep.mubr.bf16.mxu0 %v7104_v28  ;;  %v9492_v16 = vld [vmem:[#allocation18_spill] sm:$0xff]  ;;  %v7099_v19 = vld [vmem:[%s7369_s16 + $0x4a8] ss:$72 sps:$4 sm:$0xff]  }
 0x1c6   : > { %v4026_v2 = vpop.f32.mrf.mxu1  ;;  %v4219_v4 = vpop.f32.mrf.mxu0  ;;  %5027 = vmatpush2.bf16.msra.mxu1 %v7177_v39  ;;  %5220 = vmatpush2.bf16.msra.mxu0 %v7180_v7  ;;  %v7102_v63 = vld [vmem:[%s7369_s16 + $0x4b0] ss:$72 sps:$4 sm:$0xff]   ;;  %v9493_v7 = vld [vmem:[#allocation19_spill] sm:$0xff] }
 0x1c7   : > { %9490 = vst [vmem:[#allocation16_spill] sm:$0xff] %v8764_v52  ;;  %v8773_v40 = vadd.f32 %v4217_v33, %v4025_v0  ;;  %v4027_v57 = vadd.f32 %v4026_v2, %v9492_v16  ;;  %5028 = vmatprep.subr.bf16.mxu1 %v7191_v53  ;;  %5221 = vmatprep.subr.bf16.mxu0 %v7194_v54  ;;  %v7113_v52 = vld [vmem:[%s7369_s16 + $0x53c] ss:$72 sps:$4 sm:$0xff]   ;;  %v9494_v0 = vld [vmem:[#allocation20_spill] sm:$0xff] }
 0x1c8   : > { %v4028_v12 = vpop.f32.mrf.mxu1  ;;  %v4221_v28 = vpop.f32.mrf.mxu0  ;;  %v7116_v34 = vld [vmem:[%s7369_s16 + $0x544] ss:$72 sps:$4 sm:$0xff]  }
 0x1c9   : > { %v8778_v39 = vadd.f32 %v4219_v4, %v4027_v57  ;;  %v4029_v47 = vadd.f32 %v4028_v12, %v9493_v7  ;;  %v7111_v7 = vld [vmem:[%s7369_s16 + $0x538] ss:$72 sps:$4 sm:$0xff]  }
 0x1ca   : > { %v4030_v30 = vpop.f32.mrf.mxu1  ;;  %v4223_v22 = vpop.f32.mrf.mxu0  ;;  %5029 = vmatpush2.bf16.msra.mxu1 %v7189_v32  ;;  %5222 = vmatpush2.bf16.msra.mxu0 %v7192_v51 }
 0x1cb   : > { %v8783_v33 = vadd.f32 %v4221_v28, %v4029_v47  ;;  %v4031_v53 = vadd.f32 %v4030_v30, %v9494_v0  ;;  %v7114_v47 = vld [vmem:[%s7369_s16 + $0x540] ss:$72 sps:$4 sm:$0xff]   ;;  %v7128_v0 = vld [vmem:[%s7369_s16 + $0x5d4] ss:$72 sps:$4 sm:$0xff]  }
 0x1cc   : > { %v4260_v54 = vpop.f32.mrf.mxu1  ;;  %v4453_v2 = vpop.f32.mrf.mxu0  ;;  %4725 = vmatmul.mubr.bf16.gmra.mxu1 %v7099_v19  ;;  %4918 = vmatmul.mubr.bf16.gmra.mxu0 %v7102_v63 }
 0x1cd   : > { %v8786_v4 = vadd.f32 %v4223_v22, %v4031_v53  ;;  %v4261_v16 = vadd.f32 %v4260_v54, %v8320_v29  ;;  %4734 = vmatprep.mubr.bf16.mxu1 %v7113_v52  ;;  %4927 = vmatprep.mubr.bf16.mxu0 %v7116_v34  ;;  %v7125_v22 = vld [vmem:[%s7369_s16 + $0x5cc] ss:$72 sps:$4 sm:$0xff]  }
 0x1ce   : > { %v4262_v32 = vpop.f32.mrf.mxu1  ;;  %v4455_v51 = vpop.f32.mrf.mxu0 }
 0x1cf   : > { %v8789_v57 = vadd.f32 %v4453_v2, %v4261_v16  ;;  %v4263_v12 = vadd.f32 %v4262_v32, %v8326_v56 }
 0x1d0   : > { %v4264_v30 = vpop.f32.mrf.mxu1  ;;  %v4457_v28 = vpop.f32.mrf.mxu0 }
 0x1d1   : > { %v8794_v19 = vadd.f32 %v4455_v51, %v4263_v12  ;;  %v4265_v63 = vadd.f32 %v4264_v30, %v8332_v23 }
 0x1d2   : > { %v4266_v53 = vpop.f32.mrf.mxu1  ;;  %v4459_v29 = vpop.f32.mrf.mxu0 }
 0x1d3   : > { %v8799_v52 = vadd.f32 %v4457_v28, %v4265_v63  ;;  %v4267_v34 = vadd.f32 %v4266_v53, %v8336_v36  ;;  %v7123_v28 = vld [vmem:[%s7369_s16 + $0x5c8] ss:$72 sps:$4 sm:$0xff]   ;;  %v7137_v53 = vld [vmem:[%s7369_s16 + $0x65c] ss:$72 sps:$4 sm:$0xff]  }
 0x1d4   : > { %v4270_v54 = vpop.f32.mrf.mxu1  ;;  %v4463_v56 = vpop.f32.mrf.mxu0  ;;  %4735 = vmatmul.mubr.bf16.gmra.mxu1 %v7111_v7  ;;  %4928 = vmatmul.mubr.bf16.gmra.mxu0 %v7114_v47  ;;  %v7126_v63 = vld [vmem:[%s7369_s16 + $0x5d0] ss:$72 sps:$4 sm:$0xff]  }
 0x1d5   : > { %v8802_v2 = vadd.f32 %v4459_v29, %v4267_v34  ;;  %v4271_v23 = vadd.f32 %v4270_v54, %v8340_v11  ;;  %4744 = vmatprep.mubr.bf16.mxu1 %v7125_v22  ;;  %4937 = vmatprep.mubr.bf16.mxu0 %v7128_v0  ;;  %v7140_v29 = vld [vmem:[%s7369_s16 + $0x664] ss:$72 sps:$4 sm:$0xff]  }
 0x1d6   : > { %v4272_v16 = vpop.f32.mrf.mxu1  ;;  %v4465_v32 = vpop.f32.mrf.mxu0 }
 0x1d7   : > { %v8805_v51 = vadd.f32 %v4463_v56, %v4271_v23  ;;  %v4273_v12 = vadd.f32 %v4272_v16, %v8346_v49 }
 0x1d8   : > { %v4274_v36 = vpop.f32.mrf.mxu1  ;;  %v4467_v30 = vpop.f32.mrf.mxu0 }
 0x1d9   : > { %v8810_v7 = vadd.f32 %v4465_v32, %v4273_v12  ;;  %v4275_v47 = vadd.f32 %v4274_v36, %v8352_v21 }
 0x1da   : > { %v4276_v34 = vpop.f32.mrf.mxu1  ;;  %v4469_v11 = vpop.f32.mrf.mxu0 }
 0x1db   : > { %v8815_v22 = vadd.f32 %v4467_v30, %v4275_v47  ;;  %v4277_v0 = vadd.f32 %v4276_v34, %v8356_v44  ;;  %v7135_v30 = vld [vmem:[%s7369_s16 + $0x658] ss:$72 sps:$4 sm:$0xff]   ;;  %v7149_v34 = vld [vmem:[%s7369_s16 + $0x6ec] ss:$72 sps:$4 sm:$0xff]  }
 0x1dc   : > { %v4280_v54 = vpop.f32.mrf.mxu1  ;;  %v4473_v49 = vpop.f32.mrf.mxu0  ;;  %4745 = vmatmul.mubr.bf16.gmra.mxu1 %v7123_v28  ;;  %4938 = vmatmul.mubr.bf16.gmra.mxu0 %v7126_v63  ;;  %v7138_v47 = vld [vmem:[%s7369_s16 + $0x660] ss:$72 sps:$4 sm:$0xff]  }
 0x1dd   : > { %v8818_v56 = vadd.f32 %v4469_v11, %v4277_v0  ;;  %v4281_v21 = vadd.f32 %v4280_v54, %v8360_v9  ;;  %4754 = vmatprep.mubr.bf16.mxu1 %v7137_v53  ;;  %4947 = vmatprep.mubr.bf16.mxu0 %v7140_v29  ;;  %v7152_v11 = vld [vmem:[%s7369_s16 + $0x6f4] ss:$72 sps:$4 sm:$0xff]  }
 0x1de   : > { %v4282_v23 = vpop.f32.mrf.mxu1  ;;  %v4475_v16 = vpop.f32.mrf.mxu0 }
 0x1df   : > { %v8821_v32 = vadd.f32 %v4473_v49, %v4281_v21  ;;  %v4283_v12 = vadd.f32 %v4282_v23, %v8366_v58 }
 0x1e0   : > { %v4284_v44 = vpop.f32.mrf.mxu1  ;;  %v4477_v36 = vpop.f32.mrf.mxu0 }
 0x1e1   : > { %v8826_v28 = vadd.f32 %v4475_v16, %v4283_v12  ;;  %v4285_v63 = vadd.f32 %v4284_v44, %v8372_v43 }
 0x1e2   : > { %v4286_v0 = vpop.f32.mrf.mxu1  ;;  %v4479_v9 = vpop.f32.mrf.mxu0 }
 0x1e3   : > { %v8831_v53 = vadd.f32 %v4477_v36, %v4285_v63  ;;  %v4287_v29 = vadd.f32 %v4286_v0, %v8376_v26  ;;  %v7147_v36 = vld [vmem:[%s7369_s16 + $0x6e8] ss:$72 sps:$4 sm:$0xff]   ;;  %v7161_v0 = vld [vmem:[%s7369_s16 + $0x77c] ss:$72 sps:$4 sm:$0xff]  }
 0x1e4   : > { %v4290_v54 = vpop.f32.mrf.mxu1  ;;  %v4483_v58 = vpop.f32.mrf.mxu0  ;;  %4755 = vmatmul.mubr.bf16.gmra.mxu1 %v7135_v30  ;;  %4948 = vmatmul.mubr.bf16.gmra.mxu0 %v7138_v47  ;;  %v7150_v63 = vld [vmem:[%s7369_s16 + $0x6f0] ss:$72 sps:$4 sm:$0xff]  }
 0x1e5   : > { %v8834_v49 = vadd.f32 %v4479_v9, %v4287_v29  ;;  %v4291_v43 = vadd.f32 %v4290_v54, %v8380_v1  ;;  %4764 = vmatprep.mubr.bf16.mxu1 %v7149_v34  ;;  %4957 = vmatprep.mubr.bf16.mxu0 %v7152_v11  ;;  %v7164_v9 = vld [vmem:[%s7369_s16 + $0x784] ss:$72 sps:$4 sm:$0xff]  }
 0x1e6   : > { %v4292_v21 = vpop.f32.mrf.mxu1  ;;  %v4485_v23 = vpop.f32.mrf.mxu0 }
 0x1e7   : > { %v8837_v16 = vadd.f32 %v4483_v58, %v4291_v43  ;;  %v4293_v12 = vadd.f32 %v4292_v21, %v8386_v18 }
 0x1e8   : > { %v4294_v26 = vpop.f32.mrf.mxu1  ;;  %v4487_v44 = vpop.f32.mrf.mxu0 }
 0x1e9   : > { %v8842_v30 = vadd.f32 %v4485_v23, %v4293_v12  ;;  %v4295_v47 = vadd.f32 %v4294_v26, %v8392_v3 }
 0x1ea   : > { %v4296_v29 = vpop.f32.mrf.mxu1  ;;  %v4489_v1 = vpop.f32.mrf.mxu0 }
 0x1eb   : > { %v8847_v34 = vadd.f32 %v4487_v44, %v4295_v47  ;;  %v4297_v11 = vadd.f32 %v4296_v29, %v8396_v48  ;;  %v7159_v44 = vld [vmem:[%s7369_s16 + $0x778] ss:$72 sps:$4 sm:$0xff]   ;;  %v7173_v29 = vld [vmem:[%s7369_s16 + $0x80c] ss:$72 sps:$4 sm:$0xff]  }
 0x1ec   : > { %v4300_v54 = vpop.f32.mrf.mxu1  ;;  %v4493_v18 = vpop.f32.mrf.mxu0  ;;  %4765 = vmatmul.mubr.bf16.gmra.mxu1 %v7147_v36  ;;  %4958 = vmatmul.mubr.bf16.gmra.mxu0 %v7150_v63  ;;  %v7162_v47 = vld [vmem:[%s7369_s16 + $0x780] ss:$72 sps:$4 sm:$0xff]  }
 0x1ed   : > { %v8850_v58 = vadd.f32 %v4489_v1, %v4297_v11  ;;  %v4301_v3 = vadd.f32 %v4300_v54, %v8400_v37  ;;  %4774 = vmatprep.mubr.bf16.mxu1 %v7161_v0  ;;  %4967 = vmatprep.mubr.bf16.mxu0 %v7164_v9  ;;  %v7176_v1 = vld [vmem:[%s7369_s16 + $0x814] ss:$72 sps:$4 sm:$0xff]  }
 0x1ee   : > { %v4302_v43 = vpop.f32.mrf.mxu1  ;;  %v4495_v21 = vpop.f32.mrf.mxu0 }
 0x1ef   : > { %v8853_v23 = vadd.f32 %v4493_v18, %v4301_v3  ;;  %v4303_v12 = vadd.f32 %v4302_v43, %v8406_v10 }
 0x1f0   : > { %v4304_v48 = vpop.f32.mrf.mxu1  ;;  %v4497_v26 = vpop.f32.mrf.mxu0 }
 0x1f1   : > { %v8858_v36 = vadd.f32 %v4495_v21, %v4303_v12  ;;  %v4305_v63 = vadd.f32 %v4304_v48, %v8412_v35 }
 0x1f2   : > { %v4306_v11 = vpop.f32.mrf.mxu1  ;;  %v4499_v37 = vpop.f32.mrf.mxu0 }
 0x1f3   : > { %v8863_v0 = vadd.f32 %v4497_v26, %v4305_v63  ;;  %v4307_v9 = vadd.f32 %v4306_v11, %v8416_v8  ;;  %v7171_v26 = vld [vmem:[%s7369_s16 + $0x808] ss:$72 sps:$4 sm:$0xff]   ;;  %v7185_v11 = vld [vmem:[%s7369_s16 + $0x89c] ss:$72 sps:$4 sm:$0xff]  }
 0x1f4   : > { %v4310_v54 = vpop.f32.mrf.mxu1  ;;  %v4503_v10 = vpop.f32.mrf.mxu0  ;;  %4775 = vmatmul.mubr.bf16.gmra.mxu1 %v7159_v44  ;;  %4968 = vmatmul.mubr.bf16.gmra.mxu0 %v7162_v47  ;;  %v7174_v63 = vld [vmem:[%s7369_s16 + $0x810] ss:$72 sps:$4 sm:$0xff]  }
 0x1f5   : > { %v8866_v18 = vadd.f32 %v4499_v37, %v4307_v9  ;;  %v4311_v35 = vadd.f32 %v4310_v54, %v8420_v5  ;;  %4784 = vmatprep.mubr.bf16.mxu1 %v7173_v29  ;;  %4977 = vmatprep.mubr.bf16.mxu0 %v7176_v1  ;;  %v7188_v37 = vld [vmem:[%s7369_s16 + $0x8a4] ss:$72 sps:$4 sm:$0xff]  }
 0x1f6   : > { %v4312_v3 = vpop.f32.mrf.mxu1  ;;  %v4505_v43 = vpop.f32.mrf.mxu0 }
 0x1f7   : > { %v8869_v21 = vadd.f32 %v4503_v10, %v4311_v35  ;;  %v4313_v12 = vadd.f32 %v4312_v3, %v8426_v13 }
 0x1f8   : > { %v4314_v8 = vpop.f32.mrf.mxu1  ;;  %v4507_v48 = vpop.f32.mrf.mxu0 }
 0x1f9   : > { %v8874_v44 = vadd.f32 %v4505_v43, %v4313_v12  ;;  %v4315_v47 = vadd.f32 %v4314_v8, %v8432_v6 }
 0x1fa   : > { %v4316_v9 = vpop.f32.mrf.mxu1  ;;  %v4509_v5 = vpop.f32.mrf.mxu0 }
 0x1fb   : > { %v8879_v29 = vadd.f32 %v4507_v48, %v4315_v47  ;;  %v4317_v1 = vadd.f32 %v4316_v9, %v8436_v41  ;;  %v7183_v48 = vld [vmem:[%s7369_s16 + $0x898] ss:$72 sps:$4 sm:$0xff]   ;;  %v7197_v9 = vld [vmem:[%s7369_s16 + $0x3c] ss:$72 sps:$4 sm:$0xff]  }
 0x1fc   : > { %v4320_v54 = vpop.f32.mrf.mxu1  ;;  %v4513_v13 = vpop.f32.mrf.mxu0  ;;  %4785 = vmatmul.mubr.bf16.gmra.mxu1 %v7171_v26  ;;  %4978 = vmatmul.mubr.bf16.gmra.mxu0 %v7174_v63  ;;  %v7186_v47 = vld [vmem:[%s7369_s16 + $0x8a0] ss:$72 sps:$4 sm:$0xff]  }
 0x1fd   : > { %v8882_v10 = vadd.f32 %v4509_v5, %v4317_v1  ;;  %v4321_v6 = vadd.f32 %v4320_v54, %v8440_v61  ;;  %4794 = vmatprep.mubr.bf16.mxu1 %v7185_v11  ;;  %4987 = vmatprep.mubr.bf16.mxu0 %v7188_v37  ;;  %v7200_v5 = vld [vmem:[%s7369_s16 + $0x44] ss:$72 sps:$4 sm:$0xff]  }
 0x1fe   : > { %v4322_v35 = vpop.f32.mrf.mxu1  ;;  %v4515_v3 = vpop.f32.mrf.mxu0 }
 0x1ff   : > { %v8885_v43 = vadd.f32 %v4513_v13, %v4321_v6  ;;  %v4323_v12 = vadd.f32 %v4322_v35, %v8446_v31 }
 0x200   : > { %v4324_v41 = vpop.f32.mrf.mxu1  ;;  %v4517_v8 = vpop.f32.mrf.mxu0 }
 0x201   : > { %v8890_v26 = vadd.f32 %v4515_v3, %v4323_v12  ;;  %v4325_v63 = vadd.f32 %v4324_v41, %v8452_v59 }
 0x202   : > { %v4326_v1 = vpop.f32.mrf.mxu1  ;;  %v4519_v61 = vpop.f32.mrf.mxu0 }
 0x203   : > { %v8895_v11 = vadd.f32 %v4517_v8, %v4325_v63  ;;  %v4327_v37 = vadd.f32 %v4326_v1, %v8456_v15  ;;  %v7195_v8 = vld [vmem:[%s7369_s16 + $0x38] ss:$72 sps:$4 sm:$0xff]  }
 0x204   : > { %v4330_v54 = vpop.f32.mrf.mxu1  ;;  %v4523_v31 = vpop.f32.mrf.mxu0  ;;  %4795 = vmatmul.mubr.bf16.gmra.mxu1 %v7183_v48  ;;  %4988 = vmatmul.mubr.bf16.gmra.mxu0 %v7186_v47  ;;  %v7198_v63 = vld [vmem:[%s7369_s16 + $0x40] ss:$72 sps:$4 sm:$0xff]   ;;  %v9496_v47 = vld [vmem:[#allocation21_spill] sm:$0xff] }
 0x205   : > { %v8898_v13 = vadd.f32 %v4519_v61, %v4327_v37  ;;  %v4331_v59 = vadd.f32 %v4330_v54, %v8460_v24  ;;  %5030 = vmatprep.mubr.bf16.mxu1 %v7197_v9  ;;  %5223 = vmatprep.mubr.bf16.mxu0 %v7200_v5  ;;  %v7203_v61 = vld [vmem:[%s7369_s16 + $0xcc] ss:$72 sps:$4 sm:$0xff]   ;;  %v9497_v5 = vld [vmem:[#allocation22_spill] sm:$0xff] }
 0x206   : > { %v4332_v6 = vpop.f32.mrf.mxu1  ;;  %v4525_v35 = vpop.f32.mrf.mxu0  ;;  %v7206_v37 = vld [vmem:[%s7369_s16 + $0xd4] ss:$72 sps:$4 sm:$0xff]  }
 0x207   : > { %9495 = vst [vmem:[#allocation17_spill] sm:$0xff] %v8898_v13  ;;  %v8901_v3 = vadd.f32 %v4523_v31, %v4331_v59  ;;  %v4333_v12 = vadd.f32 %v4332_v6, %v8466_v55 }
 0x208   : > { %v4334_v15 = vpop.f32.mrf.mxu1  ;;  %v4527_v41 = vpop.f32.mrf.mxu0 }
 0x209   : > { %v8906_v48 = vadd.f32 %v4525_v35, %v4333_v12  ;;  %v4335_v1 = vadd.f32 %v4334_v15, %v9496_v47 }
 0x20a   : > { %v4336_v13 = vpop.f32.mrf.mxu1  ;;  %v4529_v24 = vpop.f32.mrf.mxu0 }
 0x20b   : > { %v8911_v9 = vadd.f32 %v4527_v41, %v4335_v1  ;;  %v4337_v54 = vadd.f32 %v4336_v13, %v9497_v5  ;;  %v7201_v1 = vld [vmem:[%s7369_s16 + $0xc8] ss:$72 sps:$4 sm:$0xff]  }
 0x20c   : > { %v4340_v31 = vpop.f32.mrf.mxu1  ;;  %v4533_v55 = vpop.f32.mrf.mxu0  ;;  %5031 = vmatmul.mubr.bf16.vlgmr.msra.gmra.mxu1 %v7195_v8  ;;  %5224 = vmatmul.mubr.bf16.vlgmr.msra.gmra.mxu0 %v7198_v63  ;;  %v7204_v5 = vld [vmem:[%s7369_s16 + $0xd0] ss:$72 sps:$4 sm:$0xff]  }
 0x20d   : > { %v8914_v59 = vadd.f32 %v4529_v24, %v4337_v54  ;;  %v4341_v6 = vadd.f32 %v4340_v31, %v8499_v45  ;;  %5040 = vmatprep.mubr.bf16.mxu1 %v7203_v61  ;;  %5233 = vmatprep.mubr.bf16.mxu0 %v7206_v37  ;;  %v7209_v24 = vld [vmem:[%s7369_s16 + $0x15c] ss:$72 sps:$4 sm:$0xff]  }
 0x20e   : > { %v4342_v35 = vpop.f32.mrf.mxu1  ;;  %v4535_v12 = vpop.f32.mrf.mxu0  ;;  %v7212_v54 = vld [vmem:[%s7369_s16 + $0x164] ss:$72 sps:$4 sm:$0xff]  }
 0x20f   : > { %9498 = vst [vmem:[#allocation18_spill] sm:$0xff] %v8914_v59  ;;  %v8917_v15 = vadd.f32 %v4533_v55, %v4341_v6  ;;  %v4343_v41 = vadd.f32 %v4342_v35, %v8504_v46 }
 0x210   : > { %v4344_v13 = vpop.f32.mrf.mxu1  ;;  %v4537_v47 = vpop.f32.mrf.mxu0 }
 0x211   : > { %v8922_v8 = vadd.f32 %v4535_v12, %v4343_v41  ;;  %v4345_v63 = vadd.f32 %v4344_v13, %v8515_v38  ;;  %v7207_v13 = vld [vmem:[%s7369_s16 + $0x158] ss:$72 sps:$4 sm:$0xff]  }
 0x212   : > { %v4346_v59 = vpop.f32.mrf.mxu1  ;;  %v4539_v45 = vpop.f32.mrf.mxu0 }
 0x213   : > { %v8927_v61 = vadd.f32 %v4537_v47, %v4345_v63  ;;  %v4347_v37 = vadd.f32 %v4346_v59, %v8524_v62  ;;  %v7210_v47 = vld [vmem:[%s7369_s16 + $0x160] ss:$72 sps:$4 sm:$0xff]   ;;  %v7215_v63 = vld [vmem:[%s7369_s16 + $0x1ec] ss:$72 sps:$4 sm:$0xff]  }
 0x214   : > { %v4350_v31 = vpop.f32.mrf.mxu1  ;;  %v4543_v46 = vpop.f32.mrf.mxu0  ;;  %5041 = vmatmul.mubr.bf16.gmra.mxu1 %v7201_v1  ;;  %5234 = vmatmul.mubr.bf16.gmra.mxu0 %v7204_v5 }
 0x215   : > { %v8930_v55 = vadd.f32 %v4539_v45, %v4347_v37  ;;  %v4351_v38 = vadd.f32 %v4350_v31, %v8533_v27  ;;  %5050 = vmatprep.mubr.bf16.mxu1 %v7209_v24  ;;  %5243 = vmatprep.mubr.bf16.mxu0 %v7212_v54  ;;  %v7218_v45 = vld [vmem:[%s7369_s16 + $0x1f4] ss:$72 sps:$4 sm:$0xff]  }
 0x216   : > { %v4352_v6 = vpop.f32.mrf.mxu1  ;;  %v4545_v35 = vpop.f32.mrf.mxu0 }
 0x217   : > { %v8933_v12 = vadd.f32 %v4543_v46, %v4351_v38  ;;  %v4353_v41 = vadd.f32 %v4352_v6, %v8544_v60 }
 0x218   : > { %v4354_v62 = vpop.f32.mrf.mxu1  ;;  %v4547_v59 = vpop.f32.mrf.mxu0 }
 0x219   : > { %v8938_v1 = vadd.f32 %v4545_v35, %v4353_v41  ;;  %v4355_v5 = vadd.f32 %v4354_v62, %v8555_v20 }
 0x21a   : > { %v4356_v37 = vpop.f32.mrf.mxu1  ;;  %v4549_v27 = vpop.f32.mrf.mxu0 }
 0x21b   : > { %v8943_v24 = vadd.f32 %v4547_v59, %v4355_v5  ;;  %v4357_v54 = vadd.f32 %v4356_v37, %v8564_v25  ;;  %v7213_v59 = vld [vmem:[%s7369_s16 + $0x1e8] ss:$72 sps:$4 sm:$0xff]   ;;  %v7221_v37 = vld [vmem:[%s7369_s16 + $0x27c] ss:$72 sps:$4 sm:$0xff]  }
 0x21c   : > { %v4360_v31 = vpop.f32.mrf.mxu1  ;;  %v4553_v60 = vpop.f32.mrf.mxu0  ;;  %5051 = vmatmul.mubr.bf16.gmra.mxu1 %v7207_v13  ;;  %5244 = vmatmul.mubr.bf16.gmra.mxu0 %v7210_v47  ;;  %v7216_v5 = vld [vmem:[%s7369_s16 + $0x1f0] ss:$72 sps:$4 sm:$0xff]  }
 0x21d   : > { %v8946_v46 = vadd.f32 %v4549_v27, %v4357_v54  ;;  %v4361_v20 = vadd.f32 %v4360_v31, %v8573_v14  ;;  %5060 = vmatprep.mubr.bf16.mxu1 %v7215_v63  ;;  %5253 = vmatprep.mubr.bf16.mxu0 %v7218_v45  ;;  %v7224_v27 = vld [vmem:[%s7369_s16 + $0x284] ss:$72 sps:$4 sm:$0xff]  }
 0x21e   : > { %v4362_v38 = vpop.f32.mrf.mxu1  ;;  %v4555_v6 = vpop.f32.mrf.mxu0 }
 0x21f   : > { %v8949_v35 = vadd.f32 %v4553_v60, %v4361_v20  ;;  %v4363_v41 = vadd.f32 %v4362_v38, %v8584_v17  ;;  %v9502_v20 = vld [vmem:[#allocation23_spill] sm:$0xff] }
 0x220   : > { %v4364_v25 = vpop.f32.mrf.mxu1  ;;  %v4557_v62 = vpop.f32.mrf.mxu0 }
 0x221   : > { %v8954_v13 = vadd.f32 %v4555_v6, %v4363_v41  ;;  %v4365_v47 = vadd.f32 %v4364_v25, %v8595_v42  ;;  %v9504_v25 = vld [vmem:[#allocation2_spill] sm:$0xff] }
 0x222   : > { %v4366_v54 = vpop.f32.mrf.mxu1  ;;  %v4559_v14 = vpop.f32.mrf.mxu0 }
 0x223   : > { %9499 = vst [vmem:[#allocation19_spill] sm:$0xff] %v8954_v13  ;;  %v8959_v63 = vadd.f32 %v4557_v62, %v4365_v47  ;;  %v4367_v45 = vadd.f32 %v4366_v54, %v8604_v50  ;;  %v7219_v54 = vld [vmem:[%s7369_s16 + $0x278] ss:$72 sps:$4 sm:$0xff]  }
 0x224   : > { %v4370_v31 = vpop.f32.mrf.mxu1  ;;  %v4563_v17 = vpop.f32.mrf.mxu0  ;;  %5061 = vmatmul.mubr.bf16.gmra.mxu1 %v7213_v59  ;;  %5254 = vmatmul.mubr.bf16.gmra.mxu0 %v7216_v5  ;;  %v9506_v5 = vld [vmem:[#allocation3_spill] sm:$0xff] }
 0x225   : > { %9500 = vst [vmem:[#allocation20_spill] sm:$0xff] %v8959_v63  ;;  %v8962_v60 = vadd.f32 %v4559_v14, %v4367_v45  ;;  %v4371_v42 = vadd.f32 %v4370_v31, %v9502_v20  ;;  %5070 = vmatprep.mubr.bf16.mxu1 %v7221_v37  ;;  %5263 = vmatprep.mubr.bf16.mxu0 %v7224_v27  ;;  %v7222_v63 = vld [vmem:[%s7369_s16 + $0x280] ss:$72 sps:$4 sm:$0xff]   ;;  %v7227_v14 = vld [vmem:[%s7369_s16 + $0x30c] ss:$72 sps:$4 sm:$0xff]  }
 0x226   : > { %v4372_v38 = vpop.f32.mrf.mxu1  ;;  %v4565_v6 = vpop.f32.mrf.mxu0  ;;  %v7230_v45 = vld [vmem:[%s7369_s16 + $0x314] ss:$72 sps:$4 sm:$0xff]  }
 0x227   : > { %9501 = vst [vmem:[#allocation21_spill] sm:$0xff] %v8962_v60  ;;  %v8965_v41 = vadd.f32 %v4563_v17, %v4371_v42  ;;  %v4373_v62 = vadd.f32 %v4372_v38, %v9504_v25  ;;  %v9508_v27 = vld [vmem:[#allocation4_spill] sm:$0xff] }
 0x228   : > { %v4374_v50 = vpop.f32.mrf.mxu1  ;;  %v4567_v47 = vpop.f32.mrf.mxu0 }
 0x229   : > { %9503 = vst [vmem:[#allocation22_spill] sm:$0xff] %v8965_v41  ;;  %v8970_v59 = vadd.f32 %v4565_v6, %v4373_v62  ;;  %v4375_v13 = vadd.f32 %v4374_v50, %v9506_v5  ;;  %v9510_v6 = vld [vmem:[#allocation5_spill] sm:$0xff] }
 0x22a   : > { %v4376_v60 = vpop.f32.mrf.mxu1  ;;  %v4569_v31 = vpop.f32.mrf.mxu0 }
 0x22b   : > { %9505 = vst [vmem:[#allocation23_spill] sm:$0xff] %v8970_v59  ;;  %v8975_v37 = vadd.f32 %v4567_v47, %v4375_v13  ;;  %v4377_v17 = vadd.f32 %v4376_v60, %v9508_v27  ;;  %v9512_v47 = vld [vmem:[#allocation6_spill] sm:$0xff]  ;;  %v7228_v59 = vld [vmem:[%s7369_s16 + $0x310] ss:$72 sps:$4 sm:$0xff]  }
 0x22c   : > { %v4380_v20 = vpop.f32.mrf.mxu1  ;;  %v4573_v42 = vpop.f32.mrf.mxu0  ;;  %5071 = vmatmul.mubr.bf16.gmra.mxu1 %v7219_v54  ;;  %5264 = vmatmul.mubr.bf16.gmra.mxu0 %v7222_v63  ;;  %v9514_v63 = vld [vmem:[#allocation7_spill] sm:$0xff] }
 0x22d   : > { %9507 = vst [vmem:[#allocation2_spill] sm:$0xff] %v8975_v37  ;;  %v8978_v38 = vadd.f32 %v4569_v31, %v4377_v17  ;;  %v4381_v25 = vadd.f32 %v4380_v20, %v9510_v6  ;;  %5080 = vmatprep.mubr.bf16.mxu1 %v7227_v14  ;;  %5273 = vmatprep.mubr.bf16.mxu0 %v7230_v45  ;;  %v7225_v37 = vld [vmem:[%s7369_s16 + $0x308] ss:$72 sps:$4 sm:$0xff]   ;;  %v7233_v31 = vld [vmem:[%s7369_s16 + $0x39c] ss:$72 sps:$4 sm:$0xff]  }
 0x22e   : > { %v4382_v62 = vpop.f32.mrf.mxu1  ;;  %v4575_v50 = vpop.f32.mrf.mxu0  ;;  %v7236_v17 = vld [vmem:[%s7369_s16 + $0x3a4] ss:$72 sps:$4 sm:$0xff]   ;;  %v9516_v45 = vld [vmem:[#allocation8_spill] sm:$0xff] }
 0x22f   : > { %9509 = vst [vmem:[#allocation3_spill] sm:$0xff] %v8978_v38  ;;  %v8981_v13 = vadd.f32 %v4573_v42, %v4381_v25  ;;  %v4383_v5 = vadd.f32 %v4382_v62, %v9512_v47 }
 0x230   : > { %v4384_v60 = vpop.f32.mrf.mxu1  ;;  %v4577_v27 = vpop.f32.mrf.mxu0 }
 0x231   : > { %9511 = vst [vmem:[#allocation4_spill] sm:$0xff] %v8981_v13  ;;  %v8986_v54 = vadd.f32 %v4575_v50, %v4383_v5  ;;  %v4385_v41 = vadd.f32 %v4384_v60, %v9514_v63  ;;  %v9518_v50 = vld [vmem:[#allocation9_spill] sm:$0xff] }
 0x232   : > { %v4386_v38 = vpop.f32.mrf.mxu1  ;;  %v4579_v20 = vpop.f32.mrf.mxu0 }
 0x233   : > { %9513 = vst [vmem:[#allocation5_spill] sm:$0xff] %v8986_v54  ;;  %v8991_v14 = vadd.f32 %v4577_v27, %v4385_v41  ;;  %v4387_v42 = vadd.f32 %v4386_v38, %v9516_v45  ;;  %v9520_v27 = vld [vmem:[#allocation10_spill] sm:$0xff] }
 0x234   : > { %v4390_v6 = vpop.f32.mrf.mxu1  ;;  %v4583_v25 = vpop.f32.mrf.mxu0  ;;  %5081 = vmatmul.mubr.bf16.gmra.mxu1 %v7225_v37  ;;  %5274 = vmatmul.mubr.bf16.gmra.mxu0 %v7228_v59  ;;  %v7234_v54 = vld [vmem:[%s7369_s16 + $0x3a0] ss:$72 sps:$4 sm:$0xff]  }
 0x235   : > { %9515 = vst [vmem:[#allocation6_spill] sm:$0xff] %v8991_v14  ;;  %v8994_v62 = vadd.f32 %v4579_v20, %v4387_v42  ;;  %v4391_v47 = vadd.f32 %v4390_v6, %v9518_v50  ;;  %5090 = vmatprep.mubr.bf16.mxu1 %v7233_v31  ;;  %5283 = vmatprep.mubr.bf16.mxu0 %v7236_v17  ;;  %v7231_v14 = vld [vmem:[%s7369_s16 + $0x398] ss:$72 sps:$4 sm:$0xff]   ;;  %v9522_v59 = vld [vmem:[#allocation11_spill] sm:$0xff]  ;;  %v7242_v42 = vld [vmem:[%s7369_s16 + $0x434] ss:$72 sps:$4 sm:$0xff]  }
 0x236   : > { %v4392_v5 = vpop.f32.mrf.mxu1  ;;  %v4585_v60 = vpop.f32.mrf.mxu0  ;;  %v7239_v20 = vld [vmem:[%s7369_s16 + $0x42c] ss:$72 sps:$4 sm:$0xff]  }
 0x237   : > { %9517 = vst [vmem:[#allocation7_spill] sm:$0xff] %v8994_v62  ;;  %v8997_v41 = vadd.f32 %v4583_v25, %v4391_v47  ;;  %v4393_v63 = vadd.f32 %v4392_v5, %v9520_v27  ;;  %v9524_v17 = vld [vmem:[#allocation12_spill] sm:$0xff] }
 0x238   : > { %v4394_v38 = vpop.f32.mrf.mxu1  ;;  %v4587_v45 = vpop.f32.mrf.mxu0 }
 0x239   : > { %9519 = vst [vmem:[#allocation8_spill] sm:$0xff] %v8997_v41  ;;  %v9002_v37 = vadd.f32 %v4585_v60, %v4393_v63  ;;  %v4395_v13 = vadd.f32 %v4394_v38, %v9522_v59  ;;  %v9526_v60 = vld [vmem:[#allocation13_spill] sm:$0xff] }
 0x23a   : > { %v4396_v62 = vpop.f32.mrf.mxu1  ;;  %v4589_v6 = vpop.f32.mrf.mxu0 }
 0x23b   : > { %9521 = vst [vmem:[#allocation9_spill] sm:$0xff] %v9002_v37  ;;  %v9007_v31 = vadd.f32 %v4587_v45, %v4395_v13  ;;  %v4397_v25 = vadd.f32 %v4396_v62, %v9524_v17  ;;  %v9527_v45 = vld [vmem:[#allocation14_spill] sm:$0xff]  ;;  %v7240_v37 = vld [vmem:[%s7369_s16 + $0x430] ss:$72 sps:$4 sm:$0xff]  }
 0x23c   : > { %v4400_v50 = vpop.f32.mrf.mxu1  ;;  %v4593_v47 = vpop.f32.mrf.mxu0  ;;  %5091 = vmatmul.mubr.bf16.gmra.mxu1 %v7231_v14  ;;  %5284 = vmatmul.mubr.bf16.gmra.mxu0 %v7234_v54  ;;  %v9528_v54 = vld [vmem:[#allocation15_spill] sm:$0xff] }
 0x23d   : > { %9523 = vst [vmem:[#allocation10_spill] sm:$0xff] %v9007_v31  ;;  %v9010_v5 = vadd.f32 %v4589_v6, %v4397_v25  ;;  %v4401_v27 = vadd.f32 %v4400_v50, %v9526_v60  ;;  %5100 = vmatprep.mubr.bf16.mxu1 %v7239_v20  ;;  %5293 = vmatprep.mubr.bf16.mxu0 %v7242_v42  ;;  %v7237_v31 = vld [vmem:[%s7369_s16 + $0x428] ss:$72 sps:$4 sm:$0xff]   ;;  %v7245_v6 = vld [vmem:[%s7369_s16 + $0x4bc] ss:$72 sps:$4 sm:$0xff]  }
 0x23e   : > { %v4402_v63 = vpop.f32.mrf.mxu1  ;;  %v4595_v38 = vpop.f32.mrf.mxu0  ;;  %v7248_v25 = vld [vmem:[%s7369_s16 + $0x4c4] ss:$72 sps:$4 sm:$0xff]   ;;  %v9529_v42 = vld [vmem:[#allocation16_spill] sm:$0xff] }
 0x23f   : > { %9525 = vst [vmem:[#allocation11_spill] sm:$0xff] %v9010_v5  ;;  %v9013_v13 = vadd.f32 %v4593_v47, %v4401_v27  ;;  %v4403_v59 = vadd.f32 %v4402_v63, %v9527_v45 }
 0x240   : > { %v4404_v62 = vpop.f32.mrf.mxu1  ;;  %v4597_v17 = vpop.f32.mrf.mxu0 }
 0x241   : > { %v9018_v14 = vadd.f32 %v4595_v38, %v4403_v59  ;;  %v4405_v41 = vadd.f32 %v4404_v62, %v9528_v54  ;;  %v7243_v54 = vld [vmem:[%s7369_s16 + $0x4b8] ss:$72 sps:$4 sm:$0xff]  }
 0x242   : > { %v4406_v5 = vpop.f32.mrf.mxu1  ;;  %v4599_v50 = vpop.f32.mrf.mxu0 }
 0x243   : > { %v9023_v20 = vadd.f32 %v4597_v17, %v4405_v41  ;;  %v4407_v47 = vadd.f32 %v4406_v5, %v9529_v42  ;;  %v7246_v42 = vld [vmem:[%s7369_s16 + $0x4c0] ss:$72 sps:$4 sm:$0xff]  }
 0x244   : > { %v4410_v60 = vpop.f32.mrf.mxu1  ;;  %v4603_v27 = vpop.f32.mrf.mxu0  ;;  %5101 = vmatmul.mubr.bf16.gmra.mxu1 %v7237_v31  ;;  %5294 = vmatmul.mubr.bf16.gmra.mxu0 %v7240_v37 }
 0x245   : > { %v9026_v63 = vadd.f32 %v4599_v50, %v4407_v47  ;;  %v4411_v38 = vadd.f32 %v4410_v60, %v8773_v40  ;;  %5110 = vmatprep.mubr.bf16.mxu1 %v7245_v6  ;;  %5303 = vmatprep.mubr.bf16.mxu0 %v7248_v25  ;;  %v7251_v50 = vld [vmem:[%s7369_s16 + $0x54c] ss:$72 sps:$4 sm:$0xff]  }
 0x246   : > { %v4412_v45 = vpop.f32.mrf.mxu1  ;;  %v4605_v59 = vpop.f32.mrf.mxu0  ;;  %v7254_v47 = vld [vmem:[%s7369_s16 + $0x554] ss:$72 sps:$4 sm:$0xff]  }
 0x247   : > { %9530 = vst [vmem:[#allocation12_spill] sm:$0xff] %v9026_v63  ;;  %v9029_v41 = vadd.f32 %v4603_v27, %v4411_v38  ;;  %v4413_v62 = vadd.f32 %v4412_v45, %v8778_v39 }
 0x248   : > { %v4414_v5 = vpop.f32.mrf.mxu1  ;;  %v4607_v17 = vpop.f32.mrf.mxu0 }
 0x249   : > { %v9034_v31 = vadd.f32 %v4605_v59, %v4413_v62  ;;  %v4415_v37 = vadd.f32 %v4414_v5, %v8783_v33  ;;  %v7249_v5 = vld [vmem:[%s7369_s16 + $0x548] ss:$72 sps:$4 sm:$0xff]  }
 0x24a   : > { %v4416_v63 = vpop.f32.mrf.mxu1  ;;  %v4609_v40 = vpop.f32.mrf.mxu0 }
 0x24b   : > { %v9039_v6 = vadd.f32 %v4607_v17, %v4415_v37  ;;  %v4417_v25 = vadd.f32 %v4416_v63, %v8786_v4  ;;  %v7252_v17 = vld [vmem:[%s7369_s16 + $0x550] ss:$72 sps:$4 sm:$0xff]   ;;  %v7257_v37 = vld [vmem:[%s7369_s16 + $0x5dc] ss:$72 sps:$4 sm:$0xff]  }
 0x24c   : > { %v4646_v60 = vpop.f32.mrf.mxu1  ;;  %v4839_v39 = vpop.f32.mrf.mxu0  ;;  %5111 = vmatmul.mubr.bf16.gmra.mxu1 %v7243_v54  ;;  %5304 = vmatmul.mubr.bf16.gmra.mxu0 %v7246_v42 }
 0x24d   : > { %v9042_v27 = vadd.f32 %v4609_v40, %v4417_v25  ;;  %v4647_v33 = vadd.f32 %v4646_v60, %v8789_v57  ;;  %5120 = vmatprep.mubr.bf16.mxu1 %v7251_v50  ;;  %5313 = vmatprep.mubr.bf16.mxu0 %v7254_v47  ;;  %v7260_v40 = vld [vmem:[%s7369_s16 + $0x5e4] ss:$72 sps:$4 sm:$0xff]  }
 0x24e   : > { %v4648_v38 = vpop.f32.mrf.mxu1  ;;  %v4841_v45 = vpop.f32.mrf.mxu0 }
 0x24f   : > { %v9045_v59 = vadd.f32 %v4839_v39, %v4647_v33  ;;  %v4649_v62 = vadd.f32 %v4648_v38, %v8794_v19 }
 0x250   : > { %v4650_v4 = vpop.f32.mrf.mxu1  ;;  %v4843_v63 = vpop.f32.mrf.mxu0 }
 0x251   : > { %v9050_v54 = vadd.f32 %v4841_v45, %v4649_v62  ;;  %v4651_v42 = vadd.f32 %v4650_v4, %v8799_v52 }
 0x252   : > { %v4652_v25 = vpop.f32.mrf.mxu1  ;;  %v4845_v57 = vpop.f32.mrf.mxu0 }
 0x253   : > { %v9055_v50 = vadd.f32 %v4843_v63, %v4651_v42  ;;  %v4653_v47 = vadd.f32 %v4652_v25, %v8802_v2  ;;  %v7255_v63 = vld [vmem:[%s7369_s16 + $0x5d8] ss:$72 sps:$4 sm:$0xff]   ;;  %v7263_v25 = vld [vmem:[%s7369_s16 + $0x66c] ss:$72 sps:$4 sm:$0xff]  }
 0x254   : > { %v4656_v60 = vpop.f32.mrf.mxu1  ;;  %v4849_v19 = vpop.f32.mrf.mxu0  ;;  %5121 = vmatmul.mubr.bf16.gmra.mxu1 %v7249_v5  ;;  %5314 = vmatmul.mubr.bf16.gmra.mxu0 %v7252_v17  ;;  %v7258_v42 = vld [vmem:[%s7369_s16 + $0x5e0] ss:$72 sps:$4 sm:$0xff]  }
 0x255   : > { %v9058_v39 = vadd.f32 %v4845_v57, %v4653_v47  ;;  %v4657_v52 = vadd.f32 %v4656_v60, %v8805_v51  ;;  %5130 = vmatprep.mubr.bf16.mxu1 %v7257_v37  ;;  %5323 = vmatprep.mubr.bf16.mxu0 %v7260_v40  ;;  %v7266_v57 = vld [vmem:[%s7369_s16 + $0x674] ss:$72 sps:$4 sm:$0xff]  }
 0x256   : > { %v4658_v33 = vpop.f32.mrf.mxu1  ;;  %v4851_v38 = vpop.f32.mrf.mxu0 }
 0x257   : > { %v9061_v45 = vadd.f32 %v4849_v19, %v4657_v52  ;;  %v4659_v62 = vadd.f32 %v4658_v33, %v8810_v7 }
 0x258   : > { %v4660_v2 = vpop.f32.mrf.mxu1  ;;  %v4853_v4 = vpop.f32.mrf.mxu0 }
 0x259   : > { %v9066_v5 = vadd.f32 %v4851_v38, %v4659_v62  ;;  %v4661_v17 = vadd.f32 %v4660_v2, %v8815_v22 }
 0x25a   : > { %v4662_v47 = vpop.f32.mrf.mxu1  ;;  %v4855_v51 = vpop.f32.mrf.mxu0 }
 0x25b   : > { %v9071_v37 = vadd.f32 %v4853_v4, %v4661_v17  ;;  %v4663_v40 = vadd.f32 %v4662_v47, %v8818_v56  ;;  %v7261_v4 = vld [vmem:[%s7369_s16 + $0x668] ss:$72 sps:$4 sm:$0xff]   ;;  %v7269_v47 = vld [vmem:[%s7369_s16 + $0x6fc] ss:$72 sps:$4 sm:$0xff]  }
 0x25c   : > { %v4666_v60 = vpop.f32.mrf.mxu1  ;;  %v4859_v7 = vpop.f32.mrf.mxu0  ;;  %5131 = vmatmul.mubr.bf16.gmra.mxu1 %v7255_v63  ;;  %5324 = vmatmul.mubr.bf16.gmra.mxu0 %v7258_v42  ;;  %v7264_v17 = vld [vmem:[%s7369_s16 + $0x670] ss:$72 sps:$4 sm:$0xff]  }
 0x25d   : > { %v9074_v19 = vadd.f32 %v4855_v51, %v4663_v40  ;;  %v4667_v22 = vadd.f32 %v4666_v60, %v8821_v32  ;;  %5140 = vmatprep.mubr.bf16.mxu1 %v7263_v25  ;;  %5333 = vmatprep.mubr.bf16.mxu0 %v7266_v57  ;;  %v7272_v51 = vld [vmem:[%s7369_s16 + $0x704] ss:$72 sps:$4 sm:$0xff]  }
 0x25e   : > { %v4668_v52 = vpop.f32.mrf.mxu1  ;;  %v4861_v33 = vpop.f32.mrf.mxu0 }
 0x25f   : > { %v9077_v38 = vadd.f32 %v4859_v7, %v4667_v22  ;;  %v4669_v62 = vadd.f32 %v4668_v52, %v8826_v28 }
 0x260   : > { %v4670_v56 = vpop.f32.mrf.mxu1  ;;  %v4863_v2 = vpop.f32.mrf.mxu0 }
 0x261   : > { %v9082_v63 = vadd.f32 %v4861_v33, %v4669_v62  ;;  %v4671_v42 = vadd.f32 %v4670_v56, %v8831_v53 }
 0x262   : > { %v4672_v40 = vpop.f32.mrf.mxu1  ;;  %v4865_v32 = vpop.f32.mrf.mxu0 }
 0x263   : > { %v9087_v25 = vadd.f32 %v4863_v2, %v4671_v42  ;;  %v4673_v57 = vadd.f32 %v4672_v40, %v8834_v49  ;;  %v7267_v2 = vld [vmem:[%s7369_s16 + $0x6f8] ss:$72 sps:$4 sm:$0xff]   ;;  %v7275_v40 = vld [vmem:[%s7369_s16 + $0x78c] ss:$72 sps:$4 sm:$0xff]  }
 0x264   : > { %v4676_v60 = vpop.f32.mrf.mxu1  ;;  %v4869_v28 = vpop.f32.mrf.mxu0  ;;  %5141 = vmatmul.mubr.bf16.gmra.mxu1 %v7261_v4  ;;  %5334 = vmatmul.mubr.bf16.gmra.mxu0 %v7264_v17  ;;  %v7270_v42 = vld [vmem:[%s7369_s16 + $0x700] ss:$72 sps:$4 sm:$0xff]  }
 0x265   : > { %v9090_v7 = vadd.f32 %v4865_v32, %v4673_v57  ;;  %v4677_v53 = vadd.f32 %v4676_v60, %v8837_v16  ;;  %5150 = vmatprep.mubr.bf16.mxu1 %v7269_v47  ;;  %5343 = vmatprep.mubr.bf16.mxu0 %v7272_v51  ;;  %v7278_v32 = vld [vmem:[%s7369_s16 + $0x794] ss:$72 sps:$4 sm:$0xff]  }
 0x266   : > { %v4678_v22 = vpop.f32.mrf.mxu1  ;;  %v4871_v52 = vpop.f32.mrf.mxu0 }
 0x267   : > { %v9093_v33 = vadd.f32 %v4869_v28, %v4677_v53  ;;  %v4679_v62 = vadd.f32 %v4678_v22, %v8842_v30 }
 0x268   : > { %v4680_v49 = vpop.f32.mrf.mxu1  ;;  %v4873_v56 = vpop.f32.mrf.mxu0 }
 0x269   : > { %v9098_v4 = vadd.f32 %v4871_v52, %v4679_v62  ;;  %v4681_v17 = vadd.f32 %v4680_v49, %v8847_v34 }
 0x26a   : > { %v4682_v57 = vpop.f32.mrf.mxu1  ;;  %v4875_v16 = vpop.f32.mrf.mxu0 }
 0x26b   : > { %v9103_v47 = vadd.f32 %v4873_v56, %v4681_v17  ;;  %v4683_v51 = vadd.f32 %v4682_v57, %v8850_v58  ;;  %v7273_v56 = vld [vmem:[%s7369_s16 + $0x788] ss:$72 sps:$4 sm:$0xff]   ;;  %v7281_v57 = vld [vmem:[%s7369_s16 + $0x81c] ss:$72 sps:$4 sm:$0xff]  }
 0x26c   : > { %v4686_v60 = vpop.f32.mrf.mxu1  ;;  %v4879_v30 = vpop.f32.mrf.mxu0  ;;  %5151 = vmatmul.mubr.bf16.gmra.mxu1 %v7267_v2  ;;  %5344 = vmatmul.mubr.bf16.gmra.mxu0 %v7270_v42  ;;  %v7276_v17 = vld [vmem:[%s7369_s16 + $0x790] ss:$72 sps:$4 sm:$0xff]  }
 0x26d   : > { %v9106_v28 = vadd.f32 %v4875_v16, %v4683_v51  ;;  %v4687_v34 = vadd.f32 %v4686_v60, %v8853_v23  ;;  %5160 = vmatprep.mubr.bf16.mxu1 %v7275_v40  ;;  %5353 = vmatprep.mubr.bf16.mxu0 %v7278_v32  ;;  %v7284_v16 = vld [vmem:[%s7369_s16 + $0x824] ss:$72 sps:$4 sm:$0xff]  }
 0x26e   : > { %v4688_v53 = vpop.f32.mrf.mxu1  ;;  %v4881_v22 = vpop.f32.mrf.mxu0 }
 0x26f   : > { %v9109_v52 = vadd.f32 %v4879_v30, %v4687_v34  ;;  %v4689_v62 = vadd.f32 %v4688_v53, %v8858_v36 }
 0x270   : > { %v4690_v58 = vpop.f32.mrf.mxu1  ;;  %v4883_v49 = vpop.f32.mrf.mxu0 }
 0x271   : > { %v9114_v2 = vadd.f32 %v4881_v22, %v4689_v62  ;;  %v4691_v42 = vadd.f32 %v4690_v58, %v8863_v0 }
 0x272   : > { %v4692_v51 = vpop.f32.mrf.mxu1  ;;  %v4885_v23 = vpop.f32.mrf.mxu0 }
 0x273   : > { %v9119_v40 = vadd.f32 %v4883_v49, %v4691_v42  ;;  %v4693_v32 = vadd.f32 %v4692_v51, %v8866_v18  ;;  %v7279_v49 = vld [vmem:[%s7369_s16 + $0x818] ss:$72 sps:$4 sm:$0xff]   ;;  %v7287_v51 = vld [vmem:[%s7369_s16 + $0x8ac] ss:$72 sps:$4 sm:$0xff]  }
 0x274   : > { %v4696_v60 = vpop.f32.mrf.mxu1  ;;  %v4889_v36 = vpop.f32.mrf.mxu0  ;;  %5161 = vmatmul.mubr.bf16.gmra.mxu1 %v7273_v56  ;;  %5354 = vmatmul.mubr.bf16.gmra.mxu0 %v7276_v17  ;;  %v7282_v42 = vld [vmem:[%s7369_s16 + $0x820] ss:$72 sps:$4 sm:$0xff]  }
 0x275   : > { %v9122_v30 = vadd.f32 %v4885_v23, %v4693_v32  ;;  %v4697_v0 = vadd.f32 %v4696_v60, %v8869_v21  ;;  %5170 = vmatprep.mubr.bf16.mxu1 %v7281_v57  ;;  %5363 = vmatprep.mubr.bf16.mxu0 %v7284_v16  ;;  %v7290_v23 = vld [vmem:[%s7369_s16 + $0x8b4] ss:$72 sps:$4 sm:$0xff]  }
 0x276   : > { %v4698_v34 = vpop.f32.mrf.mxu1  ;;  %v4891_v53 = vpop.f32.mrf.mxu0 }
 0x277   : > { %v9125_v22 = vadd.f32 %v4889_v36, %v4697_v0  ;;  %v4699_v62 = vadd.f32 %v4698_v34, %v8874_v44 }
 0x278   : > { %v4700_v18 = vpop.f32.mrf.mxu1  ;;  %v4893_v58 = vpop.f32.mrf.mxu0 }
 0x279   : > { %v9130_v56 = vadd.f32 %v4891_v53, %v4699_v62  ;;  %v4701_v17 = vadd.f32 %v4700_v18, %v8879_v29 }
 0x27a   : > { %v4702_v32 = vpop.f32.mrf.mxu1  ;;  %v4895_v21 = vpop.f32.mrf.mxu0 }
 0x27b   : > { %v9135_v57 = vadd.f32 %v4893_v58, %v4701_v17  ;;  %v4703_v16 = vadd.f32 %v4702_v32, %v8882_v10  ;;  %v7285_v10 = vld [vmem:[%s7369_s16 + $0x8a8] ss:$72 sps:$4 sm:$0xff]  }
 0x27c   : > { %v4706_v60 = vpop.f32.mrf.mxu1  ;;  %v4899_v44 = vpop.f32.mrf.mxu0  ;;  %5171 = vmatmul.mubr.bf16.gmra.mxu1 %v7279_v49  ;;  %5364 = vmatmul.mubr.bf16.gmra.mxu0 %v7282_v42  ;;  %v7288_v17 = vld [vmem:[%s7369_s16 + $0x8b0] ss:$72 sps:$4 sm:$0xff]   ;;  %s6353_s16 = sshll.u32 %s9586_s24, 3 }
 0x27d   : > { %v9138_v36 = vadd.f32 %v4895_v21, %v4703_v16  ;;  %v4707_v0 = vadd.f32 %v4706_v60, %v8885_v43  ;;  %5180 = vmatprep.mubr.bf16.mxu1 %v7287_v51  ;;  %5373 = vmatprep.mubr.bf16.mxu0 %v7290_v23  ;;  %v9531_v43 = vld [vmem:[#allocation17_spill] sm:$0xff]  ;;  %s9270_s21 = scalar_lea.vmem %s9438_s3, %s6353_s16 }
 0x27e   : > { %v4708_v29 = vpop.f32.mrf.mxu1  ;;  %v4901_v34 = vpop.f32.mrf.mxu0 }
 0x27f   : > { %v9141_v53 = vadd.f32 %v4899_v44, %v4707_v0  ;;  %v4709_v62 = vadd.f32 %v4708_v29, %v8890_v26 }
 0x280   : > { %v4710_v18 = vpop.f32.mrf.mxu1  ;;  %v4903_v58 = vpop.f32.mrf.mxu0 }
 0x281   : > { %v9146_v32 = vadd.f32 %v4901_v34, %v4709_v62  ;;  %v4711_v49 = vadd.f32 %v4710_v18, %v8895_v11 }
 0x282   : > { %v4712_v42 = vpop.f32.mrf.mxu1  ;;  %v4905_v21 = vpop.f32.mrf.mxu0 }
 0x283   : > { %v9149_v16 = vadd.f32 %v4903_v58, %v4711_v49  ;;  %v4713_v51 = vadd.f32 %v4712_v42, %v9531_v43 }
 0x284   : > { %v4716_v23 = vpop.f32.mrf.mxu1  ;;  %v4909_v60 = vpop.f32.mrf.mxu0  ;;  %5181 = vmatmul.mubr.bf16.gmra.mxu1 %v7285_v10  ;;  %5374 = vmatmul.mubr.bf16.gmra.mxu0 %v7288_v17  ;;  %v9532_v17 = vld [vmem:[#allocation18_spill] sm:$0xff] }
 0x285   : > { %v9152_v44 = vadd.f32 %v4905_v21, %v4713_v51  ;;  %v4717_v26 = vadd.f32 %v4716_v23, %v8901_v3 }
 0x286   : > { %v4718_v0 = vpop.f32.mrf.mxu1  ;;  %v4911_v29 = vpop.f32.mrf.mxu0 }
 0x287   : > { %v9155_v34 = vadd.f32 %v4909_v60, %v4717_v26  ;;  %v4719_v11 = vadd.f32 %v4718_v0, %v8906_v48 }
 0x288   : > { %v4720_v62 = vpop.f32.mrf.mxu1  ;;  %v4913_v18 = vpop.f32.mrf.mxu0 }
 0x289   : > { %v9158_v58 = vadd.f32 %v4911_v29, %v4719_v11  ;;  %v4721_v49 = vadd.f32 %v4720_v62, %v8911_v9 }
 0x28a   : > { %v4722_v42 = vpop.f32.mrf.mxu1  ;;  %v4915_v43 = vpop.f32.mrf.mxu0 }
 0x28b   : > { %v9161_v10 = vadd.f32 %v4913_v18, %v4721_v49  ;;  %v4723_v21 = vadd.f32 %v4722_v42, %v9532_v17 }
 0x28c   : > { %v4726_v51 = vpop.f32.mrf.mxu1  ;;  %v4919_v3 = vpop.f32.mrf.mxu0 }
 0x28d   : > { %v9164_v23 = vadd.f32 %v4915_v43, %v4723_v21  ;;  %v4727_v60 = vadd.f32 %v4726_v51, %v8917_v15 }
 0x28e   : > { %v4728_v26 = vpop.f32.mrf.mxu1  ;;  %v4921_v48 = vpop.f32.mrf.mxu0 }
 0x28f   : > { %v9167_v0 = vadd.f32 %v4919_v3, %v4727_v60  ;;  %v4729_v29 = vadd.f32 %v4728_v26, %v8922_v8 }
 0x290   : > { %v4730_v11 = vpop.f32.mrf.mxu1  ;;  %v4923_v9 = vpop.f32.mrf.mxu0 }
 0x291   : > { %v9170_v62 = vadd.f32 %v4921_v48, %v4729_v29  ;;  %v4731_v18 = vadd.f32 %v4730_v11, %v8927_v61 }
 0x292   : > { %v4732_v49 = vpop.f32.mrf.mxu1  ;;  %v4925_v42 = vpop.f32.mrf.mxu0 }
 0x293   : > { %v9173_v17 = vadd.f32 %v4923_v9, %v4731_v18  ;;  %v4733_v43 = vadd.f32 %v4732_v49, %v8930_v55 }
 0x294   : > { %v4736_v21 = vpop.f32.mrf.mxu1  ;;  %v4929_v15 = vpop.f32.mrf.mxu0 }
 0x295   : > { %v9176_v51 = vadd.f32 %v4925_v42, %v4733_v43  ;;  %v4737_v3 = vadd.f32 %v4736_v21, %v8933_v12 }
 0x296   : > { %v4738_v60 = vpop.f32.mrf.mxu1  ;;  %v4931_v8 = vpop.f32.mrf.mxu0 }
 0x297   : > { %v9179_v26 = vadd.f32 %v4929_v15, %v4737_v3  ;;  %v4739_v48 = vadd.f32 %v4738_v60, %v8938_v1 }
 0x298   : > { %v4740_v29 = vpop.f32.mrf.mxu1  ;;  %v4933_v61 = vpop.f32.mrf.mxu0 }
 0x299   : > { %v9182_v11 = vadd.f32 %v4931_v8, %v4739_v48  ;;  %v4741_v9 = vadd.f32 %v4740_v29, %v8943_v24  ;;  %v9537_v8 = vld [vmem:[#allocation19_spill] sm:$0xff] }
 0x29a   : > { %v4742_v18 = vpop.f32.mrf.mxu1  ;;  %v4935_v55 = vpop.f32.mrf.mxu0 }
 0x29b   : > { %9533 = vst [vmem:[#allocation13_spill] sm:$0xff] %v9182_v11  ;;  %v9185_v49 = vadd.f32 %v4933_v61, %v4741_v9  ;;  %v4743_v42 = vadd.f32 %v4742_v18, %v8946_v46  ;;  %v9539_v61 = vld [vmem:[#allocation20_spill] sm:$0xff] }
 0x29c   : > { %v4746_v43 = vpop.f32.mrf.mxu1  ;;  %v4939_v12 = vpop.f32.mrf.mxu0 }
 0x29d   : > { %9534 = vst [vmem:[#allocation14_spill] sm:$0xff] %v9185_v49  ;;  %v9188_v21 = vadd.f32 %v4935_v55, %v4743_v42  ;;  %v4747_v15 = vadd.f32 %v4746_v43, %v8949_v35  ;;  %v9541_v55 = vld [vmem:[#allocation21_spill] sm:$0xff] }
 0x29e   : > { %v4748_v3 = vpop.f32.mrf.mxu1  ;;  %v4941_v1 = vpop.f32.mrf.mxu0 }
 0x29f   : > { %9535 = vst [vmem:[#allocation15_spill] sm:$0xff] %v9188_v21  ;;  %v9191_v60 = vadd.f32 %v4939_v12, %v4747_v15  ;;  %v4749_v48 = vadd.f32 %v4748_v3, %v9537_v8  ;;  %v9543_v12 = vld [vmem:[#allocation22_spill] sm:$0xff] }
 0x2a0   : > { %v4750_v11 = vpop.f32.mrf.mxu1  ;;  %v4943_v24 = vpop.f32.mrf.mxu0 }
 0x2a1   : > { %9536 = vst [vmem:[#allocation16_spill] sm:$0xff] %v9191_v60  ;;  %v9194_v29 = vadd.f32 %v4941_v1, %v4749_v48  ;;  %v4751_v9 = vadd.f32 %v4750_v11, %v9539_v61  ;;  %v9545_v1 = vld [vmem:[#allocation23_spill] sm:$0xff] }
 0x2a2   : > { %v4752_v49 = vpop.f32.mrf.mxu1  ;;  %v4945_v46 = vpop.f32.mrf.mxu0 }
 0x2a3   : > { %9538 = vst [vmem:[#allocation17_spill] sm:$0xff] %v9194_v29  ;;  %v9197_v18 = vadd.f32 %v4943_v24, %v4751_v9  ;;  %v4753_v42 = vadd.f32 %v4752_v49, %v9541_v55  ;;  %v9547_v24 = vld [vmem:[#allocation2_spill] sm:$0xff] }
 0x2a4   : > { %v4756_v21 = vpop.f32.mrf.mxu1  ;;  %v4949_v35 = vpop.f32.mrf.mxu0 }
 0x2a5   : > { %9540 = vst [vmem:[#allocation18_spill] sm:$0xff] %v9197_v18  ;;  %v9200_v43 = vadd.f32 %v4945_v46, %v4753_v42  ;;  %v4757_v15 = vadd.f32 %v4756_v21, %v9543_v12  ;;  %v9549_v46 = vld [vmem:[#allocation3_spill] sm:$0xff] }
 0x2a6   : > { %v4758_v60 = vpop.f32.mrf.mxu1  ;;  %v4951_v3 = vpop.f32.mrf.mxu0 }
 0x2a7   : > { %9542 = vst [vmem:[#allocation19_spill] sm:$0xff] %v9200_v43  ;;  %v9203_v8 = vadd.f32 %v4949_v35, %v4757_v15  ;;  %v4759_v48 = vadd.f32 %v4758_v60, %v9545_v1  ;;  %v9551_v35 = vld [vmem:[#allocation4_spill] sm:$0xff] }
 0x2a8   : > { %v4760_v29 = vpop.f32.mrf.mxu1  ;;  %v4953_v11 = vpop.f32.mrf.mxu0 }
 0x2a9   : > { %9544 = vst [vmem:[#allocation20_spill] sm:$0xff] %v9203_v8  ;;  %v9206_v61 = vadd.f32 %v4951_v3, %v4759_v48  ;;  %v4761_v9 = vadd.f32 %v4760_v29, %v9547_v24  ;;  %v9553_v3 = vld [vmem:[#allocation5_spill] sm:$0xff] }
 0x2aa   : > { %v4762_v18 = vpop.f32.mrf.mxu1  ;;  %v4955_v49 = vpop.f32.mrf.mxu0 }
 0x2ab   : > { %9546 = vst [vmem:[#allocation21_spill] sm:$0xff] %v9206_v61  ;;  %v9209_v55 = vadd.f32 %v4953_v11, %v4761_v9  ;;  %v4763_v42 = vadd.f32 %v4762_v18, %v9549_v46  ;;  %v9555_v11 = vld [vmem:[#allocation6_spill] sm:$0xff] }
 0x2ac   : > { %v4766_v43 = vpop.f32.mrf.mxu1  ;;  %v4959_v21 = vpop.f32.mrf.mxu0 }
 0x2ad   : > { %9548 = vst [vmem:[#allocation22_spill] sm:$0xff] %v9209_v55  ;;  %v9212_v12 = vadd.f32 %v4955_v49, %v4763_v42  ;;  %v4767_v15 = vadd.f32 %v4766_v43, %v9551_v35  ;;  %v9557_v49 = vld [vmem:[#allocation7_spill] sm:$0xff] }
 0x2ae   : > { %v4768_v8 = vpop.f32.mrf.mxu1  ;;  %v4961_v60 = vpop.f32.mrf.mxu0 }
 0x2af   : > { %9550 = vst [vmem:[#allocation23_spill] sm:$0xff] %v9212_v12  ;;  %v9215_v1 = vadd.f32 %v4959_v21, %v4767_v15  ;;  %v4769_v48 = vadd.f32 %v4768_v8, %v9553_v3  ;;  %v9559_v21 = vld [vmem:[#allocation8_spill] sm:$0xff] }
 0x2b0   : > { %v4770_v61 = vpop.f32.mrf.mxu1  ;;  %v4963_v29 = vpop.f32.mrf.mxu0 }
 0x2b1   : > { %9552 = vst [vmem:[#allocation2_spill] sm:$0xff] %v9215_v1  ;;  %v9218_v24 = vadd.f32 %v4961_v60, %v4769_v48  ;;  %v4771_v9 = vadd.f32 %v4770_v61, %v9555_v11  ;;  %v9560_v60 = vld [vmem:[#allocation9_spill] sm:$0xff] }
 0x2b2   : > { %v4772_v55 = vpop.f32.mrf.mxu1  ;;  %v4965_v18 = vpop.f32.mrf.mxu0 }
 0x2b3   : > { %9554 = vst [vmem:[#allocation3_spill] sm:$0xff] %v9218_v24  ;;  %v9221_v46 = vadd.f32 %v4963_v29, %v4771_v9  ;;  %v4773_v42 = vadd.f32 %v4772_v55, %v9557_v49  ;;  %v9561_v29 = vld [vmem:[#allocation10_spill] sm:$0xff] }
 0x2b4   : > { %v4776_v12 = vpop.f32.mrf.mxu1  ;;  %v4969_v43 = vpop.f32.mrf.mxu0 }
 0x2b5   : > { %9556 = vst [vmem:[#allocation4_spill] sm:$0xff] %v9221_v46  ;;  %v9224_v35 = vadd.f32 %v4965_v18, %v4773_v42  ;;  %v4777_v15 = vadd.f32 %v4776_v12, %v9559_v21  ;;  %v9562_v18 = vld [vmem:[#allocation11_spill] sm:$0xff] }
 0x2b6   : > { %v4778_v1 = vpop.f32.mrf.mxu1  ;;  %v4971_v8 = vpop.f32.mrf.mxu0 }
 0x2b7   : > { %9558 = vst [vmem:[#allocation5_spill] sm:$0xff] %v9224_v35  ;;  %v9227_v3 = vadd.f32 %v4969_v43, %v4777_v15  ;;  %v4779_v48 = vadd.f32 %v4778_v1, %v9560_v60 }
 0x2b8   : > { %v4780_v24 = vpop.f32.mrf.mxu1  ;;  %v4973_v61 = vpop.f32.mrf.mxu0 }
 0x2b9   : > { %v9230_v11 = vadd.f32 %v4971_v8, %v4779_v48  ;;  %v4781_v9 = vadd.f32 %v4780_v24, %v9561_v29 }
 0x2ba   : > { %v4782_v46 = vpop.f32.mrf.mxu1  ;;  %v4975_v55 = vpop.f32.mrf.mxu0 }
 0x2bb   : > { %v9233_v49 = vadd.f32 %v4973_v61, %v4781_v9  ;;  %v4783_v42 = vadd.f32 %v4782_v46, %v9562_v18 }
 0x2bc   : > { %v4786_v35 = vpop.f32.mrf.mxu1  ;;  %v4979_v12 = vpop.f32.mrf.mxu0 }
 0x2bd   : > { %v9236_v21 = vadd.f32 %v4975_v55, %v4783_v42  ;;  %v4787_v43 = vadd.f32 %v4786_v35, %v9013_v13  ;;  %v9564_v55 = vld [vmem:[#allocation12_spill] sm:$0xff] }
 0x2be   : > { %v4788_v15 = vpop.f32.mrf.mxu1  ;;  %v4981_v1 = vpop.f32.mrf.mxu0 }
 0x2bf   : > { %9563 = vst [vmem:[#allocation6_spill] sm:$0xff] %v9236_v21  ;;  %v9239_v60 = vadd.f32 %v4979_v12, %v4787_v43  ;;  %v4789_v8 = vadd.f32 %v4788_v15, %v9018_v14 }
 0x2c0   : > { %v4790_v48 = vpop.f32.mrf.mxu1  ;;  %v4983_v24 = vpop.f32.mrf.mxu0 }
 0x2c1   : > { %v9242_v29 = vadd.f32 %v4981_v1, %v4789_v8  ;;  %v4791_v61 = vadd.f32 %v4790_v48, %v9023_v20 }
 0x2c2   : > { %v4792_v9 = vpop.f32.mrf.mxu1  ;;  %v4985_v46 = vpop.f32.mrf.mxu0 }
 0x2c3   : > { %v9245_v18 = vadd.f32 %v4983_v24, %v4791_v61  ;;  %v4793_v42 = vadd.f32 %v4792_v9, %v9564_v55 }
 0x2c4   : > { %v4796_v21 = vpop.f32.mrf.mxu1  ;;  %v4989_v13 = vpop.f32.mrf.mxu0 }
 0x2c5   : > { %v9248_v35 = vadd.f32 %v4985_v46, %v4793_v42  ;;  %v4797_v12 = vadd.f32 %v4796_v21, %v9029_v41 }
 0x2c6   : > { %v4798_v43 = vpop.f32.mrf.mxu1  ;;  %v4991_v14 = vpop.f32.mrf.mxu0 }
 0x2c7   : > { %v9251_v15 = vadd.f32 %v4989_v13, %v4797_v12  ;;  %v4799_v1 = vadd.f32 %v4798_v43, %v9034_v31 }
 0x2c8   : > { %v4800_v8 = vpop.f32.mrf.mxu1  ;;  %v4993_v20 = vpop.f32.mrf.mxu0 }
 0x2c9   : > { %v9254_v48 = vadd.f32 %v4991_v14, %v4799_v1  ;;  %v4801_v24 = vadd.f32 %v4800_v8, %v9039_v6 }
 0x2ca   : > { %v4802_v61 = vpop.f32.mrf.mxu1  ;;  %v4995_v9 = vpop.f32.mrf.mxu0 }
 0x2cb   : > { %9565 = vst [vmem:[#allocation7_spill] sm:$0xff] %v9254_v48  ;;  %v9257_v55 = vadd.f32 %v4993_v20, %v4801_v24  ;;  %v4803_v46 = vadd.f32 %v4802_v61, %v9042_v27 }
 0x2cc   : > { %v5032_v41 = vpop.f32.mrf.mxu1  ;;  %v5225_v21 = vpop.f32.mrf.mxu0 }
 0x2cd   : > { %v9260_v42 = vadd.f32 %v4995_v9, %v4803_v46  ;;  %v5033_v13 = vadd.f32 %v5032_v41, %v9045_v59 }
 0x2ce   : > { %v5034_v31 = vpop.f32.mrf.mxu1  ;;  %v5227_v12 = vpop.f32.mrf.mxu0 }
 0x2cf   : > { %v5226_v43 = vadd.f32 %v5225_v21, %v5033_v13  ;;  %v5035_v14 = vadd.f32 %v5034_v31, %v9050_v54 }
 0x2d0   : > { %v5036_v1 = vpop.f32.mrf.mxu1  ;;  %v5229_v48 = vpop.f32.mrf.mxu0 }
 0x2d1   : > { %v5228_v6 = vadd.f32 %v5227_v12, %v5035_v14  ;;  %v5037_v8 = vadd.f32 %v5036_v1, %v9055_v50  ;;  %v5384_v24 = vmax.f32 %v5226_v43, 0.0 }
 0x2d2   : > { %v5038_v27 = vpop.f32.mrf.mxu1  ;;  %v5231_v20 = vpop.f32.mrf.mxu0 }
 0x2d3   : > { %v5385_v61 = vmax.f32 %v5228_v6, 0.0  ;;  %v5230_v9 = vadd.f32 %v5229_v48, %v5037_v8  ;;  %v5039_v59 = vadd.f32 %v5038_v27, %v9058_v39 }
 0x2d4   : > { %v5042_v46 = vpop.f32.mrf.mxu1  ;;  %v5235_v41 = vpop.f32.mrf.mxu0 }
 0x2d5   : > { %v6354_v50 = vpack.c.bf16 %v5385_v61, %v5384_v24  ;;  %v5232_v21 = vadd.f32 %v5231_v20, %v5039_v59  ;;  %v5043_v13 = vadd.f32 %v5042_v46, %v9061_v45  ;;  %v5386_v39 = vmax.f32 %v5230_v9, 0.0 }
 0x2d6   : > { %v5044_v48 = vpop.f32.mrf.mxu1  ;;  %v5237_v31 = vpop.f32.mrf.mxu0 }
 0x2d7   : > { %5643 = vst.msk [vmem:[%s9270_s21] sm:$0xff] %vm9272_vm2, %v6354_v50  ;;  %v5387_v12 = vmax.f32 %v5232_v21, 0.0  ;;  %v5236_v43 = vadd.f32 %v5235_v41, %v5043_v13  ;;  %v5045_v14 = vadd.f32 %v5044_v48, %v9066_v5 }
 0x2d8   : > { %v5046_v1 = vpop.f32.mrf.mxu1  ;;  %v5239_v6 = vpop.f32.mrf.mxu0 }
 0x2d9   : > { %v6355_v8 = vpack.c.bf16 %v5387_v12, %v5386_v39  ;;  %v5238_v27 = vadd.f32 %v5237_v31, %v5045_v14  ;;  %v5047_v20 = vadd.f32 %v5046_v1, %v9071_v37  ;;  %v5388_v45 = vmax.f32 %v5236_v43, 0.0 }
 0x2da   : > { %v5048_v24 = vpop.f32.mrf.mxu1  ;;  %v5241_v61 = vpop.f32.mrf.mxu0 }
 0x2db   : > { %5644 = vst.msk [vmem:[%s9270_s21 + $0x8] sm:$0xff] %vm9272_vm2, %v6355_v8  ;;  %v5389_v59 = vmax.f32 %v5238_v27, 0.0  ;;  %v5240_v46 = vadd.f32 %v5239_v6, %v5047_v20  ;;  %v5049_v9 = vadd.f32 %v5048_v24, %v9074_v19 }
 0x2dc   : > { %v5052_v41 = vpop.f32.mrf.mxu1  ;;  %v5245_v50 = vpop.f32.mrf.mxu0 }
 0x2dd   : > { %v6356_v5 = vpack.c.bf16 %v5389_v59, %v5388_v45  ;;  %v5242_v21 = vadd.f32 %v5241_v61, %v5049_v9  ;;  %v5053_v13 = vadd.f32 %v5052_v41, %v9077_v38  ;;  %v5390_v37 = vmax.f32 %v5240_v46, 0.0 }
 0x2de   : > { %v5054_v48 = vpop.f32.mrf.mxu1  ;;  %v5247_v31 = vpop.f32.mrf.mxu0 }
 0x2df   : > { %5645 = vst.msk [vmem:[%s9270_s21 + $0x10] sm:$0xff] %vm9272_vm2, %v6356_v5  ;;  %v5391_v39 = vmax.f32 %v5242_v21, 0.0  ;;  %v5246_v12 = vadd.f32 %v5245_v50, %v5053_v13  ;;  %v5055_v43 = vadd.f32 %v5054_v48, %v9082_v63 }
 0x2e0   : > { %v5056_v14 = vpop.f32.mrf.mxu1  ;;  %v5249_v1 = vpop.f32.mrf.mxu0 }
 0x2e1   : > { %v6357_v19 = vpack.c.bf16 %v5391_v39, %v5390_v37  ;;  %v5248_v6 = vadd.f32 %v5247_v31, %v5055_v43  ;;  %v5057_v8 = vadd.f32 %v5056_v14, %v9087_v25  ;;  %v5392_v38 = vmax.f32 %v5246_v12, 0.0 }
 0x2e2   : > { %v5058_v27 = vpop.f32.mrf.mxu1  ;;  %v5251_v20 = vpop.f32.mrf.mxu0 }
 0x2e3   : > { %5646 = vst.msk [vmem:[%s9270_s21 + $0x18] sm:$0xff] %vm9272_vm2, %v6357_v19  ;;  %v5393_v24 = vmax.f32 %v5248_v6, 0.0  ;;  %v5250_v61 = vadd.f32 %v5249_v1, %v5057_v8  ;;  %v5059_v45 = vadd.f32 %v5058_v27, %v9090_v7 }
 0x2e4   : > { %v5062_v59 = vpop.f32.mrf.mxu1  ;;  %v5255_v46 = vpop.f32.mrf.mxu0 }
 0x2e5   : > { %v6358_v63 = vpack.c.bf16 %v5393_v24, %v5392_v38  ;;  %v5252_v9 = vadd.f32 %v5251_v20, %v5059_v45  ;;  %v5063_v41 = vadd.f32 %v5062_v59, %v9093_v33  ;;  %v5394_v25 = vmax.f32 %v5250_v61, 0.0 }
 0x2e6   : > { %v5064_v50 = vpop.f32.mrf.mxu1  ;;  %v5257_v5 = vpop.f32.mrf.mxu0 }
 0x2e7   : > { %5647 = vst.msk [vmem:[%s9270_s21 + $0x20] sm:$0xff] %vm9272_vm2, %v6358_v63  ;;  %v5395_v21 = vmax.f32 %v5252_v9, 0.0  ;;  %v5256_v13 = vadd.f32 %v5255_v46, %v5063_v41  ;;  %v5065_v48 = vadd.f32 %v5064_v50, %v9098_v4 }
 0x2e8   : > { %v5066_v31 = vpop.f32.mrf.mxu1  ;;  %v5259_v37 = vpop.f32.mrf.mxu0 }
 0x2e9   : > { %v6359_v7 = vpack.c.bf16 %v5395_v21, %v5394_v25  ;;  %v5258_v39 = vadd.f32 %v5257_v5, %v5065_v48  ;;  %v5067_v12 = vadd.f32 %v5066_v31, %v9103_v47  ;;  %v5396_v33 = vmax.f32 %v5256_v13, 0.0 }
 0x2ea   : > { %v5068_v43 = vpop.f32.mrf.mxu1  ;;  %v5261_v14 = vpop.f32.mrf.mxu0 }
 0x2eb   : > { %5648 = vst.msk [vmem:[%s9270_s21 + $0x28] sm:$0xff] %vm9272_vm2, %v6359_v7  ;;  %v5397_v1 = vmax.f32 %v5258_v39, 0.0  ;;  %v5260_v19 = vadd.f32 %v5259_v37, %v5067_v12  ;;  %v5069_v6 = vadd.f32 %v5068_v43, %v9106_v28 }
 0x2ec   : > { %v5072_v8 = vpop.f32.mrf.mxu1  ;;  %v5265_v27 = vpop.f32.mrf.mxu0 }
 0x2ed   : > { %v6360_v4 = vpack.c.bf16 %v5397_v1, %v5396_v33  ;;  %v5262_v20 = vadd.f32 %v5261_v14, %v5069_v6  ;;  %v5073_v38 = vadd.f32 %v5072_v8, %v9109_v52  ;;  %v5398_v47 = vmax.f32 %v5260_v19, 0.0 }
 0x2ee   : > { %v5074_v24 = vpop.f32.mrf.mxu1  ;;  %v5267_v61 = vpop.f32.mrf.mxu0 }
 0x2ef   : > { %5649 = vst.msk [vmem:[%s9270_s21 + $0x30] sm:$0xff] %vm9272_vm2, %v6360_v4  ;;  %v5399_v45 = vmax.f32 %v5262_v20, 0.0  ;;  %v5266_v59 = vadd.f32 %v5265_v27, %v5073_v38  ;;  %v5075_v46 = vadd.f32 %v5074_v24, %v9114_v2 }
 0x2f0   : > { %v5076_v63 = vpop.f32.mrf.mxu1  ;;  %v5269_v9 = vpop.f32.mrf.mxu0 }
 0x2f1   : > { %v6361_v28 = vpack.c.bf16 %v5399_v45, %v5398_v47  ;;  %v5268_v41 = vadd.f32 %v5267_v61, %v5075_v46  ;;  %v5077_v50 = vadd.f32 %v5076_v63, %v9119_v40  ;;  %v5400_v52 = vmax.f32 %v5266_v59, 0.0 }
 0x2f2   : > { %v5078_v5 = vpop.f32.mrf.mxu1  ;;  %v5271_v25 = vpop.f32.mrf.mxu0 }
 0x2f3   : > { %5650 = vst.msk [vmem:[%s9270_s21 + $0x38] sm:$0xff] %vm9272_vm2, %v6361_v28  ;;  %v5401_v21 = vmax.f32 %v5268_v41, 0.0  ;;  %v5270_v13 = vadd.f32 %v5269_v9, %v5077_v50  ;;  %v5079_v48 = vadd.f32 %v5078_v5, %v9122_v30 }
 0x2f4   : > { %v5082_v31 = vpop.f32.mrf.mxu1  ;;  %v5275_v37 = vpop.f32.mrf.mxu0 }
 0x2f5   : > { %v6362_v2 = vpack.c.bf16 %v5401_v21, %v5400_v52  ;;  %v5272_v7 = vadd.f32 %v5271_v25, %v5079_v48  ;;  %v5083_v39 = vadd.f32 %v5082_v31, %v9125_v22  ;;  %v5402_v40 = vmax.f32 %v5270_v13, 0.0 }
 0x2f6   : > { %v5084_v12 = vpop.f32.mrf.mxu1  ;;  %v5277_v43 = vpop.f32.mrf.mxu0 }
 0x2f7   : > { %5651 = vst.msk [vmem:[%s9270_s21 + $0x40] sm:$0xff] %vm9272_vm2, %v6362_v2  ;;  %v5403_v14 = vmax.f32 %v5272_v7, 0.0  ;;  %v5276_v33 = vadd.f32 %v5275_v37, %v5083_v39  ;;  %v5085_v1 = vadd.f32 %v5084_v12, %v9130_v56 }
 0x2f8   : > { %v5086_v19 = vpop.f32.mrf.mxu1  ;;  %v5279_v6 = vpop.f32.mrf.mxu0 }
 0x2f9   : > { %v6363_v30 = vpack.c.bf16 %v5403_v14, %v5402_v40  ;;  %v5278_v8 = vadd.f32 %v5277_v43, %v5085_v1  ;;  %v5087_v27 = vadd.f32 %v5086_v19, %v9135_v57  ;;  %v5404_v22 = vmax.f32 %v5276_v33, 0.0 }
 0x2fa   : > { %v5088_v4 = vpop.f32.mrf.mxu1  ;;  %v5281_v20 = vpop.f32.mrf.mxu0 }
 0x2fb   : > { %5652 = vst.msk [vmem:[%s9270_s21 + $0x48] sm:$0xff] %vm9272_vm2, %v6363_v30  ;;  %v5405_v38 = vmax.f32 %v5278_v8, 0.0  ;;  %v5280_v24 = vadd.f32 %v5279_v6, %v5087_v27  ;;  %v5089_v61 = vadd.f32 %v5088_v4, %v9138_v36 }
 0x2fc   : > { %v5092_v47 = vpop.f32.mrf.mxu1  ;;  %v5285_v45 = vpop.f32.mrf.mxu0 }
 0x2fd   : > { %v6364_v56 = vpack.c.bf16 %v5405_v38, %v5404_v22  ;;  %v5282_v59 = vadd.f32 %v5281_v20, %v5089_v61  ;;  %v5093_v46 = vadd.f32 %v5092_v47, %v9141_v53  ;;  %v5406_v57 = vmax.f32 %v5280_v24, 0.0 }
 0x2fe   : > { %v5094_v63 = vpop.f32.mrf.mxu1  ;;  %v5287_v9 = vpop.f32.mrf.mxu0 }
 0x2ff   : > { %5653 = vst.msk [vmem:[%s9270_s21 + $0x50] sm:$0xff] %vm9272_vm2, %v6364_v56  ;;  %v5407_v28 = vmax.f32 %v5282_v59, 0.0  ;;  %v5286_v41 = vadd.f32 %v5285_v45, %v5093_v46  ;;  %v5095_v50 = vadd.f32 %v5094_v63, %v9146_v32 }
 0x300   : > { %v5096_v5 = vpop.f32.mrf.mxu1  ;;  %v5289_v25 = vpop.f32.mrf.mxu0 }
 0x301   : > { %v6365_v36 = vpack.c.bf16 %v5407_v28, %v5406_v57  ;;  %v5288_v52 = vadd.f32 %v5287_v9, %v5095_v50  ;;  %v5097_v21 = vadd.f32 %v5096_v5, %v9149_v16  ;;  %v5408_v53 = vmax.f32 %v5286_v41, 0.0 }
 0x302   : > { %v5098_v13 = vpop.f32.mrf.mxu1  ;;  %v5291_v48 = vpop.f32.mrf.mxu0 }
 0x303   : > { %5654 = vst.msk [vmem:[%s9270_s21 + $0x58] sm:$0xff] %vm9272_vm2, %v6365_v36  ;;  %v5409_v31 = vmax.f32 %v5288_v52, 0.0  ;;  %v5290_v37 = vadd.f32 %v5289_v25, %v5097_v21  ;;  %v5099_v2 = vadd.f32 %v5098_v13, %v9152_v44 }
 0x304   : > { %v5102_v7 = vpop.f32.mrf.mxu1  ;;  %v5295_v39 = vpop.f32.mrf.mxu0 }
 0x305   : > { %v6366_v32 = vpack.c.bf16 %v5409_v31, %v5408_v53  ;;  %v5292_v12 = vadd.f32 %v5291_v48, %v5099_v2  ;;  %v5103_v43 = vadd.f32 %v5102_v7, %v9155_v34  ;;  %v5410_v16 = vmax.f32 %v5290_v37, 0.0 }
 0x306   : > { %v5104_v40 = vpop.f32.mrf.mxu1  ;;  %v5297_v14 = vpop.f32.mrf.mxu0 }
 0x307   : > { %5655 = vst.msk [vmem:[%s9270_s21 + $0x60] sm:$0xff] %vm9272_vm2, %v6366_v32  ;;  %v5411_v33 = vmax.f32 %v5292_v12, 0.0  ;;  %v5296_v1 = vadd.f32 %v5295_v39, %v5103_v43  ;;  %v5105_v19 = vadd.f32 %v5104_v40, %v9158_v58  ;;  %v9568_v12 = vld [vmem:[#allocation13_spill] sm:$0xff] }
 0x308   : > { %v5106_v6 = vpop.f32.mrf.mxu1  ;;  %v5299_v30 = vpop.f32.mrf.mxu0 }
 0x309   : > { %v6367_v44 = vpack.c.bf16 %v5411_v33, %v5410_v16  ;;  %v5298_v8 = vadd.f32 %v5297_v14, %v5105_v19  ;;  %v5107_v27 = vadd.f32 %v5106_v6, %v9161_v10  ;;  %v5412_v34 = vmax.f32 %v5296_v1, 0.0  ;;  %v9569_v33 = vld [vmem:[#allocation14_spill] sm:$0xff] }
 0x30a   : > { %v5108_v4 = vpop.f32.mrf.mxu1  ;;  %v5301_v20 = vpop.f32.mrf.mxu0 }
 0x30b   : > { %5656 = vst.msk [vmem:[%s9270_s21 + $0x68] sm:$0xff] %vm9272_vm2, %v6367_v44  ;;  %v5413_v22 = vmax.f32 %v5298_v8, 0.0  ;;  %v5300_v38 = vadd.f32 %v5299_v30, %v5107_v27  ;;  %v5109_v24 = vadd.f32 %v5108_v4, %v9164_v23  ;;  %v9570_v8 = vld [vmem:[#allocation15_spill] sm:$0xff] }
 0x30c   : > { %v5112_v61 = vpop.f32.mrf.mxu1  ;;  %v5305_v47 = vpop.f32.mrf.mxu0 }
 0x30d   : > { %v6368_v58 = vpack.c.bf16 %v5413_v22, %v5412_v34  ;;  %v5302_v45 = vadd.f32 %v5301_v20, %v5109_v24  ;;  %v5113_v56 = vadd.f32 %v5112_v61, %v9167_v0  ;;  %v5414_v10 = vmax.f32 %v5300_v38, 0.0  ;;  %v9571_v38 = vld [vmem:[#allocation16_spill] sm:$0xff] }
 0x30e   : > { %v5114_v59 = vpop.f32.mrf.mxu1  ;;  %v5307_v46 = vpop.f32.mrf.mxu0 }
 0x30f   : > { %5657 = vst.msk [vmem:[%s9270_s21 + $0x70] sm:$0xff] %vm9272_vm2, %v6368_v58  ;;  %v5415_v63 = vmax.f32 %v5302_v45, 0.0  ;;  %v5306_v9 = vadd.f32 %v5305_v47, %v5113_v56  ;;  %v5115_v57 = vadd.f32 %v5114_v59, %v9170_v62  ;;  %v9572_v59 = vld [vmem:[#allocation17_spill] sm:$0xff] }
 0x310   : > { %v5116_v28 = vpop.f32.mrf.mxu1  ;;  %v5309_v41 = vpop.f32.mrf.mxu0 }
 0x311   : > { %v6369_v23 = vpack.c.bf16 %v5415_v63, %v5414_v10  ;;  %v5308_v50 = vadd.f32 %v5307_v46, %v5115_v57  ;;  %v5117_v5 = vadd.f32 %v5116_v28, %v9173_v17  ;;  %v5416_v0 = vmax.f32 %v5306_v9, 0.0  ;;  %v9573_v28 = vld [vmem:[#allocation18_spill] sm:$0xff] }
 0x312   : > { %v5118_v25 = vpop.f32.mrf.mxu1  ;;  %v5311_v36 = vpop.f32.mrf.mxu0 }
 0x313   : > { %5658 = vst.msk [vmem:[%s9270_s21 + $0x78] sm:$0xff] %vm9272_vm2, %v6369_v23  ;;  %v5417_v52 = vmax.f32 %v5308_v50, 0.0  ;;  %v5310_v21 = vadd.f32 %v5309_v41, %v5117_v5  ;;  %v5119_v13 = vadd.f32 %v5118_v25, %v9176_v51 }
 0x314   : > { %v5122_v48 = vpop.f32.mrf.mxu1  ;;  %v5315_v53 = vpop.f32.mrf.mxu0 }
 0x315   : > { %v6370_v62 = vpack.c.bf16 %v5417_v52, %v5416_v0  ;;  %v5312_v31 = vadd.f32 %v5311_v36, %v5119_v13  ;;  %v5123_v37 = vadd.f32 %v5122_v48, %v9179_v26  ;;  %v5418_v17 = vmax.f32 %v5310_v21, 0.0  ;;  %v9574_v0 = vld [vmem:[#allocation19_spill] sm:$0xff] }
 0x316   : > { %v5124_v2 = vpop.f32.mrf.mxu1  ;;  %v5317_v7 = vpop.f32.mrf.mxu0 }
 0x317   : > { %5659 = vst.msk [vmem:[%s9270_s21 + $0x80] sm:$0xff] %vm9272_vm2, %v6370_v62  ;;  %v5419_v39 = vmax.f32 %v5312_v31, 0.0  ;;  %v5316_v32 = vadd.f32 %v5315_v53, %v5123_v37  ;;  %v5125_v43 = vadd.f32 %v5124_v2, %v9568_v12  ;;  %v9575_v62 = vld [vmem:[#allocation20_spill] sm:$0xff] }
 0x318   : > { %v5126_v40 = vpop.f32.mrf.mxu1  ;;  %v5319_v14 = vpop.f32.mrf.mxu0 }
 0x319   : > { %v6371_v51 = vpack.c.bf16 %v5419_v39, %v5418_v17  ;;  %v5318_v16 = vadd.f32 %v5317_v7, %v5125_v43  ;;  %v5127_v1 = vadd.f32 %v5126_v40, %v9569_v33  ;;  %v5420_v26 = vmax.f32 %v5316_v32, 0.0  ;;  %v9576_v32 = vld [vmem:[#allocation21_spill] sm:$0xff] }
 0x31a   : > { %v5128_v19 = vpop.f32.mrf.mxu1  ;;  %v5321_v6 = vpop.f32.mrf.mxu0 }
 0x31b   : > { %5660 = vst.msk [vmem:[%s9270_s21 + $0x88] sm:$0xff] %vm9272_vm2, %v6371_v51  ;;  %v5421_v30 = vmax.f32 %v5318_v16, 0.0  ;;  %v5320_v44 = vadd.f32 %v5319_v14, %v5127_v1  ;;  %v5129_v27 = vadd.f32 %v5128_v19, %v9570_v8  ;;  %v9577_v16 = vld [vmem:[#allocation22_spill] sm:$0xff] }
 0x31c   : > { %v5132_v4 = vpop.f32.mrf.mxu1  ;;  %v5325_v20 = vpop.f32.mrf.mxu0 }
 0x31d   : > { %v6372_v34 = vpack.c.bf16 %v5421_v30, %v5420_v26  ;;  %v5322_v22 = vadd.f32 %v5321_v6, %v5129_v27  ;;  %v5133_v24 = vadd.f32 %v5132_v4, %v9571_v38  ;;  %v5422_v58 = vmax.f32 %v5320_v44, 0.0  ;;  %v9578_v44 = vld [vmem:[#allocation23_spill] sm:$0xff] }
 0x31e   : > { %v5134_v61 = vpop.f32.mrf.mxu1  ;;  %v5327_v47 = vpop.f32.mrf.mxu0 }
 0x31f   : > { %5661 = vst.msk [vmem:[%s9270_s21 + $0x90] sm:$0xff] %vm9272_vm2, %v6372_v34  ;;  %v5423_v45 = vmax.f32 %v5322_v22, 0.0  ;;  %v5326_v56 = vadd.f32 %v5325_v20, %v5133_v24  ;;  %v5135_v46 = vadd.f32 %v5134_v61, %v9572_v59  ;;  %v9579_v22 = vld [vmem:[#allocation2_spill] sm:$0xff] }
 0x320   : > { %v5136_v10 = vpop.f32.mrf.mxu1  ;;  %v5329_v63 = vpop.f32.mrf.mxu0 }
 0x321   : > { %v6373_v9 = vpack.c.bf16 %v5423_v45, %v5422_v58  ;;  %v5328_v57 = vadd.f32 %v5327_v47, %v5135_v46  ;;  %v5137_v41 = vadd.f32 %v5136_v10, %v9573_v28  ;;  %v5424_v5 = vmax.f32 %v5326_v56, 0.0  ;;  %v9580_v56 = vld [vmem:[#allocation3_spill] sm:$0xff] }
 0x322   : > { %v5138_v23 = vpop.f32.mrf.mxu1  ;;  %v5331_v50 = vpop.f32.mrf.mxu0 }
 0x323   : > { %5662 = vst.msk [vmem:[%s9270_s21 + $0x98] sm:$0xff] %vm9272_vm2, %v6373_v9  ;;  %v5425_v25 = vmax.f32 %v5328_v57, 0.0  ;;  %v5330_v36 = vadd.f32 %v5329_v63, %v5137_v41  ;;  %v5139_v52 = vadd.f32 %v5138_v23, %v9574_v0  ;;  %v9581_v57 = vld [vmem:[#allocation4_spill] sm:$0xff] }
 0x324   : > { %v5142_v21 = vpop.f32.mrf.mxu1  ;;  %v5335_v13 = vpop.f32.mrf.mxu0 }
 0x325   : > { %v6374_v48 = vpack.c.bf16 %v5425_v25, %v5424_v5  ;;  %v5332_v53 = vadd.f32 %v5331_v50, %v5139_v52  ;;  %v5143_v31 = vadd.f32 %v5142_v21, %v9575_v62  ;;  %v5426_v7 = vmax.f32 %v5330_v36, 0.0  ;;  %v9582_v36 = vld [vmem:[#allocation5_spill] sm:$0xff] }
 0x326   : > { %v5144_v37 = vpop.f32.mrf.mxu1  ;;  %v5337_v2 = vpop.f32.mrf.mxu0 }
 0x327   : > { %5663 = vst.msk [vmem:[%s9270_s21 + $0xa0] sm:$0xff] %vm9272_vm2, %v6374_v48  ;;  %v5427_v17 = vmax.f32 %v5332_v53, 0.0  ;;  %v5336_v39 = vadd.f32 %v5335_v13, %v5143_v31  ;;  %v5145_v12 = vadd.f32 %v5144_v37, %v9576_v32 }
 0x328   : > { %v5146_v43 = vpop.f32.mrf.mxu1  ;;  %v5339_v40 = vpop.f32.mrf.mxu0 }
 0x329   : > { %v6375_v14 = vpack.c.bf16 %v5427_v17, %v5426_v7  ;;  %v5338_v51 = vadd.f32 %v5337_v2, %v5145_v12  ;;  %v5147_v33 = vadd.f32 %v5146_v43, %v9577_v16  ;;  %v5428_v6 = vmax.f32 %v5336_v39, 0.0 }
 0x32a   : > { %v5148_v1 = vpop.f32.mrf.mxu1  ;;  %v5341_v19 = vpop.f32.mrf.mxu0 }
 0x32b   : > { %5664 = vst.msk [vmem:[%s9270_s21 + $0xa8] sm:$0xff] %vm9272_vm2, %v6375_v14  ;;  %v5429_v26 = vmax.f32 %v5338_v51, 0.0  ;;  %v5340_v30 = vadd.f32 %v5339_v40, %v5147_v33  ;;  %v5149_v8 = vadd.f32 %v5148_v1, %v9578_v44  ;;  %v9583_v1 = vld [vmem:[#allocation6_spill] sm:$0xff] }
 0x32c   : > { %v5152_v27 = vpop.f32.mrf.mxu1  ;;  %v5345_v4 = vpop.f32.mrf.mxu0 }
 0x32d   : > { %v6376_v20 = vpack.c.bf16 %v5429_v26, %v5428_v6  ;;  %v5342_v34 = vadd.f32 %v5341_v19, %v5149_v8  ;;  %v5153_v38 = vadd.f32 %v5152_v27, %v9579_v22  ;;  %v5430_v47 = vmax.f32 %v5340_v30, 0.0 }
 0x32e   : > { %v5154_v24 = vpop.f32.mrf.mxu1  ;;  %v5347_v61 = vpop.f32.mrf.mxu0 }
 0x32f   : > { %5665 = vst.msk [vmem:[%s9270_s21 + $0xb0] sm:$0xff] %vm9272_vm2, %v6376_v20  ;;  %v5431_v58 = vmax.f32 %v5342_v34, 0.0  ;;  %v5346_v45 = vadd.f32 %v5345_v4, %v5153_v38  ;;  %v5155_v59 = vadd.f32 %v5154_v24, %v9580_v56 }
 0x330   : > { %v5156_v46 = vpop.f32.mrf.mxu1  ;;  %v5349_v10 = vpop.f32.mrf.mxu0 }
 0x331   : > { %v6377_v63 = vpack.c.bf16 %v5431_v58, %v5430_v47  ;;  %v5348_v9 = vadd.f32 %v5347_v61, %v5155_v59  ;;  %v5157_v28 = vadd.f32 %v5156_v46, %v9581_v57  ;;  %v5432_v50 = vmax.f32 %v5346_v45, 0.0 }
 0x332   : > { %v5158_v41 = vpop.f32.mrf.mxu1  ;;  %v5351_v23 = vpop.f32.mrf.mxu0 }
 0x333   : > { %5666 = vst.msk [vmem:[%s9270_s21 + $0xb8] sm:$0xff] %vm9272_vm2, %v6377_v63  ;;  %v5433_v5 = vmax.f32 %v5348_v9, 0.0  ;;  %v5350_v25 = vadd.f32 %v5349_v10, %v5157_v28  ;;  %v5159_v0 = vadd.f32 %v5158_v41, %v9582_v36 }
 0x334   : > { %v5162_v52 = vpop.f32.mrf.mxu1  ;;  %v5355_v21 = vpop.f32.mrf.mxu0 }
 0x335   : > { %v6378_v13 = vpack.c.bf16 %v5433_v5, %v5432_v50  ;;  %v5352_v48 = vadd.f32 %v5351_v23, %v5159_v0  ;;  %v5163_v53 = vadd.f32 %v5162_v52, %v9227_v3  ;;  %v5434_v37 = vmax.f32 %v5350_v25, 0.0  ;;  %v9584_v5 = vld [vmem:[#allocation7_spill] sm:$0xff] }
 0x336   : > { %v5164_v62 = vpop.f32.mrf.mxu1  ;;  %v5357_v31 = vpop.f32.mrf.mxu0 }
 0x337   : > { %5667 = vst.msk [vmem:[%s9270_s21 + $0xc0] sm:$0xff] %vm9272_vm2, %v6378_v13  ;;  %v5435_v2 = vmax.f32 %v5352_v48, 0.0  ;;  %v5356_v7 = vadd.f32 %v5355_v21, %v5163_v53  ;;  %v5165_v17 = vadd.f32 %v5164_v62, %v9230_v11 }
 0x338   : > { %v5166_v39 = vpop.f32.mrf.mxu1  ;;  %v5359_v32 = vpop.f32.mrf.mxu0 }
 0x339   : > { %v6379_v12 = vpack.c.bf16 %v5435_v2, %v5434_v37  ;;  %v5358_v43 = vadd.f32 %v5357_v31, %v5165_v17  ;;  %v5167_v40 = vadd.f32 %v5166_v39, %v9233_v49  ;;  %v5436_v3 = vmax.f32 %v5356_v7, 0.0 }
 0x33a   : > { %v5168_v14 = vpop.f32.mrf.mxu1  ;;  %v5361_v51 = vpop.f32.mrf.mxu0 }
 0x33b   : > { %5668 = vst.msk [vmem:[%s9270_s21 + $0xc8] sm:$0xff] %vm9272_vm2, %v6379_v12  ;;  %v5437_v16 = vmax.f32 %v5358_v43, 0.0  ;;  %v5360_v33 = vadd.f32 %v5359_v32, %v5167_v40  ;;  %v5169_v19 = vadd.f32 %v5168_v14, %v9583_v1 }
 0x33c   : > { %v5172_v6 = vpop.f32.mrf.mxu1  ;;  %v5365_v26 = vpop.f32.mrf.mxu0 }
 0x33d   : > { %v6380_v11 = vpack.c.bf16 %v5437_v16, %v5436_v3  ;;  %v5362_v30 = vadd.f32 %v5361_v51, %v5169_v19  ;;  %v5173_v44 = vadd.f32 %v5172_v6, %v9239_v60  ;;  %v5438_v49 = vmax.f32 %v5360_v33, 0.0 }
 0x33e   : > { %v5174_v8 = vpop.f32.mrf.mxu1  ;;  %v5367_v27 = vpop.f32.mrf.mxu0 }
 0x33f   : > { %5669 = vst.msk [vmem:[%s9270_s21 + $0xd0] sm:$0xff] %vm9272_vm2, %v6380_v11  ;;  %v5439_v4 = vmax.f32 %v5362_v30, 0.0  ;;  %v5366_v20 = vadd.f32 %v5365_v26, %v5173_v44  ;;  %v5175_v34 = vadd.f32 %v5174_v8, %v9242_v29 }
 0x340   : > { %v5176_v22 = vpop.f32.mrf.mxu1  ;;  %v5369_v38 = vpop.f32.mrf.mxu0 }
 0x341   : > { %v6381_v24 = vpack.c.bf16 %v5439_v4, %v5438_v49  ;;  %v5368_v61 = vadd.f32 %v5367_v27, %v5175_v34  ;;  %v5177_v47 = vadd.f32 %v5176_v22, %v9245_v18  ;;  %v5440_v60 = vmax.f32 %v5366_v20, 0.0 }
 0x342   : > { %v5178_v58 = vpop.f32.mrf.mxu1  ;;  %v5371_v45 = vpop.f32.mrf.mxu0 }
 0x343   : > { %5670 = vst.msk [vmem:[%s9270_s21 + $0xd8] sm:$0xff] %vm9272_vm2, %v6381_v24  ;;  %v5441_v56 = vmax.f32 %v5368_v61, 0.0  ;;  %v5370_v59 = vadd.f32 %v5369_v38, %v5177_v47  ;;  %v5179_v46 = vadd.f32 %v5178_v58, %v9248_v35 }
 0x344   : > { %v5182_v10 = vpop.f32.mrf.mxu1  ;;  %v5375_v63 = vpop.f32.mrf.mxu0 }
 0x345   : > { %v6382_v29 = vpack.c.bf16 %v5441_v56, %v5440_v60  ;;  %v5372_v9 = vadd.f32 %v5371_v45, %v5179_v46  ;;  %v5183_v57 = vadd.f32 %v5182_v10, %v9251_v15  ;;  %v5442_v18 = vmax.f32 %v5370_v59, 0.0 }
 0x346   : > { %v5184_v28 = vpop.f32.mrf.mxu1  ;;  %v5377_v41 = vpop.f32.mrf.mxu0 }
 0x347   : > { %5671 = vst.msk [vmem:[%s9270_s21 + $0xe0] sm:$0xff] %vm9272_vm2, %v6382_v29  ;;  %v5443_v23 = vmax.f32 %v5372_v9, 0.0  ;;  %v5376_v50 = vadd.f32 %v5375_v63, %v5183_v57  ;;  %v5185_v25 = vadd.f32 %v5184_v28, %v9584_v5 }
 0x348   : > { %v5186_v36 = vpop.f32.mrf.mxu1  ;;  %v5379_v35 = vpop.f32.mrf.mxu0 }
 0x349   : > { %v6383_v0 = vpack.c.bf16 %v5443_v23, %v5442_v18  ;;  %v5378_v52 = vadd.f32 %v5377_v41, %v5185_v25  ;;  %v5187_v21 = vadd.f32 %v5186_v36, %v9257_v55  ;;  %v5444_v15 = vmax.f32 %v5376_v50, 0.0 }
 0x34a   : > { %v5188_v13 = vpop.f32.mrf.mxu1  ;;  %v5381_v31 = vpop.f32.mrf.mxu0 }
 0x34b   : > { %5672 = vst.msk [vmem:[%s9270_s21 + $0xe8] sm:$0xff] %vm9272_vm2, %v6383_v0  ;;  %v5445_v48 = vmax.f32 %v5378_v52, 0.0  ;;  %v5380_v53 = vadd.f32 %v5379_v35, %v5187_v21  ;;  %v5189_v62 = vadd.f32 %v5188_v13, %v9260_v42 }
 0x34d   : > { %v6384_v37 = vpack.c.bf16 %v5445_v48, %v5444_v15  ;;  %v5382_v2 = vadd.f32 %v5381_v31, %v5189_v62  ;;  %v5446_v7 = vmax.f32 %v5380_v53, 0.0 }
 0x34f   : > { %5673 = vst.msk [vmem:[%s9270_s21 + $0xf0] sm:$0xff] %vm9272_vm2, %v6384_v37  ;;  %v5447_v17 = vmax.f32 %v5382_v2, 0.0 }
 0x351   : > { %v6385_v39 = vpack.c.bf16 %v5447_v17, %v5446_v7 }
 0x353   : > { %5674 = vst.msk [vmem:[%s9270_s21 + $0xf8] sm:$0xff] %vm9272_vm2, %v6385_v39 }
 0x354 PF: > { %s13_s12 = sadd.s32 1, %s7297_s12  }
 0x355   : > { %p10_p4 = scmp.ge.s32.totalorder %s13_s12, 4  }
 0x357   :  { %12 = sbr.rel (!%p10_p4) target bundleno = 1 (0x1), region = 62 }

// kernel: _lambda_.9
= control target key start
LH: loop header
LB: loop body
LE: loop exit
PB: predicated region body
PF: predicated region fallthrough
CT: control target
= control target key end

     0   :  { %s6684_s12 = smov 0   ;;  %s7887_s0 = inlined_call_operand.vmem [shape: bf16[512,2304], index: 0, kind: input, shape index: {}]   ;;  %s7888_s1 = inlined_call_operand.vmem [shape: bf16[2304,128], index: 1, kind: input, shape index: {}]   ;;  %s7889_s2 = inlined_call_operand.vmem [shape: f32[1,128], index: 2, kind: input, shape index: {}]   ;;  %s7890_s3 = inlined_call_operand.vmem [shape: f32[512,128], index: 3, kind: output, shape index: {}]  }
   0x1 LB: > { %s4602_s13 = sadd.s32 4294967295, %s6662_s12   ;;  %p4606_p0 = scmp.ge.s32.totalorder %s6662_s12, 1  ;;  %s6662_s12 = sphi %s6684_s12, %s13_s12  }
   0x2   : > { %p139_p1 = scmp.lt.s32.totalorder %s6662_s12, 3 }
   0x4   : > { %p140_p2 = pnand %p4606_p0, %p139_p1 }
   0x5   : > { %s4607_s16 = sshll.u32 (!%p140_p2), %s4602_s13, 5 }
   0x6   : > { %143 = sbr.rel (%p140_p2) target bundleno = 818 (0x332), region = 32  ;;  %p165_p3 = scmp.lt.s32.totalorder (!%p140_p2), %s4607_s16, 63 }
   0xb   : > { %v6079_v0 = vld [vmem:[%s7888_s1 + $0x78] sm:$0xff]   ;;  %v6081_v2 = vld [vmem:[%s7888_s1 + $0x70] sm:$0xff]   ;;  %v6083_v4 = vld [vmem:[%s7888_s1 + $0x68] sm:$0xff]   ;;  %s7892_s16 = smov (!%p165_p3, %s4607_s16), 63 }
   0xc   : > { %v6080_v1 = vld [vmem:[%s7888_s1 + $0x38] sm:$0xff]   ;;  %5046 = vmatprep.subr.bf16.mxu0 %v6079_v0  ;;  %6054 = vmatprep.subr.bf16.mxu1 %v6079_v0  ;;  %v6082_v3 = vld [vmem:[%s7888_s1 + $0x30] sm:$0xff]   ;;  %v6084_v5 = vld [vmem:[%s7888_s1 + $0x28] sm:$0xff]   ;;  %s6070_s29 = smul.u32 72, %s7892_s16 }
   0xd   : > { %5047 = vmatpush3.bf16.msra.mxu0 %v6080_v1  ;;  %6062 = vmatpush3.bf16.msra.mxu1 %v6080_v1  ;;  %v6085_v6 = vld [vmem:[%s7888_s1 + $0x60] sm:$0xff]   ;;  %v6087_v8 = vld [vmem:[%s7888_s1 + $0x58] sm:$0xff]   ;;  %v6089_v10 = vld [vmem:[%s7888_s1 + $0x50] sm:$0xff]  }
   0xe   : > { %5048 = vmatprep.subr.bf16.mxu0 %v6081_v2  ;;  %6055 = vmatprep.subr.bf16.mxu1 %v6081_v2  ;;  %v6086_v7 = vld [vmem:[%s7888_s1 + $0x20] sm:$0xff]   ;;  %s6725_s9 = scalar_lea.vmem %s7887_s0, %s6070_s29  ;;  %v6088_v9 = vld [vmem:[%s7888_s1 + $0x18] sm:$0xff]   ;;  %v6090_v13 = vld [vmem:[%s7888_s1 + $0x10] sm:$0xff]  }
   0xf   : > { %v6097_v11 = vld [vmem:[%s6725_s9 + $0x4] ss:$72 sps:$4 sm:$0xff]   ;;  %v6101_v18 = vld [vmem:[%s7888_s1 + $0xf8] sm:$0xff]   ;;  %v6095_v19 = vld [vmem:[%s6725_s9] ss:$72 sps:$4 sm:$0xff]  }
  0x10   : > { %v6100_v12 = vld [vmem:[%s6725_s9 + $0x484] ss:$72 sps:$4 sm:$0xff]   ;;  %3097 = vmatprep.mubr.bf16.mxu0 %v6097_v11  ;;  %v6103_v20 = vld [vmem:[%s7888_s1 + $0x178] sm:$0xff]   ;;  %v6098_v21 = vld [vmem:[%s6725_s9 + $0x480] ss:$72 sps:$4 sm:$0xff]  }
  0x11   : > { %5049 = vmatpush3.bf16.msra.mxu0 %v6082_v3  ;;  %6063 = vmatpush3.bf16.msra.mxu1 %v6082_v3  ;;  %v6091_v14 = vld [vmem:[%s7888_s1 + $0x48] sm:$0xff]   ;;  %v6093_v16 = vld [vmem:[%s7888_s1 + $0x40] sm:$0xff]   ;;  %v6102_v22 = vld [vmem:[%s7888_s1 + $0xb8] sm:$0xff]  }
  0x12   : > { %5050 = vmatprep.subr.bf16.mxu0 %v6083_v4  ;;  %6056 = vmatprep.subr.bf16.mxu1 %v6083_v4  ;;  %v6092_v15 = vld [vmem:[%s7888_s1 + $0x8] sm:$0xff]   ;;  %v6094_v17 = vld [vmem:[%s7888_s1] sm:$0xff]   ;;  %v6104_v23 = vld [vmem:[%s7888_s1 + $0x138] sm:$0xff]  }
  0x13   : > { %3161 = vmatprep.mubr.bf16.mxu1 %v6100_v12  ;;  %v6105_v24 = vld [vmem:[%s6725_s9 + $0x94] ss:$72 sps:$4 sm:$0xff]   ;;  %v6121_v30 = vld [vmem:[%s7888_s1 + $0xe8] sm:$0xff]   ;;  %v6109_v31 = vld [vmem:[%s6725_s9 + $0x90] ss:$72 sps:$4 sm:$0xff]  }
  0x14   : > { %v6107_v25 = vld [vmem:[%s6725_s9 + $0x514] ss:$72 sps:$4 sm:$0xff]   ;;  %v6110_v32 = vld [vmem:[%s6725_s9 + $0x510] ss:$72 sps:$4 sm:$0xff]   ;;  %v6123_v33 = vld [vmem:[%s7888_s1 + $0x168] sm:$0xff]  }
  0x15   : > { %5051 = vmatpush3.bf16.msra.mxu0 %v6084_v5  ;;  %6064 = vmatpush3.bf16.msra.mxu1 %v6084_v5  ;;  %v6111_v26 = vld [vmem:[%s7888_s1 + $0xf0] sm:$0xff]   ;;  %v6115_v34 = vld [vmem:[%s6725_s9 + $0x124] ss:$72 sps:$4 sm:$0xff]   ;;  %v6119_v40 = vld [vmem:[%s6725_s9 + $0x120] ss:$72 sps:$4 sm:$0xff]  }
  0x16   : > { %5052 = vmatprep.subr.bf16.mxu0 %v6085_v6  ;;  %6057 = vmatprep.subr.bf16.mxu1 %v6085_v6  ;;  %v6112_v27 = vld [vmem:[%s7888_s1 + $0xb0] sm:$0xff]   ;;  %v6117_v35 = vld [vmem:[%s6725_s9 + $0x5a4] ss:$72 sps:$4 sm:$0xff]   ;;  %v6120_v41 = vld [vmem:[%s6725_s9 + $0x5a0] ss:$72 sps:$4 sm:$0xff]  }
  0x17   : > { %v6113_v28 = vld [vmem:[%s7888_s1 + $0x170] sm:$0xff]   ;;  %v6122_v36 = vld [vmem:[%s7888_s1 + $0xa8] sm:$0xff]   ;;  %v6131_v38 = vld [vmem:[%s7888_s1 + $0xe0] sm:$0xff]  }
  0x18   : > { %v6114_v29 = vld [vmem:[%s7888_s1 + $0x130] sm:$0xff]   ;;  %v6124_v37 = vld [vmem:[%s7888_s1 + $0x128] sm:$0xff]   ;;  %v6133_v39 = vld [vmem:[%s7888_s1 + $0x160] sm:$0xff]  }
  0x19   : > { %5053 = vmatpush3.bf16.msra.mxu0 %v6086_v7  ;;  %6065 = vmatpush3.bf16.msra.mxu1 %v6086_v7  ;;  %v6132_v42 = vld [vmem:[%s7888_s1 + $0xa0] sm:$0xff]   ;;  %v6125_v44 = vld [vmem:[%s6725_s9 + $0x1b4] ss:$72 sps:$4 sm:$0xff]   ;;  %v6129_v50 = vld [vmem:[%s6725_s9 + $0x1b0] ss:$72 sps:$4 sm:$0xff]  }
  0x1a   : > { %5054 = vmatprep.subr.bf16.mxu0 %v6087_v8  ;;  %6058 = vmatprep.subr.bf16.mxu1 %v6087_v8  ;;  %v6134_v43 = vld [vmem:[%s7888_s1 + $0x120] sm:$0xff]   ;;  %v6127_v45 = vld [vmem:[%s6725_s9 + $0x634] ss:$72 sps:$4 sm:$0xff]   ;;  %v6130_v51 = vld [vmem:[%s6725_s9 + $0x630] ss:$72 sps:$4 sm:$0xff]  }
  0x1b   : > { %v6141_v46 = vld [vmem:[%s7888_s1 + $0xd8] sm:$0xff]   ;;  %v6151_v52 = vld [vmem:[%s7888_s1 + $0xd0] sm:$0xff]   ;;  %v6135_v53 = vld [vmem:[%s6725_s9 + $0x244] ss:$72 sps:$4 sm:$0xff]  }
  0x1c   : > { %v6142_v47 = vld [vmem:[%s7888_s1 + $0x98] sm:$0xff]   ;;  %v6137_v54 = vld [vmem:[%s6725_s9 + $0x6c4] ss:$72 sps:$4 sm:$0xff]   ;;  %v6152_v55 = vld [vmem:[%s7888_s1 + $0x90] sm:$0xff]  }
  0x1d   : > { %5055 = vmatpush3.bf16.msra.mxu0 %v6088_v9  ;;  %6066 = vmatpush3.bf16.msra.mxu1 %v6088_v9  ;;  %v6143_v48 = vld [vmem:[%s7888_s1 + $0x158] sm:$0xff]   ;;  %v6153_v56 = vld [vmem:[%s7888_s1 + $0x150] sm:$0xff]   ;;  %v6161_v58 = vld [vmem:[%s7888_s1 + $0xc8] sm:$0xff]  }
  0x1e   : > { %5056 = vmatprep.subr.bf16.mxu0 %v6089_v10  ;;  %6059 = vmatprep.subr.bf16.mxu1 %v6089_v10  ;;  %v6144_v49 = vld [vmem:[%s7888_s1 + $0x118] sm:$0xff]   ;;  %v6154_v57 = vld [vmem:[%s7888_s1 + $0x110] sm:$0xff]   ;;  %v6139_v59 = vld [vmem:[%s6725_s9 + $0x240] ss:$72 sps:$4 sm:$0xff]  }
  0x1f   : > { %v6140_v60 = vld [vmem:[%s6725_s9 + $0x6c0] ss:$72 sps:$4 sm:$0xff]   ;;  %v6145_v62 = vld [vmem:[%s6725_s9 + $0x2d4] ss:$72 sps:$4 sm:$0xff]   ;;  %v6149_v6 = vld [vmem:[%s6725_s9 + $0x2d0] ss:$72 sps:$4 sm:$0xff]  }
  0x20   : > { %v6162_v61 = vld [vmem:[%s7888_s1 + $0x88] sm:$0xff]   ;;  %v6147_v1 = vld [vmem:[%s6725_s9 + $0x754] ss:$72 sps:$4 sm:$0xff]   ;;  %v6171_v2 = vld [vmem:[%s7888_s1 + $0xc0] sm:$0xff]  }
  0x21   : > { %5057 = vmatpush3.bf16.msra.mxu0 %v6090_v13  ;;  %6067 = vmatpush3.bf16.msra.mxu1 %v6090_v13  ;;  %v6163_v63 = vld [vmem:[%s7888_s1 + $0x148] sm:$0xff]   ;;  %v6172_v3 = vld [vmem:[%s7888_s1 + $0x80] sm:$0xff]   ;;  %v6150_v7 = vld [vmem:[%s6725_s9 + $0x750] ss:$72 sps:$4 sm:$0xff]  }
  0x22   : > { %5058 = vmatprep.subr.bf16.mxu0 %v6091_v14  ;;  %6060 = vmatprep.subr.bf16.mxu1 %v6091_v14  ;;  %v6164_v0 = vld [vmem:[%s7888_s1 + $0x108] sm:$0xff]   ;;  %v6173_v4 = vld [vmem:[%s7888_s1 + $0x140] sm:$0xff]   ;;  %v6181_v10 = vld [vmem:[%s7888_s1 + $0x1f8] sm:$0xff]  }
  0x23   : > { %v6174_v5 = vld [vmem:[%s7888_s1 + $0x100] sm:$0xff]   ;;  %v6183_v11 = vld [vmem:[%s7888_s1 + $0x278] sm:$0xff]  }
  0x24   : > { %v6155_v8 = vld [vmem:[%s6725_s9 + $0x364] ss:$72 sps:$4 sm:$0xff]   ;;  %v6159_v12 = vld [vmem:[%s6725_s9 + $0x360] ss:$72 sps:$4 sm:$0xff]   ;;  %v6165_v14 = vld [vmem:[%s6725_s9 + $0x3f4] ss:$72 sps:$4 sm:$0xff]  }
  0x25   : > { %5059 = vmatpush3.bf16.msra.mxu0 %v6092_v15  ;;  %6068 = vmatpush3.bf16.msra.mxu1 %v6092_v15  ;;  %v6157_v9 = vld [vmem:[%s6725_s9 + $0x7e4] ss:$72 sps:$4 sm:$0xff]   ;;  %v6160_v13 = vld [vmem:[%s6725_s9 + $0x7e0] ss:$72 sps:$4 sm:$0xff]   ;;  %v6167_v15 = vld [vmem:[%s6725_s9 + $0x874] ss:$72 sps:$4 sm:$0xff]  }
  0x26   : > { %5060 = vmatprep.subr.bf16.mxu0 %v6093_v16  ;;  %6061 = vmatprep.subr.bf16.mxu1 %v6093_v16  ;;  %v6169_v16 = vld [vmem:[%s6725_s9 + $0x3f0] ss:$72 sps:$4 sm:$0xff]  }
  0x29   : > { %5061 = vmatpush3.bf16.msra.mxu0 %v6094_v17  ;;  %6069 = vmatpush3.bf16.msra.mxu1 %v6094_v17  ;;  %v6170_v17 = vld [vmem:[%s6725_s9 + $0x870] ss:$72 sps:$4 sm:$0xff]  }
  0x2a   : > { %5158 = vmatprep.subr.bf16.mxu1 %v6101_v18  ;;  %5270 = vmatprep.subr.bf16.mxu0 %v6103_v20  ;;  %v6177_v18 = vld [vmem:[%s6725_s9 + $0xc] ss:$72 sps:$4 sm:$0xff]   ;;  %v6175_v20 = vld [vmem:[%s6725_s9 + $0x8] ss:$72 sps:$4 sm:$0xff]  }
  0x2c   : > { %3098 = vmatmul.mubr.bf16.vlgmr.msra.gmra.mxu0 %v6095_v19  ;;  %3162 = vmatmul.mubr.bf16.vlgmr.msra.gmra.mxu1 %v6098_v21  ;;  %v6180_v19 = vld [vmem:[%s6725_s9 + $0x14] ss:$72 sps:$4 sm:$0xff]   ;;  %v6178_v21 = vld [vmem:[%s6725_s9 + $0x10] ss:$72 sps:$4 sm:$0xff]  }
  0x2d   : > { %5159 = vmatpush3.bf16.msra.mxu1 %v6102_v22  ;;  %5271 = vmatpush3.bf16.msra.mxu0 %v6104_v23  ;;  %v6182_v22 = vld [vmem:[%s7888_s1 + $0x1b8] sm:$0xff]  }
  0x2e   : > { %3105 = vmatprep.mubr.bf16.mxu0 %v6105_v24  ;;  %3169 = vmatprep.mubr.bf16.mxu1 %v6107_v25  ;;  %v6184_v23 = vld [vmem:[%s7888_s1 + $0x238] sm:$0xff]   ;;  %v6187_v25 = vld [vmem:[%s6725_s9 + $0xa4] ss:$72 sps:$4 sm:$0xff]  }
  0x2f   : > { %5160 = vmatprep.subr.bf16.mxu1 %v6111_v26  ;;  %5272 = vmatprep.subr.bf16.mxu0 %v6113_v28  ;;  %v6185_v24 = vld [vmem:[%s6725_s9 + $0x9c] ss:$72 sps:$4 sm:$0xff]   ;;  %v6197_v26 = vld [vmem:[%s7888_s1 + $0x1f0] sm:$0xff]  }
  0x30   : > { %v6198_v28 = vld [vmem:[%s7888_s1 + $0x1b0] sm:$0xff]  }
  0x31   : > { %5161 = vmatpush3.bf16.msra.mxu1 %v6112_v27  ;;  %5273 = vmatpush3.bf16.msra.mxu0 %v6114_v29  ;;  %v6199_v27 = vld [vmem:[%s7888_s1 + $0x270] sm:$0xff]  }
  0x32   : > { %5162 = vmatprep.subr.bf16.mxu1 %v6121_v30  ;;  %5274 = vmatprep.subr.bf16.mxu0 %v6123_v33  ;;  %v6200_v29 = vld [vmem:[%s7888_s1 + $0x230] sm:$0xff]   ;;  %v6213_v30 = vld [vmem:[%s7888_s1 + $0x1e8] sm:$0xff]  }
  0x33   : > { %v6215_v33 = vld [vmem:[%s7888_s1 + $0x268] sm:$0xff]  }
  0x34   : > { %3106 = vmatmul.mubr.bf16.gmra.mxu0 %v6109_v31  ;;  %3170 = vmatmul.mubr.bf16.gmra.mxu1 %v6110_v32  ;;  %v6189_v31 = vld [vmem:[%s6725_s9 + $0x98] ss:$72 sps:$4 sm:$0xff]  }
  0x35   : > { %3113 = vmatprep.mubr.bf16.mxu0 %v6115_v34  ;;  %3177 = vmatprep.mubr.bf16.mxu1 %v6117_v35  ;;  %v6190_v32 = vld [vmem:[%s6725_s9 + $0xa0] ss:$72 sps:$4 sm:$0xff]   ;;  %v6191_v34 = vld [vmem:[%s6725_s9 + $0x12c] ss:$72 sps:$4 sm:$0xff]  }
  0x36   : > { %5163 = vmatpush3.bf16.msra.mxu1 %v6122_v36  ;;  %5275 = vmatpush3.bf16.msra.mxu0 %v6124_v37  ;;  %v6193_v35 = vld [vmem:[%s6725_s9 + $0x134] ss:$72 sps:$4 sm:$0xff]   ;;  %v6214_v36 = vld [vmem:[%s7888_s1 + $0x1a8] sm:$0xff]  }
  0x37   : > { %5164 = vmatprep.subr.bf16.mxu1 %v6131_v38  ;;  %5276 = vmatprep.subr.bf16.mxu0 %v6133_v39  ;;  %v6216_v37 = vld [vmem:[%s7888_s1 + $0x228] sm:$0xff]   ;;  %v6229_v38 = vld [vmem:[%s7888_s1 + $0x1e0] sm:$0xff]  }
  0x38   : > { %v6231_v39 = vld [vmem:[%s7888_s1 + $0x260] sm:$0xff]  }
  0x3a   : > { %5165 = vmatpush3.bf16.msra.mxu1 %v6132_v42  ;;  %5277 = vmatpush3.bf16.msra.mxu0 %v6134_v43  ;;  %v6230_v42 = vld [vmem:[%s7888_s1 + $0x1a0] sm:$0xff]  }
  0x3b   : > { %5166 = vmatprep.subr.bf16.mxu1 %v6141_v46  ;;  %5278 = vmatprep.subr.bf16.mxu0 %v6143_v48  ;;  %v6232_v43 = vld [vmem:[%s7888_s1 + $0x220] sm:$0xff]   ;;  %v6245_v46 = vld [vmem:[%s7888_s1 + $0x1d8] sm:$0xff]  }
  0x3c   : > { %3114 = vmatmul.mubr.bf16.gmra.mxu0 %v6119_v40  ;;  %3178 = vmatmul.mubr.bf16.gmra.mxu1 %v6120_v41  ;;  %v6195_v40 = vld [vmem:[%s6725_s9 + $0x128] ss:$72 sps:$4 sm:$0xff]   ;;  %v6247_v48 = vld [vmem:[%s7888_s1 + $0x258] sm:$0xff]  }
  0x3d   : > { %3121 = vmatprep.mubr.bf16.mxu0 %v6125_v44  ;;  %3185 = vmatprep.mubr.bf16.mxu1 %v6127_v45  ;;  %v6196_v41 = vld [vmem:[%s6725_s9 + $0x130] ss:$72 sps:$4 sm:$0xff]   ;;  %v6201_v44 = vld [vmem:[%s6725_s9 + $0x1bc] ss:$72 sps:$4 sm:$0xff]  }
  0x3e   : > { %5167 = vmatpush3.bf16.msra.mxu1 %v6142_v47  ;;  %5279 = vmatpush3.bf16.msra.mxu0 %v6144_v49  ;;  %v6203_v45 = vld [vmem:[%s6725_s9 + $0x1c4] ss:$72 sps:$4 sm:$0xff]   ;;  %v6246_v47 = vld [vmem:[%s7888_s1 + $0x198] sm:$0xff]  }
  0x3f   : > { %5168 = vmatprep.subr.bf16.mxu1 %v6151_v52  ;;  %5280 = vmatprep.subr.bf16.mxu0 %v6153_v56  ;;  %v6248_v49 = vld [vmem:[%s7888_s1 + $0x218] sm:$0xff]   ;;  %v6207_v52 = vld [vmem:[%s6725_s9 + $0x24c] ss:$72 sps:$4 sm:$0xff]  }
  0x40   : > { %v6263_v56 = vld [vmem:[%s7888_s1 + $0x250] sm:$0xff]  }
  0x42   : > { %5169 = vmatpush3.bf16.msra.mxu1 %v6152_v55  ;;  %5281 = vmatpush3.bf16.msra.mxu0 %v6154_v57  ;;  %v6262_v55 = vld [vmem:[%s7888_s1 + $0x190] sm:$0xff]  }
  0x43   : > { %5170 = vmatprep.subr.bf16.mxu1 %v6161_v58  ;;  %5282 = vmatprep.subr.bf16.mxu0 %v6163_v63  ;;  %v6264_v57 = vld [vmem:[%s7888_s1 + $0x210] sm:$0xff]   ;;  %v6278_v63 = vld [vmem:[%s7888_s1 + $0x188] sm:$0xff]  }
  0x44   : > { %3122 = vmatmul.mubr.bf16.gmra.mxu0 %v6129_v50  ;;  %3186 = vmatmul.mubr.bf16.gmra.mxu1 %v6130_v51  ;;  %v6205_v50 = vld [vmem:[%s6725_s9 + $0x1b8] ss:$72 sps:$4 sm:$0xff]   ;;  %v6211_v58 = vld [vmem:[%s6725_s9 + $0x248] ss:$72 sps:$4 sm:$0xff]  }
  0x45   : > { %3129 = vmatprep.mubr.bf16.mxu0 %v6135_v53  ;;  %3193 = vmatprep.mubr.bf16.mxu1 %v6137_v54  ;;  %v6206_v51 = vld [vmem:[%s6725_s9 + $0x1c0] ss:$72 sps:$4 sm:$0xff]   ;;  %v6209_v53 = vld [vmem:[%s6725_s9 + $0x254] ss:$72 sps:$4 sm:$0xff]  }
  0x46   : > { %5171 = vmatpush3.bf16.msra.mxu1 %v6162_v61  ;;  %5283 = vmatpush3.bf16.msra.mxu0 %v6164_v0  ;;  %v6261_v54 = vld [vmem:[%s7888_s1 + $0x1d0] sm:$0xff]   ;;  %v6219_v61 = vld [vmem:[%s6725_s9 + $0x2e4] ss:$72 sps:$4 sm:$0xff]  }
  0x47   : > { %5172 = vmatprep.subr.bf16.mxu1 %v6171_v2  ;;  %5284 = vmatprep.subr.bf16.mxu0 %v6173_v4  ;;  %v6279_v0 = vld [vmem:[%s7888_s1 + $0x248] sm:$0xff]   ;;  %v6221_v2 = vld [vmem:[%s6725_s9 + $0x2d8] ss:$72 sps:$4 sm:$0xff]  }
  0x48   : > { %v6223_v4 = vld [vmem:[%s6725_s9 + $0x36c] ss:$72 sps:$4 sm:$0xff]  }
  0x4a   : > { %5173 = vmatpush3.bf16.msra.mxu1 %v6172_v3  ;;  %5285 = vmatpush3.bf16.msra.mxu0 %v6174_v5  ;;  %v6222_v3 = vld [vmem:[%s6725_s9 + $0x2e0] ss:$72 sps:$4 sm:$0xff]   ;;  %v6225_v5 = vld [vmem:[%s6725_s9 + $0x374] ss:$72 sps:$4 sm:$0xff]  }
  0x4b   : > { %5382 = vmatprep.subr.bf16.mxu1 %v6181_v10  ;;  %5494 = vmatprep.subr.bf16.mxu0 %v6183_v11  ;;  %v6296_v10 = vld [vmem:[%s7888_s1 + $0x200] sm:$0xff]   ;;  %v6228_v11 = vld [vmem:[%s6725_s9 + $0x370] ss:$72 sps:$4 sm:$0xff]  }
  0x4c   : > { %3130 = vmatmul.mubr.bf16.gmra.mxu0 %v6139_v59  ;;  %3194 = vmatmul.mubr.bf16.gmra.mxu1 %v6140_v60  ;;  %v6212_v59 = vld [vmem:[%s6725_s9 + $0x250] ss:$72 sps:$4 sm:$0xff]   ;;  %v6217_v60 = vld [vmem:[%s6725_s9 + $0x2dc] ss:$72 sps:$4 sm:$0xff]  }
  0x4d   : > { %3137 = vmatprep.mubr.bf16.mxu0 %v6145_v62  ;;  %3201 = vmatprep.mubr.bf16.mxu1 %v6147_v1  ;;  %v6277_v62 = vld [vmem:[%s7888_s1 + $0x1c8] sm:$0xff]  }
  0x4e   : > { %v6280_v1 = vld [vmem:[%s7888_s1 + $0x208] sm:$0xff]  }
  0x54   : > { %3138 = vmatmul.mubr.bf16.gmra.mxu0 %v6149_v6  ;;  %3202 = vmatmul.mubr.bf16.gmra.mxu1 %v6150_v7  ;;  %v6293_v6 = vld [vmem:[%s7888_s1 + $0x1c0] sm:$0xff]  }
  0x55   : > { %3145 = vmatprep.mubr.bf16.mxu0 %v6155_v8  ;;  %3209 = vmatprep.mubr.bf16.mxu1 %v6157_v9  ;;  %v6294_v7 = vld [vmem:[%s7888_s1 + $0x180] sm:$0xff]   ;;  %v6227_v8 = vld [vmem:[%s6725_s9 + $0x368] ss:$72 sps:$4 sm:$0xff]  }
  0x56   : > { %v6295_v9 = vld [vmem:[%s7888_s1 + $0x240] sm:$0xff]  }
  0x5c   : > { %3146 = vmatmul.mubr.bf16.gmra.mxu0 %v6159_v12  ;;  %3210 = vmatmul.mubr.bf16.gmra.mxu1 %v6160_v13  ;;  %v6233_v12 = vld [vmem:[%s6725_s9 + $0x3fc] ss:$72 sps:$4 sm:$0xff]  }
  0x5d   : > { %3153 = vmatprep.mubr.bf16.mxu0 %v6165_v14  ;;  %3217 = vmatprep.mubr.bf16.mxu1 %v6167_v15  ;;  %v6235_v13 = vld [vmem:[%s6725_s9 + $0x404] ss:$72 sps:$4 sm:$0xff]   ;;  %v6309_v14 = vld [vmem:[%s7888_s1 + $0x2f8] sm:$0xff]  }
  0x5e   : > { %v6237_v15 = vld [vmem:[%s6725_s9 + $0x3f8] ss:$72 sps:$4 sm:$0xff]  }
  0x64   : > { %3154 = vmatmul.mubr.bf16.gmra.mxu0 %v6169_v16  ;;  %3218 = vmatmul.mubr.bf16.gmra.mxu1 %v6170_v17  ;;  %v6238_v16 = vld [vmem:[%s6725_s9 + $0x400] ss:$72 sps:$4 sm:$0xff]   ;;  %v6311_v17 = vld [vmem:[%s7888_s1 + $0x378] sm:$0xff]  }
  0x65   : > { %3258 = vmatprep.mubr.bf16.mxu1 %v6177_v18  ;;  %3419 = vmatprep.mubr.bf16.mxu0 %v6180_v19  ;;  %v6239_v18 = vld [vmem:[%s6725_s9 + $0x48c] ss:$72 sps:$4 sm:$0xff]  }
  0x66   : > { %v6241_v19 = vld [vmem:[%s6725_s9 + $0x494] ss:$72 sps:$4 sm:$0xff]  }
  0x6c   : > { %3259 = vmatmul.mubr.bf16.vlgmr.msra.gmra.mxu1 %v6175_v20  ;;  %3420 = vmatmul.mubr.bf16.vlgmr.msra.gmra.mxu0 %v6178_v21  ;;  %v6243_v20 = vld [vmem:[%s6725_s9 + $0x488] ss:$72 sps:$4 sm:$0xff]  }
  0x6d   : > { %5383 = vmatpush3.bf16.msra.mxu1 %v6182_v22  ;;  %5495 = vmatpush3.bf16.msra.mxu0 %v6184_v23  ;;  %v6244_v21 = vld [vmem:[%s6725_s9 + $0x490] ss:$72 sps:$4 sm:$0xff]   ;;  %v6249_v22 = vld [vmem:[%s6725_s9 + $0x51c] ss:$72 sps:$4 sm:$0xff]  }
  0x6e   : > { %3266 = vmatprep.mubr.bf16.mxu1 %v6185_v24  ;;  %3427 = vmatprep.mubr.bf16.mxu0 %v6187_v25  ;;  %v6251_v23 = vld [vmem:[%s6725_s9 + $0x524] ss:$72 sps:$4 sm:$0xff]   ;;  %v6253_v24 = vld [vmem:[%s6725_s9 + $0x518] ss:$72 sps:$4 sm:$0xff]  }
  0x6f   : > { %5384 = vmatprep.subr.bf16.mxu1 %v6197_v26  ;;  %5496 = vmatprep.subr.bf16.mxu0 %v6199_v27  ;;  %v6254_v25 = vld [vmem:[%s6725_s9 + $0x520] ss:$72 sps:$4 sm:$0xff]   ;;  %v6255_v26 = vld [vmem:[%s6725_s9 + $0x5ac] ss:$72 sps:$4 sm:$0xff]  }
  0x70   : > { %v6257_v27 = vld [vmem:[%s6725_s9 + $0x5b4] ss:$72 sps:$4 sm:$0xff]  }
  0x71   : > { %5385 = vmatpush3.bf16.msra.mxu1 %v6198_v28  ;;  %5497 = vmatpush3.bf16.msra.mxu0 %v6200_v29  ;;  %v6259_v28 = vld [vmem:[%s6725_s9 + $0x5a8] ss:$72 sps:$4 sm:$0xff]  }
  0x72   : > { %5386 = vmatprep.subr.bf16.mxu1 %v6213_v30  ;;  %5498 = vmatprep.subr.bf16.mxu0 %v6215_v33  ;;  %v6260_v29 = vld [vmem:[%s6725_s9 + $0x5b0] ss:$72 sps:$4 sm:$0xff]   ;;  %v6265_v30 = vld [vmem:[%s6725_s9 + $0x63c] ss:$72 sps:$4 sm:$0xff]   ;;  %v6270_v33 = vld [vmem:[%s6725_s9 + $0x640] ss:$72 sps:$4 sm:$0xff]  }
  0x74   : > { %3267 = vmatmul.mubr.bf16.gmra.mxu1 %v6189_v31  ;;  %3428 = vmatmul.mubr.bf16.gmra.mxu0 %v6190_v32  ;;  %v6267_v31 = vld [vmem:[%s6725_s9 + $0x644] ss:$72 sps:$4 sm:$0xff]   ;;  %v6269_v32 = vld [vmem:[%s6725_s9 + $0x638] ss:$72 sps:$4 sm:$0xff]  }
  0x75   : > { %3274 = vmatprep.mubr.bf16.mxu1 %v6191_v34  ;;  %3435 = vmatprep.mubr.bf16.mxu0 %v6193_v35  ;;  %v6271_v34 = vld [vmem:[%s6725_s9 + $0x6cc] ss:$72 sps:$4 sm:$0xff]  }
  0x76   : > { %5387 = vmatpush3.bf16.msra.mxu1 %v6214_v36  ;;  %5499 = vmatpush3.bf16.msra.mxu0 %v6216_v37  ;;  %v6273_v35 = vld [vmem:[%s6725_s9 + $0x6d4] ss:$72 sps:$4 sm:$0xff]   ;;  %v6275_v36 = vld [vmem:[%s6725_s9 + $0x6c8] ss:$72 sps:$4 sm:$0xff]  }
  0x77   : > { %5388 = vmatprep.subr.bf16.mxu1 %v6229_v38  ;;  %5500 = vmatprep.subr.bf16.mxu0 %v6231_v39  ;;  %v6276_v37 = vld [vmem:[%s6725_s9 + $0x6d0] ss:$72 sps:$4 sm:$0xff]   ;;  %v6281_v38 = vld [vmem:[%s6725_s9 + $0x75c] ss:$72 sps:$4 sm:$0xff]  }
  0x78   : > { %v6283_v39 = vld [vmem:[%s6725_s9 + $0x764] ss:$72 sps:$4 sm:$0xff]  }
  0x7a   : > { %5389 = vmatpush3.bf16.msra.mxu1 %v6230_v42  ;;  %5501 = vmatpush3.bf16.msra.mxu0 %v6232_v43  ;;  %v6287_v42 = vld [vmem:[%s6725_s9 + $0x7ec] ss:$72 sps:$4 sm:$0xff]  }
  0x7b   : > { %5390 = vmatprep.subr.bf16.mxu1 %v6245_v46  ;;  %5502 = vmatprep.subr.bf16.mxu0 %v6247_v48  ;;  %v6289_v43 = vld [vmem:[%s6725_s9 + $0x7f4] ss:$72 sps:$4 sm:$0xff]   ;;  %v6301_v48 = vld [vmem:[%s6725_s9 + $0x878] ss:$72 sps:$4 sm:$0xff]  }
  0x7c   : > { %3275 = vmatmul.mubr.bf16.gmra.mxu1 %v6195_v40  ;;  %3436 = vmatmul.mubr.bf16.gmra.mxu0 %v6196_v41  ;;  %v6285_v40 = vld [vmem:[%s6725_s9 + $0x758] ss:$72 sps:$4 sm:$0xff]   ;;  %v6297_v46 = vld [vmem:[%s6725_s9 + $0x87c] ss:$72 sps:$4 sm:$0xff]  }
  0x7d   : > { %3282 = vmatprep.mubr.bf16.mxu1 %v6201_v44  ;;  %3443 = vmatprep.mubr.bf16.mxu0 %v6203_v45  ;;  %v6286_v41 = vld [vmem:[%s6725_s9 + $0x760] ss:$72 sps:$4 sm:$0xff]   ;;  %v6292_v45 = vld [vmem:[%s6725_s9 + $0x7f0] ss:$72 sps:$4 sm:$0xff]  }
  0x7e   : > { %5391 = vmatpush3.bf16.msra.mxu1 %v6246_v47  ;;  %5503 = vmatpush3.bf16.msra.mxu0 %v6248_v49  ;;  %v6291_v44 = vld [vmem:[%s6725_s9 + $0x7e8] ss:$72 sps:$4 sm:$0xff]   ;;  %v6299_v47 = vld [vmem:[%s6725_s9 + $0x884] ss:$72 sps:$4 sm:$0xff]  }
  0x7f   : > { %5392 = vmatprep.subr.bf16.mxu1 %v6261_v54  ;;  %5504 = vmatprep.subr.bf16.mxu0 %v6263_v56  ;;  %v6302_v49 = vld [vmem:[%s6725_s9 + $0x880] ss:$72 sps:$4 sm:$0xff]   ;;  %v6310_v54 = vld [vmem:[%s7888_s1 + $0x2b8] sm:$0xff]   ;;  %v6313_v56 = vld [vmem:[%s6725_s9 + $0xac] ss:$72 sps:$4 sm:$0xff]  }
  0x82   : > { %5393 = vmatpush3.bf16.msra.mxu1 %v6262_v55  ;;  %5505 = vmatpush3.bf16.msra.mxu0 %v6264_v57  ;;  %v6312_v55 = vld [vmem:[%s7888_s1 + $0x338] sm:$0xff]  }
  0x83   : > { %5394 = vmatprep.subr.bf16.mxu1 %v6277_v62  ;;  %5506 = vmatprep.subr.bf16.mxu0 %v6279_v0  ;;  %v6315_v57 = vld [vmem:[%s6725_s9 + $0xb4] ss:$72 sps:$4 sm:$0xff]   ;;  %v7069_v0 = vld [vmem:[%s7889_s2] ss:$0 sm:$0xff] }
  0x84   : > { %3283 = vmatmul.mubr.bf16.gmra.mxu1 %v6205_v50  ;;  %3444 = vmatmul.mubr.bf16.gmra.mxu0 %v6206_v51  ;;  %v6305_v50 = vld [vmem:[%s6725_s9 + $0x1c] ss:$72 sps:$4 sm:$0xff]  }
  0x85   : > { %3290 = vmatprep.mubr.bf16.mxu1 %v6207_v52  ;;  %3451 = vmatprep.mubr.bf16.mxu0 %v6209_v53  ;;  %v6308_v51 = vld [vmem:[%s6725_s9 + $0x24] ss:$72 sps:$4 sm:$0xff]   ;;  %v6303_v52 = vld [vmem:[%s6725_s9 + $0x18] ss:$72 sps:$4 sm:$0xff]  }
  0x86   : > { %5395 = vmatpush3.bf16.msra.mxu1 %v6278_v63  ;;  %5507 = vmatpush3.bf16.msra.mxu0 %v6280_v1  ;;  %v6306_v53 = vld [vmem:[%s6725_s9 + $0x20] ss:$72 sps:$4 sm:$0xff]  }
  0x87   : > { %5396 = vmatprep.subr.bf16.mxu1 %v6293_v6  ;;  %5508 = vmatprep.subr.bf16.mxu0 %v6295_v9  ;;  %v6341_v1 = vld [vmem:[%s7888_s1 + $0x2e8] sm:$0xff]  }
  0x8a   : > { %5397 = vmatpush3.bf16.msra.mxu1 %v6294_v7  ;;  %5509 = vmatpush3.bf16.msra.mxu0 %v6296_v10  ;;  %v6317_v7 = vld [vmem:[%s6725_s9 + $0xa8] ss:$72 sps:$4 sm:$0xff]  }
  0x8b   : > { %5606 = vmatprep.subr.bf16.mxu1 %v6309_v14  ;;  %5718 = vmatprep.subr.bf16.mxu0 %v6311_v17  ;;  %v6344_v17 = vld [vmem:[%s7888_s1 + $0x328] sm:$0xff]  }
  0x8c   : > { %3291 = vmatmul.mubr.bf16.gmra.mxu1 %v6211_v58  ;;  %3452 = vmatmul.mubr.bf16.gmra.mxu0 %v6212_v59  ;;  %v6325_v58 = vld [vmem:[%s7888_s1 + $0x2f0] sm:$0xff]  }
  0x8d   : > { %3298 = vmatprep.mubr.bf16.mxu1 %v6217_v60  ;;  %3459 = vmatprep.mubr.bf16.mxu0 %v6219_v61  ;;  %v6327_v59 = vld [vmem:[%s7888_s1 + $0x370] sm:$0xff]  }
  0x8e   : > { %v6326_v60 = vld [vmem:[%s7888_s1 + $0x2b0] sm:$0xff]  }
  0x8f   : > { %v6328_v61 = vld [vmem:[%s7888_s1 + $0x330] sm:$0xff]  }
  0x94   : > { %3299 = vmatmul.mubr.bf16.gmra.mxu1 %v6221_v2  ;;  %3460 = vmatmul.mubr.bf16.gmra.mxu0 %v6222_v3  ;;  %v6343_v2 = vld [vmem:[%s7888_s1 + $0x368] sm:$0xff]  }
  0x95   : > { %3306 = vmatprep.mubr.bf16.mxu1 %v6223_v4  ;;  %3467 = vmatprep.mubr.bf16.mxu0 %v6225_v5 }
  0x9c   : > { %3307 = vmatmul.mubr.bf16.gmra.mxu1 %v6227_v8  ;;  %3468 = vmatmul.mubr.bf16.gmra.mxu0 %v6228_v11  ;;  %v6318_v8 = vld [vmem:[%s6725_s9 + $0xb0] ss:$72 sps:$4 sm:$0xff]  }
  0x9d   : > { %3314 = vmatprep.mubr.bf16.mxu1 %v6233_v12  ;;  %3475 = vmatprep.mubr.bf16.mxu0 %v6235_v13  ;;  %v6319_v12 = vld [vmem:[%s6725_s9 + $0x13c] ss:$72 sps:$4 sm:$0xff]  }
  0x9e   : > { %v6321_v13 = vld [vmem:[%s6725_s9 + $0x144] ss:$72 sps:$4 sm:$0xff]  }
  0xa4   : > { %3315 = vmatmul.mubr.bf16.gmra.mxu1 %v6237_v15  ;;  %3476 = vmatmul.mubr.bf16.gmra.mxu0 %v6238_v16  ;;  %v6342_v16 = vld [vmem:[%s7888_s1 + $0x2a8] sm:$0xff]  }
  0xa5   : > { %3322 = vmatprep.mubr.bf16.mxu1 %v6239_v18  ;;  %3483 = vmatprep.mubr.bf16.mxu0 %v6241_v19 }
  0xac   : > { %3323 = vmatmul.mubr.bf16.gmra.mxu1 %v6243_v20  ;;  %3484 = vmatmul.mubr.bf16.gmra.mxu0 %v6244_v21  ;;  %v6357_v20 = vld [vmem:[%s7888_s1 + $0x2e0] sm:$0xff]  }
  0xad   : > { %3330 = vmatprep.mubr.bf16.mxu1 %v6249_v22  ;;  %3491 = vmatprep.mubr.bf16.mxu0 %v6251_v23  ;;  %v6359_v21 = vld [vmem:[%s7888_s1 + $0x360] sm:$0xff]  }
  0xb4   : > { %3331 = vmatmul.mubr.bf16.gmra.mxu1 %v6253_v24  ;;  %3492 = vmatmul.mubr.bf16.gmra.mxu0 %v6254_v25  ;;  %v6358_v24 = vld [vmem:[%s7888_s1 + $0x2a0] sm:$0xff]  }
  0xb5   : > { %3338 = vmatprep.mubr.bf16.mxu1 %v6255_v26  ;;  %3499 = vmatprep.mubr.bf16.mxu0 %v6257_v27  ;;  %v6360_v25 = vld [vmem:[%s7888_s1 + $0x320] sm:$0xff]   ;;  %v6373_v27 = vld [vmem:[%s7888_s1 + $0x2d8] sm:$0xff]  }
  0xbc   : > { %3339 = vmatmul.mubr.bf16.gmra.mxu1 %v6259_v28  ;;  %3500 = vmatmul.mubr.bf16.gmra.mxu0 %v6260_v29  ;;  %v6375_v28 = vld [vmem:[%s7888_s1 + $0x358] sm:$0xff]  }
  0xbd   : > { %3346 = vmatprep.mubr.bf16.mxu1 %v6265_v30  ;;  %3507 = vmatprep.mubr.bf16.mxu0 %v6267_v31  ;;  %v6323_v31 = vld [vmem:[%s6725_s9 + $0x138] ss:$72 sps:$4 sm:$0xff]  }
  0xc4   : > { %3347 = vmatmul.mubr.bf16.gmra.mxu1 %v6269_v32  ;;  %3508 = vmatmul.mubr.bf16.gmra.mxu0 %v6270_v33  ;;  %v6324_v32 = vld [vmem:[%s6725_s9 + $0x140] ss:$72 sps:$4 sm:$0xff]  }
  0xc5   : > { %3354 = vmatprep.mubr.bf16.mxu1 %v6271_v34  ;;  %3515 = vmatprep.mubr.bf16.mxu0 %v6273_v35  ;;  %v6329_v35 = vld [vmem:[%s6725_s9 + $0x1cc] ss:$72 sps:$4 sm:$0xff]  }
  0xcc   : > { %3355 = vmatmul.mubr.bf16.gmra.mxu1 %v6275_v36  ;;  %3516 = vmatmul.mubr.bf16.gmra.mxu0 %v6276_v37  ;;  %v6331_v36 = vld [vmem:[%s6725_s9 + $0x1d4] ss:$72 sps:$4 sm:$0xff]  }
  0xcd   : > { %3362 = vmatprep.mubr.bf16.mxu1 %v6281_v38  ;;  %3523 = vmatprep.mubr.bf16.mxu0 %v6283_v39 }
  0xd4   : > { %3363 = vmatmul.mubr.bf16.gmra.mxu1 %v6285_v40  ;;  %3524 = vmatmul.mubr.bf16.gmra.mxu0 %v6286_v41  ;;  %v6374_v40 = vld [vmem:[%s7888_s1 + $0x298] sm:$0xff]  }
  0xd5   : > { %3370 = vmatprep.mubr.bf16.mxu1 %v6287_v42  ;;  %3531 = vmatprep.mubr.bf16.mxu0 %v6289_v43  ;;  %v6376_v41 = vld [vmem:[%s7888_s1 + $0x318] sm:$0xff]  }
  0xdc   : > { %3371 = vmatmul.mubr.bf16.gmra.mxu1 %v6291_v44  ;;  %3532 = vmatmul.mubr.bf16.gmra.mxu0 %v6292_v45  ;;  %v6389_v44 = vld [vmem:[%s7888_s1 + $0x2d0] sm:$0xff]  }
  0xdd   : > { %3378 = vmatprep.mubr.bf16.mxu1 %v6297_v46  ;;  %3539 = vmatprep.mubr.bf16.mxu0 %v6299_v47  ;;  %v6391_v45 = vld [vmem:[%s7888_s1 + $0x350] sm:$0xff]  }
  0xe4   : > { %3379 = vmatmul.mubr.bf16.gmra.mxu1 %v6301_v48  ;;  %3540 = vmatmul.mubr.bf16.gmra.mxu0 %v6302_v49 }
  0xe5   : > { %3580 = vmatprep.mubr.bf16.mxu1 %v6305_v50  ;;  %3741 = vmatprep.mubr.bf16.mxu0 %v6308_v51  ;;  %v6390_v50 = vld [vmem:[%s7888_s1 + $0x290] sm:$0xff]  }
  0xe6   : > { %v6392_v51 = vld [vmem:[%s7888_s1 + $0x310] sm:$0xff]  }
  0xec   : > { %v5062_v62 = vpop.f32.mrf.mxu0  ;;  %v5110_v63 = vpop.f32.mrf.mxu1  ;;  %3581 = vmatmul.mubr.bf16.vlgmr.msra.gmra.mxu1 %v6303_v52  ;;  %3742 = vmatmul.mubr.bf16.vlgmr.msra.gmra.mxu0 %v6306_v53 }
  0xed   : > { %5607 = vmatpush3.bf16.msra.mxu1 %v6310_v54  ;;  %5719 = vmatpush3.bf16.msra.mxu0 %v6312_v55  ;;  %v6333_v55 = vld [vmem:[%s6725_s9 + $0x1c8] ss:$72 sps:$4 sm:$0xff]  }
  0xee   : > { %v5063_v3 = vpop.f32.mrf.mxu0  ;;  %v5111_v4 = vpop.f32.mrf.mxu1  ;;  %3588 = vmatprep.mubr.bf16.mxu1 %v6313_v56  ;;  %3749 = vmatprep.mubr.bf16.mxu0 %v6315_v57  ;;  %v6334_v56 = vld [vmem:[%s6725_s9 + $0x1d0] ss:$72 sps:$4 sm:$0xff]  }
  0xef   : > { %v7077_v5 = vadd.f32 %v5063_v3, %v5062_v62  ;;  %v5112_v6 = vadd.f32 %v5111_v4, %v5110_v63  ;;  %5608 = vmatprep.subr.bf16.mxu1 %v6325_v58  ;;  %5720 = vmatprep.subr.bf16.mxu0 %v6327_v59  ;;  %v6405_v59 = vld [vmem:[%s7888_s1 + $0x2c8] sm:$0xff]  }
  0xf0   : > { %v5065_v9 = vpop.f32.mrf.mxu0  ;;  %v5113_v10 = vpop.f32.mrf.mxu1 }
  0xf1   : > { %v7082_v11 = vadd.f32 %v5112_v6, %v7069_v0  ;;  %5609 = vmatpush3.bf16.msra.mxu1 %v6326_v60  ;;  %5721 = vmatpush3.bf16.msra.mxu0 %v6328_v61  ;;  %v6407_v60 = vld [vmem:[%s7888_s1 + $0x348] sm:$0xff]  }
  0xf2   : > { %v5066_v14 = vpop.f32.mrf.mxu0  ;;  %v5114_v15 = vpop.f32.mrf.mxu1  ;;  %5610 = vmatprep.subr.bf16.mxu1 %v6341_v1  ;;  %5722 = vmatprep.subr.bf16.mxu0 %v6343_v2  ;;  %v6337_v1 = vld [vmem:[%s6725_s9 + $0x25c] ss:$72 sps:$4 sm:$0xff]   ;;  %v6406_v6 = vld [vmem:[%s7888_s1 + $0x288] sm:$0xff]  }
  0xf3   : > { %v7092_v18 = vadd.f32 %v5066_v14, %v5065_v9  ;;  %v5115_v19 = vadd.f32 %v5114_v15, %v5113_v10  ;;  %v6340_v2 = vld [vmem:[%s6725_s9 + $0x264] ss:$72 sps:$4 sm:$0xff]  }
  0xf4   : > { %v5068_v22 = vpop.f32.mrf.mxu0  ;;  %v5116_v23 = vpop.f32.mrf.mxu1  ;;  %3589 = vmatmul.mubr.bf16.gmra.mxu1 %v6317_v7  ;;  %3750 = vmatmul.mubr.bf16.gmra.mxu0 %v6318_v8  ;;  %v6408_v7 = vld [vmem:[%s7888_s1 + $0x308] sm:$0xff]   ;;  %v6421_v10 = vld [vmem:[%s7888_s1 + $0x2c0] sm:$0xff]  }
  0xf5   : > { %v7107_v26 = vadd.f32 %v5115_v19, %v7069_v0  ;;  %3596 = vmatprep.mubr.bf16.mxu1 %v6319_v12  ;;  %3757 = vmatprep.mubr.bf16.mxu0 %v6321_v13  ;;  %v6423_v12 = vld [vmem:[%s7888_s1 + $0x340] sm:$0xff]   ;;  %v6437_v19 = vld [vmem:[%s7888_s1 + $0x3f8] sm:$0xff]  }
  0xf6   : > { %v5069_v29 = vpop.f32.mrf.mxu0  ;;  %v5117_v30 = vpop.f32.mrf.mxu1  ;;  %5611 = vmatpush3.bf16.msra.mxu1 %v6342_v16  ;;  %5723 = vmatpush3.bf16.msra.mxu0 %v6344_v17  ;;  %v6422_v15 = vld [vmem:[%s7888_s1 + $0x280] sm:$0xff]  }
  0xf7   : > { %v7117_v33 = vadd.f32 %v5069_v29, %v5068_v22  ;;  %v5118_v34 = vadd.f32 %v5117_v30, %v5116_v23  ;;  %5612 = vmatprep.subr.bf16.mxu1 %v6357_v20  ;;  %5724 = vmatprep.subr.bf16.mxu0 %v6359_v21  ;;  %v6424_v16 = vld [vmem:[%s7888_s1 + $0x300] sm:$0xff]   ;;  %v6439_v20 = vld [vmem:[%s7888_s1 + $0x478] sm:$0xff]  }
  0xf8   : > { %v5071_v37 = vpop.f32.mrf.mxu0  ;;  %v5119_v38 = vpop.f32.mrf.mxu1  ;;  %v6335_v23 = vld [vmem:[%s6725_s9 + $0x258] ss:$72 sps:$4 sm:$0xff]  }
  0xf9   : > { %v7122_v39 = vadd.f32 %v5118_v34, %v7069_v0 }
  0xfa   : > { %v5072_v42 = vpop.f32.mrf.mxu0  ;;  %v5120_v43 = vpop.f32.mrf.mxu1  ;;  %5613 = vmatpush3.bf16.msra.mxu1 %v6358_v24  ;;  %5725 = vmatpush3.bf16.msra.mxu0 %v6360_v25  ;;  %v6338_v24 = vld [vmem:[%s6725_s9 + $0x260] ss:$72 sps:$4 sm:$0xff]  }
  0xfb   : > { %v7136_v46 = vadd.f32 %v5072_v42, %v5071_v37  ;;  %v5121_v47 = vadd.f32 %v5120_v43, %v5119_v38  ;;  %5614 = vmatprep.subr.bf16.mxu1 %v6373_v27  ;;  %5726 = vmatprep.subr.bf16.mxu0 %v6375_v28 }
  0xfc   : > { %v5074_v48 = vpop.f32.mrf.mxu0  ;;  %v5122_v49 = vpop.f32.mrf.mxu1  ;;  %3597 = vmatmul.mubr.bf16.gmra.mxu1 %v6323_v31  ;;  %3758 = vmatmul.mubr.bf16.gmra.mxu0 %v6324_v32  ;;  %v6347_v31 = vld [vmem:[%s6725_s9 + $0x2ec] ss:$72 sps:$4 sm:$0xff]  }
  0xfd   : > { %v7145_v52 = vadd.f32 %v5121_v47, %v7069_v0  ;;  %3604 = vmatprep.mubr.bf16.mxu1 %v6329_v35  ;;  %3765 = vmatprep.mubr.bf16.mxu0 %v6331_v36  ;;  %v6350_v32 = vld [vmem:[%s6725_s9 + $0x2f4] ss:$72 sps:$4 sm:$0xff]   ;;  %v6345_v47 = vld [vmem:[%s6725_s9 + $0x2e8] ss:$72 sps:$4 sm:$0xff]  }
  0xfe   : > { %v5075_v53 = vpop.f32.mrf.mxu0  ;;  %v5123_v54 = vpop.f32.mrf.mxu1  ;;  %5615 = vmatpush3.bf16.msra.mxu1 %v6374_v40  ;;  %5727 = vmatpush3.bf16.msra.mxu0 %v6376_v41 }
  0xff   : > { %v7149_v57 = vadd.f32 %v5075_v53, %v5074_v48  ;;  %v5124_v58 = vadd.f32 %v5123_v54, %v5122_v49  ;;  %5616 = vmatprep.subr.bf16.mxu1 %v6389_v44  ;;  %5728 = vmatprep.subr.bf16.mxu0 %v6391_v45  ;;  %v6348_v48 = vld [vmem:[%s6725_s9 + $0x2f0] ss:$72 sps:$4 sm:$0xff]   ;;  %v6353_v53 = vld [vmem:[%s6725_s9 + $0x37c] ss:$72 sps:$4 sm:$0xff]  }
 0x100   : > { %v5077_v61 = vpop.f32.mrf.mxu0  ;;  %v5125_v62 = vpop.f32.mrf.mxu1  ;;  %v6356_v54 = vld [vmem:[%s6725_s9 + $0x384] ss:$72 sps:$4 sm:$0xff]  }
 0x101   : > { %v7158_v63 = vadd.f32 %v5124_v58, %v7069_v0 }
 0x102   : > { %v5078_v3 = vpop.f32.mrf.mxu0  ;;  %v5126_v4 = vpop.f32.mrf.mxu1  ;;  %5617 = vmatpush3.bf16.msra.mxu1 %v6390_v50  ;;  %5729 = vmatpush3.bf16.msra.mxu0 %v6392_v51 }
 0x103   : > { %v7168_v8 = vadd.f32 %v5078_v3, %v5077_v61  ;;  %v5127_v9 = vadd.f32 %v5126_v4, %v5125_v62  ;;  %5618 = vmatprep.subr.bf16.mxu1 %v6405_v59  ;;  %5730 = vmatprep.subr.bf16.mxu0 %v6407_v60  ;;  %v6351_v3 = vld [vmem:[%s6725_s9 + $0x378] ss:$72 sps:$4 sm:$0xff]  }
 0x104   : > { %v5080_v13 = vpop.f32.mrf.mxu0  ;;  %v5128_v14 = vpop.f32.mrf.mxu1  ;;  %3605 = vmatmul.mubr.bf16.gmra.mxu1 %v6333_v55  ;;  %3766 = vmatmul.mubr.bf16.gmra.mxu0 %v6334_v56  ;;  %v6354_v4 = vld [vmem:[%s6725_s9 + $0x380] ss:$72 sps:$4 sm:$0xff]  }
 0x105   : > { %v7183_v17 = vadd.f32 %v5127_v9, %v7069_v0  ;;  %3612 = vmatprep.mubr.bf16.mxu1 %v6337_v1  ;;  %3773 = vmatprep.mubr.bf16.mxu0 %v6340_v2 }
 0x106   : > { %v5081_v21 = vpop.f32.mrf.mxu0  ;;  %v5129_v22 = vpop.f32.mrf.mxu1  ;;  %5619 = vmatpush3.bf16.msra.mxu1 %v6406_v6  ;;  %5731 = vmatpush3.bf16.msra.mxu0 %v6408_v7 }
 0x107   : > { %v7193_v25 = vadd.f32 %v5081_v21, %v5080_v13  ;;  %v5130_v27 = vadd.f32 %v5129_v22, %v5128_v14  ;;  %5620 = vmatprep.subr.bf16.mxu1 %v6421_v10  ;;  %5732 = vmatprep.subr.bf16.mxu0 %v6423_v12  ;;  %v6363_v13 = vld [vmem:[%s6725_s9 + $0x40c] ss:$72 sps:$4 sm:$0xff]  }
 0x108   : > { %v5083_v28 = vpop.f32.mrf.mxu0  ;;  %v5131_v29 = vpop.f32.mrf.mxu1  ;;  %v6366_v14 = vld [vmem:[%s6725_s9 + $0x414] ss:$72 sps:$4 sm:$0xff]  }
 0x109   : > { %v7196_v30 = vadd.f32 %v5130_v27, %v7069_v0 }
 0x10a   : > { %v5084_v34 = vpop.f32.mrf.mxu0  ;;  %v5132_v35 = vpop.f32.mrf.mxu1  ;;  %5621 = vmatpush3.bf16.msra.mxu1 %v6422_v15  ;;  %5733 = vmatpush3.bf16.msra.mxu0 %v6424_v16 }
 0x10b   : > { %v7200_v36 = vadd.f32 %v5084_v34, %v5083_v28  ;;  %v5133_v37 = vadd.f32 %v5132_v35, %v5131_v29  ;;  %5830 = vmatprep.subr.bf16.mxu1 %v6437_v19  ;;  %5942 = vmatprep.subr.bf16.mxu0 %v6439_v20 }
 0x10c   : > { %v5086_v38 = vpop.f32.mrf.mxu0  ;;  %v5134_v40 = vpop.f32.mrf.mxu1  ;;  %3613 = vmatmul.mubr.bf16.gmra.mxu1 %v6335_v23  ;;  %3774 = vmatmul.mubr.bf16.gmra.mxu0 %v6338_v24 }
 0x10d   : > { %v7203_v41 = vadd.f32 %v5133_v37, %v7069_v0  ;;  %3620 = vmatprep.mubr.bf16.mxu1 %v6347_v31  ;;  %3781 = vmatprep.mubr.bf16.mxu0 %v6350_v32  ;;  %v6361_v31 = vld [vmem:[%s6725_s9 + $0x408] ss:$72 sps:$4 sm:$0xff]  }
 0x10e   : > { %v5087_v42 = vpop.f32.mrf.mxu0  ;;  %v5135_v43 = vpop.f32.mrf.mxu1  ;;  %v6364_v32 = vld [vmem:[%s6725_s9 + $0x410] ss:$72 sps:$4 sm:$0xff]  }
 0x10f   : > { %v7205_v44 = vadd.f32 %v5087_v42, %v5086_v38  ;;  %v5136_v45 = vadd.f32 %v5135_v43, %v5134_v40  ;;  %v6369_v38 = vld [vmem:[%s6725_s9 + $0x49c] ss:$72 sps:$4 sm:$0xff]  }
 0x110   : > { %v5089_v49 = vpop.f32.mrf.mxu0  ;;  %v5137_v50 = vpop.f32.mrf.mxu1  ;;  %v6372_v40 = vld [vmem:[%s6725_s9 + $0x4a4] ss:$72 sps:$4 sm:$0xff]  }
 0x111   : > { %v7210_v51 = vadd.f32 %v5136_v45, %v7069_v0 }
 0x112   : > { %v5090_v55 = vpop.f32.mrf.mxu0  ;;  %v5138_v56 = vpop.f32.mrf.mxu1 }
 0x113   : > { %v7214_v58 = vadd.f32 %v5090_v55, %v5089_v49  ;;  %v5139_v59 = vadd.f32 %v5138_v56, %v5137_v50  ;;  %v6367_v55 = vld [vmem:[%s6725_s9 + $0x498] ss:$72 sps:$4 sm:$0xff]  }
 0x114   : > { %v5092_v60 = vpop.f32.mrf.mxu0  ;;  %v5140_v61 = vpop.f32.mrf.mxu1  ;;  %3621 = vmatmul.mubr.bf16.gmra.mxu1 %v6345_v47  ;;  %3782 = vmatmul.mubr.bf16.gmra.mxu0 %v6348_v48  ;;  %v6370_v56 = vld [vmem:[%s6725_s9 + $0x4a0] ss:$72 sps:$4 sm:$0xff]  }
 0x115   : > { %v7217_v62 = vadd.f32 %v5139_v59, %v7069_v0  ;;  %3628 = vmatprep.mubr.bf16.mxu1 %v6353_v53  ;;  %3789 = vmatprep.mubr.bf16.mxu0 %v6356_v54 }
 0x116   : > { %v5093_v1 = vpop.f32.mrf.mxu0  ;;  %v5141_v2 = vpop.f32.mrf.mxu1 }
 0x117   : > { %v7221_v6 = vadd.f32 %v5093_v1, %v5092_v60  ;;  %v5142_v7 = vadd.f32 %v5141_v2, %v5140_v61 }
 0x118   : > { %v5095_v9 = vpop.f32.mrf.mxu0  ;;  %v5143_v10 = vpop.f32.mrf.mxu1 }
 0x119   : > { %v7224_v12 = vadd.f32 %v5142_v7, %v7069_v0 }
 0x11a   : > { %v5096_v15 = vpop.f32.mrf.mxu0  ;;  %v5144_v16 = vpop.f32.mrf.mxu1 }
 0x11b   : > { %v7228_v19 = vadd.f32 %v5096_v15, %v5095_v9  ;;  %v5145_v20 = vadd.f32 %v5144_v16, %v5143_v10 }
 0x11c   : > { %v5098_v21 = vpop.f32.mrf.mxu0  ;;  %v5146_v22 = vpop.f32.mrf.mxu1  ;;  %3629 = vmatmul.mubr.bf16.gmra.mxu1 %v6351_v3  ;;  %3790 = vmatmul.mubr.bf16.gmra.mxu0 %v6354_v4  ;;  %v6379_v3 = vld [vmem:[%s6725_s9 + $0x52c] ss:$72 sps:$4 sm:$0xff]  }
 0x11d   : > { %v7231_v23 = vadd.f32 %v5145_v20, %v7069_v0  ;;  %3636 = vmatprep.mubr.bf16.mxu1 %v6363_v13  ;;  %3797 = vmatprep.mubr.bf16.mxu0 %v6366_v14  ;;  %v6382_v4 = vld [vmem:[%s6725_s9 + $0x534] ss:$72 sps:$4 sm:$0xff]  }
 0x11e   : > { %v5099_v24 = vpop.f32.mrf.mxu0  ;;  %v5147_v27 = vpop.f32.mrf.mxu1 }
 0x11f   : > { %v7233_v28 = vadd.f32 %v5099_v24, %v5098_v21  ;;  %v5148_v29 = vadd.f32 %v5147_v27, %v5146_v22  ;;  %v3100_v22 = vadd.f32 %v7077_v5, %v7069_v0 }
 0x120   : > { %v5101_v34 = vpop.f32.mrf.mxu0  ;;  %v5149_v35 = vpop.f32.mrf.mxu1 }
 0x121   : > { %v7238_v37 = vadd.f32 %v5148_v29, %v7069_v0  ;;  %v6377_v29 = vld [vmem:[%s6725_s9 + $0x528] ss:$72 sps:$4 sm:$0xff]  }
 0x122   : > { %v5102_v42 = vpop.f32.mrf.mxu0  ;;  %v5150_v43 = vpop.f32.mrf.mxu1 }
 0x123   : > { %v7242_v45 = vadd.f32 %v5102_v42, %v5101_v34  ;;  %v5151_v47 = vadd.f32 %v5150_v43, %v5149_v35 }
 0x124   : > { %v5104_v48 = vpop.f32.mrf.mxu0  ;;  %v5152_v49 = vpop.f32.mrf.mxu1  ;;  %3637 = vmatmul.mubr.bf16.gmra.mxu1 %v6361_v31  ;;  %3798 = vmatmul.mubr.bf16.gmra.mxu0 %v6364_v32  ;;  %v6380_v31 = vld [vmem:[%s6725_s9 + $0x530] ss:$72 sps:$4 sm:$0xff]  }
 0x125   : > { %v7245_v50 = vadd.f32 %v5151_v47, %v7069_v0  ;;  %3644 = vmatprep.mubr.bf16.mxu1 %v6369_v38  ;;  %3805 = vmatprep.mubr.bf16.mxu0 %v6372_v40  ;;  %v6385_v38 = vld [vmem:[%s6725_s9 + $0x5bc] ss:$72 sps:$4 sm:$0xff]   ;;  %v3103_v47 = vadd.f32 %v7092_v18, %v7069_v0  ;;  %v3108_v18 = vadd.f32 %v7117_v33, %v7069_v0 }
 0x126   : > { %v5105_v53 = vpop.f32.mrf.mxu0  ;;  %v5153_v54 = vpop.f32.mrf.mxu1  ;;  %v6388_v40 = vld [vmem:[%s6725_s9 + $0x5c4] ss:$72 sps:$4 sm:$0xff]  }
 0x127   : > { %v7249_v59 = vadd.f32 %v5105_v53, %v5104_v48  ;;  %v5154_v60 = vadd.f32 %v5153_v54, %v5152_v49 }
 0x128   : > { %v5107_v61 = vpop.f32.mrf.mxu0  ;;  %v5155_v1 = vpop.f32.mrf.mxu1 }
 0x129   : > { %v7252_v2 = vadd.f32 %v5154_v60, %v7069_v0 }
 0x12a   : > { %v5108_v7 = vpop.f32.mrf.mxu0  ;;  %v5156_v9 = vpop.f32.mrf.mxu1 }
 0x12b   : > { %v7256_v10 = vadd.f32 %v5108_v7, %v5107_v61  ;;  %v5157_v13 = vadd.f32 %v5156_v9, %v5155_v1  ;;  %v6383_v61 = vld [vmem:[%s6725_s9 + $0x5b8] ss:$72 sps:$4 sm:$0xff]  }
 0x12c   : > { %v5174_v14 = vpop.f32.mrf.mxu1  ;;  %v5286_v15 = vpop.f32.mrf.mxu0  ;;  %3645 = vmatmul.mubr.bf16.gmra.mxu1 %v6367_v55  ;;  %3806 = vmatmul.mubr.bf16.gmra.mxu0 %v6370_v56  ;;  %v6386_v1 = vld [vmem:[%s6725_s9 + $0x5c0] ss:$72 sps:$4 sm:$0xff]  }
 0x12d   : > { %v7259_v16 = vadd.f32 %v5157_v13, %v7069_v0  ;;  %3652 = vmatprep.mubr.bf16.mxu1 %v6379_v3  ;;  %3813 = vmatprep.mubr.bf16.mxu0 %v6382_v4 }
 0x12e   : > { %v5175_v20 = vpop.f32.mrf.mxu1  ;;  %v5287_v21 = vpop.f32.mrf.mxu0 }
 0x12f   : > { %v5176_v24 = vadd.f32 %v5175_v20, %v5174_v14  ;;  %v5288_v27 = vadd.f32 %v5287_v21, %v5286_v15  ;;  %v6395_v15 = vld [vmem:[%s6725_s9 + $0x64c] ss:$72 sps:$4 sm:$0xff]  }
 0x130   : > { %v5177_v32 = vpop.f32.mrf.mxu1  ;;  %v5289_v34 = vpop.f32.mrf.mxu0  ;;  %v6398_v20 = vld [vmem:[%s6725_s9 + $0x654] ss:$72 sps:$4 sm:$0xff]  }
 0x131   : > { %v3261_v35 = vadd.f32 %v5176_v24, %v3100_v22  ;;  %v3111_v24 = vadd.f32 %v7136_v46, %v7069_v0  ;;  %v3116_v46 = vadd.f32 %v7149_v57, %v7069_v0 }
 0x132   : > { %v5178_v42 = vpop.f32.mrf.mxu1  ;;  %v5290_v43 = vpop.f32.mrf.mxu0 }
 0x133   : > { %v7269_v48 = vadd.f32 %v5288_v27, %v3261_v35  ;;  %v5179_v49 = vadd.f32 %v5178_v42, %v5177_v32  ;;  %v5291_v5 = vadd.f32 %v5290_v43, %v5289_v34 }
 0x134   : > { %v5180_v53 = vpop.f32.mrf.mxu1  ;;  %v5292_v54 = vpop.f32.mrf.mxu0  ;;  %3653 = vmatmul.mubr.bf16.gmra.mxu1 %v6377_v29  ;;  %3814 = vmatmul.mubr.bf16.gmra.mxu0 %v6380_v31 }
 0x135   : > { %v3264_v55 = vadd.f32 %v5179_v49, %v3103_v47  ;;  %3660 = vmatprep.mubr.bf16.mxu1 %v6385_v38  ;;  %3821 = vmatprep.mubr.bf16.mxu0 %v6388_v40 }
 0x136   : > { %v5181_v56 = vpop.f32.mrf.mxu1  ;;  %v5293_v60 = vpop.f32.mrf.mxu0 }
 0x137   : > { %v7275_v3 = vadd.f32 %v5291_v5, %v3264_v55  ;;  %v5182_v4 = vadd.f32 %v5181_v56, %v5180_v53  ;;  %v5294_v7 = vadd.f32 %v5293_v60, %v5292_v54  ;;  %v6393_v5 = vld [vmem:[%s6725_s9 + $0x648] ss:$72 sps:$4 sm:$0xff]   ;;  %v6401_v55 = vld [vmem:[%s6725_s9 + $0x6dc] ss:$72 sps:$4 sm:$0xff]  }
 0x138   : > { %v5183_v9 = vpop.f32.mrf.mxu1  ;;  %v5295_v13 = vpop.f32.mrf.mxu0  ;;  %v6396_v53 = vld [vmem:[%s6725_s9 + $0x650] ss:$72 sps:$4 sm:$0xff]   ;;  %v6404_v56 = vld [vmem:[%s6725_s9 + $0x6e4] ss:$72 sps:$4 sm:$0xff]  }
 0x139   : > { %v3269_v14 = vadd.f32 %v5182_v4, %v3108_v18 }
 0x13a   : > { %v5184_v21 = vpop.f32.mrf.mxu1  ;;  %v5296_v22 = vpop.f32.mrf.mxu0 }
 0x13b   : > { %v7281_v27 = vadd.f32 %v5294_v7, %v3269_v14  ;;  %v5185_v29 = vadd.f32 %v5184_v21, %v5183_v9  ;;  %v5297_v31 = vadd.f32 %v5296_v22, %v5295_v13 }
 0x13c   : > { %v5186_v33 = vpop.f32.mrf.mxu1  ;;  %v5298_v32 = vpop.f32.mrf.mxu0  ;;  %3661 = vmatmul.mubr.bf16.gmra.mxu1 %v6383_v61  ;;  %3822 = vmatmul.mubr.bf16.gmra.mxu0 %v6386_v1  ;;  %v3119_v1 = vadd.f32 %v7168_v8, %v7069_v0  ;;  %v3124_v8 = vadd.f32 %v7193_v25, %v7069_v0 }
 0x13d   : > { %v3272_v34 = vadd.f32 %v5185_v29, %v3111_v24  ;;  %3668 = vmatprep.mubr.bf16.mxu1 %v6395_v15  ;;  %3829 = vmatprep.mubr.bf16.mxu0 %v6398_v20 }
 0x13e   : > { %v5187_v35 = vpop.f32.mrf.mxu1  ;;  %v5299_v38 = vpop.f32.mrf.mxu0 }
 0x13f   : > { %v7285_v40 = vadd.f32 %v5297_v31, %v3272_v34  ;;  %v5188_v42 = vadd.f32 %v5187_v35, %v5186_v33  ;;  %v5300_v43 = vadd.f32 %v5299_v38, %v5298_v32  ;;  %v6399_v31 = vld [vmem:[%s6725_s9 + $0x6d8] ss:$72 sps:$4 sm:$0xff]   ;;  %v6411_v34 = vld [vmem:[%s6725_s9 + $0x76c] ss:$72 sps:$4 sm:$0xff]  }
 0x140   : > { %v5189_v47 = vpop.f32.mrf.mxu1  ;;  %v5301_v49 = vpop.f32.mrf.mxu0  ;;  %v6402_v33 = vld [vmem:[%s6725_s9 + $0x6e0] ss:$72 sps:$4 sm:$0xff]   ;;  %v6414_v35 = vld [vmem:[%s6725_s9 + $0x774] ss:$72 sps:$4 sm:$0xff]  }
 0x141   : > { %v3277_v54 = vadd.f32 %v5188_v42, %v3116_v46  ;;  %v3127_v42 = vadd.f32 %v7200_v36, %v7069_v0  ;;  %v7310_v0 = vld [vmem:[%s7889_s2] ss:$0 sm:$0xff] }
 0x142   : > { %v5190_v60 = vpop.f32.mrf.mxu1  ;;  %v5302_v61 = vpop.f32.mrf.mxu0  ;;  %v3132_v36 = vadd.f32 %v7310_v0, %v7205_v44 }
 0x143   : > { %v7293_v18 = vadd.f32 %v5300_v43, %v3277_v54  ;;  %v5191_v4 = vadd.f32 %v5190_v60, %v5189_v47  ;;  %v5303_v57 = vadd.f32 %v5302_v61, %v5301_v49 }
 0x144   : > { %v5192_v7 = vpop.f32.mrf.mxu1  ;;  %v5304_v9 = vpop.f32.mrf.mxu0  ;;  %3669 = vmatmul.mubr.bf16.gmra.mxu1 %v6393_v5  ;;  %3830 = vmatmul.mubr.bf16.gmra.mxu0 %v6396_v53 }
 0x145   : > { %v3280_v13 = vadd.f32 %v5191_v4, %v3119_v1  ;;  %3676 = vmatprep.mubr.bf16.mxu1 %v6401_v55  ;;  %3837 = vmatprep.mubr.bf16.mxu0 %v6404_v56 }
 0x146   : > { %v5193_v14 = vpop.f32.mrf.mxu1  ;;  %v5305_v15 = vpop.f32.mrf.mxu0 }
 0x147   : > { %v7297_v20 = vadd.f32 %v5303_v57, %v3280_v13  ;;  %v5194_v21 = vadd.f32 %v5193_v14, %v5192_v7  ;;  %v5306_v22 = vadd.f32 %v5305_v15, %v5304_v9  ;;  %v6409_v57 = vld [vmem:[%s6725_s9 + $0x768] ss:$72 sps:$4 sm:$0xff]   ;;  %v6417_v13 = vld [vmem:[%s6725_s9 + $0x7fc] ss:$72 sps:$4 sm:$0xff]  }
 0x148   : > { %v5195_v24 = vpop.f32.mrf.mxu1  ;;  %v5307_v29 = vpop.f32.mrf.mxu0  ;;  %v6412_v7 = vld [vmem:[%s6725_s9 + $0x770] ss:$72 sps:$4 sm:$0xff]   ;;  %v6420_v14 = vld [vmem:[%s6725_s9 + $0x804] ss:$72 sps:$4 sm:$0xff]  }
 0x149   : > { %v3285_v32 = vadd.f32 %v5194_v21, %v3124_v8  ;;  %v3135_v21 = vadd.f32 %v7310_v0, %v7214_v58  ;;  %v3140_v58 = vadd.f32 %v7310_v0, %v7221_v6 }
 0x14a   : > { %v5196_v38 = vpop.f32.mrf.mxu1  ;;  %v5308_v46 = vpop.f32.mrf.mxu0 }
 0x14b   : > { %v7305_v43 = vadd.f32 %v5306_v22, %v3285_v32  ;;  %v5197_v47 = vadd.f32 %v5196_v38, %v5195_v24  ;;  %v5309_v25 = vadd.f32 %v5308_v46, %v5307_v29 }
 0x14c   : > { %v5198_v49 = vpop.f32.mrf.mxu1  ;;  %v5310_v5 = vpop.f32.mrf.mxu0  ;;  %3677 = vmatmul.mubr.bf16.gmra.mxu1 %v6399_v31  ;;  %3838 = vmatmul.mubr.bf16.gmra.mxu0 %v6402_v33 }
 0x14d   : > { %v3288_v53 = vadd.f32 %v5197_v47, %v3127_v42  ;;  %3684 = vmatprep.mubr.bf16.mxu1 %v6411_v34  ;;  %3845 = vmatprep.mubr.bf16.mxu0 %v6414_v35 }
 0x14e   : > { %v5199_v54 = vpop.f32.mrf.mxu1  ;;  %v5311_v55 = vpop.f32.mrf.mxu0 }
 0x14f   : > { %v7314_v56 = vadd.f32 %v5309_v25, %v3288_v53  ;;  %v5200_v60 = vadd.f32 %v5199_v54, %v5198_v49  ;;  %v5312_v61 = vadd.f32 %v5311_v55, %v5310_v5  ;;  %v6415_v25 = vld [vmem:[%s6725_s9 + $0x7f8] ss:$72 sps:$4 sm:$0xff]   ;;  %v6427_v53 = vld [vmem:[%s6725_s9 + $0x88c] ss:$72 sps:$4 sm:$0xff]  }
 0x150   : > { %v5201_v1 = vpop.f32.mrf.mxu1  ;;  %v5313_v4 = vpop.f32.mrf.mxu0  ;;  %v6418_v49 = vld [vmem:[%s6725_s9 + $0x800] ss:$72 sps:$4 sm:$0xff]   ;;  %v6430_v54 = vld [vmem:[%s6725_s9 + $0x894] ss:$72 sps:$4 sm:$0xff]  }
 0x151   : > { %v3293_v9 = vadd.f32 %v5200_v60, %v3132_v36  ;;  %v3143_v60 = vadd.f32 %v7310_v0, %v7228_v19  ;;  %v3148_v19 = vadd.f32 %v7310_v0, %v7233_v28 }
 0x152   : > { %v5202_v15 = vpop.f32.mrf.mxu1  ;;  %v5314_v8 = vpop.f32.mrf.mxu0 }
 0x153   : > { %v7322_v22 = vadd.f32 %v5312_v61, %v3293_v9  ;;  %v5203_v24 = vadd.f32 %v5202_v15, %v5201_v1  ;;  %v5315_v44 = vadd.f32 %v5314_v8, %v5313_v4 }
 0x154   : > { %v5204_v29 = vpop.f32.mrf.mxu1  ;;  %v5316_v31 = vpop.f32.mrf.mxu0  ;;  %3685 = vmatmul.mubr.bf16.gmra.mxu1 %v6409_v57  ;;  %3846 = vmatmul.mubr.bf16.gmra.mxu0 %v6412_v7 }
 0x155   : > { %v3296_v33 = vadd.f32 %v5203_v24, %v3135_v21  ;;  %3692 = vmatprep.mubr.bf16.mxu1 %v6417_v13  ;;  %3853 = vmatprep.mubr.bf16.mxu0 %v6420_v14 }
 0x156   : > { %v5205_v32 = vpop.f32.mrf.mxu1  ;;  %v5317_v34 = vpop.f32.mrf.mxu0 }
 0x157   : > { %v7326_v35 = vadd.f32 %v5315_v44, %v3296_v33  ;;  %v5206_v38 = vadd.f32 %v5205_v32, %v5204_v29  ;;  %v5318_v46 = vadd.f32 %v5317_v34, %v5316_v31  ;;  %v6425_v44 = vld [vmem:[%s6725_s9 + $0x888] ss:$72 sps:$4 sm:$0xff]   ;;  %v6433_v33 = vld [vmem:[%s6725_s9 + $0x2c] ss:$72 sps:$4 sm:$0xff]  }
 0x158   : > { %v5207_v42 = vpop.f32.mrf.mxu1  ;;  %v5319_v47 = vpop.f32.mrf.mxu0  ;;  %v6428_v29 = vld [vmem:[%s6725_s9 + $0x890] ss:$72 sps:$4 sm:$0xff]   ;;  %v6436_v32 = vld [vmem:[%s6725_s9 + $0x34] ss:$72 sps:$4 sm:$0xff]  }
 0x159   : > { %v3301_v5 = vadd.f32 %v5206_v38, %v3140_v58  ;;  %v3151_v38 = vadd.f32 %v7310_v0, %v7242_v45  ;;  %v3156_v45 = vadd.f32 %v7310_v0, %v7249_v59  ;;  %v6443_v59 = vld [vmem:[%s6725_s9 + $0xbc] ss:$72 sps:$4 sm:$0xff]  }
 0x15a   : > { %v5208_v55 = vpop.f32.mrf.mxu1  ;;  %v5320_v36 = vpop.f32.mrf.mxu0 }
 0x15b   : > { %v7334_v61 = vadd.f32 %v5318_v46, %v3301_v5  ;;  %v5209_v1 = vadd.f32 %v5208_v55, %v5207_v42  ;;  %v5321_v6 = vadd.f32 %v5320_v36, %v5319_v47 }
 0x15c   : > { %v5210_v4 = vpop.f32.mrf.mxu1  ;;  %v5322_v57 = vpop.f32.mrf.mxu0  ;;  %3693 = vmatmul.mubr.bf16.gmra.mxu1 %v6415_v25  ;;  %3854 = vmatmul.mubr.bf16.gmra.mxu0 %v6418_v49 }
 0x15d   : > { %v3304_v7 = vadd.f32 %v5209_v1, %v3143_v60  ;;  %3700 = vmatprep.mubr.bf16.mxu1 %v6427_v53  ;;  %3861 = vmatprep.mubr.bf16.mxu0 %v6430_v54 }
 0x15e   : > { %v5211_v9 = vpop.f32.mrf.mxu1  ;;  %v5323_v13 = vpop.f32.mrf.mxu0 }
 0x15f   : > { %v7338_v14 = vadd.f32 %v5321_v6, %v3304_v7  ;;  %v5212_v15 = vadd.f32 %v5211_v9, %v5210_v4  ;;  %v5324_v8 = vadd.f32 %v5323_v13, %v5322_v57  ;;  %v6431_v6 = vld [vmem:[%s6725_s9 + $0x28] ss:$72 sps:$4 sm:$0xff]   ;;  %v6438_v7 = vld [vmem:[%s7888_s1 + $0x3b8] sm:$0xff]  }
 0x160   : > { %v5213_v21 = vpop.f32.mrf.mxu1  ;;  %v5325_v24 = vpop.f32.mrf.mxu0  ;;  %v6434_v4 = vld [vmem:[%s6725_s9 + $0x30] ss:$72 sps:$4 sm:$0xff]  }
 0x161   : > { %v3309_v31 = vadd.f32 %v5212_v15, %v3148_v19  ;;  %v6440_v9 = vld [vmem:[%s7888_s1 + $0x438] sm:$0xff]   ;;  %v6446_v15 = vld [vmem:[%s6725_s9 + $0xc4] ss:$72 sps:$4 sm:$0xff]  }
 0x162   : > { %v5214_v34 = vpop.f32.mrf.mxu1  ;;  %v5326_v58 = vpop.f32.mrf.mxu0 }
 0x163   : > { %v7346_v46 = vadd.f32 %v5324_v8, %v3309_v31  ;;  %v5215_v42 = vadd.f32 %v5214_v34, %v5213_v21  ;;  %v5327_v28 = vadd.f32 %v5326_v58, %v5325_v24  ;;  %v3159_v8 = vadd.f32 %v7310_v0, %v7256_v10  ;;  %v6455_v31 = vld [vmem:[%s7888_s1 + $0x470] sm:$0xff]  }
 0x164   : > { %v5216_v47 = vpop.f32.mrf.mxu1  ;;  %v5328_v25 = vpop.f32.mrf.mxu0  ;;  %3701 = vmatmul.mubr.bf16.gmra.mxu1 %v6425_v44  ;;  %3862 = vmatmul.mubr.bf16.gmra.mxu0 %v6428_v29  ;;  %v6453_v29 = vld [vmem:[%s7888_s1 + $0x3f0] sm:$0xff]  }
 0x165   : > { %v3312_v49 = vadd.f32 %v5215_v42, %v3151_v38  ;;  %3902 = vmatprep.mubr.bf16.mxu1 %v6433_v33  ;;  %4063 = vmatprep.mubr.bf16.mxu0 %v6436_v32  ;;  %v6454_v10 = vld [vmem:[%s7888_s1 + $0x3b0] sm:$0xff]   ;;  %v6469_v42 = vld [vmem:[%s7888_s1 + $0x3e8] sm:$0xff]  }
 0x166   : > { %v5217_v5 = vpop.f32.mrf.mxu1  ;;  %v5329_v53 = vpop.f32.mrf.mxu0  ;;  %v6456_v0 = vld [vmem:[%s7888_s1 + $0x430] sm:$0xff]  }
 0x167   : > { %v7350_v54 = vadd.f32 %v5327_v28, %v3312_v49  ;;  %v5218_v55 = vadd.f32 %v5217_v5, %v5216_v47  ;;  %v5330_v36 = vadd.f32 %v5329_v53, %v5328_v25  ;;  %v6471_v28 = vld [vmem:[%s7888_s1 + $0x468] sm:$0xff]  }
 0x168   : > { %v5219_v60 = vpop.f32.mrf.mxu1  ;;  %v5331_v1 = vpop.f32.mrf.mxu0 }
 0x169   : > { %v3317_v57 = vadd.f32 %v5218_v55, %v3156_v45  ;;  %v6441_v45 = vld [vmem:[%s6725_s9 + $0xb8] ss:$72 sps:$4 sm:$0xff]  }
 0x16a   : > { %v5220_v13 = vpop.f32.mrf.mxu1  ;;  %v5332_v19 = vpop.f32.mrf.mxu0  ;;  %v6444_v55 = vld [vmem:[%s6725_s9 + $0xc0] ss:$72 sps:$4 sm:$0xff]  }
 0x16b   : > { %v7364_v21 = vadd.f32 %v5330_v36, %v3317_v57  ;;  %v5221_v24 = vadd.f32 %v5220_v13, %v5219_v60  ;;  %v5333_v44 = vadd.f32 %v5332_v19, %v5331_v1  ;;  %v6449_v60 = vld [vmem:[%s6725_s9 + $0x14c] ss:$72 sps:$4 sm:$0xff]   ;;  %v6485_v19 = vld [vmem:[%s7888_s1 + $0x3e0] sm:$0xff]  }
 0x16c   : > { %v5222_v33 = vpop.f32.mrf.mxu1  ;;  %v5334_v32 = vpop.f32.mrf.mxu0  ;;  %3903 = vmatmul.mubr.bf16.vlgmr.msra.gmra.mxu1 %v6431_v6  ;;  %4064 = vmatmul.mubr.bf16.vlgmr.msra.gmra.mxu0 %v6434_v4  ;;  %v6452_v1 = vld [vmem:[%s6725_s9 + $0x154] ss:$72 sps:$4 sm:$0xff]   ;;  %v6470_v57 = vld [vmem:[%s7888_s1 + $0x3a8] sm:$0xff]  }
 0x16d   : > { %v3320_v34 = vadd.f32 %v5221_v24, %v3159_v8  ;;  %5831 = vmatpush3.bf16.msra.mxu1 %v6438_v7  ;;  %5943 = vmatpush3.bf16.msra.mxu0 %v6440_v9  ;;  %v6472_v7 = vld [vmem:[%s7888_s1 + $0x428] sm:$0xff]  }
 0x16e   : > { %v5223_v58 = vpop.f32.mrf.mxu1  ;;  %v5335_v38 = vpop.f32.mrf.mxu0  ;;  %3910 = vmatprep.mubr.bf16.mxu1 %v6443_v59  ;;  %4071 = vmatprep.mubr.bf16.mxu0 %v6446_v15  ;;  %v6487_v59 = vld [vmem:[%s7888_s1 + $0x460] sm:$0xff]  }
 0x16f   : > { %v7384_v47 = vadd.f32 %v5333_v44, %v3320_v34  ;;  %v5224_v25 = vadd.f32 %v5223_v58, %v5222_v33  ;;  %v5336_v49 = vadd.f32 %v5335_v38, %v5334_v32  ;;  %5832 = vmatprep.subr.bf16.mxu1 %v6453_v29  ;;  %5944 = vmatprep.subr.bf16.mxu0 %v6455_v31  ;;  %v6486_v31 = vld [vmem:[%s7888_s1 + $0x3a0] sm:$0xff]  }
 0x170   : > { %v5225_v5 = vpop.f32.mrf.mxu1  ;;  %v5337_v53 = vpop.f32.mrf.mxu0  ;;  %v6488_v33 = vld [vmem:[%s7888_s1 + $0x420] sm:$0xff]  }
 0x171   : > { %v3325_v36 = vadd.f32 %v5224_v25, %v7082_v11  ;;  %5833 = vmatpush3.bf16.msra.mxu1 %v6454_v10  ;;  %5945 = vmatpush3.bf16.msra.mxu0 %v6456_v0  ;;  %v6501_v10 = vld [vmem:[%s7888_s1 + $0x3d8] sm:$0xff]  }
 0x172   : > { %v5226_v6 = vpop.f32.mrf.mxu1  ;;  %v5338_v4 = vpop.f32.mrf.mxu0  ;;  %5834 = vmatprep.subr.bf16.mxu1 %v6469_v42  ;;  %5946 = vmatprep.subr.bf16.mxu0 %v6471_v28  ;;  %v6503_v0 = vld [vmem:[%s7888_s1 + $0x458] sm:$0xff]   ;;  %v6447_v42 = vld [vmem:[%s6725_s9 + $0x148] ss:$72 sps:$4 sm:$0xff]  }
 0x173   : > { %v7397_v9 = vadd.f32 %v5336_v49, %v3325_v36  ;;  %v5227_v13 = vadd.f32 %v5226_v6, %v5225_v5  ;;  %v5339_v11 = vadd.f32 %v5338_v4, %v5337_v53  ;;  %v6450_v28 = vld [vmem:[%s6725_s9 + $0x150] ss:$72 sps:$4 sm:$0xff]   ;;  %v6459_v49 = vld [vmem:[%s6725_s9 + $0x1dc] ss:$72 sps:$4 sm:$0xff]  }
 0x174   : > { %v5228_v15 = vpop.f32.mrf.mxu1  ;;  %v5340_v8 = vpop.f32.mrf.mxu0  ;;  %3911 = vmatmul.mubr.bf16.gmra.mxu1 %v6441_v45  ;;  %4072 = vmatmul.mubr.bf16.gmra.mxu0 %v6444_v55  ;;  %v6462_v5 = vld [vmem:[%s6725_s9 + $0x1e4] ss:$72 sps:$4 sm:$0xff]   ;;  %v6502_v55 = vld [vmem:[%s7888_s1 + $0x398] sm:$0xff]   ;;  %v6519_v4 = vld [vmem:[%s7888_s1 + $0x450] sm:$0xff]  }
 0x175   : > { %v3328_v24 = vadd.f32 %v5227_v13, %v7107_v26  ;;  %3918 = vmatprep.mubr.bf16.mxu1 %v6449_v60  ;;  %4079 = vmatprep.mubr.bf16.mxu0 %v6452_v1  ;;  %v6504_v36 = vld [vmem:[%s7888_s1 + $0x418] sm:$0xff]  }
 0x176   : > { %v5229_v44 = vpop.f32.mrf.mxu1  ;;  %v5341_v29 = vpop.f32.mrf.mxu0  ;;  %5835 = vmatpush3.bf16.msra.mxu1 %v6470_v57  ;;  %5947 = vmatpush3.bf16.msra.mxu0 %v6472_v7 }
 0x177   : > { %v7412_v32 = vadd.f32 %v5339_v11, %v3328_v24  ;;  %v5230_v26 = vadd.f32 %v5229_v44, %v5228_v15  ;;  %v5342_v34 = vadd.f32 %v5341_v29, %v5340_v8  ;;  %5836 = vmatprep.subr.bf16.mxu1 %v6485_v19  ;;  %5948 = vmatprep.subr.bf16.mxu0 %v6487_v59  ;;  %v6518_v59 = vld [vmem:[%s7888_s1 + $0x390] sm:$0xff]   ;;  %v6533_v44 = vld [vmem:[%s7888_s1 + $0x3c8] sm:$0xff]  }
 0x178   : > { %v5231_v58 = vpop.f32.mrf.mxu1  ;;  %v5343_v38 = vpop.f32.mrf.mxu0  ;;  %v6520_v15 = vld [vmem:[%s7888_s1 + $0x410] sm:$0xff]   ;;  %v6535_v29 = vld [vmem:[%s7888_s1 + $0x448] sm:$0xff]  }
 0x179   : > { %v3333_v25 = vadd.f32 %v5230_v26, %v7122_v39  ;;  %v6517_v39 = vld [vmem:[%s7888_s1 + $0x3d0] sm:$0xff]   ;;  %v6457_v26 = vld [vmem:[%s6725_s9 + $0x1d8] ss:$72 sps:$4 sm:$0xff]  }
 0x17a   : > { %v5232_v53 = vpop.f32.mrf.mxu1  ;;  %v5344_v45 = vpop.f32.mrf.mxu0  ;;  %5837 = vmatpush3.bf16.msra.mxu1 %v6486_v31  ;;  %5949 = vmatpush3.bf16.msra.mxu0 %v6488_v33 }
 0x17b   : > { %v7431_v60 = vadd.f32 %v5342_v34, %v3333_v25  ;;  %v5233_v1 = vadd.f32 %v5232_v53, %v5231_v58  ;;  %v5345_v6 = vadd.f32 %v5344_v45, %v5343_v38  ;;  %5838 = vmatprep.subr.bf16.mxu1 %v6501_v10  ;;  %5950 = vmatprep.subr.bf16.mxu0 %v6503_v0  ;;  %v6460_v34 = vld [vmem:[%s6725_s9 + $0x1e0] ss:$72 sps:$4 sm:$0xff]   ;;  %v6465_v0 = vld [vmem:[%s6725_s9 + $0x26c] ss:$72 sps:$4 sm:$0xff]  }
 0x17c   : > { %v5234_v57 = vpop.f32.mrf.mxu1  ;;  %v5346_v7 = vpop.f32.mrf.mxu0  ;;  %3919 = vmatmul.mubr.bf16.gmra.mxu1 %v6447_v42  ;;  %4080 = vmatmul.mubr.bf16.gmra.mxu0 %v6450_v28  ;;  %v6468_v58 = vld [vmem:[%s6725_s9 + $0x274] ss:$72 sps:$4 sm:$0xff]   ;;  %v6534_v28 = vld [vmem:[%s7888_s1 + $0x388] sm:$0xff]   ;;  %v6551_v45 = vld [vmem:[%s7888_s1 + $0x440] sm:$0xff]  }
 0x17d   : > { %v3336_v13 = vadd.f32 %v5233_v1, %v7145_v52  ;;  %3926 = vmatprep.mubr.bf16.mxu1 %v6459_v49  ;;  %4087 = vmatprep.mubr.bf16.mxu0 %v6462_v5  ;;  %v6536_v25 = vld [vmem:[%s7888_s1 + $0x408] sm:$0xff]  }
 0x17e   : > { %v5235_v11 = vpop.f32.mrf.mxu1  ;;  %v5347_v19 = vpop.f32.mrf.mxu0  ;;  %5839 = vmatpush3.bf16.msra.mxu1 %v6502_v55  ;;  %5951 = vmatpush3.bf16.msra.mxu0 %v6504_v36 }
 0x17f   : > { %v7446_v8 = vadd.f32 %v5345_v6, %v3336_v13  ;;  %v5236_v52 = vadd.f32 %v5235_v11, %v5234_v57  ;;  %v5348_v24 = vadd.f32 %v5347_v19, %v5346_v7  ;;  %5840 = vmatprep.subr.bf16.mxu1 %v6517_v39  ;;  %5952 = vmatprep.subr.bf16.mxu0 %v6519_v4  ;;  %v6550_v4 = vld [vmem:[%s7888_s1 + $0x380] sm:$0xff]  }
 0x180   : > { %v5237_v31 = vpop.f32.mrf.mxu1  ;;  %v5349_v33 = vpop.f32.mrf.mxu0  ;;  %v6552_v57 = vld [vmem:[%s7888_s1 + $0x400] sm:$0xff]  }
 0x181   : > { %v3341_v10 = vadd.f32 %v5236_v52, %v7158_v63  ;;  %v6549_v63 = vld [vmem:[%s7888_s1 + $0x3c0] sm:$0xff]  }
 0x182   : > { %v5238_v38 = vpop.f32.mrf.mxu1  ;;  %v5350_v42 = vpop.f32.mrf.mxu0  ;;  %5841 = vmatpush3.bf16.msra.mxu1 %v6518_v59  ;;  %5953 = vmatpush3.bf16.msra.mxu0 %v6520_v15  ;;  %v6463_v59 = vld [vmem:[%s6725_s9 + $0x268] ss:$72 sps:$4 sm:$0xff]  }
 0x183   : > { %v7465_v49 = vadd.f32 %v5348_v24, %v3341_v10  ;;  %v5239_v5 = vadd.f32 %v5238_v38, %v5237_v31  ;;  %v5351_v53 = vadd.f32 %v5350_v42, %v5349_v33  ;;  %5842 = vmatprep.subr.bf16.mxu1 %v6533_v44  ;;  %5954 = vmatprep.subr.bf16.mxu0 %v6535_v29  ;;  %v6466_v15 = vld [vmem:[%s6725_s9 + $0x270] ss:$72 sps:$4 sm:$0xff]   ;;  %v6475_v24 = vld [vmem:[%s6725_s9 + $0x2fc] ss:$72 sps:$4 sm:$0xff]  }
 0x184   : > { %v5240_v55 = vpop.f32.mrf.mxu1  ;;  %v5352_v36 = vpop.f32.mrf.mxu0  ;;  %3927 = vmatmul.mubr.bf16.gmra.mxu1 %v6457_v26  ;;  %4088 = vmatmul.mubr.bf16.gmra.mxu0 %v6460_v34  ;;  %v6478_v44 = vld [vmem:[%s6725_s9 + $0x304] ss:$72 sps:$4 sm:$0xff]  }
 0x185   : > { %v3344_v1 = vadd.f32 %v5239_v5, %v7183_v17  ;;  %3934 = vmatprep.mubr.bf16.mxu1 %v6465_v0  ;;  %4095 = vmatprep.mubr.bf16.mxu0 %v6468_v58 }
 0x186   : > { %v5241_v6 = vpop.f32.mrf.mxu1  ;;  %v5353_v39 = vpop.f32.mrf.mxu0  ;;  %5843 = vmatpush3.bf16.msra.mxu1 %v6534_v28  ;;  %5955 = vmatpush3.bf16.msra.mxu0 %v6536_v25 }
 0x187   : > { %v7480_v7 = vadd.f32 %v5351_v53, %v3344_v1  ;;  %v5242_v17 = vadd.f32 %v5241_v6, %v5240_v55  ;;  %v5354_v13 = vadd.f32 %v5353_v39, %v5352_v36  ;;  %5844 = vmatprep.subr.bf16.mxu1 %v6549_v63  ;;  %5956 = vmatprep.subr.bf16.mxu0 %v6551_v45  ;;  %v6473_v63 = vld [vmem:[%s6725_s9 + $0x2f8] ss:$72 sps:$4 sm:$0xff]   ;;  %v6481_v36 = vld [vmem:[%s6725_s9 + $0x38c] ss:$72 sps:$4 sm:$0xff]  }
 0x188   : > { %v5243_v11 = vpop.f32.mrf.mxu1  ;;  %v5355_v19 = vpop.f32.mrf.mxu0  ;;  %v6476_v45 = vld [vmem:[%s6725_s9 + $0x300] ss:$72 sps:$4 sm:$0xff]   ;;  %v6484_v1 = vld [vmem:[%s6725_s9 + $0x394] ss:$72 sps:$4 sm:$0xff]  }
 0x189   : > { %v3349_v52 = vadd.f32 %v5242_v17, %v7196_v30 }
 0x18a   : > { %v5244_v29 = vpop.f32.mrf.mxu1  ;;  %v5356_v31 = vpop.f32.mrf.mxu0  ;;  %5845 = vmatpush3.bf16.msra.mxu1 %v6550_v4  ;;  %5957 = vmatpush3.bf16.msra.mxu0 %v6552_v57 }
 0x18b   : > { %v7487_v33 = vadd.f32 %v5354_v13, %v3349_v52  ;;  %v5245_v26 = vadd.f32 %v5244_v29, %v5243_v11  ;;  %v5357_v34 = vadd.f32 %v5356_v31, %v5355_v19  ;;  %v6479_v29 = vld [vmem:[%s6725_s9 + $0x388] ss:$72 sps:$4 sm:$0xff]  }
 0x18c   : > { %v5246_v10 = vpop.f32.mrf.mxu1  ;;  %v5358_v0 = vpop.f32.mrf.mxu0  ;;  %3935 = vmatmul.mubr.bf16.gmra.mxu1 %v6463_v59  ;;  %4096 = vmatmul.mubr.bf16.gmra.mxu0 %v6466_v15  ;;  %v6482_v31 = vld [vmem:[%s6725_s9 + $0x390] ss:$72 sps:$4 sm:$0xff]  }
 0x18d   : > { %v3352_v30 = vadd.f32 %v5245_v26, %v7203_v41  ;;  %3942 = vmatprep.mubr.bf16.mxu1 %v6475_v24  ;;  %4103 = vmatprep.mubr.bf16.mxu0 %v6478_v44 }
 0x18e   : > { %v5247_v58 = vpop.f32.mrf.mxu1  ;;  %v5359_v38 = vpop.f32.mrf.mxu0 }
 0x18f   : > { %v7490_v42 = vadd.f32 %v5357_v34, %v3352_v30  ;;  %v5248_v28 = vadd.f32 %v5247_v58, %v5246_v10  ;;  %v5360_v25 = vadd.f32 %v5359_v38, %v5358_v0  ;;  %v6491_v34 = vld [vmem:[%s6725_s9 + $0x41c] ss:$72 sps:$4 sm:$0xff]  }
 0x190   : > { %v5249_v5 = vpop.f32.mrf.mxu1  ;;  %v5361_v53 = vpop.f32.mrf.mxu0  ;;  %v6494_v10 = vld [vmem:[%s6725_s9 + $0x424] ss:$72 sps:$4 sm:$0xff]  }
 0x191   : > { %v3357_v55 = vadd.f32 %v5248_v28, %v7210_v51 }
 0x192   : > { %v5250_v6 = vpop.f32.mrf.mxu1  ;;  %v5362_v39 = vpop.f32.mrf.mxu0 }
 0x193   : > { %v7497_v4 = vadd.f32 %v5360_v25, %v3357_v55  ;;  %v5251_v41 = vadd.f32 %v5250_v6, %v5249_v5  ;;  %v5363_v57 = vadd.f32 %v5362_v39, %v5361_v53  ;;  %v6489_v6 = vld [vmem:[%s6725_s9 + $0x418] ss:$72 sps:$4 sm:$0xff]  }
 0x194   : > { %v5252_v17 = vpop.f32.mrf.mxu1  ;;  %v5364_v13 = vpop.f32.mrf.mxu0  ;;  %3943 = vmatmul.mubr.bf16.gmra.mxu1 %v6473_v63  ;;  %4104 = vmatmul.mubr.bf16.gmra.mxu0 %v6476_v45  ;;  %v6492_v39 = vld [vmem:[%s6725_s9 + $0x420] ss:$72 sps:$4 sm:$0xff]  }
 0x195   : > { %v3360_v11 = vadd.f32 %v5251_v41, %v7217_v62  ;;  %3950 = vmatprep.mubr.bf16.mxu1 %v6481_v36  ;;  %4111 = vmatprep.mubr.bf16.mxu0 %v6484_v1 }
 0x196   : > { %v5253_v51 = vpop.f32.mrf.mxu1  ;;  %v5365_v19 = vpop.f32.mrf.mxu0 }
 0x197   : > { %v7500_v59 = vadd.f32 %v5363_v57, %v3360_v11  ;;  %v5254_v15 = vadd.f32 %v5253_v51, %v5252_v17  ;;  %v5366_v52 = vadd.f32 %v5365_v19, %v5364_v13  ;;  %v6497_v57 = vld [vmem:[%s6725_s9 + $0x4ac] ss:$72 sps:$4 sm:$0xff]  }
 0x198   : > { %v5255_v24 = vpop.f32.mrf.mxu1  ;;  %v5367_v44 = vpop.f32.mrf.mxu0  ;;  %v6500_v17 = vld [vmem:[%s6725_s9 + $0x4b4] ss:$72 sps:$4 sm:$0xff]  }
 0x199   : > { %v3365_v26 = vadd.f32 %v5254_v15, %v7224_v12 }
 0x19a   : > { %v5256_v0 = vpop.f32.mrf.mxu1  ;;  %v5368_v30 = vpop.f32.mrf.mxu0 }
 0x19b   : > { %v7507_v58 = vadd.f32 %v5366_v52, %v3365_v26  ;;  %v5257_v62 = vadd.f32 %v5256_v0, %v5255_v24  ;;  %v5369_v38 = vadd.f32 %v5368_v30, %v5367_v44  ;;  %v6495_v0 = vld [vmem:[%s6725_s9 + $0x4a8] ss:$72 sps:$4 sm:$0xff]  }
 0x19c   : > { %v5258_v28 = vpop.f32.mrf.mxu1  ;;  %v5370_v25 = vpop.f32.mrf.mxu0  ;;  %3951 = vmatmul.mubr.bf16.gmra.mxu1 %v6479_v29  ;;  %4112 = vmatmul.mubr.bf16.gmra.mxu0 %v6482_v31  ;;  %v6498_v30 = vld [vmem:[%s6725_s9 + $0x4b0] ss:$72 sps:$4 sm:$0xff]  }
 0x19d   : > { %v3368_v5 = vadd.f32 %v5257_v62, %v7231_v23  ;;  %3958 = vmatprep.mubr.bf16.mxu1 %v6491_v34  ;;  %4119 = vmatprep.mubr.bf16.mxu0 %v6494_v10 }
 0x19e   : > { %v5259_v12 = vpop.f32.mrf.mxu1  ;;  %v5371_v53 = vpop.f32.mrf.mxu0 }
 0x19f   : > { %v7510_v63 = vadd.f32 %v5369_v38, %v3368_v5  ;;  %v5260_v45 = vadd.f32 %v5259_v12, %v5258_v28  ;;  %v5372_v55 = vadd.f32 %v5371_v53, %v5370_v25  ;;  %v6507_v38 = vld [vmem:[%s6725_s9 + $0x53c] ss:$72 sps:$4 sm:$0xff]  }
 0x1a0   : > { %v5261_v36 = vpop.f32.mrf.mxu1  ;;  %v5373_v1 = vpop.f32.mrf.mxu0  ;;  %v6510_v28 = vld [vmem:[%s6725_s9 + $0x544] ss:$72 sps:$4 sm:$0xff]  }
 0x1a1   : > { %v3373_v41 = vadd.f32 %v5260_v45, %v7238_v37 }
 0x1a2   : > { %v5262_v13 = vpop.f32.mrf.mxu1  ;;  %v5374_v11 = vpop.f32.mrf.mxu0 }
 0x1a3   : > { %v7517_v51 = vadd.f32 %v5372_v55, %v3373_v41  ;;  %v5263_v23 = vadd.f32 %v5262_v13, %v5261_v36  ;;  %v5375_v19 = vadd.f32 %v5374_v11, %v5373_v1  ;;  %v6505_v13 = vld [vmem:[%s6725_s9 + $0x538] ss:$72 sps:$4 sm:$0xff]  }
 0x1a4   : > { %v5264_v15 = vpop.f32.mrf.mxu1  ;;  %v5376_v52 = vpop.f32.mrf.mxu0  ;;  %3959 = vmatmul.mubr.bf16.gmra.mxu1 %v6489_v6  ;;  %4120 = vmatmul.mubr.bf16.gmra.mxu0 %v6492_v39  ;;  %v6508_v11 = vld [vmem:[%s6725_s9 + $0x540] ss:$72 sps:$4 sm:$0xff]  }
 0x1a5   : > { %v3376_v24 = vadd.f32 %v5263_v23, %v7245_v50  ;;  %3966 = vmatprep.mubr.bf16.mxu1 %v6497_v57  ;;  %4127 = vmatprep.mubr.bf16.mxu0 %v6500_v17 }
 0x1a6   : > { %v5265_v37 = vpop.f32.mrf.mxu1  ;;  %v5377_v44 = vpop.f32.mrf.mxu0 }
 0x1a7   : > { %v7520_v29 = vadd.f32 %v5375_v19, %v3376_v24  ;;  %v5266_v31 = vadd.f32 %v5265_v37, %v5264_v15  ;;  %v5378_v26 = vadd.f32 %v5377_v44, %v5376_v52  ;;  %v6513_v19 = vld [vmem:[%s6725_s9 + $0x5cc] ss:$72 sps:$4 sm:$0xff]  }
 0x1a8   : > { %v5267_v34 = vpop.f32.mrf.mxu1  ;;  %v5379_v10 = vpop.f32.mrf.mxu0  ;;  %v6516_v15 = vld [vmem:[%s6725_s9 + $0x5d4] ss:$72 sps:$4 sm:$0xff]  }
 0x1a9   : > { %v3381_v62 = vadd.f32 %v5266_v31, %v7252_v2 }
 0x1aa   : > { %v5268_v25 = vpop.f32.mrf.mxu1  ;;  %v5380_v5 = vpop.f32.mrf.mxu0 }
 0x1ab   : > { %v7527_v12 = vadd.f32 %v5378_v26, %v3381_v62  ;;  %v5269_v50 = vadd.f32 %v5268_v25, %v5267_v34  ;;  %v5381_v53 = vadd.f32 %v5380_v5, %v5379_v10  ;;  %v6511_v25 = vld [vmem:[%s6725_s9 + $0x5c8] ss:$72 sps:$4 sm:$0xff]  }
 0x1ac   : > { %v5398_v45 = vpop.f32.mrf.mxu1  ;;  %v5510_v55 = vpop.f32.mrf.mxu0  ;;  %3967 = vmatmul.mubr.bf16.gmra.mxu1 %v6495_v0  ;;  %4128 = vmatmul.mubr.bf16.gmra.mxu0 %v6498_v30  ;;  %v6514_v5 = vld [vmem:[%s6725_s9 + $0x5d0] ss:$72 sps:$4 sm:$0xff]  }
 0x1ad   : > { %v3384_v36 = vadd.f32 %v5269_v50, %v7259_v16  ;;  %3974 = vmatprep.mubr.bf16.mxu1 %v6507_v38  ;;  %4135 = vmatprep.mubr.bf16.mxu0 %v6510_v28 }
 0x1ae   : > { %v5399_v2 = vpop.f32.mrf.mxu1  ;;  %v5511_v1 = vpop.f32.mrf.mxu0 }
 0x1af   : > { %v7530_v6 = vadd.f32 %v5381_v53, %v3384_v36  ;;  %v5400_v39 = vadd.f32 %v5399_v2, %v5398_v45  ;;  %v5512_v41 = vadd.f32 %v5511_v1, %v5510_v55  ;;  %v6523_v53 = vld [vmem:[%s6725_s9 + $0x65c] ss:$72 sps:$4 sm:$0xff]  }
 0x1b0   : > { %v5401_v57 = vpop.f32.mrf.mxu1  ;;  %v5513_v17 = vpop.f32.mrf.mxu0  ;;  %v6526_v45 = vld [vmem:[%s6725_s9 + $0x664] ss:$72 sps:$4 sm:$0xff]  }
 0x1b1   : > { %v3583_v23 = vadd.f32 %v5400_v39, %v7269_v48 }
 0x1b2   : > { %v5402_v52 = vpop.f32.mrf.mxu1  ;;  %v5514_v24 = vpop.f32.mrf.mxu0 }
 0x1b3   : > { %v7537_v37 = vadd.f32 %v5512_v41, %v3583_v23  ;;  %v5403_v16 = vadd.f32 %v5402_v52, %v5401_v57  ;;  %v5515_v44 = vadd.f32 %v5514_v24, %v5513_v17  ;;  %v6521_v52 = vld [vmem:[%s6725_s9 + $0x658] ss:$72 sps:$4 sm:$0xff]  }
 0x1b4   : > { %v5404_v31 = vpop.f32.mrf.mxu1  ;;  %v5516_v26 = vpop.f32.mrf.mxu0  ;;  %3975 = vmatmul.mubr.bf16.gmra.mxu1 %v6505_v13  ;;  %4136 = vmatmul.mubr.bf16.gmra.mxu0 %v6508_v11  ;;  %v6524_v24 = vld [vmem:[%s6725_s9 + $0x660] ss:$72 sps:$4 sm:$0xff]  }
 0x1b5   : > { %v3586_v34 = vadd.f32 %v5403_v16, %v7275_v3  ;;  %3982 = vmatprep.mubr.bf16.mxu1 %v6513_v19  ;;  %4143 = vmatprep.mubr.bf16.mxu0 %v6516_v15 }
 0x1b6   : > { %v5405_v48 = vpop.f32.mrf.mxu1  ;;  %v5517_v10 = vpop.f32.mrf.mxu0 }
 0x1b7   : > { %v7540_v0 = vadd.f32 %v5515_v44, %v3586_v34  ;;  %v5406_v30 = vadd.f32 %v5405_v48, %v5404_v31  ;;  %v5518_v62 = vadd.f32 %v5517_v10, %v5516_v26  ;;  %v6529_v44 = vld [vmem:[%s6725_s9 + $0x6ec] ss:$72 sps:$4 sm:$0xff]  }
 0x1b8   : > { %v5407_v38 = vpop.f32.mrf.mxu1  ;;  %v5519_v28 = vpop.f32.mrf.mxu0  ;;  %v6532_v31 = vld [vmem:[%s6725_s9 + $0x6f4] ss:$72 sps:$4 sm:$0xff]  }
 0x1b9   : > { %v3591_v50 = vadd.f32 %v5406_v30, %v7281_v27 }
 0x1ba   : > { %v5408_v55 = vpop.f32.mrf.mxu1  ;;  %v5520_v36 = vpop.f32.mrf.mxu0 }
 0x1bb   : > { %v7547_v2 = vadd.f32 %v5518_v62, %v3591_v50  ;;  %v5409_v3 = vadd.f32 %v5408_v55, %v5407_v38  ;;  %v5521_v1 = vadd.f32 %v5520_v36, %v5519_v28  ;;  %v6527_v55 = vld [vmem:[%s6725_s9 + $0x6e8] ss:$72 sps:$4 sm:$0xff]  }
 0x1bc   : > { %v5410_v39 = vpop.f32.mrf.mxu1  ;;  %v5522_v41 = vpop.f32.mrf.mxu0  ;;  %3983 = vmatmul.mubr.bf16.gmra.mxu1 %v6511_v25  ;;  %4144 = vmatmul.mubr.bf16.gmra.mxu0 %v6514_v5  ;;  %v6530_v36 = vld [vmem:[%s6725_s9 + $0x6f0] ss:$72 sps:$4 sm:$0xff]  }
 0x1bd   : > { %v3594_v57 = vadd.f32 %v5409_v3, %v7285_v40  ;;  %3990 = vmatprep.mubr.bf16.mxu1 %v6523_v53  ;;  %4151 = vmatprep.mubr.bf16.mxu0 %v6526_v45 }
 0x1be   : > { %v5411_v27 = vpop.f32.mrf.mxu1  ;;  %v5523_v17 = vpop.f32.mrf.mxu0 }
 0x1bf   : > { %v7550_v13 = vadd.f32 %v5521_v1, %v3594_v57  ;;  %v5412_v11 = vadd.f32 %v5411_v27, %v5410_v39  ;;  %v5524_v23 = vadd.f32 %v5523_v17, %v5522_v41  ;;  %v6539_v1 = vld [vmem:[%s6725_s9 + $0x77c] ss:$72 sps:$4 sm:$0xff]  }
 0x1c0   : > { %v5413_v19 = vpop.f32.mrf.mxu1  ;;  %v5525_v15 = vpop.f32.mrf.mxu0  ;;  %v6542_v39 = vld [vmem:[%s6725_s9 + $0x784] ss:$72 sps:$4 sm:$0xff]  }
 0x1c1   : > { %v3599_v16 = vadd.f32 %v5412_v11, %v7293_v18 }
 0x1c2   : > { %v5414_v26 = vpop.f32.mrf.mxu1  ;;  %v5526_v34 = vpop.f32.mrf.mxu0 }
 0x1c3   : > { %v7557_v48 = vadd.f32 %v5524_v23, %v3599_v16  ;;  %v5415_v40 = vadd.f32 %v5414_v26, %v5413_v19  ;;  %v5527_v10 = vadd.f32 %v5526_v34, %v5525_v15  ;;  %v6537_v26 = vld [vmem:[%s6725_s9 + $0x778] ss:$72 sps:$4 sm:$0xff]  }
 0x1c4   : > { %v5416_v30 = vpop.f32.mrf.mxu1  ;;  %v5528_v62 = vpop.f32.mrf.mxu0  ;;  %3991 = vmatmul.mubr.bf16.gmra.mxu1 %v6521_v52  ;;  %4152 = vmatmul.mubr.bf16.gmra.mxu0 %v6524_v24  ;;  %v6540_v34 = vld [vmem:[%s6725_s9 + $0x780] ss:$72 sps:$4 sm:$0xff]  }
 0x1c5   : > { %v3602_v38 = vadd.f32 %v5415_v40, %v7297_v20  ;;  %3998 = vmatprep.mubr.bf16.mxu1 %v6529_v44  ;;  %4159 = vmatprep.mubr.bf16.mxu0 %v6532_v31 }
 0x1c6   : > { %v5417_v18 = vpop.f32.mrf.mxu1  ;;  %v5529_v28 = vpop.f32.mrf.mxu0 }
 0x1c7   : > { %v7560_v25 = vadd.f32 %v5527_v10, %v3602_v38  ;;  %v5418_v5 = vadd.f32 %v5417_v18, %v5416_v30  ;;  %v5530_v50 = vadd.f32 %v5529_v28, %v5528_v62  ;;  %v6545_v10 = vld [vmem:[%s6725_s9 + $0x80c] ss:$72 sps:$4 sm:$0xff]  }
 0x1c8   : > { %v5419_v53 = vpop.f32.mrf.mxu1  ;;  %v5531_v45 = vpop.f32.mrf.mxu0  ;;  %v6548_v30 = vld [vmem:[%s6725_s9 + $0x814] ss:$72 sps:$4 sm:$0xff]  }
 0x1c9   : > { %v3607_v3 = vadd.f32 %v5418_v5, %v7305_v43 }
 0x1ca   : > { %v5420_v41 = vpop.f32.mrf.mxu1  ;;  %v5532_v57 = vpop.f32.mrf.mxu0 }
 0x1cb   : > { %v7567_v27 = vadd.f32 %v5530_v50, %v3607_v3  ;;  %v5421_v20 = vadd.f32 %v5420_v41, %v5419_v53  ;;  %v5533_v17 = vadd.f32 %v5532_v57, %v5531_v45  ;;  %v6543_v41 = vld [vmem:[%s6725_s9 + $0x808] ss:$72 sps:$4 sm:$0xff]  }
 0x1cc   : > { %v5422_v11 = vpop.f32.mrf.mxu1  ;;  %v5534_v23 = vpop.f32.mrf.mxu0  ;;  %3999 = vmatmul.mubr.bf16.gmra.mxu1 %v6527_v55  ;;  %4160 = vmatmul.mubr.bf16.gmra.mxu0 %v6530_v36  ;;  %v6546_v57 = vld [vmem:[%s6725_s9 + $0x810] ss:$72 sps:$4 sm:$0xff]  }
 0x1cd   : > { %v3610_v19 = vadd.f32 %v5421_v20, %v7314_v56  ;;  %4006 = vmatprep.mubr.bf16.mxu1 %v6539_v1  ;;  %4167 = vmatprep.mubr.bf16.mxu0 %v6542_v39 }
 0x1ce   : > { %v5423_v43 = vpop.f32.mrf.mxu1  ;;  %v5535_v15 = vpop.f32.mrf.mxu0 }
 0x1cf   : > { %v7570_v52 = vadd.f32 %v5533_v17, %v3610_v19  ;;  %v5424_v24 = vadd.f32 %v5423_v43, %v5422_v11  ;;  %v5536_v16 = vadd.f32 %v5535_v15, %v5534_v23  ;;  %v6555_v17 = vld [vmem:[%s6725_s9 + $0x89c] ss:$72 sps:$4 sm:$0xff]  }
 0x1d0   : > { %v5425_v44 = vpop.f32.mrf.mxu1  ;;  %v5537_v31 = vpop.f32.mrf.mxu0  ;;  %v6558_v11 = vld [vmem:[%s6725_s9 + $0x8a4] ss:$72 sps:$4 sm:$0xff]  }
 0x1d1   : > { %v3615_v40 = vadd.f32 %v5424_v24, %v7322_v22 }
 0x1d2   : > { %v5426_v62 = vpop.f32.mrf.mxu1  ;;  %v5538_v38 = vpop.f32.mrf.mxu0 }
 0x1d3   : > { %v7577_v18 = vadd.f32 %v5536_v16, %v3615_v40  ;;  %v5427_v56 = vadd.f32 %v5426_v62, %v5425_v44  ;;  %v5539_v28 = vadd.f32 %v5538_v38, %v5537_v31  ;;  %v6553_v62 = vld [vmem:[%s6725_s9 + $0x898] ss:$72 sps:$4 sm:$0xff]  }
 0x1d4   : > { %v5428_v5 = vpop.f32.mrf.mxu1  ;;  %v5540_v50 = vpop.f32.mrf.mxu0  ;;  %4007 = vmatmul.mubr.bf16.gmra.mxu1 %v6537_v26  ;;  %4168 = vmatmul.mubr.bf16.gmra.mxu0 %v6540_v34  ;;  %v6556_v38 = vld [vmem:[%s6725_s9 + $0x8a0] ss:$72 sps:$4 sm:$0xff]  }
 0x1d5   : > { %v3618_v53 = vadd.f32 %v5427_v56, %v7326_v35  ;;  %4014 = vmatprep.mubr.bf16.mxu1 %v6545_v10  ;;  %4175 = vmatprep.mubr.bf16.mxu0 %v6548_v30 }
 0x1d6   : > { %v5429_v22 = vpop.f32.mrf.mxu1  ;;  %v5541_v45 = vpop.f32.mrf.mxu0 }
 0x1d7   : > { %v7580_v55 = vadd.f32 %v5539_v28, %v3618_v53  ;;  %v5430_v36 = vadd.f32 %v5429_v22, %v5428_v5  ;;  %v5542_v3 = vadd.f32 %v5541_v45, %v5540_v50  ;;  %v6561_v28 = vld [vmem:[%s6725_s9 + $0x3c] ss:$72 sps:$4 sm:$0xff]  }
 0x1d8   : > { %v5431_v1 = vpop.f32.mrf.mxu1  ;;  %v5543_v39 = vpop.f32.mrf.mxu0  ;;  %v6564_v5 = vld [vmem:[%s6725_s9 + $0x44] ss:$72 sps:$4 sm:$0xff]  }
 0x1d9   : > { %v3623_v20 = vadd.f32 %v5430_v36, %v7334_v61 }
 0x1da   : > { %v5432_v23 = vpop.f32.mrf.mxu1  ;;  %v5544_v19 = vpop.f32.mrf.mxu0 }
 0x1db   : > { %v7587_v43 = vadd.f32 %v5542_v3, %v3623_v20  ;;  %v5433_v35 = vadd.f32 %v5432_v23, %v5431_v1  ;;  %v5545_v15 = vadd.f32 %v5544_v19, %v5543_v39  ;;  %v6559_v23 = vld [vmem:[%s6725_s9 + $0x38] ss:$72 sps:$4 sm:$0xff]  }
 0x1dc   : > { %v5434_v24 = vpop.f32.mrf.mxu1  ;;  %v5546_v16 = vpop.f32.mrf.mxu0  ;;  %4015 = vmatmul.mubr.bf16.gmra.mxu1 %v6543_v41  ;;  %4176 = vmatmul.mubr.bf16.gmra.mxu0 %v6546_v57  ;;  %v6562_v19 = vld [vmem:[%s6725_s9 + $0x40] ss:$72 sps:$4 sm:$0xff]  }
 0x1dd   : > { %v3626_v44 = vadd.f32 %v5433_v35, %v7338_v14  ;;  %4022 = vmatprep.mubr.bf16.mxu1 %v6555_v17  ;;  %4183 = vmatprep.mubr.bf16.mxu0 %v6558_v11 }
 0x1de   : > { %v5435_v61 = vpop.f32.mrf.mxu1  ;;  %v5547_v31 = vpop.f32.mrf.mxu0 }
 0x1df   : > { %v7590_v26 = vadd.f32 %v5545_v15, %v3626_v44  ;;  %v5436_v34 = vadd.f32 %v5435_v61, %v5434_v24  ;;  %v5548_v40 = vadd.f32 %v5547_v31, %v5546_v16  ;;  %v6567_v15 = vld [vmem:[%s6725_s9 + $0xcc] ss:$72 sps:$4 sm:$0xff]  }
 0x1e0   : > { %v5437_v10 = vpop.f32.mrf.mxu1  ;;  %v5549_v30 = vpop.f32.mrf.mxu0  ;;  %v6570_v24 = vld [vmem:[%s6725_s9 + $0xd4] ss:$72 sps:$4 sm:$0xff]  }
 0x1e1   : > { %v3631_v56 = vadd.f32 %v5436_v34, %v7346_v46 }
 0x1e2   : > { %v5438_v50 = vpop.f32.mrf.mxu1  ;;  %v5550_v53 = vpop.f32.mrf.mxu0 }
 0x1e3   : > { %v7597_v22 = vadd.f32 %v5548_v40, %v3631_v56  ;;  %v5439_v14 = vadd.f32 %v5438_v50, %v5437_v10  ;;  %v5551_v45 = vadd.f32 %v5550_v53, %v5549_v30  ;;  %v6565_v50 = vld [vmem:[%s6725_s9 + $0xc8] ss:$72 sps:$4 sm:$0xff]  }
 0x1e4   : > { %v5440_v36 = vpop.f32.mrf.mxu1  ;;  %v5552_v3 = vpop.f32.mrf.mxu0  ;;  %4023 = vmatmul.mubr.bf16.gmra.mxu1 %v6553_v62  ;;  %4184 = vmatmul.mubr.bf16.gmra.mxu0 %v6556_v38  ;;  %v6568_v53 = vld [vmem:[%s6725_s9 + $0xd0] ss:$72 sps:$4 sm:$0xff]  }
 0x1e5   : > { %v3634_v1 = vadd.f32 %v5439_v14, %v7350_v54  ;;  %4224 = vmatprep.mubr.bf16.mxu1 %v6561_v28  ;;  %4385 = vmatprep.mubr.bf16.mxu0 %v6564_v5 }
 0x1e6   : > { %v5441_v46 = vpop.f32.mrf.mxu1  ;;  %v5553_v39 = vpop.f32.mrf.mxu0 }
 0x1e7   : > { %v7600_v41 = vadd.f32 %v5551_v45, %v3634_v1  ;;  %v5442_v57 = vadd.f32 %v5441_v46, %v5440_v36  ;;  %v5554_v20 = vadd.f32 %v5553_v39, %v5552_v3  ;;  %v6573_v45 = vld [vmem:[%s6725_s9 + $0x15c] ss:$72 sps:$4 sm:$0xff]  }
 0x1e8   : > { %v5443_v17 = vpop.f32.mrf.mxu1  ;;  %v5555_v11 = vpop.f32.mrf.mxu0  ;;  %v6576_v36 = vld [vmem:[%s6725_s9 + $0x164] ss:$72 sps:$4 sm:$0xff]  }
 0x1e9   : > { %v3639_v35 = vadd.f32 %v5442_v57, %v7364_v21 }
 0x1ea   : > { %v5444_v16 = vpop.f32.mrf.mxu1  ;;  %v5556_v44 = vpop.f32.mrf.mxu0 }
 0x1eb   : > { %v7607_v61 = vadd.f32 %v5554_v20, %v3639_v35  ;;  %v5445_v54 = vadd.f32 %v5444_v16, %v5443_v17  ;;  %v5557_v31 = vadd.f32 %v5556_v44, %v5555_v11  ;;  %v6571_v16 = vld [vmem:[%s6725_s9 + $0x158] ss:$72 sps:$4 sm:$0xff]  }
 0x1ec   : > { %v5446_v34 = vpop.f32.mrf.mxu1  ;;  %v5558_v40 = vpop.f32.mrf.mxu0  ;;  %4225 = vmatmul.mubr.bf16.vlgmr.msra.gmra.mxu1 %v6559_v23  ;;  %4386 = vmatmul.mubr.bf16.vlgmr.msra.gmra.mxu0 %v6562_v19  ;;  %v6574_v44 = vld [vmem:[%s6725_s9 + $0x160] ss:$72 sps:$4 sm:$0xff]  }
 0x1ed   : > { %v3642_v10 = vadd.f32 %v5445_v54, %v7384_v47  ;;  %4232 = vmatprep.mubr.bf16.mxu1 %v6567_v15  ;;  %4393 = vmatprep.mubr.bf16.mxu0 %v6570_v24 }
 0x1ee   : > { %v5447_v21 = vpop.f32.mrf.mxu1  ;;  %v5559_v30 = vpop.f32.mrf.mxu0 }
 0x1ef   : > { %v7610_v62 = vadd.f32 %v5557_v31, %v3642_v10  ;;  %v5448_v38 = vadd.f32 %v5447_v21, %v5446_v34  ;;  %v5560_v56 = vadd.f32 %v5559_v30, %v5558_v40  ;;  %v6579_v31 = vld [vmem:[%s6725_s9 + $0x1ec] ss:$72 sps:$4 sm:$0xff]  }
 0x1f0   : > { %v5449_v28 = vpop.f32.mrf.mxu1  ;;  %v5561_v5 = vpop.f32.mrf.mxu0  ;;  %v6582_v34 = vld [vmem:[%s6725_s9 + $0x1f4] ss:$72 sps:$4 sm:$0xff]  }
 0x1f1   : > { %v3647_v14 = vadd.f32 %v5448_v38, %v7397_v9 }
 0x1f2   : > { %v5450_v3 = vpop.f32.mrf.mxu1  ;;  %v5562_v1 = vpop.f32.mrf.mxu0 }
 0x1f3   : > { %v7617_v46 = vadd.f32 %v5560_v56, %v3647_v14  ;;  %v5451_v47 = vadd.f32 %v5450_v3, %v5449_v28  ;;  %v5563_v39 = vadd.f32 %v5562_v1, %v5561_v5  ;;  %v6577_v3 = vld [vmem:[%s6725_s9 + $0x1e8] ss:$72 sps:$4 sm:$0xff]  }
 0x1f4   : > { %v5452_v57 = vpop.f32.mrf.mxu1  ;;  %v5564_v20 = vpop.f32.mrf.mxu0  ;;  %4233 = vmatmul.mubr.bf16.gmra.mxu1 %v6565_v50  ;;  %4394 = vmatmul.mubr.bf16.gmra.mxu0 %v6568_v53  ;;  %v6580_v1 = vld [vmem:[%s6725_s9 + $0x1f0] ss:$72 sps:$4 sm:$0xff]  }
 0x1f5   : > { %v3650_v17 = vadd.f32 %v5451_v47, %v7412_v32  ;;  %4240 = vmatprep.mubr.bf16.mxu1 %v6573_v45  ;;  %4401 = vmatprep.mubr.bf16.mxu0 %v6576_v36 }
 0x1f6   : > { %v5453_v9 = vpop.f32.mrf.mxu1  ;;  %v5565_v11 = vpop.f32.mrf.mxu0 }
 0x1f7   : > { %v7620_v23 = vadd.f32 %v5563_v39, %v3650_v17  ;;  %v5454_v19 = vadd.f32 %v5453_v9, %v5452_v57  ;;  %v5566_v35 = vadd.f32 %v5565_v11, %v5564_v20  ;;  %v6585_v39 = vld [vmem:[%s6725_s9 + $0x27c] ss:$72 sps:$4 sm:$0xff]  }
 0x1f8   : > { %v5455_v15 = vpop.f32.mrf.mxu1  ;;  %v5567_v24 = vpop.f32.mrf.mxu0  ;;  %v6588_v57 = vld [vmem:[%s6725_s9 + $0x284] ss:$72 sps:$4 sm:$0xff]  }
 0x1f9   : > { %v3655_v54 = vadd.f32 %v5454_v19, %v7431_v60 }
 0x1fa   : > { %v5456_v40 = vpop.f32.mrf.mxu1  ;;  %v5568_v10 = vpop.f32.mrf.mxu0 }
 0x1fb   : > { %v7627_v21 = vadd.f32 %v5566_v35, %v3655_v54  ;;  %v5457_v32 = vadd.f32 %v5456_v40, %v5455_v15  ;;  %v5569_v30 = vadd.f32 %v5568_v10, %v5567_v24  ;;  %v6583_v40 = vld [vmem:[%s6725_s9 + $0x278] ss:$72 sps:$4 sm:$0xff]  }
 0x1fc   : > { %v5458_v38 = vpop.f32.mrf.mxu1  ;;  %v5570_v56 = vpop.f32.mrf.mxu0  ;;  %4241 = vmatmul.mubr.bf16.gmra.mxu1 %v6571_v16  ;;  %4402 = vmatmul.mubr.bf16.gmra.mxu0 %v6574_v44  ;;  %v6586_v10 = vld [vmem:[%s6725_s9 + $0x280] ss:$72 sps:$4 sm:$0xff]  }
 0x1fd   : > { %v3658_v28 = vadd.f32 %v5457_v32, %v7446_v8  ;;  %4248 = vmatprep.mubr.bf16.mxu1 %v6579_v31  ;;  %4409 = vmatprep.mubr.bf16.mxu0 %v6582_v34 }
 0x1fe   : > { %v5459_v60 = vpop.f32.mrf.mxu1  ;;  %v5571_v5 = vpop.f32.mrf.mxu0 }
 0x1ff   : > { %v7630_v50 = vadd.f32 %v5569_v30, %v3658_v28  ;;  %v5460_v53 = vadd.f32 %v5459_v60, %v5458_v38  ;;  %v5572_v14 = vadd.f32 %v5571_v5, %v5570_v56  ;;  %v6591_v30 = vld [vmem:[%s6725_s9 + $0x30c] ss:$72 sps:$4 sm:$0xff]  }
 0x200   : > { %v5461_v45 = vpop.f32.mrf.mxu1  ;;  %v5573_v36 = vpop.f32.mrf.mxu0  ;;  %v6594_v38 = vld [vmem:[%s6725_s9 + $0x314] ss:$72 sps:$4 sm:$0xff]  }
 0x201   : > { %v3663_v47 = vadd.f32 %v5460_v53, %v7465_v49 }
 0x202   : > { %v5462_v20 = vpop.f32.mrf.mxu1  ;;  %v5574_v17 = vpop.f32.mrf.mxu0 }
 0x203   : > { %v7637_v9 = vadd.f32 %v5572_v14, %v3663_v47  ;;  %v5463_v8 = vadd.f32 %v5462_v20, %v5461_v45  ;;  %v5575_v11 = vadd.f32 %v5574_v17, %v5573_v36  ;;  %v6589_v20 = vld [vmem:[%s6725_s9 + $0x308] ss:$72 sps:$4 sm:$0xff]  }
 0x204   : > { %v5464_v19 = vpop.f32.mrf.mxu1  ;;  %v5576_v35 = vpop.f32.mrf.mxu0  ;;  %4249 = vmatmul.mubr.bf16.gmra.mxu1 %v6577_v3  ;;  %4410 = vmatmul.mubr.bf16.gmra.mxu0 %v6580_v1  ;;  %v6592_v17 = vld [vmem:[%s6725_s9 + $0x310] ss:$72 sps:$4 sm:$0xff]  }
 0x205   : > { %v3666_v15 = vadd.f32 %v5463_v8, %v7480_v7  ;;  %4256 = vmatprep.mubr.bf16.mxu1 %v6585_v39  ;;  %4417 = vmatprep.mubr.bf16.mxu0 %v6588_v57 }
 0x206   : > { %v5465_v49 = vpop.f32.mrf.mxu1  ;;  %v5577_v24 = vpop.f32.mrf.mxu0 }
 0x207   : > { %v7640_v16 = vadd.f32 %v5575_v11, %v3666_v15  ;;  %v5466_v44 = vadd.f32 %v5465_v49, %v5464_v19  ;;  %v5578_v54 = vadd.f32 %v5577_v24, %v5576_v35  ;;  %v6597_v11 = vld [vmem:[%s6725_s9 + $0x39c] ss:$72 sps:$4 sm:$0xff]  }
 0x208   : > { %v5467_v31 = vpop.f32.mrf.mxu1  ;;  %v5579_v34 = vpop.f32.mrf.mxu0  ;;  %v6600_v19 = vld [vmem:[%s6725_s9 + $0x3a4] ss:$72 sps:$4 sm:$0xff]  }
 0x209   : > { %v3671_v32 = vadd.f32 %v5466_v44, %v7487_v33 }
 0x20a   : > { %v5468_v56 = vpop.f32.mrf.mxu1  ;;  %v5580_v28 = vpop.f32.mrf.mxu0 }
 0x20b   : > { %v7647_v60 = vadd.f32 %v5578_v54, %v3671_v32  ;;  %v5469_v7 = vadd.f32 %v5468_v56, %v5467_v31  ;;  %v5581_v5 = vadd.f32 %v5580_v28, %v5579_v34  ;;  %v6595_v56 = vld [vmem:[%s6725_s9 + $0x398] ss:$72 sps:$4 sm:$0xff]  }
 0x20c   : > { %v5470_v53 = vpop.f32.mrf.mxu1  ;;  %v5582_v14 = vpop.f32.mrf.mxu0  ;;  %4257 = vmatmul.mubr.bf16.gmra.mxu1 %v6583_v40  ;;  %4418 = vmatmul.mubr.bf16.gmra.mxu0 %v6586_v10  ;;  %v6598_v28 = vld [vmem:[%s6725_s9 + $0x3a0] ss:$72 sps:$4 sm:$0xff]  }
 0x20d   : > { %v3674_v45 = vadd.f32 %v5469_v7, %v7490_v42  ;;  %4264 = vmatprep.mubr.bf16.mxu1 %v6591_v30  ;;  %4425 = vmatprep.mubr.bf16.mxu0 %v6594_v38 }
 0x20e   : > { %v5471_v33 = vpop.f32.mrf.mxu1  ;;  %v5583_v36 = vpop.f32.mrf.mxu0 }
 0x20f   : > { %v7650_v3 = vadd.f32 %v5581_v5, %v3674_v45  ;;  %v5472_v1 = vadd.f32 %v5471_v33, %v5470_v53  ;;  %v5584_v47 = vadd.f32 %v5583_v36, %v5582_v14  ;;  %v6603_v5 = vld [vmem:[%s6725_s9 + $0x42c] ss:$72 sps:$4 sm:$0xff]  }
 0x210   : > { %v5473_v39 = vpop.f32.mrf.mxu1  ;;  %v5585_v57 = vpop.f32.mrf.mxu0  ;;  %v6606_v53 = vld [vmem:[%s6725_s9 + $0x434] ss:$72 sps:$4 sm:$0xff]  }
 0x211   : > { %v3679_v8 = vadd.f32 %v5472_v1, %v7497_v4 }
 0x212   : > { %v5474_v35 = vpop.f32.mrf.mxu1  ;;  %v5586_v15 = vpop.f32.mrf.mxu0 }
 0x213   : > { %v7657_v49 = vadd.f32 %v5584_v47, %v3679_v8  ;;  %v5475_v42 = vadd.f32 %v5474_v35, %v5473_v39  ;;  %v5587_v24 = vadd.f32 %v5586_v15, %v5585_v57  ;;  %v6601_v35 = vld [vmem:[%s6725_s9 + $0x428] ss:$72 sps:$4 sm:$0xff]  }
 0x214   : > { %v5476_v44 = vpop.f32.mrf.mxu1  ;;  %v5588_v54 = vpop.f32.mrf.mxu0  ;;  %4265 = vmatmul.mubr.bf16.gmra.mxu1 %v6589_v20  ;;  %4426 = vmatmul.mubr.bf16.gmra.mxu0 %v6592_v17  ;;  %v6604_v15 = vld [vmem:[%s6725_s9 + $0x430] ss:$72 sps:$4 sm:$0xff]  }
 0x215   : > { %v3682_v31 = vadd.f32 %v5475_v42, %v7500_v59  ;;  %4272 = vmatprep.mubr.bf16.mxu1 %v6597_v11  ;;  %4433 = vmatprep.mubr.bf16.mxu0 %v6600_v19 }
 0x216   : > { %v5477_v4 = vpop.f32.mrf.mxu1  ;;  %v5589_v34 = vpop.f32.mrf.mxu0 }
 0x217   : > { %v7660_v40 = vadd.f32 %v5587_v24, %v3682_v31  ;;  %v5478_v10 = vadd.f32 %v5477_v4, %v5476_v44  ;;  %v5590_v32 = vadd.f32 %v5589_v34, %v5588_v54  ;;  %v6609_v24 = vld [vmem:[%s6725_s9 + $0x4bc] ss:$72 sps:$4 sm:$0xff]  }
 0x218   : > { %v5479_v30 = vpop.f32.mrf.mxu1  ;;  %v5591_v38 = vpop.f32.mrf.mxu0  ;;  %v6612_v44 = vld [vmem:[%s6725_s9 + $0x4c4] ss:$72 sps:$4 sm:$0xff]  }
 0x219   : > { %v3687_v7 = vadd.f32 %v5478_v10, %v7507_v58 }
 0x21a   : > { %v5480_v14 = vpop.f32.mrf.mxu1  ;;  %v5592_v45 = vpop.f32.mrf.mxu0 }
 0x21b   : > { %v7667_v33 = vadd.f32 %v5590_v32, %v3687_v7  ;;  %v5481_v59 = vadd.f32 %v5480_v14, %v5479_v30  ;;  %v5593_v36 = vadd.f32 %v5592_v45, %v5591_v38  ;;  %v6607_v14 = vld [vmem:[%s6725_s9 + $0x4b8] ss:$72 sps:$4 sm:$0xff]  }
 0x21c   : > { %v5482_v1 = vpop.f32.mrf.mxu1  ;;  %v5594_v47 = vpop.f32.mrf.mxu0  ;;  %4273 = vmatmul.mubr.bf16.gmra.mxu1 %v6595_v56  ;;  %4434 = vmatmul.mubr.bf16.gmra.mxu0 %v6598_v28  ;;  %v6610_v45 = vld [vmem:[%s6725_s9 + $0x4c0] ss:$72 sps:$4 sm:$0xff]  }
 0x21d   : > { %v3690_v39 = vadd.f32 %v5481_v59, %v7510_v63  ;;  %4280 = vmatprep.mubr.bf16.mxu1 %v6603_v5  ;;  %4441 = vmatprep.mubr.bf16.mxu0 %v6606_v53 }
 0x21e   : > { %v5483_v58 = vpop.f32.mrf.mxu1  ;;  %v5595_v57 = vpop.f32.mrf.mxu0 }
 0x21f   : > { %v7670_v20 = vadd.f32 %v5593_v36, %v3690_v39  ;;  %v5484_v17 = vadd.f32 %v5483_v58, %v5482_v1  ;;  %v5596_v8 = vadd.f32 %v5595_v57, %v5594_v47  ;;  %v6615_v36 = vld [vmem:[%s6725_s9 + $0x54c] ss:$72 sps:$4 sm:$0xff]  }
 0x220   : > { %v5485_v11 = vpop.f32.mrf.mxu1  ;;  %v5597_v19 = vpop.f32.mrf.mxu0  ;;  %v6618_v1 = vld [vmem:[%s6725_s9 + $0x554] ss:$72 sps:$4 sm:$0xff]  }
 0x221   : > { %v3695_v42 = vadd.f32 %v5484_v17, %v7517_v51 }
 0x222   : > { %v5486_v54 = vpop.f32.mrf.mxu1  ;;  %v5598_v31 = vpop.f32.mrf.mxu0 }
 0x223   : > { %v7677_v4 = vadd.f32 %v5596_v8, %v3695_v42  ;;  %v5487_v63 = vadd.f32 %v5486_v54, %v5485_v11  ;;  %v5599_v34 = vadd.f32 %v5598_v31, %v5597_v19  ;;  %v6613_v54 = vld [vmem:[%s6725_s9 + $0x548] ss:$72 sps:$4 sm:$0xff]  }
 0x224   : > { %v5488_v10 = vpop.f32.mrf.mxu1  ;;  %v5600_v32 = vpop.f32.mrf.mxu0  ;;  %4281 = vmatmul.mubr.bf16.gmra.mxu1 %v6601_v35  ;;  %4442 = vmatmul.mubr.bf16.gmra.mxu0 %v6604_v15  ;;  %v6616_v31 = vld [vmem:[%s6725_s9 + $0x550] ss:$72 sps:$4 sm:$0xff]  }
 0x225   : > { %v3698_v30 = vadd.f32 %v5487_v63, %v7520_v29  ;;  %4288 = vmatprep.mubr.bf16.mxu1 %v6609_v24  ;;  %4449 = vmatprep.mubr.bf16.mxu0 %v6612_v44 }
 0x226   : > { %v5489_v51 = vpop.f32.mrf.mxu1  ;;  %v5601_v38 = vpop.f32.mrf.mxu0 }
 0x227   : > { %v7680_v56 = vadd.f32 %v5599_v34, %v3698_v30  ;;  %v5490_v28 = vadd.f32 %v5489_v51, %v5488_v10  ;;  %v5602_v7 = vadd.f32 %v5601_v38, %v5600_v32  ;;  %v6621_v34 = vld [vmem:[%s6725_s9 + $0x5dc] ss:$72 sps:$4 sm:$0xff]  }
 0x228   : > { %v5491_v5 = vpop.f32.mrf.mxu1  ;;  %v5603_v53 = vpop.f32.mrf.mxu0  ;;  %v6624_v10 = vld [vmem:[%s6725_s9 + $0x5e4] ss:$72 sps:$4 sm:$0xff]  }
 0x229   : > { %v3703_v59 = vadd.f32 %v5490_v28, %v7527_v12 }
 0x22a   : > { %v5492_v47 = vpop.f32.mrf.mxu1  ;;  %v5604_v39 = vpop.f32.mrf.mxu0 }
 0x22b   : > { %v7687_v58 = vadd.f32 %v5602_v7, %v3703_v59  ;;  %v5493_v29 = vadd.f32 %v5492_v47, %v5491_v5  ;;  %v5605_v57 = vadd.f32 %v5604_v39, %v5603_v53  ;;  %v6619_v47 = vld [vmem:[%s6725_s9 + $0x5d8] ss:$72 sps:$4 sm:$0xff]  }
 0x22c   : > { %v5622_v17 = vpop.f32.mrf.mxu1  ;;  %v5734_v8 = vpop.f32.mrf.mxu0  ;;  %4289 = vmatmul.mubr.bf16.gmra.mxu1 %v6607_v14  ;;  %4450 = vmatmul.mubr.bf16.gmra.mxu0 %v6610_v45  ;;  %v6622_v39 = vld [vmem:[%s6725_s9 + $0x5e0] ss:$72 sps:$4 sm:$0xff]  }
 0x22d   : > { %v3706_v11 = vadd.f32 %v5493_v29, %v7530_v6  ;;  %4296 = vmatprep.mubr.bf16.mxu1 %v6615_v36  ;;  %4457 = vmatprep.mubr.bf16.mxu0 %v6618_v1 }
 0x22e   : > { %v5623_v12 = vpop.f32.mrf.mxu1  ;;  %v5735_v19 = vpop.f32.mrf.mxu0 }
 0x22f   : > { %v7690_v35 = vadd.f32 %v5605_v57, %v3706_v11  ;;  %v5624_v15 = vadd.f32 %v5623_v12, %v5622_v17  ;;  %v5736_v42 = vadd.f32 %v5735_v19, %v5734_v8  ;;  %v6627_v57 = vld [vmem:[%s6725_s9 + $0x66c] ss:$72 sps:$4 sm:$0xff]  }
 0x230   : > { %v5625_v24 = vpop.f32.mrf.mxu1  ;;  %v5737_v44 = vpop.f32.mrf.mxu0  ;;  %v6630_v17 = vld [vmem:[%s6725_s9 + $0x674] ss:$72 sps:$4 sm:$0xff]  }
 0x231   : > { %v3905_v63 = vadd.f32 %v5624_v15, %v7537_v37 }
 0x232   : > { %v5626_v32 = vpop.f32.mrf.mxu1  ;;  %v5738_v30 = vpop.f32.mrf.mxu0 }
 0x233   : > { %v7697_v51 = vadd.f32 %v5736_v42, %v3905_v63  ;;  %v5627_v6 = vadd.f32 %v5626_v32, %v5625_v24  ;;  %v5739_v38 = vadd.f32 %v5738_v30, %v5737_v44  ;;  %v6625_v32 = vld [vmem:[%s6725_s9 + $0x668] ss:$72 sps:$4 sm:$0xff]  }
 0x234   : > { %v5628_v28 = vpop.f32.mrf.mxu1  ;;  %v5740_v7 = vpop.f32.mrf.mxu0  ;;  %4297 = vmatmul.mubr.bf16.gmra.mxu1 %v6613_v54  ;;  %4458 = vmatmul.mubr.bf16.gmra.mxu0 %v6616_v31  ;;  %v6628_v30 = vld [vmem:[%s6725_s9 + $0x670] ss:$72 sps:$4 sm:$0xff]  }
 0x235   : > { %v3908_v5 = vadd.f32 %v5627_v6, %v7540_v0  ;;  %4304 = vmatprep.mubr.bf16.mxu1 %v6621_v34  ;;  %4465 = vmatprep.mubr.bf16.mxu0 %v6624_v10 }
 0x236   : > { %v5629_v37 = vpop.f32.mrf.mxu1  ;;  %v5741_v53 = vpop.f32.mrf.mxu0 }
 0x237   : > { %v7700_v14 = vadd.f32 %v5739_v38, %v3908_v5  ;;  %v5630_v45 = vadd.f32 %v5629_v37, %v5628_v28  ;;  %v5742_v59 = vadd.f32 %v5741_v53, %v5740_v7  ;;  %v6633_v38 = vld [vmem:[%s6725_s9 + $0x6fc] ss:$72 sps:$4 sm:$0xff]  }
 0x238   : > { %v5631_v36 = vpop.f32.mrf.mxu1  ;;  %v5743_v1 = vpop.f32.mrf.mxu0  ;;  %v6636_v28 = vld [vmem:[%s6725_s9 + $0x704] ss:$72 sps:$4 sm:$0xff]  }
 0x239   : > { %v3913_v29 = vadd.f32 %v5630_v45, %v7547_v2 }
 0x23a   : > { %v5632_v8 = vpop.f32.mrf.mxu1  ;;  %v5744_v11 = vpop.f32.mrf.mxu0 }
 0x23b   : > { %v7707_v12 = vadd.f32 %v5742_v59, %v3913_v29  ;;  %v5633_v0 = vadd.f32 %v5632_v8, %v5631_v36  ;;  %v5745_v19 = vadd.f32 %v5744_v11, %v5743_v1  ;;  %v6631_v8 = vld [vmem:[%s6725_s9 + $0x6f8] ss:$72 sps:$4 sm:$0xff]  }
 0x23c   : > { %v5634_v15 = vpop.f32.mrf.mxu1  ;;  %v5746_v42 = vpop.f32.mrf.mxu0  ;;  %4305 = vmatmul.mubr.bf16.gmra.mxu1 %v6619_v47  ;;  %4466 = vmatmul.mubr.bf16.gmra.mxu0 %v6622_v39  ;;  %v6634_v11 = vld [vmem:[%s6725_s9 + $0x700] ss:$72 sps:$4 sm:$0xff]  }
 0x23d   : > { %v3916_v24 = vadd.f32 %v5633_v0, %v7550_v13  ;;  %4312 = vmatprep.mubr.bf16.mxu1 %v6627_v57  ;;  %4473 = vmatprep.mubr.bf16.mxu0 %v6630_v17 }
 0x23e   : > { %v5635_v2 = vpop.f32.mrf.mxu1  ;;  %v5747_v44 = vpop.f32.mrf.mxu0 }
 0x23f   : > { %v7710_v54 = vadd.f32 %v5745_v19, %v3916_v24  ;;  %v5636_v31 = vadd.f32 %v5635_v2, %v5634_v15  ;;  %v5748_v63 = vadd.f32 %v5747_v44, %v5746_v42  ;;  %v6639_v19 = vld [vmem:[%s6725_s9 + $0x78c] ss:$72 sps:$4 sm:$0xff]  }
 0x240   : > { %v5637_v34 = vpop.f32.mrf.mxu1  ;;  %v5749_v10 = vpop.f32.mrf.mxu0  ;;  %v6642_v15 = vld [vmem:[%s6725_s9 + $0x794] ss:$72 sps:$4 sm:$0xff]  }
 0x241   : > { %v3921_v6 = vadd.f32 %v5636_v31, %v7557_v48 }
 0x242   : > { %v5638_v7 = vpop.f32.mrf.mxu1  ;;  %v5750_v5 = vpop.f32.mrf.mxu0 }
 0x243   : > { %v7717_v37 = vadd.f32 %v5748_v63, %v3921_v6  ;;  %v5639_v13 = vadd.f32 %v5638_v7, %v5637_v34  ;;  %v5751_v53 = vadd.f32 %v5750_v5, %v5749_v10  ;;  %v6637_v7 = vld [vmem:[%s6725_s9 + $0x788] ss:$72 sps:$4 sm:$0xff]  }
 0x244   : > { %v5640_v45 = vpop.f32.mrf.mxu1  ;;  %v5752_v59 = vpop.f32.mrf.mxu0  ;;  %4313 = vmatmul.mubr.bf16.gmra.mxu1 %v6625_v32  ;;  %4474 = vmatmul.mubr.bf16.gmra.mxu0 %v6628_v30  ;;  %v6640_v5 = vld [vmem:[%s6725_s9 + $0x790] ss:$72 sps:$4 sm:$0xff]  }
 0x245   : > { %v3924_v36 = vadd.f32 %v5639_v13, %v7560_v25  ;;  %4320 = vmatprep.mubr.bf16.mxu1 %v6633_v38  ;;  %4481 = vmatprep.mubr.bf16.mxu0 %v6636_v28 }
 0x246   : > { %v5641_v48 = vpop.f32.mrf.mxu1  ;;  %v5753_v1 = vpop.f32.mrf.mxu0 }
 0x247   : > { %v7720_v47 = vadd.f32 %v5751_v53, %v3924_v36  ;;  %v5642_v39 = vadd.f32 %v5641_v48, %v5640_v45  ;;  %v5754_v29 = vadd.f32 %v5753_v1, %v5752_v59  ;;  %v6645_v53 = vld [vmem:[%s6725_s9 + $0x81c] ss:$72 sps:$4 sm:$0xff]  }
 0x248   : > { %v5643_v57 = vpop.f32.mrf.mxu1  ;;  %v5755_v17 = vpop.f32.mrf.mxu0  ;;  %v6648_v45 = vld [vmem:[%s6725_s9 + $0x824] ss:$72 sps:$4 sm:$0xff]  }
 0x249   : > { %v3929_v0 = vadd.f32 %v5642_v39, %v7567_v27 }
 0x24a   : > { %v5644_v42 = vpop.f32.mrf.mxu1  ;;  %v5756_v24 = vpop.f32.mrf.mxu0 }
 0x24b   : > { %v7727_v2 = vadd.f32 %v5754_v29, %v3929_v0  ;;  %v5645_v25 = vadd.f32 %v5644_v42, %v5643_v57  ;;  %v5757_v44 = vadd.f32 %v5756_v24, %v5755_v17  ;;  %v6643_v42 = vld [vmem:[%s6725_s9 + $0x818] ss:$72 sps:$4 sm:$0xff]  }
 0x24c   : > { %v5646_v31 = vpop.f32.mrf.mxu1  ;;  %v5758_v63 = vpop.f32.mrf.mxu0  ;;  %4321 = vmatmul.mubr.bf16.gmra.mxu1 %v6631_v8  ;;  %4482 = vmatmul.mubr.bf16.gmra.mxu0 %v6634_v11  ;;  %v6646_v24 = vld [vmem:[%s6725_s9 + $0x820] ss:$72 sps:$4 sm:$0xff]  }
 0x24d   : > { %v3932_v34 = vadd.f32 %v5645_v25, %v7570_v52  ;;  %4328 = vmatprep.mubr.bf16.mxu1 %v6639_v19  ;;  %4489 = vmatprep.mubr.bf16.mxu0 %v6642_v15 }
 0x24e   : > { %v5647_v27 = vpop.f32.mrf.mxu1  ;;  %v5759_v10 = vpop.f32.mrf.mxu0 }
 0x24f   : > { %v7730_v32 = vadd.f32 %v5757_v44, %v3932_v34  ;;  %v5648_v30 = vadd.f32 %v5647_v27, %v5646_v31  ;;  %v5760_v6 = vadd.f32 %v5759_v10, %v5758_v63  ;;  %v6651_v44 = vld [vmem:[%s6725_s9 + $0x8ac] ss:$72 sps:$4 sm:$0xff]  }
 0x250   : > { %v5649_v38 = vpop.f32.mrf.mxu1  ;;  %v5761_v28 = vpop.f32.mrf.mxu0  ;;  %v6654_v31 = vld [vmem:[%s6725_s9 + $0x8b4] ss:$72 sps:$4 sm:$0xff]  }
 0x251   : > { %v3937_v13 = vadd.f32 %v5648_v30, %v7577_v18 }
 0x252   : > { %v5650_v59 = vpop.f32.mrf.mxu1  ;;  %v5762_v36 = vpop.f32.mrf.mxu0 }
 0x253   : > { %v7737_v48 = vadd.f32 %v5760_v6, %v3937_v13  ;;  %v5651_v52 = vadd.f32 %v5650_v59, %v5649_v38  ;;  %v5763_v1 = vadd.f32 %v5762_v36, %v5761_v28  ;;  %v6649_v59 = vld [vmem:[%s6725_s9 + $0x8a8] ss:$72 sps:$4 sm:$0xff]  }
 0x254   : > { %v5652_v39 = vpop.f32.mrf.mxu1  ;;  %v5764_v29 = vpop.f32.mrf.mxu0  ;;  %4329 = vmatmul.mubr.bf16.gmra.mxu1 %v6637_v7  ;;  %4490 = vmatmul.mubr.bf16.gmra.mxu0 %v6640_v5  ;;  %v6652_v36 = vld [vmem:[%s6725_s9 + $0x8b0] ss:$72 sps:$4 sm:$0xff]   ;;  %s4610_s9 = sshll.u32 %s7892_s16, 3 }
 0x255   : > { %v3940_v57 = vadd.f32 %v5651_v52, %v7580_v55  ;;  %4336 = vmatprep.mubr.bf16.mxu1 %v6645_v53  ;;  %4497 = vmatprep.mubr.bf16.mxu0 %v6648_v45  ;;  %s7819_s24 = scalar_lea.vmem %s7890_s3, %s4610_s9 }
 0x256   : > { %v5653_v18 = vpop.f32.mrf.mxu1  ;;  %v5765_v17 = vpop.f32.mrf.mxu0 }
 0x257   : > { %v7740_v8 = vadd.f32 %v5763_v1, %v3940_v57  ;;  %v5654_v11 = vadd.f32 %v5653_v18, %v5652_v39  ;;  %v5766_v0 = vadd.f32 %v5765_v17, %v5764_v29 }
 0x258   : > { %v5655_v19 = vpop.f32.mrf.mxu1  ;;  %v5767_v15 = vpop.f32.mrf.mxu0 }
 0x259   : > { %v3945_v25 = vadd.f32 %v5654_v11, %v7587_v43 }
 0x25a   : > { %v5656_v63 = vpop.f32.mrf.mxu1  ;;  %v5768_v34 = vpop.f32.mrf.mxu0 }
 0x25b   : > { %v7747_v27 = vadd.f32 %v5766_v0, %v3945_v25  ;;  %v5657_v55 = vadd.f32 %v5656_v63, %v5655_v19  ;;  %v5769_v10 = vadd.f32 %v5768_v34, %v5767_v15 }
 0x25c   : > { %v5658_v30 = vpop.f32.mrf.mxu1  ;;  %v5770_v6 = vpop.f32.mrf.mxu0  ;;  %4337 = vmatmul.mubr.bf16.gmra.mxu1 %v6643_v42  ;;  %4498 = vmatmul.mubr.bf16.gmra.mxu0 %v6646_v24 }
 0x25d   : > { %v3948_v38 = vadd.f32 %v5657_v55, %v7590_v26  ;;  %4344 = vmatprep.mubr.bf16.mxu1 %v6651_v44  ;;  %4505 = vmatprep.mubr.bf16.mxu0 %v6654_v31 }
 0x25e   : > { %v5659_v28 = vpop.f32.mrf.mxu1  ;;  %v5771_v43 = vpop.f32.mrf.mxu0 }
 0x25f   : > { %v7750_v7 = vadd.f32 %v5769_v10, %v3948_v38  ;;  %v5660_v5 = vadd.f32 %v5659_v28, %v5658_v30  ;;  %v5772_v13 = vadd.f32 %v5771_v43, %v5770_v6 }
 0x260   : > { %v5661_v53 = vpop.f32.mrf.mxu1  ;;  %v5773_v45 = vpop.f32.mrf.mxu0 }
 0x261   : > { %v3953_v52 = vadd.f32 %v5660_v5, %v7597_v22 }
 0x262   : > { %v5662_v1 = vpop.f32.mrf.mxu1  ;;  %v5774_v39 = vpop.f32.mrf.mxu0 }
 0x263   : > { %v7755_v29 = vadd.f32 %v5772_v13, %v3953_v52  ;;  %v5663_v57 = vadd.f32 %v5662_v1, %v5661_v53  ;;  %v5775_v26 = vadd.f32 %v5774_v39, %v5773_v45 }
 0x264   : > { %v5664_v18 = vpop.f32.mrf.mxu1  ;;  %v5776_v17 = vpop.f32.mrf.mxu0  ;;  %4345 = vmatmul.mubr.bf16.gmra.mxu1 %v6649_v59  ;;  %4506 = vmatmul.mubr.bf16.gmra.mxu0 %v6652_v36 }
 0x265   : > { %v3956_v11 = vadd.f32 %v5663_v57, %v7600_v41 }
 0x266   : > { %v5665_v0 = vpop.f32.mrf.mxu1  ;;  %v5777_v19 = vpop.f32.mrf.mxu0 }
 0x267   : > { %v7758_v15 = vadd.f32 %v5775_v26, %v3956_v11  ;;  %v5666_v42 = vadd.f32 %v5665_v0, %v5664_v18  ;;  %v5778_v24 = vadd.f32 %v5777_v19, %v5776_v17 }
 0x268   : > { %v5667_v25 = vpop.f32.mrf.mxu1  ;;  %v5779_v22 = vpop.f32.mrf.mxu0 }
 0x269   : > { %v3961_v44 = vadd.f32 %v5666_v42, %v7607_v61 }
 0x26a   : > { %v5668_v31 = vpop.f32.mrf.mxu1  ;;  %v5780_v63 = vpop.f32.mrf.mxu0 }
 0x26b   : > { %v7761_v34 = vadd.f32 %v5778_v24, %v3961_v44  ;;  %v5669_v55 = vadd.f32 %v5668_v31, %v5667_v25  ;;  %v5781_v10 = vadd.f32 %v5780_v63, %v5779_v22 }
 0x26c   : > { %v5670_v30 = vpop.f32.mrf.mxu1  ;;  %v5782_v6 = vpop.f32.mrf.mxu0 }
 0x26d   : > { %v3964_v41 = vadd.f32 %v5669_v55, %v7610_v62 }
 0x26e   : > { %v5671_v38 = vpop.f32.mrf.mxu1  ;;  %v5783_v28 = vpop.f32.mrf.mxu0 }
 0x26f   : > { %v7764_v43 = vadd.f32 %v5781_v10, %v3964_v41  ;;  %v5672_v5 = vadd.f32 %v5671_v38, %v5670_v30  ;;  %v5784_v13 = vadd.f32 %v5783_v28, %v5782_v6 }
 0x270   : > { %v5673_v53 = vpop.f32.mrf.mxu1  ;;  %v5785_v45 = vpop.f32.mrf.mxu0 }
 0x271   : > { %v3969_v61 = vadd.f32 %v5672_v5, %v7617_v46 }
 0x272   : > { %v5674_v59 = vpop.f32.mrf.mxu1  ;;  %v5786_v36 = vpop.f32.mrf.mxu0 }
 0x273   : > { %v7767_v52 = vadd.f32 %v5784_v13, %v3969_v61  ;;  %v5675_v1 = vadd.f32 %v5674_v59, %v5673_v53  ;;  %v5787_v39 = vadd.f32 %v5786_v36, %v5785_v45 }
 0x274   : > { %v5676_v57 = vpop.f32.mrf.mxu1  ;;  %v5788_v26 = vpop.f32.mrf.mxu0 }
 0x275   : > { %v3972_v62 = vadd.f32 %v5675_v1, %v7620_v23 }
 0x276   : > { %v5677_v18 = vpop.f32.mrf.mxu1  ;;  %v5789_v17 = vpop.f32.mrf.mxu0 }
 0x277   : > { %v7770_v11 = vadd.f32 %v5787_v39, %v3972_v62  ;;  %v5678_v0 = vadd.f32 %v5677_v18, %v5676_v57  ;;  %v5790_v19 = vadd.f32 %v5789_v17, %v5788_v26 }
 0x278   : > { %v5679_v42 = vpop.f32.mrf.mxu1  ;;  %v5791_v24 = vpop.f32.mrf.mxu0 }
 0x279   : > { %v3977_v46 = vadd.f32 %v5678_v0, %v7627_v21 }
 0x27a   : > { %v5680_v25 = vpop.f32.mrf.mxu1  ;;  %v5792_v22 = vpop.f32.mrf.mxu0 }
 0x27b   : > { %v7773_v44 = vadd.f32 %v5790_v19, %v3977_v46  ;;  %v5681_v31 = vadd.f32 %v5680_v25, %v5679_v42  ;;  %v5793_v63 = vadd.f32 %v5792_v22, %v5791_v24 }
 0x27c   : > { %v5682_v55 = vpop.f32.mrf.mxu1  ;;  %v5794_v10 = vpop.f32.mrf.mxu0 }
 0x27d   : > { %v3980_v23 = vadd.f32 %v5681_v31, %v7630_v50 }
 0x27e   : > { %v5683_v30 = vpop.f32.mrf.mxu1  ;;  %v5795_v6 = vpop.f32.mrf.mxu0 }
 0x27f   : > { %v7776_v41 = vadd.f32 %v5793_v63, %v3980_v23  ;;  %v5684_v38 = vadd.f32 %v5683_v30, %v5682_v55  ;;  %v5796_v28 = vadd.f32 %v5795_v6, %v5794_v10 }
 0x280   : > { %v5685_v5 = vpop.f32.mrf.mxu1  ;;  %v5797_v13 = vpop.f32.mrf.mxu0 }
 0x281   : > { %v3985_v21 = vadd.f32 %v5684_v38, %v7637_v9 }
 0x282   : > { %v5686_v53 = vpop.f32.mrf.mxu1  ;;  %v5798_v45 = vpop.f32.mrf.mxu0 }
 0x283   : > { %v7779_v61 = vadd.f32 %v5796_v28, %v3985_v21  ;;  %v5687_v59 = vadd.f32 %v5686_v53, %v5685_v5  ;;  %v5799_v36 = vadd.f32 %v5798_v45, %v5797_v13 }
 0x284   : > { %v5688_v1 = vpop.f32.mrf.mxu1  ;;  %v5800_v39 = vpop.f32.mrf.mxu0 }
 0x285   : > { %v3988_v50 = vadd.f32 %v5687_v59, %v7640_v16 }
 0x286   : > { %v5689_v57 = vpop.f32.mrf.mxu1  ;;  %v5801_v26 = vpop.f32.mrf.mxu0 }
 0x287   : > { %v7782_v62 = vadd.f32 %v5799_v36, %v3988_v50  ;;  %v5690_v18 = vadd.f32 %v5689_v57, %v5688_v1  ;;  %v5802_v17 = vadd.f32 %v5801_v26, %v5800_v39 }
 0x288   : > { %v5691_v0 = vpop.f32.mrf.mxu1  ;;  %v5803_v19 = vpop.f32.mrf.mxu0 }
 0x289   : > { %v3993_v9 = vadd.f32 %v5690_v18, %v7647_v60 }
 0x28a   : > { %v5692_v42 = vpop.f32.mrf.mxu1  ;;  %v5804_v24 = vpop.f32.mrf.mxu0 }
 0x28b   : > { %v7785_v46 = vadd.f32 %v5802_v17, %v3993_v9  ;;  %v5693_v25 = vadd.f32 %v5692_v42, %v5691_v0  ;;  %v5805_v22 = vadd.f32 %v5804_v24, %v5803_v19 }
 0x28c   : > { %v5694_v31 = vpop.f32.mrf.mxu1  ;;  %v5806_v63 = vpop.f32.mrf.mxu0 }
 0x28d   : > { %v3996_v16 = vadd.f32 %v5693_v25, %v7650_v3 }
 0x28e   : > { %v5695_v55 = vpop.f32.mrf.mxu1  ;;  %v5807_v10 = vpop.f32.mrf.mxu0 }
 0x28f   : > { %v7788_v23 = vadd.f32 %v5805_v22, %v3996_v16  ;;  %v5696_v30 = vadd.f32 %v5695_v55, %v5694_v31  ;;  %v5808_v6 = vadd.f32 %v5807_v10, %v5806_v63 }
 0x290   : > { %v5697_v38 = vpop.f32.mrf.mxu1  ;;  %v5809_v28 = vpop.f32.mrf.mxu0 }
 0x291   : > { %v4001_v60 = vadd.f32 %v5696_v30, %v7657_v49 }
 0x292   : > { %v5698_v5 = vpop.f32.mrf.mxu1  ;;  %v5810_v13 = vpop.f32.mrf.mxu0 }
 0x293   : > { %v7791_v21 = vadd.f32 %v5808_v6, %v4001_v60  ;;  %v5699_v53 = vadd.f32 %v5698_v5, %v5697_v38  ;;  %v5811_v45 = vadd.f32 %v5810_v13, %v5809_v28 }
 0x294   : > { %v5700_v59 = vpop.f32.mrf.mxu1  ;;  %v5812_v36 = vpop.f32.mrf.mxu0 }
 0x295   : > { %v4004_v3 = vadd.f32 %v5699_v53, %v7660_v40 }
 0x296   : > { %v5701_v1 = vpop.f32.mrf.mxu1  ;;  %v5813_v39 = vpop.f32.mrf.mxu0 }
 0x297   : > { %v7794_v50 = vadd.f32 %v5811_v45, %v4004_v3  ;;  %v5702_v57 = vadd.f32 %v5701_v1, %v5700_v59  ;;  %v5814_v26 = vadd.f32 %v5813_v39, %v5812_v36 }
 0x298   : > { %v5703_v18 = vpop.f32.mrf.mxu1  ;;  %v5815_v17 = vpop.f32.mrf.mxu0 }
 0x299   : > { %v4009_v49 = vadd.f32 %v5702_v57, %v7667_v33 }
 0x29a   : > { %v5704_v0 = vpop.f32.mrf.mxu1  ;;  %v5816_v19 = vpop.f32.mrf.mxu0 }
 0x29b   : > { %v7797_v9 = vadd.f32 %v5814_v26, %v4009_v49  ;;  %v5705_v42 = vadd.f32 %v5704_v0, %v5703_v18  ;;  %v5817_v24 = vadd.f32 %v5816_v19, %v5815_v17 }
 0x29c   : > { %v5706_v25 = vpop.f32.mrf.mxu1  ;;  %v5818_v22 = vpop.f32.mrf.mxu0 }
 0x29d   : > { %v4012_v40 = vadd.f32 %v5705_v42, %v7670_v20 }
 0x29e   : > { %v5707_v31 = vpop.f32.mrf.mxu1  ;;  %v5819_v63 = vpop.f32.mrf.mxu0 }
 0x29f   : > { %v7800_v16 = vadd.f32 %v5817_v24, %v4012_v40  ;;  %v5708_v55 = vadd.f32 %v5707_v31, %v5706_v25  ;;  %v5820_v10 = vadd.f32 %v5819_v63, %v5818_v22 }
 0x2a0   : > { %v5709_v30 = vpop.f32.mrf.mxu1  ;;  %v5821_v6 = vpop.f32.mrf.mxu0 }
 0x2a1   : > { %v4017_v33 = vadd.f32 %v5708_v55, %v7677_v4 }
 0x2a2   : > { %v5710_v38 = vpop.f32.mrf.mxu1  ;;  %v5822_v28 = vpop.f32.mrf.mxu0 }
 0x2a3   : > { %v7803_v60 = vadd.f32 %v5820_v10, %v4017_v33  ;;  %v5711_v5 = vadd.f32 %v5710_v38, %v5709_v30  ;;  %v5823_v13 = vadd.f32 %v5822_v28, %v5821_v6 }
 0x2a4   : > { %v5712_v53 = vpop.f32.mrf.mxu1  ;;  %v5824_v45 = vpop.f32.mrf.mxu0 }
 0x2a5   : > { %v4020_v20 = vadd.f32 %v5711_v5, %v7680_v56 }
 0x2a6   : > { %v5713_v59 = vpop.f32.mrf.mxu1  ;;  %v5825_v36 = vpop.f32.mrf.mxu0 }
 0x2a7   : > { %v7806_v3 = vadd.f32 %v5823_v13, %v4020_v20  ;;  %v5714_v1 = vadd.f32 %v5713_v59, %v5712_v53  ;;  %v5826_v39 = vadd.f32 %v5825_v36, %v5824_v45 }
 0x2a8   : > { %v5715_v57 = vpop.f32.mrf.mxu1  ;;  %v5827_v26 = vpop.f32.mrf.mxu0 }
 0x2a9   : > { %v4025_v4 = vadd.f32 %v5714_v1, %v7687_v58 }
 0x2aa   : > { %v5716_v18 = vpop.f32.mrf.mxu1  ;;  %v5828_v17 = vpop.f32.mrf.mxu0 }
 0x2ab   : > { %v7809_v49 = vadd.f32 %v5826_v39, %v4025_v4  ;;  %v5717_v0 = vadd.f32 %v5716_v18, %v5715_v57  ;;  %v5829_v19 = vadd.f32 %v5828_v17, %v5827_v26 }
 0x2ac   : > { %v5846_v42 = vpop.f32.mrf.mxu1  ;;  %v5958_v24 = vpop.f32.mrf.mxu0 }
 0x2ad   : > { %v4028_v56 = vadd.f32 %v5717_v0, %v7690_v35 }
 0x2ae   : > { %v5847_v25 = vpop.f32.mrf.mxu1  ;;  %v5959_v22 = vpop.f32.mrf.mxu0 }
 0x2af   : > { %v7812_v40 = vadd.f32 %v5829_v19, %v4028_v56  ;;  %v5848_v31 = vadd.f32 %v5847_v25, %v5846_v42  ;;  %v5960_v10 = vadd.f32 %v5959_v22, %v5958_v24 }
 0x2b0   : > { %v5849_v63 = vpop.f32.mrf.mxu1  ;;  %v5961_v55 = vpop.f32.mrf.mxu0 }
 0x2b1   : > { %v4227_v58 = vadd.f32 %v5848_v31, %v7697_v51 }
 0x2b2   : > { %v5850_v30 = vpop.f32.mrf.mxu1  ;;  %v5962_v35 = vpop.f32.mrf.mxu0 }
 0x2b3   : > { %v4388_v6 = vadd.f32 %v5960_v10, %v4227_v58  ;;  %v5851_v33 = vadd.f32 %v5850_v30, %v5849_v63  ;;  %v5963_v13 = vadd.f32 %v5962_v35, %v5961_v55 }
 0x2b4   : > { %v5852_v38 = vpop.f32.mrf.mxu1  ;;  %v5964_v28 = vpop.f32.mrf.mxu0 }
 0x2b5   : > { %4514 = vst [vmem:[%s7819_s24] sm:$0xff] %v4388_v6  ;;  %v4230_v5 = vadd.f32 %v5851_v33, %v7700_v14 }
 0x2b6   : > { %v5853_v51 = vpop.f32.mrf.mxu1  ;;  %v5965_v53 = vpop.f32.mrf.mxu0 }
 0x2b7   : > { %v4391_v45 = vadd.f32 %v5963_v13, %v4230_v5  ;;  %v5854_v20 = vadd.f32 %v5853_v51, %v5852_v38  ;;  %v5966_v39 = vadd.f32 %v5965_v53, %v5964_v28 }
 0x2b8   : > { %v5855_v59 = vpop.f32.mrf.mxu1  ;;  %v5967_v36 = vpop.f32.mrf.mxu0 }
 0x2b9   : > { %4515 = vst [vmem:[%s7819_s24 + $0x8] sm:$0xff] %v4391_v45  ;;  %v4235_v1 = vadd.f32 %v5854_v20, %v7707_v12 }
 0x2ba   : > { %v5856_v57 = vpop.f32.mrf.mxu1  ;;  %v5968_v26 = vpop.f32.mrf.mxu0 }
 0x2bb   : > { %v4396_v4 = vadd.f32 %v5966_v39, %v4235_v1  ;;  %v5857_v18 = vadd.f32 %v5856_v57, %v5855_v59  ;;  %v5969_v19 = vadd.f32 %v5968_v26, %v5967_v36 }
 0x2bc   : > { %v5858_v17 = vpop.f32.mrf.mxu1  ;;  %v5970_v0 = vpop.f32.mrf.mxu0 }
 0x2bd   : > { %4516 = vst [vmem:[%s7819_s24 + $0x10] sm:$0xff] %v4396_v4  ;;  %v4238_v14 = vadd.f32 %v5857_v18, %v7710_v54 }
 0x2be   : > { %v5859_v42 = vpop.f32.mrf.mxu1  ;;  %v5971_v24 = vpop.f32.mrf.mxu0 }
 0x2bf   : > { %v4399_v56 = vadd.f32 %v5969_v19, %v4238_v14  ;;  %v5860_v25 = vadd.f32 %v5859_v42, %v5858_v17  ;;  %v5972_v63 = vadd.f32 %v5971_v24, %v5970_v0 }
 0x2c0   : > { %v5861_v22 = vpop.f32.mrf.mxu1  ;;  %v5973_v31 = vpop.f32.mrf.mxu0 }
 0x2c1   : > { %4517 = vst [vmem:[%s7819_s24 + $0x18] sm:$0xff] %v4399_v56  ;;  %v4243_v12 = vadd.f32 %v5860_v25, %v7717_v37 }
 0x2c2   : > { %v5862_v55 = vpop.f32.mrf.mxu1  ;;  %v5974_v58 = vpop.f32.mrf.mxu0 }
 0x2c3   : > { %v4404_v10 = vadd.f32 %v5972_v63, %v4243_v12  ;;  %v5863_v30 = vadd.f32 %v5862_v55, %v5861_v22  ;;  %v5975_v33 = vadd.f32 %v5974_v58, %v5973_v31 }
 0x2c4   : > { %v5864_v35 = vpop.f32.mrf.mxu1  ;;  %v5976_v6 = vpop.f32.mrf.mxu0 }
 0x2c5   : > { %4518 = vst [vmem:[%s7819_s24 + $0x20] sm:$0xff] %v4404_v10  ;;  %v4246_v54 = vadd.f32 %v5863_v30, %v7720_v47 }
 0x2c6   : > { %v5865_v38 = vpop.f32.mrf.mxu1  ;;  %v5977_v28 = vpop.f32.mrf.mxu0 }
 0x2c7   : > { %v4407_v5 = vadd.f32 %v5975_v33, %v4246_v54  ;;  %v5866_v13 = vadd.f32 %v5865_v38, %v5864_v35  ;;  %v5978_v45 = vadd.f32 %v5977_v28, %v5976_v6 }
 0x2c8   : > { %v5867_v51 = vpop.f32.mrf.mxu1  ;;  %v5979_v53 = vpop.f32.mrf.mxu0 }
 0x2c9   : > { %4519 = vst [vmem:[%s7819_s24 + $0x28] sm:$0xff] %v4407_v5  ;;  %v4251_v37 = vadd.f32 %v5866_v13, %v7727_v2 }
 0x2ca   : > { %v5868_v20 = vpop.f32.mrf.mxu1  ;;  %v5980_v59 = vpop.f32.mrf.mxu0 }
 0x2cb   : > { %v4412_v36 = vadd.f32 %v5978_v45, %v4251_v37  ;;  %v5869_v1 = vadd.f32 %v5868_v20, %v5867_v51  ;;  %v5981_v26 = vadd.f32 %v5980_v59, %v5979_v53 }
 0x2cc   : > { %v5870_v39 = vpop.f32.mrf.mxu1  ;;  %v5982_v57 = vpop.f32.mrf.mxu0 }
 0x2cd   : > { %4520 = vst [vmem:[%s7819_s24 + $0x30] sm:$0xff] %v4412_v36  ;;  %v4254_v47 = vadd.f32 %v5869_v1, %v7730_v32 }
 0x2ce   : > { %v5871_v4 = vpop.f32.mrf.mxu1  ;;  %v5983_v18 = vpop.f32.mrf.mxu0 }
 0x2cf   : > { %v4415_v17 = vadd.f32 %v5981_v26, %v4254_v47  ;;  %v5872_v0 = vadd.f32 %v5871_v4, %v5870_v39  ;;  %v5984_v42 = vadd.f32 %v5983_v18, %v5982_v57 }
 0x2d0   : > { %v5873_v14 = vpop.f32.mrf.mxu1  ;;  %v5985_v19 = vpop.f32.mrf.mxu0 }
 0x2d1   : > { %4521 = vst [vmem:[%s7819_s24 + $0x38] sm:$0xff] %v4415_v17  ;;  %v4259_v2 = vadd.f32 %v5872_v0, %v7737_v48 }
 0x2d2   : > { %v5874_v24 = vpop.f32.mrf.mxu1  ;;  %v5986_v56 = vpop.f32.mrf.mxu0 }
 0x2d3   : > { %v4420_v25 = vadd.f32 %v5984_v42, %v4259_v2  ;;  %v5875_v22 = vadd.f32 %v5874_v24, %v5873_v14  ;;  %v5987_v63 = vadd.f32 %v5986_v56, %v5985_v19 }
 0x2d4   : > { %v5876_v31 = vpop.f32.mrf.mxu1  ;;  %v5988_v12 = vpop.f32.mrf.mxu0 }
 0x2d5   : > { %4522 = vst [vmem:[%s7819_s24 + $0x40] sm:$0xff] %v4420_v25  ;;  %v4262_v32 = vadd.f32 %v5875_v22, %v7740_v8 }
 0x2d6   : > { %v5877_v55 = vpop.f32.mrf.mxu1  ;;  %v5989_v58 = vpop.f32.mrf.mxu0 }
 0x2d7   : > { %v4423_v10 = vadd.f32 %v5987_v63, %v4262_v32  ;;  %v5878_v30 = vadd.f32 %v5877_v55, %v5876_v31  ;;  %v5990_v54 = vadd.f32 %v5989_v58, %v5988_v12 }
 0x2d8   : > { %v5879_v35 = vpop.f32.mrf.mxu1  ;;  %v5991_v6 = vpop.f32.mrf.mxu0 }
 0x2d9   : > { %4523 = vst [vmem:[%s7819_s24 + $0x48] sm:$0xff] %v4423_v10  ;;  %v4267_v48 = vadd.f32 %v5878_v30, %v7747_v27 }
 0x2da   : > { %v5880_v33 = vpop.f32.mrf.mxu1  ;;  %v5992_v38 = vpop.f32.mrf.mxu0 }
 0x2db   : > { %v4428_v28 = vadd.f32 %v5990_v54, %v4267_v48  ;;  %v5881_v5 = vadd.f32 %v5880_v33, %v5879_v35  ;;  %v5993_v53 = vadd.f32 %v5992_v38, %v5991_v6 }
 0x2dc   : > { %v5882_v13 = vpop.f32.mrf.mxu1  ;;  %v5994_v51 = vpop.f32.mrf.mxu0 }
 0x2dd   : > { %4524 = vst [vmem:[%s7819_s24 + $0x50] sm:$0xff] %v4428_v28  ;;  %v4270_v8 = vadd.f32 %v5881_v5, %v7750_v7 }
 0x2de   : > { %v5883_v37 = vpop.f32.mrf.mxu1  ;;  %v5995_v45 = vpop.f32.mrf.mxu0 }
 0x2df   : > { %v4431_v20 = vadd.f32 %v5993_v53, %v4270_v8  ;;  %v5884_v59 = vadd.f32 %v5883_v37, %v5882_v13  ;;  %v5996_v39 = vadd.f32 %v5995_v45, %v5994_v51 }
 0x2e0   : > { %v5885_v36 = vpop.f32.mrf.mxu1  ;;  %v5997_v1 = vpop.f32.mrf.mxu0 }
 0x2e1   : > { %4525 = vst [vmem:[%s7819_s24 + $0x58] sm:$0xff] %v4431_v20  ;;  %v4275_v27 = vadd.f32 %v5884_v59, %v7755_v29 }
 0x2e2   : > { %v5886_v57 = vpop.f32.mrf.mxu1  ;;  %v5998_v47 = vpop.f32.mrf.mxu0 }
 0x2e3   : > { %v4436_v26 = vadd.f32 %v5996_v39, %v4275_v27  ;;  %v5887_v4 = vadd.f32 %v5886_v57, %v5885_v36  ;;  %v5999_v0 = vadd.f32 %v5998_v47, %v5997_v1 }
 0x2e4   : > { %v5888_v18 = vpop.f32.mrf.mxu1  ;;  %v6000_v17 = vpop.f32.mrf.mxu0 }
 0x2e5   : > { %4526 = vst [vmem:[%s7819_s24 + $0x60] sm:$0xff] %v4436_v26  ;;  %v4278_v7 = vadd.f32 %v5887_v4, %v7758_v15 }
 0x2e6   : > { %v5889_v14 = vpop.f32.mrf.mxu1  ;;  %v6001_v19 = vpop.f32.mrf.mxu0 }
 0x2e7   : > { %v4439_v2 = vadd.f32 %v5999_v0, %v4278_v7  ;;  %v5890_v42 = vadd.f32 %v5889_v14, %v5888_v18  ;;  %v6002_v25 = vadd.f32 %v6001_v19, %v6000_v17 }
 0x2e8   : > { %v5891_v24 = vpop.f32.mrf.mxu1  ;;  %v6003_v56 = vpop.f32.mrf.mxu0 }
 0x2e9   : > { %4527 = vst [vmem:[%s7819_s24 + $0x68] sm:$0xff] %v4439_v2  ;;  %v4283_v29 = vadd.f32 %v5890_v42, %v7761_v34 }
 0x2ea   : > { %v5892_v22 = vpop.f32.mrf.mxu1  ;;  %v6004_v31 = vpop.f32.mrf.mxu0 }
 0x2eb   : > { %v4444_v12 = vadd.f32 %v6002_v25, %v4283_v29  ;;  %v5893_v32 = vadd.f32 %v5892_v22, %v5891_v24  ;;  %v6005_v58 = vadd.f32 %v6004_v31, %v6003_v56 }
 0x2ec   : > { %v5894_v63 = vpop.f32.mrf.mxu1  ;;  %v6006_v55 = vpop.f32.mrf.mxu0 }
 0x2ed   : > { %4528 = vst [vmem:[%s7819_s24 + $0x70] sm:$0xff] %v4444_v12  ;;  %v4286_v15 = vadd.f32 %v5893_v32, %v7764_v43 }
 0x2ee   : > { %v5895_v10 = vpop.f32.mrf.mxu1  ;;  %v6007_v30 = vpop.f32.mrf.mxu0 }
 0x2ef   : > { %v4447_v35 = vadd.f32 %v6005_v58, %v4286_v15  ;;  %v5896_v6 = vadd.f32 %v5895_v10, %v5894_v63  ;;  %v6008_v33 = vadd.f32 %v6007_v30, %v6006_v55 }
 0x2f0   : > { %v5897_v48 = vpop.f32.mrf.mxu1  ;;  %v6009_v54 = vpop.f32.mrf.mxu0 }
 0x2f1   : > { %4529 = vst [vmem:[%s7819_s24 + $0x78] sm:$0xff] %v4447_v35  ;;  %v4291_v34 = vadd.f32 %v5896_v6, %v7767_v52 }
 0x2f2   : > { %v5898_v38 = vpop.f32.mrf.mxu1  ;;  %v6010_v28 = vpop.f32.mrf.mxu0 }
 0x2f3   : > { %v4452_v5 = vadd.f32 %v6008_v33, %v4291_v34  ;;  %v5899_v13 = vadd.f32 %v5898_v38, %v5897_v48  ;;  %v6011_v53 = vadd.f32 %v6010_v28, %v6009_v54 }
 0x2f4   : > { %v5900_v51 = vpop.f32.mrf.mxu1  ;;  %v6012_v8 = vpop.f32.mrf.mxu0 }
 0x2f5   : > { %4530 = vst [vmem:[%s7819_s24 + $0x80] sm:$0xff] %v4452_v5  ;;  %v4294_v43 = vadd.f32 %v5899_v13, %v7770_v11 }
 0x2f6   : > { %v5901_v37 = vpop.f32.mrf.mxu1  ;;  %v6013_v45 = vpop.f32.mrf.mxu0 }
 0x2f7   : > { %v4455_v20 = vadd.f32 %v6011_v53, %v4294_v43  ;;  %v5902_v59 = vadd.f32 %v5901_v37, %v5900_v51  ;;  %v6014_v27 = vadd.f32 %v6013_v45, %v6012_v8 }
 0x2f8   : > { %v5903_v36 = vpop.f32.mrf.mxu1  ;;  %v6015_v1 = vpop.f32.mrf.mxu0 }
 0x2f9   : > { %4531 = vst [vmem:[%s7819_s24 + $0x88] sm:$0xff] %v4455_v20  ;;  %v4299_v52 = vadd.f32 %v5902_v59, %v7773_v44 }
 0x2fa   : > { %v5904_v39 = vpop.f32.mrf.mxu1  ;;  %v6016_v57 = vpop.f32.mrf.mxu0 }
 0x2fb   : > { %v4460_v47 = vadd.f32 %v6014_v27, %v4299_v52  ;;  %v5905_v26 = vadd.f32 %v5904_v39, %v5903_v36  ;;  %v6017_v17 = vadd.f32 %v6016_v57, %v6015_v1 }
 0x2fc   : > { %v5906_v4 = vpop.f32.mrf.mxu1  ;;  %v6018_v18 = vpop.f32.mrf.mxu0 }
 0x2fd   : > { %4532 = vst [vmem:[%s7819_s24 + $0x90] sm:$0xff] %v4460_v47  ;;  %v4302_v11 = vadd.f32 %v5905_v26, %v7776_v41 }
 0x2fe   : > { %v5907_v7 = vpop.f32.mrf.mxu1  ;;  %v6019_v0 = vpop.f32.mrf.mxu0 }
 0x2ff   : > { %v4463_v14 = vadd.f32 %v6017_v17, %v4302_v11  ;;  %v5908_v19 = vadd.f32 %v5907_v7, %v5906_v4  ;;  %v6020_v24 = vadd.f32 %v6019_v0, %v6018_v18 }
 0x300   : > { %v5909_v2 = vpop.f32.mrf.mxu1  ;;  %v6021_v42 = vpop.f32.mrf.mxu0 }
 0x301   : > { %4533 = vst [vmem:[%s7819_s24 + $0x98] sm:$0xff] %v4463_v14  ;;  %v4307_v44 = vadd.f32 %v5908_v19, %v7779_v61 }
 0x302   : > { %v5910_v56 = vpop.f32.mrf.mxu1  ;;  %v6022_v29 = vpop.f32.mrf.mxu0 }
 0x303   : > { %v4468_v25 = vadd.f32 %v6020_v24, %v4307_v44  ;;  %v5911_v22 = vadd.f32 %v5910_v56, %v5909_v2  ;;  %v6023_v32 = vadd.f32 %v6022_v29, %v6021_v42 }
 0x304   : > { %v5912_v31 = vpop.f32.mrf.mxu1  ;;  %v6024_v12 = vpop.f32.mrf.mxu0 }
 0x305   : > { %4534 = vst [vmem:[%s7819_s24 + $0xa0] sm:$0xff] %v4468_v25  ;;  %v4310_v41 = vadd.f32 %v5911_v22, %v7782_v62 }
 0x306   : > { %v5913_v63 = vpop.f32.mrf.mxu1  ;;  %v6025_v55 = vpop.f32.mrf.mxu0 }
 0x307   : > { %v4471_v15 = vadd.f32 %v6023_v32, %v4310_v41  ;;  %v5914_v58 = vadd.f32 %v5913_v63, %v5912_v31  ;;  %v6026_v35 = vadd.f32 %v6025_v55, %v6024_v12 }
 0x308   : > { %v5915_v10 = vpop.f32.mrf.mxu1  ;;  %v6027_v30 = vpop.f32.mrf.mxu0 }
 0x309   : > { %4535 = vst [vmem:[%s7819_s24 + $0xa8] sm:$0xff] %v4471_v15  ;;  %v4315_v61 = vadd.f32 %v5914_v58, %v7785_v46 }
 0x30a   : > { %v5916_v6 = vpop.f32.mrf.mxu1  ;;  %v6028_v48 = vpop.f32.mrf.mxu0 }
 0x30b   : > { %v4476_v54 = vadd.f32 %v6026_v35, %v4315_v61  ;;  %v5917_v34 = vadd.f32 %v5916_v6, %v5915_v10  ;;  %v6029_v28 = vadd.f32 %v6028_v48, %v6027_v30 }
 0x30c   : > { %v5918_v33 = vpop.f32.mrf.mxu1  ;;  %v6030_v38 = vpop.f32.mrf.mxu0 }
 0x30d   : > { %4536 = vst [vmem:[%s7819_s24 + $0xb0] sm:$0xff] %v4476_v54  ;;  %v4318_v62 = vadd.f32 %v5917_v34, %v7788_v23 }
 0x30e   : > { %v5919_v5 = vpop.f32.mrf.mxu1  ;;  %v6031_v13 = vpop.f32.mrf.mxu0 }
 0x30f   : > { %v4479_v51 = vadd.f32 %v6029_v28, %v4318_v62  ;;  %v5920_v8 = vadd.f32 %v5919_v5, %v5918_v33  ;;  %v6032_v37 = vadd.f32 %v6031_v13, %v6030_v38 }
 0x310   : > { %v5921_v43 = vpop.f32.mrf.mxu1  ;;  %v6033_v53 = vpop.f32.mrf.mxu0 }
 0x311   : > { %4537 = vst [vmem:[%s7819_s24 + $0xb8] sm:$0xff] %v4479_v51  ;;  %v4323_v46 = vadd.f32 %v5920_v8, %v7791_v21 }
 0x312   : > { %v5922_v45 = vpop.f32.mrf.mxu1  ;;  %v6034_v20 = vpop.f32.mrf.mxu0 }
 0x313   : > { %v4484_v59 = vadd.f32 %v6032_v37, %v4323_v46  ;;  %v5923_v36 = vadd.f32 %v5922_v45, %v5921_v43  ;;  %v6035_v27 = vadd.f32 %v6034_v20, %v6033_v53 }
 0x314   : > { %v5924_v1 = vpop.f32.mrf.mxu1  ;;  %v6036_v52 = vpop.f32.mrf.mxu0 }
 0x315   : > { %4538 = vst [vmem:[%s7819_s24 + $0xc0] sm:$0xff] %v4484_v59  ;;  %v4326_v23 = vadd.f32 %v5923_v36, %v7794_v50 }
 0x316   : > { %v5925_v39 = vpop.f32.mrf.mxu1  ;;  %v6037_v57 = vpop.f32.mrf.mxu0 }
 0x317   : > { %v4487_v47 = vadd.f32 %v6035_v27, %v4326_v23  ;;  %v5926_v26 = vadd.f32 %v5925_v39, %v5924_v1  ;;  %v6038_v11 = vadd.f32 %v6037_v57, %v6036_v52 }
 0x318   : > { %v5927_v4 = vpop.f32.mrf.mxu1  ;;  %v6039_v18 = vpop.f32.mrf.mxu0 }
 0x319   : > { %4539 = vst [vmem:[%s7819_s24 + $0xc8] sm:$0xff] %v4487_v47  ;;  %v4331_v21 = vadd.f32 %v5926_v26, %v7797_v9 }
 0x31a   : > { %v5928_v17 = vpop.f32.mrf.mxu1  ;;  %v6040_v7 = vpop.f32.mrf.mxu0 }
 0x31b   : > { %v4492_v0 = vadd.f32 %v6038_v11, %v4331_v21  ;;  %v5929_v14 = vadd.f32 %v5928_v17, %v5927_v4  ;;  %v6041_v42 = vadd.f32 %v6040_v7, %v6039_v18 }
 0x31c   : > { %v5930_v19 = vpop.f32.mrf.mxu1  ;;  %v6042_v2 = vpop.f32.mrf.mxu0 }
 0x31d   : > { %4540 = vst [vmem:[%s7819_s24 + $0xd0] sm:$0xff] %v4492_v0  ;;  %v4334_v50 = vadd.f32 %v5929_v14, %v7800_v16 }
 0x31e   : > { %v5931_v44 = vpop.f32.mrf.mxu1  ;;  %v6043_v24 = vpop.f32.mrf.mxu0 }
 0x31f   : > { %v4495_v56 = vadd.f32 %v6041_v42, %v4334_v50  ;;  %v5932_v29 = vadd.f32 %v5931_v44, %v5930_v19  ;;  %v6044_v31 = vadd.f32 %v6043_v24, %v6042_v2 }
 0x320   : > { %v5933_v25 = vpop.f32.mrf.mxu1  ;;  %v6045_v22 = vpop.f32.mrf.mxu0 }
 0x321   : > { %4541 = vst [vmem:[%s7819_s24 + $0xd8] sm:$0xff] %v4495_v56  ;;  %v4339_v9 = vadd.f32 %v5932_v29, %v7803_v60 }
 0x322   : > { %v5934_v12 = vpop.f32.mrf.mxu1  ;;  %v6046_v41 = vpop.f32.mrf.mxu0 }
 0x323   : > { %v4500_v32 = vadd.f32 %v6044_v31, %v4339_v9  ;;  %v5935_v63 = vadd.f32 %v5934_v12, %v5933_v25  ;;  %v6047_v58 = vadd.f32 %v6046_v41, %v6045_v22 }
 0x324   : > { %v5936_v55 = vpop.f32.mrf.mxu1  ;;  %v6048_v15 = vpop.f32.mrf.mxu0 }
 0x325   : > { %4542 = vst [vmem:[%s7819_s24 + $0xe0] sm:$0xff] %v4500_v32  ;;  %v4342_v16 = vadd.f32 %v5935_v63, %v7806_v3 }
 0x326   : > { %v5937_v10 = vpop.f32.mrf.mxu1  ;;  %v6049_v30 = vpop.f32.mrf.mxu0 }
 0x327   : > { %v4503_v61 = vadd.f32 %v6047_v58, %v4342_v16  ;;  %v5938_v35 = vadd.f32 %v5937_v10, %v5936_v55  ;;  %v6050_v54 = vadd.f32 %v6049_v30, %v6048_v15 }
 0x328   : > { %v5939_v6 = vpop.f32.mrf.mxu1  ;;  %v6051_v60 = vpop.f32.mrf.mxu0 }
 0x329   : > { %4543 = vst [vmem:[%s7819_s24 + $0xe8] sm:$0xff] %v4503_v61  ;;  %v4347_v48 = vadd.f32 %v5938_v35, %v7809_v49 }
 0x32a   : > { %v5940_v34 = vpop.f32.mrf.mxu1  ;;  %v6052_v33 = vpop.f32.mrf.mxu0 }
 0x32b   : > { %v4508_v38 = vadd.f32 %v6050_v54, %v4347_v48  ;;  %v5941_v62 = vadd.f32 %v5940_v34, %v5939_v6  ;;  %v6053_v3 = vadd.f32 %v6052_v33, %v6051_v60 }
 0x32d   : > { %4544 = vst [vmem:[%s7819_s24 + $0xf0] sm:$0xff] %v4508_v38  ;;  %v4350_v28 = vadd.f32 %v5941_v62, %v7812_v40 }
 0x32f   : > { %v4511_v5 = vadd.f32 %v6053_v3, %v4350_v28 }
 0x331   : > { %4545 = vst [vmem:[%s7819_s24 + $0xf8] sm:$0xff] %v4511_v5 }
 0x332 PF: > { %s13_s12 = sadd.s32 1, %s6662_s12  }
 0x333   : > { %p10_p4 = scmp.ge.s32.totalorder %s13_s12, 4  }
 0x335   :  { %12 = sbr.rel (!%p10_p4) target bundleno = 1 (0x1), region = 62 }

</bundles_post_ra>
